<compile_context>
chip_gen: v6e
topology: v6e:2x2x1
jax: 0.10.0
libtpu: 0.0.40
codegen_flags: <defaults>
</compile_context>

<pallas_src>
import functools

import jax
import jax.numpy as jnp
from jax.experimental import pallas as pl
from jax.experimental.pallas import tpu as pltpu

EPS = 1e-5
LANE = 128        # channel tiles are lane-dense
ROW_ALIGN = 128   # flattened-spatial rows rounded up (>=16 for bf16 packing)


def _round_up(v, m):
    return (v + m - 1) // m * m


# ------------------------------ in-kernel helpers ------------------------------
def _accum_taps(x_ref, w_ref, offsets, m):
    """3x3 conv as 9 row-shifted MXU matmuls against the VMEM-resident slab.

    x_ref : (n_phase * m_slab, cin_p) flattened stride-phase slabs (read once
            from HBM; each tap re-reads it from VMEM at a static row offset).
    w_ref : (9 * cin_p, cout_tile)    tap-major / channel-minor weights.
    """
    cin_p = x_ref.shape[1]
    acc = None
    for t, off in enumerate(offsets):
        part = jnp.dot(x_ref[off:off + m, :],
                       w_ref[t * cin_p:(t + 1) * cin_p, :],
                       preferred_element_type=jnp.float32)
        acc = part if acc is None else acc + part
    return acc


def _bn_train(acc, gamma, beta, mask, m_real, eps):
    """Training-mode BatchNorm (biased stats) over the valid rows of `acc`.

    * `mask` zeroes the phase-grid halo/padding rows so they do not pollute
      the statistics (the conv output is computed on the padded grid so that
      every tap is a constant row shift).
    * Stats are shifted by row 0 (a valid sample) before the one-pass
      sum / sum-of-squares to avoid E[x^2]-E[x]^2 cancellation.
    * The conv bias is NOT added before BN: a per-channel bias is exactly
      cancelled by training-mode BN, so it is dropped entirely.
    """
    inv_m = 1.0 / float(m_real)
    c = acc[0:1, :]
    a = (acc - c) * mask
    s1 = jnp.sum(a, axis=0, keepdims=True) * inv_m
    s2 = jnp.sum(a * a, axis=0, keepdims=True) * inv_m
    var = jnp.maximum(s2 - s1 * s1, 0.0)
    return (acc - (c + s1)) * (jax.lax.rsqrt(var + eps) * gamma) + beta


# ----------------------------------- kernels -----------------------------------
def _conv_bn_relu_kernel(x_ref, w_ref, pr_ref, msk_ref, o_ref, *,
                         offsets, m_real, eps):
    """y = relu(bn(conv3x3(x))) for one Cout tile (stage 1)."""
    acc = _accum_taps(x_ref, w_ref, offsets, o_ref.shape[0])
    y = _bn_train(acc, pr_ref[0:1, :], pr_ref[1:2, :], msk_ref[...], m_real, eps)
    o_ref[...] = jnp.maximum(y, 0.0).astype(o_ref.dtype)


def _conv_bn_add_relu_kernel(x_ref, w_ref, pr_ref, msk_ref, sc_ref, o_ref, *,
                             offsets, m_real, eps):
    """out = relu(bn(conv3x3(y1)) + identity_shortcut) (stage 2)."""
    acc = _accum_taps(x_ref, w_ref, offsets, o_ref.shape[0])
    y = _bn_train(acc, pr_ref[0:1, :], pr_ref[1:2, :], msk_ref[...], m_real, eps)
    o_ref[...] = jnp.maximum(y + sc_ref[...], 0.0).astype(o_ref.dtype)


def _conv_bn_proj_add_relu_kernel(x_ref, w_ref, pr_ref, msk_ref, xs_ref, w3_ref,
                                  o_ref, *, offsets, m_real, eps):
    """out = relu(bn(conv3x3(y1)) + conv1x1(x) + b3) (stage 2, fused projection)."""
    acc = _accum_taps(x_ref, w_ref, offsets, o_ref.shape[0])
    y = _bn_train(acc, pr_ref[0:1, :], pr_ref[1:2, :], msk_ref[...], m_real, eps)
    sc = jnp.dot(xs_ref[...], w3_ref[...], preferred_element_type=jnp.float32)
    o_ref[...] = jnp.maximum(y + sc + pr_ref[2:3, :], 0.0).astype(o_ref.dtype)


# ------------------------------- wrapper helpers --------------------------------
def _pad_last(a, target):
    pad = target - a.shape[-1]
    return a if pad == 0 else jnp.pad(a, [(0, 0)] * (a.ndim - 1) + [(0, pad)])


def _pack_params(cout_p, *vecs):
    """gamma/beta(/b3) packed into one (8, cout_p) f32 slab -> one DMA per step."""
    rows = jnp.concatenate(
        [_pad_last(v.astype(jnp.float32).reshape(1, -1), cout_p) for v in vecs],
        axis=0)
    return jnp.pad(rows, ((0, 8 - rows.shape[0]), (0, 0)))


def _prep3x3(w_oihw, cin_p, cout_p):
    """OIHW 3x3 weights -> (9*cin_p, cout_p), tap-major / channel-minor."""
    co, ci, kh, kw = w_oihw.shape
    w = jnp.transpose(w_oihw, (2, 3, 1, 0))                        # (3,3,ci,co)
    w = jnp.pad(w, ((0, 0), (0, 0), (0, cin_p - ci), (0, cout_p - co)))
    return w.reshape(kh * kw * cin_p, cout_p)


def _conv_operands(x_nhwc, stride):
    """Prepare a pad=1 3x3 conv as 9 row-shifted matmuls (no im2col duplication).

    The zero-padded input is split into stride**2 stride-phase sub-grids
    (together = the input exactly once) and flattened to rows; tap (ky,kx)
    then reads phase (ky%s, kx%s) at a constant row offset, so the kernel can
    accumulate 9 shifted matmuls against a single VMEM-resident slab.
    Returns (x_flat, tap_row_offsets, (hq, wq), m_pad); valid conv outputs
    live at rows (n, ho, wo) with ho < Ho, wo < Wo of the (N, hq, wq) grid.
    """
    n, h, w, c = x_nhwc.shape
    s = stride
    hq = -(-(h + 2) // s)                       # per-image phase-grid height
    wq = -(-(w + 2) // s)                       # per-image phase-grid width
    m_out = n * hq * wq
    m_pad = _round_up(m_out, ROW_ALIGN)
    dr_max = (2 // s) * (wq + 1)                # largest tap row shift
    m_slab = _round_up(m_pad + dr_max, 8)
    xp = jnp.pad(x_nhwc, ((0, 0),
                          (1, 1 + hq * s - (h + 2)),
                          (1, 1 + wq * s - (w + 2)),
                          (0, 0)))
    slabs = [jnp.pad(xp[:, ph::s, pw::s, :].reshape(m_out, c),
                     ((0, m_slab - m_out), (0, 0)))
             for ph in range(s) for pw in range(s)]
    x_flat = slabs[0] if len(slabs) == 1 else jnp.concatenate(slabs, axis=0)
    offsets = [((ky % s) * s + (kx % s)) * m_slab + (ky // s) * wq + (kx // s)
               for ky in range(3) for kx in range(3)]
    return x_flat, offsets, (hq, wq), m_pad


def _grid_mask(n, hq, wq, ho, wo, m_pad):
    """(m_pad, 1) f32: 1.0 on rows that are real (ho, wo) outputs, 0.0 on halo/pad."""
    valid = (jnp.arange(hq)[:, None] < ho) & (jnp.arange(wq)[None, :] < wo)
    m = jnp.broadcast_to(valid[None].astype(jnp.float32), (n, hq, wq))
    m = m.reshape(n * hq * wq, 1)
    return jnp.pad(m, ((0, m_pad - n * hq * wq), (0, 0)))


def _vmem_limit_bytes():
    """Generation-aware VMEM budget (~85% of physical); conservative fallback."""
    try:
        info = pltpu.get_tpu_info()
        for attr in ("vmem_capacity_bytes", "vmem_size_bytes", "vmem_bytes"):
            cap = getattr(info, attr, None)
            if cap:
                return int(cap * 0.85)
    except Exception:
        pass
    return 48 * 1024 * 1024


def _pick_cout_tile(cout_p):
    # 256-wide output tiles feed the 256-wide MXUs on v6e/v7x; keep >= 2 grid
    # steps so both v7x TensorCores stay busy.  v5e (4x128x128 MXU) and small
    # Cout keep the native 128-wide tile.
    if cout_p % 256 == 0 and cout_p // 256 >= 2:
        return 256
    return 128


# ----------------------------------- forward -----------------------------------
def residual_forward(x_nchw, params, *, use_1x1conv, stride, eps=EPS,
                     compute_dtype=jnp.bfloat16):
    x = jnp.transpose(x_nchw, (0, 2, 3, 1)).astype(jnp.float32)    # NCHW -> NHWC
    n, h, w, cin = x.shape
    cout = params["w1"].shape[0]
    if not use_1x1conv:
        assert cin == cout and stride == 1, \
            "identity shortcut requires cin == cout and stride == 1"
    ho = (h - 1) // stride + 1
    wo = (w - 1) // stride + 1
    m_real = n * ho * wo                        # rows feeding the BN statistics
    cin_p = _round_up(cin, LANE)
    cout_p = _round_up(cout, LANE)
    tile = _pick_cout_tile(cout_p)
    grid = (cout_p // tile,)
    cd = jnp.dtype(compute_dtype)
    cparams = pltpu.CompilerParams(
        dimension_semantics=("parallel",),      # Cout tiles are independent
        vmem_limit_bytes=_vmem_limit_bytes())

    xc = _pad_last(x, cin_p)                    # lane-dense zero-padded channels

    # ---- stage 1: conv1 + bn1 + relu (one fused kernel, in-kernel im2col) ----
    x1, offs1, (hq1, wq1), m_pad1 = _conv_operands(xc.astype(cd), stride)
    w1 = _prep3x3(params["w1"], cin_p, cout_p).astype(cd)
    pr1 = _pack_params(cout_p, params["g1"], params["be1"])  # bias dropped (BN cancels it)
    msk1 = _grid_mask(n, hq1, wq1, ho, wo, m_pad1)
    cost1 = pl.CostEstimate(
        flops=2 * m_pad1 * 9 * cin_p * cout_p,
        transcendentals=cout_p,
        bytes_accessed=(x1.size + w1.size + m_pad1 * cout_p) * cd.itemsize
                       + (pr1.size + msk1.size) * 4)
    y1 = pl.pallas_call(
        functools.partial(_conv_bn_relu_kernel, offsets=offs1, m_real=m_real, eps=eps),
        out_shape=jax.ShapeDtypeStruct((m_pad1, cout_p), cd),   # bf16 writeback in perf mode
        grid=grid,
        in_specs=[
            pl.BlockSpec(x1.shape, lambda j: (0, 0)),
            pl.BlockSpec((9 * cin_p, tile), lambda j: (0, j)),
            pl.BlockSpec((8, tile), lambda j: (0, j)),
            pl.BlockSpec((m_pad1, 1), lambda j: (0, 0)),
        ],
        out_specs=pl.BlockSpec((m_pad1, tile), lambda j: (0, j)),
        compiler_params=cparams,
        cost_estimate=cost1,
    )(x1, w1, pr1, msk1)

    # ---- stage 2: conv2 + bn2 + shortcut + relu (one fused kernel) ----
    y1_valid = y1[:n * hq1 * wq1].reshape(n, hq1, wq1, cout_p)[:, :ho, :wo, :]
    x2, offs2, (hq2, wq2), m_pad2 = _conv_operands(y1_valid, 1)
    w2 = _prep3x3(params["w2"], cout_p, cout_p).astype(cd)
    msk2 = _grid_mask(n, hq2, wq2, ho, wo, m_pad2)
    m_out2 = n * hq2 * wq2

    def _embed(a_nhwc):     # place (n, ho, wo, c) onto the stage-2 phase-grid rows
        a = jnp.pad(a_nhwc, ((0, 0), (0, hq2 - ho), (0, wq2 - wo), (0, 0)))
        a = a.reshape(m_out2, a_nhwc.shape[-1])
        return jnp.pad(a, ((0, m_pad2 - m_out2), (0, 0)))

    base_specs = [
        pl.BlockSpec(x2.shape, lambda j: (0, 0)),
        pl.BlockSpec((9 * cout_p, tile), lambda j: (0, j)),
        pl.BlockSpec((8, tile), lambda j: (0, j)),
        pl.BlockSpec((m_pad2, 1), lambda j: (0, 0)),
    ]
    out_spec = pl.BlockSpec((m_pad2, tile), lambda j: (0, j))
    out_shape = jax.ShapeDtypeStruct((m_pad2, cout_p), jnp.float32)

    if use_1x1conv:
        # 1x1 projection shortcut fused into the second kernel (no extra pass).
        xs = _embed(xc[:, ::stride, ::stride, :]).astype(cd)
        w3 = jnp.transpose(params["w3"][:, :, 0, 0], (1, 0))
        w3 = jnp.pad(w3, ((0, cin_p - cin), (0, cout_p - cout))).astype(cd)
        pr2 = _pack_params(cout_p, params["g2"], params["be2"], params["b3"])
        cost2 = pl.CostEstimate(
            flops=2 * m_pad2 * (9 * cout_p + cin_p) * cout_p,
            transcendentals=cout_p,
            bytes_accessed=(x2.size + w2.size + xs.size + w3.size) * cd.itemsize
                           + (pr2.size + msk2.size + m_pad2 * cout_p) * 4)
        out = pl.pallas_call(
            functools.partial(_conv_bn_proj_add_relu_kernel,
                              offsets=offs2, m_real=m_real, eps=eps),
            out_shape=out_shape, grid=grid,
            in_specs=base_specs + [
                pl.BlockSpec((m_pad2, cin_p), lambda j: (0, 0)),
                pl.BlockSpec((cin_p, tile), lambda j: (0, j)),
            ],
            out_specs=out_spec, compiler_params=cparams, cost_estimate=cost2,
        )(x2, w2, pr2, msk2, xs, w3)
    else:
        sc = _embed(xc)                                        # identity shortcut (f32)
        pr2 = _pack_params(cout_p, params["g2"], params["be2"])
        cost2 = pl.CostEstimate(
            flops=2 * m_pad2 * 9 * cout_p * cout_p,
            transcendentals=cout_p,
            bytes_accessed=(x2.size + w2.size) * cd.itemsize
                           + (pr2.size + msk2.size + sc.size + m_pad2 * cout_p) * 4)
        out = pl.pallas_call(
            functools.partial(_conv_bn_add_relu_kernel,
                              offsets=offs2, m_real=m_real, eps=eps),
            out_shape=out_shape, grid=grid,
            in_specs=base_specs + [pl.BlockSpec((m_pad2, tile), lambda j: (0, j))],
            out_specs=out_spec, compiler_params=cparams, cost_estimate=cost2,
        )(x2, w2, pr2, msk2, sc)

    out = out[:m_out2].reshape(n, hq2, wq2, cout_p)[:, :ho, :wo, :cout]
    return jnp.transpose(out, (0, 3, 1, 2))                        # NHWC -> NCHW


# ---------- deterministic parameter init (shapes from the module __init__) ----------
def init_params(key, in_channels, num_channels, use_1x1conv):
    ks = jax.random.split(key, 10)

    def conv_w(k, co, ci, kh, kw):
        bound = 1.0 / float(ci * kh * kw) ** 0.5
        return jax.random.uniform(k, (co, ci, kh, kw), jnp.float32, -bound, bound)

    p = {
        "w1": conv_w(ks[0], num_channels, in_channels, 3, 3),
        "b1": jax.random.uniform(ks[1], (num_channels,), jnp.float32, -0.1, 0.1),
        "w2": conv_w(ks[2], num_channels, num_channels, 3, 3),
        "b2": jax.random.uniform(ks[3], (num_channels,), jnp.float32, -0.1, 0.1),
        "g1": 1.0 + 0.1 * jax.random.normal(ks[4], (num_channels,), jnp.float32),
        "be1": 0.1 * jax.random.normal(ks[5], (num_channels,), jnp.float32),
        "g2": 1.0 + 0.1 * jax.random.normal(ks[6], (num_channels,), jnp.float32),
        "be2": 0.1 * jax.random.normal(ks[7], (num_channels,), jnp.float32),
    }
    if use_1x1conv:
        p["w3"] = conv_w(ks[8], num_channels, in_channels, 1, 1)
        p["b3"] = jax.random.uniform(ks[9], (num_channels,), jnp.float32, -0.1, 0.1)
    return p


# ---------- pure-JAX reference (matches the PyTorch forward in training mode) ----------
def ref_residual(x_nchw, params, *, use_1x1conv, stride, eps=EPS):
    def conv(x, w, b, s, pad):
        y = jax.lax.conv_general_dilated(
            x, w, (s, s), ((pad, pad), (pad, pad)),
            dimension_numbers=("NCHW", "OIHW", "NCHW"))
        return y + b[None, :, None, None]

    def bn(y, g, be):
        mean = jnp.mean(y, axis=(0, 2, 3), keepdims=True)
        var = jnp.mean((y - mean) ** 2, axis=(0, 2, 3), keepdims=True)
        return (y - mean) * jax.lax.rsqrt(var + eps) * g[None, :, None, None] \
            + be[None, :, None, None]

    y = jax.nn.relu(bn(conv(x_nchw, params["w1"], params["b1"], stride, 1),
                       params["g1"], params["be1"]))
    y = bn(conv(y, params["w2"], params["b2"], 1, 1), params["g2"], params["be2"])
    sc = x_nchw
    if use_1x1conv:
        sc = conv(x_nchw, params["w3"], params["b3"], stride, 0)
    return jax.nn.relu(sc + y)


if __name__ == "__main__":
    key = jax.random.PRNGKey(0)
    kx, kp1, kp2, kp3 = jax.random.split(key, 4)

    # PyTorch-style NCHW input
    x = jax.random.normal(kx, (2, 4, 16, 16), jnp.float32)

    configs = [
        ("identity shortcut", init_params(kp1, 4, 4, False),
         dict(use_1x1conv=False, stride=1), (2, 4, 16, 16)),
        ("1x1 projection", init_params(kp2, 4, 8, True),
         dict(use_1x1conv=True, stride=1), (2, 8, 16, 16)),
        ("1x1 projection stride 2", init_params(kp3, 4, 8, True),
         dict(use_1x1conv=True, stride=2), (2, 8, 8, 8)),
    ]

    for name, params, cfg, shape in configs:
        ref = ref_residual(x, params, **cfg)

        # exact-semantics check (f32 matmul inputs)
        out32 = jax.block_until_ready(
            residual_forward(x, params, compute_dtype=jnp.float32, **cfg))
        assert out32.shape == shape, f"{name}: shape {out32.shape} != {shape}"
        assert jnp.allclose(out32, ref, atol=1e-4, rtol=1e-4), \
            f"{name}: f32 mismatch (max err {jnp.max(jnp.abs(out32 - ref)):.2e})"

        # perf mode (bf16 matmuls + bf16 y1 writeback, f32 accumulation/BN)
        out16 = jax.block_until_ready(
            residual_forward(x, params, compute_dtype=jnp.bfloat16, **cfg))
        assert out16.shape == shape, f"{name}: bf16 shape mismatch"
        assert jnp.allclose(out16, ref, atol=1e-1, rtol=1e-1), \
            f"{name}: bf16 mismatch (max err {jnp.max(jnp.abs(out16 - ref)):.2e})"

    print("KERNEL_OK")
</pallas_src>

<mosaic_0001>
module attributes {stable_mosaic.version = 11 : i64} {
  func.func @_conv_bn_relu_kernel(%arg0: i32, %arg1: memref<808x128xf32, #tpu.memory_space<vmem>>, %arg2: memref<1152x128xf32, #tpu.memory_space<vmem>>, %arg3: memref<8x128xf32, #tpu.memory_space<vmem>>, %arg4: memref<768x1xf32, #tpu.memory_space<vmem>>, %arg5: memref<768x128xf32, #tpu.memory_space<vmem>>) attributes {dimension_semantics = [#tpu.dimension_semantics<parallel>], iteration_bounds = array<i64: 1>, scalar_prefetch = 0 : i64, scratch_operands = 0 : i64, tpu.core_type = #tpu.core_type<tc>, window_params = [{pipeline_mode = #tpu.pipeline_mode<synchronous>, transform_indices = @transform_0, window_bounds = array<i64: 808, 128>}, {transform_indices = @transform_1, window_bounds = array<i64: 1152, 128>}, {transform_indices = @transform_2, window_bounds = array<i64: 8, 128>}, {pipeline_mode = #tpu.pipeline_mode<synchronous>, transform_indices = @transform_3, window_bounds = array<i64: 768, 1>}, {transform_indices = @transform_4, window_bounds = array<i64: 768, 128>}]} {
    %c0 = arith.constant 0 : index
    %c0_0 = arith.constant 0 : index
    %0 = vector.load %arg1[%c0, %c0_0] : memref<808x128xf32, #tpu.memory_space<vmem>>, vector<768x128xf32>
    %c0_1 = arith.constant 0 : index
    %c0_2 = arith.constant 0 : index
    %1 = vector.load %arg2[%c0_1, %c0_2] : memref<1152x128xf32, #tpu.memory_space<vmem>>, vector<128x128xf32>
    %cst = arith.constant dense<0.000000e+00> : vector<768x128xf32>
    %2 = tpu.matmul %0, %1, %cst {dimension_numbers = #tpu.dot_dimension_numbers<[1], [0], [0], [1], [0, 0, 1, 1], [], []>} : vector<768x128xf32>, vector<128x128xf32>, vector<768x128xf32> -> vector<768x128xf32>
    %c1 = arith.constant 1 : index
    %c0_3 = arith.constant 0 : index
    %3 = vector.load %arg1[%c1, %c0_3] : memref<808x128xf32, #tpu.memory_space<vmem>>, vector<768x128xf32>
    %c128 = arith.constant 128 : index
    %c0_4 = arith.constant 0 : index
    %4 = vector.load %arg2[%c128, %c0_4] : memref<1152x128xf32, #tpu.memory_space<vmem>>, vector<128x128xf32>
    %cst_5 = arith.constant dense<0.000000e+00> : vector<768x128xf32>
    %5 = tpu.matmul %3, %4, %cst_5 {dimension_numbers = #tpu.dot_dimension_numbers<[1], [0], [0], [1], [0, 0, 1, 1], [], []>} : vector<768x128xf32>, vector<128x128xf32>, vector<768x128xf32> -> vector<768x128xf32>
    %6 = arith.addf %2, %5 : vector<768x128xf32>
    %c2 = arith.constant 2 : index
    %c0_6 = arith.constant 0 : index
    %7 = vector.load %arg1[%c2, %c0_6] : memref<808x128xf32, #tpu.memory_space<vmem>>, vector<768x128xf32>
    %c256 = arith.constant 256 : index
    %c0_7 = arith.constant 0 : index
    %8 = vector.load %arg2[%c256, %c0_7] : memref<1152x128xf32, #tpu.memory_space<vmem>>, vector<128x128xf32>
    %cst_8 = arith.constant dense<0.000000e+00> : vector<768x128xf32>
    %9 = tpu.matmul %7, %8, %cst_8 {dimension_numbers = #tpu.dot_dimension_numbers<[1], [0], [0], [1], [0, 0, 1, 1], [], []>} : vector<768x128xf32>, vector<128x128xf32>, vector<768x128xf32> -> vector<768x128xf32>
    %10 = arith.addf %6, %9 : vector<768x128xf32>
    %c18 = arith.constant 18 : index
    %c0_9 = arith.constant 0 : index
    %11 = vector.load %arg1[%c18, %c0_9] : memref<808x128xf32, #tpu.memory_space<vmem>>, vector<768x128xf32>
    %c384 = arith.constant 384 : index
    %c0_10 = arith.constant 0 : index
    %12 = vector.load %arg2[%c384, %c0_10] : memref<1152x128xf32, #tpu.memory_space<vmem>>, vector<128x128xf32>
    %cst_11 = arith.constant dense<0.000000e+00> : vector<768x128xf32>
    %13 = tpu.matmul %11, %12, %cst_11 {dimension_numbers = #tpu.dot_dimension_numbers<[1], [0], [0], [1], [0, 0, 1, 1], [], []>} : vector<768x128xf32>, vector<128x128xf32>, vector<768x128xf32> -> vector<768x128xf32>
    %14 = arith.addf %10, %13 : vector<768x128xf32>
    %c19 = arith.constant 19 : index
    %c0_12 = arith.constant 0 : index
    %15 = vector.load %arg1[%c19, %c0_12] : memref<808x128xf32, #tpu.memory_space<vmem>>, vector<768x128xf32>
    %c512 = arith.constant 512 : index
    %c0_13 = arith.constant 0 : index
    %16 = vector.load %arg2[%c512, %c0_13] : memref<1152x128xf32, #tpu.memory_space<vmem>>, vector<128x128xf32>
    %cst_14 = arith.constant dense<0.000000e+00> : vector<768x128xf32>
    %17 = tpu.matmul %15, %16, %cst_14 {dimension_numbers = #tpu.dot_dimension_numbers<[1], [0], [0], [1], [0, 0, 1, 1], [], []>} : vector<768x128xf32>, vector<128x128xf32>, vector<768x128xf32> -> vector<768x128xf32>
    %18 = arith.addf %14, %17 : vector<768x128xf32>
    %c20 = arith.constant 20 : index
    %c0_15 = arith.constant 0 : index
    %19 = vector.load %arg1[%c20, %c0_15] : memref<808x128xf32, #tpu.memory_space<vmem>>, vector<768x128xf32>
    %c640 = arith.constant 640 : index
    %c0_16 = arith.constant 0 : index
    %20 = vector.load %arg2[%c640, %c0_16] : memref<1152x128xf32, #tpu.memory_space<vmem>>, vector<128x128xf32>
    %cst_17 = arith.constant dense<0.000000e+00> : vector<768x128xf32>
    %21 = tpu.matmul %19, %20, %cst_17 {dimension_numbers = #tpu.dot_dimension_numbers<[1], [0], [0], [1], [0, 0, 1, 1], [], []>} : vector<768x128xf32>, vector<128x128xf32>, vector<768x128xf32> -> vector<768x128xf32>
    %22 = arith.addf %18, %21 : vector<768x128xf32>
    %c36 = arith.constant 36 : index
    %c0_18 = arith.constant 0 : index
    %23 = vector.load %arg1[%c36, %c0_18] : memref<808x128xf32, #tpu.memory_space<vmem>>, vector<768x128xf32>
    %c768 = arith.constant 768 : index
    %c0_19 = arith.constant 0 : index
    %24 = vector.load %arg2[%c768, %c0_19] : memref<1152x128xf32, #tpu.memory_space<vmem>>, vector<128x128xf32>
    %cst_20 = arith.constant dense<0.000000e+00> : vector<768x128xf32>
    %25 = tpu.matmul %23, %24, %cst_20 {dimension_numbers = #tpu.dot_dimension_numbers<[1], [0], [0], [1], [0, 0, 1, 1], [], []>} : vector<768x128xf32>, vector<128x128xf32>, vector<768x128xf32> -> vector<768x128xf32>
    %26 = arith.addf %22, %25 : vector<768x128xf32>
    %c37 = arith.constant 37 : index
    %c0_21 = arith.constant 0 : index
    %27 = vector.load %arg1[%c37, %c0_21] : memref<808x128xf32, #tpu.memory_space<vmem>>, vector<768x128xf32>
    %c896 = arith.constant 896 : index
    %c0_22 = arith.constant 0 : index
    %28 = vector.load %arg2[%c896, %c0_22] : memref<1152x128xf32, #tpu.memory_space<vmem>>, vector<128x128xf32>
    %cst_23 = arith.constant dense<0.000000e+00> : vector<768x128xf32>
    %29 = tpu.matmul %27, %28, %cst_23 {dimension_numbers = #tpu.dot_dimension_numbers<[1], [0], [0], [1], [0, 0, 1, 1], [], []>} : vector<768x128xf32>, vector<128x128xf32>, vector<768x128xf32> -> vector<768x128xf32>
    %30 = arith.addf %26, %29 : vector<768x128xf32>
    %c38 = arith.constant 38 : index
    %c0_24 = arith.constant 0 : index
    %31 = vector.load %arg1[%c38, %c0_24] : memref<808x128xf32, #tpu.memory_space<vmem>>, vector<768x128xf32>
    %c1024 = arith.constant 1024 : index
    %c0_25 = arith.constant 0 : index
    %32 = vector.load %arg2[%c1024, %c0_25] : memref<1152x128xf32, #tpu.memory_space<vmem>>, vector<128x128xf32>
    %cst_26 = arith.constant dense<0.000000e+00> : vector<768x128xf32>
    %33 = tpu.matmul %31, %32, %cst_26 {dimension_numbers = #tpu.dot_dimension_numbers<[1], [0], [0], [1], [0, 0, 1, 1], [], []>} : vector<768x128xf32>, vector<128x128xf32>, vector<768x128xf32> -> vector<768x128xf32>
    %34 = arith.addf %30, %33 : vector<768x128xf32>
    %c0_27 = arith.constant 0 : index
    %c0_28 = arith.constant 0 : index
    %35 = vector.load %arg3[%c0_27, %c0_28] : memref<8x128xf32, #tpu.memory_space<vmem>>, vector<1x128xf32>
    %c1_29 = arith.constant 1 : index
    %c0_30 = arith.constant 0 : index
    %36 = vector.load %arg3[%c1_29, %c0_30] : memref<8x128xf32, #tpu.memory_space<vmem>>, vector<1x128xf32>
    %c0_31 = arith.constant 0 : index
    %c0_32 = arith.constant 0 : index
    %37 = vector.load %arg4[%c0_31, %c0_32] : memref<768x1xf32, #tpu.memory_space<vmem>>, vector<768x1xf32>
    %38 = vector.extract_strided_slice %34 {offsets = [0, 0], sizes = [1, 128], strides = [1, 1]} : vector<768x128xf32> to vector<1x128xf32>
    %39 = vector.broadcast %38 : vector<1x128xf32> to vector<768x128xf32>
    %40 = arith.subf %34, %39 : vector<768x128xf32>
    %41 = vector.broadcast %37 : vector<768x1xf32> to vector<768x128xf32>
    %42 = arith.mulf %40, %41 : vector<768x128xf32>
    %cst_33 = arith.constant dense<0.000000e+00> : vector<128xf32>
    %43 = vector.multi_reduction <add>, %42, %cst_33 [0] : vector<768x128xf32> to vector<128xf32>
    %44 = vector.shape_cast %43 : vector<128xf32> to vector<1x128xf32>
    %cst_34 = arith.constant 0.001953125 : f32
    %45 = vector.broadcast %cst_34 : f32 to vector<1x128xf32>
    %46 = arith.mulf %44, %45 : vector<1x128xf32>
    %47 = arith.mulf %42, %42 : vector<768x128xf32>
    %cst_35 = arith.constant dense<0.000000e+00> : vector<128xf32>
    %48 = vector.multi_reduction <add>, %47, %cst_35 [0] : vector<768x128xf32> to vector<128xf32>
    %49 = vector.shape_cast %48 : vector<128xf32> to vector<1x128xf32>
    %cst_36 = arith.constant 0.001953125 : f32
    %50 = vector.broadcast %cst_36 : f32 to vector<1x128xf32>
    %51 = arith.mulf %49, %50 : vector<1x128xf32>
    %52 = arith.mulf %46, %46 : vector<1x128xf32>
    %53 = arith.subf %51, %52 : vector<1x128xf32>
    %cst_37 = arith.constant 0.000000e+00 : f32
    %54 = vector.broadcast %cst_37 : f32 to vector<1x128xf32>
    %55 = arith.maximumf %53, %54 : vector<1x128xf32>
    %56 = arith.addf %38, %46 : vector<1x128xf32>
    %57 = vector.broadcast %56 : vector<1x128xf32> to vector<768x128xf32>
    %58 = arith.subf %34, %57 : vector<768x128xf32>
    %cst_38 = arith.constant 9.99999974E-6 : f32
    %59 = vector.broadcast %cst_38 : f32 to vector<1x128xf32>
    %60 = arith.addf %55, %59 : vector<1x128xf32>
    %61 = math.rsqrt %60 : vector<1x128xf32>
    %62 = arith.mulf %61, %35 : vector<1x128xf32>
    %63 = vector.broadcast %62 : vector<1x128xf32> to vector<768x128xf32>
    %64 = arith.mulf %58, %63 : vector<768x128xf32>
    %65 = vector.broadcast %36 : vector<1x128xf32> to vector<768x128xf32>
    %66 = arith.addf %64, %65 : vector<768x128xf32>
    %cst_39 = arith.constant 0.000000e+00 : f32
    %67 = vector.broadcast %cst_39 : f32 to vector<768x128xf32>
    %68 = arith.maximumf %66, %67 : vector<768x128xf32>
    %c0_40 = arith.constant 0 : index
    %c0_41 = arith.constant 0 : index
    %69 = vector.load %arg5[%c0_40, %c0_41] : memref<768x128xf32, #tpu.memory_space<vmem>>, vector<768x128xf32>
    tpu.vector_store %arg5[%c0_40, %c0_41], %68 {strides = array<i32>} : memref<768x128xf32, #tpu.memory_space<vmem>>, vector<768x128xf32>,
    return
  }
  func.func @transform_0(%arg0: i32) -> (i32, i32) {
    %c0_i32 = arith.constant 0 : i32
    %c0_i32_0 = arith.constant 0 : i32
    %c0_i32_1 = arith.constant 0 : i32
    return %c0_i32, %c0_i32_0 : i32, i32
  }
  func.func @transform_1(%arg0: i32) -> (i32, i32) {
    %c0_i32 = arith.constant 0 : i32
    %c0_i32_0 = arith.constant 0 : i32
    return %c0_i32, %arg0 : i32, i32
  }
  func.func @transform_2(%arg0: i32) -> (i32, i32) {
    %c0_i32 = arith.constant 0 : i32
    %c0_i32_0 = arith.constant 0 : i32
    return %c0_i32, %arg0 : i32, i32
  }
  func.func @transform_3(%arg0: i32) -> (i32, i32) {
    %c0_i32 = arith.constant 0 : i32
    %c0_i32_0 = arith.constant 0 : i32
    %c0_i32_1 = arith.constant 0 : i32
    return %c0_i32, %c0_i32_0 : i32, i32
  }
  func.func @transform_4(%arg0: i32) -> (i32, i32) {
    %c0_i32 = arith.constant 0 : i32
    %c0_i32_0 = arith.constant 0 : i32
    return %c0_i32, %arg0 : i32, i32
  }
}

</mosaic_0001>

<bundles_post_ra>
// kernel: tpu_custom_call.1
= control target key start
LH: loop header
LB: loop body
LE: loop exit
PB: predicated region body
PF: predicated region fallthrough
CT: control target
= control target key end

     0   :  { %9 = vsyncpa [#allocation3], 0  ;;  %s14326_s0 = inlined_call_operand.hbm [shape: f32[808,128], index: 0, kind: input, shape index: {}]   ;;  %s14327_s1 = inlined_call_operand.hbm [shape: f32[1152,128], index: 1, kind: input, shape index: {}]   ;;  %s14328_s2 = inlined_call_operand.vmem [shape: f32[8,128], index: 2, kind: input, shape index: {}]   ;;  %s14329_s3 = inlined_call_operand.vmem [shape: f32[768,1], index: 3, kind: input, shape index: {}]   ;;  %s14330_s4 = inlined_call_operand.hbm [shape: f32[768,128], index: 4, kind: output, shape index: {}]  }
   0x1   :  { %10 = vsyncpa [#allocation6], 0 }
   0x2   :  { %11 = vsyncpa [#allocation4], 0  ;;  %s10925_s15 = smov [#allocation2]  }
   0x3   :  { %s17_s16 = sshll.u32 %s10925_s15, 4  ;;  %s18_s16 = int_to_ptr.vmem [resolvable:$true] %s17_s16 }
   0x4   :  { %s10867_s17 = scalar_lea.vmem %s18_s16, 12928  ;;  %p10872_p1 = scmp.lt.s32.totalorder %s18_s16, %s18_s16 }
   0x5   :  { %p10868_p0 = scmp.ne.s32.totalorder %s18_s16, %s10867_s17  ;;  %p10873_p2 = scmp.lt.s32.totalorder %s10867_s17, %s10867_s17 }
   0x7   :  { %p10874_p3 = por %p10873_p2, %p10872_p1 }
   0x9   :  { %p10875_p4 = pnand %p10874_p3, %p10868_p0 }
   0xb   :  { %10878 = shalt.err (!%p10875_p4)
}
   0xc   :  { %s10926_s18 = smov 128   ;;  %s10927_s19 = smov 8  }
   0xd   :  { %23 = dma.hbm_to_vmem [thread:$0]  %s14326_s0, 12928, %s18_s16, [#allocation3], %s10926_s18, %s10926_s18, %s10927_s19  }
   0xe   :  { %s10928_s22 = smov [#allocation5]  }
   0xf   :  { %s29_s23 = sshll.u32 %s10928_s22, 4  ;;  %s30_s23 = int_to_ptr.vmem [resolvable:$true] %s29_s23 }
  0x10   :  { %s10887_s24 = scalar_lea.vmem %s30_s23, 18432  ;;  %p10892_p6 = scmp.lt.s32.totalorder %s30_s23, %s30_s23 }
  0x11   :  { %p10888_p5 = scmp.ne.s32.totalorder %s30_s23, %s10887_s24  ;;  %p10893_p7 = scmp.lt.s32.totalorder %s10887_s24, %s10887_s24 }
  0x13   :  { %p10894_p8 = por %p10893_p7, %p10892_p6 }
  0x15   :  { %p10895_p9 = pnand %p10894_p8, %p10888_p5 }
  0x17   :  { %10898 = shalt.err (!%p10895_p9)
}
  0x18   :  { %35 = dma.hbm_to_vmem [thread:$0]  %s14327_s1, 18432, %s30_s23, [#allocation6], %s10926_s18, %s10926_s18, %s10927_s19  }
  0x19   :  { %10919 = dma.done.wait [#allocation3], 12928  }
  0x1a   :  { %10920 = vsyncadd [#allocation3], 4294954368 }
  0x1b   :  { %10921 = dma.done.wait [#allocation6], 18432  }
  0x1c   :  { %10922 = vsyncadd [#allocation6], 4294948864  ;;  %v269_v0 = vld [vmem:[#allocation5 + $0xf8] sm:$0xff]  ;;  %v268_v1 = vld [vmem:[#allocation5 + $0xf0] sm:$0xff] }
  0x1d   :  { %10815 = vmatprep.subr.mxu1 %v269_v0  ;;  %9231 = vmatprep.subr.mxu0 %v269_v0  ;;  %v267_v2 = vld [vmem:[#allocation5 + $0xe8] sm:$0xff]  ;;  %v266_v3 = vld [vmem:[#allocation5 + $0xe0] sm:$0xff]  ;;  %v265_v4 = vld [vmem:[#allocation5 + $0xd8] sm:$0xff] }
  0x1e   :  { %10831 = vmatpush3.msra.mxu1 %v269_v0  ;;  %9232 = vmatpush3.msra.mxu0 %v269_v0  ;;  %v264_v5 = vld [vmem:[#allocation5 + $0xd0] sm:$0xff]  ;;  %v263_v6 = vld [vmem:[#allocation5 + $0xc8] sm:$0xff]  ;;  %v262_v7 = vld [vmem:[#allocation5 + $0xc0] sm:$0xff] }
  0x1f   :  { %10816 = vmatprep.subr.mxu1 %v268_v1  ;;  %9233 = vmatprep.subr.mxu0 %v268_v1  ;;  %v261_v8 = vld [vmem:[#allocation5 + $0xb8] sm:$0xff]  ;;  %v260_v9 = vld [vmem:[#allocation5 + $0xb0] sm:$0xff]  ;;  %v259_v10 = vld [vmem:[#allocation5 + $0xa8] sm:$0xff] }
  0x20   :  { %10832 = vmatpush3.msra.mxu1 %v268_v1  ;;  %9234 = vmatpush3.msra.mxu0 %v268_v1  ;;  %v258_v11 = vld [vmem:[#allocation5 + $0xa0] sm:$0xff]  ;;  %v257_v12 = vld [vmem:[#allocation5 + $0x98] sm:$0xff]  ;;  %v256_v13 = vld [vmem:[#allocation5 + $0x90] sm:$0xff] }
  0x21   :  { %10817 = vmatprep.subr.mxu1 %v267_v2  ;;  %9235 = vmatprep.subr.mxu0 %v267_v2  ;;  %v255_v14 = vld [vmem:[#allocation5 + $0x88] sm:$0xff]  ;;  %v254_v15 = vld [vmem:[#allocation5 + $0x80] sm:$0xff]  ;;  %v157_v19 = vld [vmem:[#allocation5 + $0x78] sm:$0xff] }
  0x22   :  { %10833 = vmatpush3.msra.mxu1 %v267_v2  ;;  %9236 = vmatpush3.msra.mxu0 %v267_v2  ;;  %v206_v16 = vld [vmem:[#allocation2 + $0x181] sm:$0xff]  ;;  %v207_v18 = vld [vmem:[#allocation2 + $0x189] sm:$0xff]  ;;  %v208_v22 = vld [vmem:[#allocation2 + $0x191] sm:$0xff] }
  0x23   :  { %10818 = vmatprep.subr.mxu1 %v266_v3  ;;  %9237 = vmatprep.subr.mxu0 %v266_v3  ;;  %v158_v17 = vld [vmem:[#allocation2 + $0x1] sm:$0xff]  ;;  %v159_v20 = vld [vmem:[#allocation2 + $0x9] sm:$0xff]  ;;  %v160_v23 = vld [vmem:[#allocation2 + $0x11] sm:$0xff] }
  0x24   :  { %10834 = vmatpush3.msra.mxu1 %v266_v3  ;;  %9238 = vmatpush3.msra.mxu0 %v266_v3  ;;  %v1471_v21 = vld [vmem:[#allocation5 + $0x178] sm:$0xff]  ;;  %v156_v25 = vld [vmem:[#allocation5 + $0x70] sm:$0xff]  ;;  %v155_v30 = vld [vmem:[#allocation5 + $0x68] sm:$0xff] }
  0x25   :  { %10819 = vmatprep.subr.mxu1 %v265_v4  ;;  %9239 = vmatprep.subr.mxu0 %v265_v4  ;;  %v209_v24 = vld [vmem:[#allocation2 + $0x199] sm:$0xff]  ;;  %v210_v27 = vld [vmem:[#allocation2 + $0x1a1] sm:$0xff]  ;;  %v211_v31 = vld [vmem:[#allocation2 + $0x1a9] sm:$0xff] }
  0x26   :  { %10835 = vmatpush3.msra.mxu1 %v265_v4  ;;  %9240 = vmatpush3.msra.mxu0 %v265_v4  ;;  %v161_v26 = vld [vmem:[#allocation2 + $0x19] sm:$0xff]  ;;  %v162_v28 = vld [vmem:[#allocation2 + $0x21] sm:$0xff]  ;;  %v163_v32 = vld [vmem:[#allocation2 + $0x29] sm:$0xff] }
  0x27   :  { %10820 = vmatprep.subr.mxu1 %v264_v5  ;;  %9241 = vmatprep.subr.mxu0 %v264_v5  ;;  %v1470_v29 = vld [vmem:[#allocation5 + $0x170] sm:$0xff]  ;;  %v1469_v35 = vld [vmem:[#allocation5 + $0x168] sm:$0xff]  ;;  %v154_v36 = vld [vmem:[#allocation5 + $0x60] sm:$0xff] }
  0x28   :  { %10836 = vmatpush3.msra.mxu1 %v264_v5  ;;  %9242 = vmatpush3.msra.mxu0 %v264_v5  ;;  %v212_v33 = vld [vmem:[#allocation2 + $0x1b1] sm:$0xff]  ;;  %v213_v37 = vld [vmem:[#allocation2 + $0x1b9] sm:$0xff]  ;;  %v214_v39 = vld [vmem:[#allocation2 + $0x1c1] sm:$0xff] }
  0x29   :  { %10821 = vmatprep.subr.mxu1 %v263_v6  ;;  %9243 = vmatprep.subr.mxu0 %v263_v6  ;;  %v164_v34 = vld [vmem:[#allocation2 + $0x31] sm:$0xff]  ;;  %v165_v38 = vld [vmem:[#allocation2 + $0x39] sm:$0xff]  ;;  %v166_v40 = vld [vmem:[#allocation2 + $0x41] sm:$0xff] }
  0x2a   :  { %10837 = vmatpush3.msra.mxu1 %v263_v6  ;;  %9244 = vmatpush3.msra.mxu0 %v263_v6  ;;  %v1468_v41 = vld [vmem:[#allocation5 + $0x160] sm:$0xff]  ;;  %v153_v42 = vld [vmem:[#allocation5 + $0x58] sm:$0xff]  ;;  %v216_v45 = vld [vmem:[#allocation2 + $0x1d1] sm:$0xff] }
  0x2b   :  { %10822 = vmatprep.subr.mxu1 %v262_v7  ;;  %9245 = vmatprep.subr.mxu0 %v262_v7  ;;  %v215_v43 = vld [vmem:[#allocation2 + $0x1c9] sm:$0xff]  ;;  %v168_v46 = vld [vmem:[#allocation2 + $0x51] sm:$0xff]  ;;  %v1467_v47 = vld [vmem:[#allocation5 + $0x158] sm:$0xff] }
  0x2c   :  { %10838 = vmatpush3.msra.mxu1 %v262_v7  ;;  %9246 = vmatpush3.msra.mxu0 %v262_v7  ;;  %v167_v44 = vld [vmem:[#allocation2 + $0x49] sm:$0xff]  ;;  %v152_v48 = vld [vmem:[#allocation5 + $0x50] sm:$0xff]  ;;  %v218_v51 = vld [vmem:[#allocation2 + $0x1e1] sm:$0xff] }
  0x2d   :  { %10823 = vmatprep.subr.mxu1 %v261_v8  ;;  %9247 = vmatprep.subr.mxu0 %v261_v8  ;;  %v217_v49 = vld [vmem:[#allocation2 + $0x1d9] sm:$0xff]  ;;  %v170_v52 = vld [vmem:[#allocation2 + $0x61] sm:$0xff]  ;;  %v151_v54 = vld [vmem:[#allocation5 + $0x48] sm:$0xff] }
  0x2e   :  { %10839 = vmatpush3.msra.mxu1 %v261_v8  ;;  %9248 = vmatpush3.msra.mxu0 %v261_v8  ;;  %v169_v50 = vld [vmem:[#allocation2 + $0x59] sm:$0xff]  ;;  %v219_v55 = vld [vmem:[#allocation2 + $0x1e9] sm:$0xff]  ;;  %v220_v57 = vld [vmem:[#allocation2 + $0x1f1] sm:$0xff] }
  0x2f   :  { %10824 = vmatprep.subr.mxu1 %v260_v9  ;;  %9249 = vmatprep.subr.mxu0 %v260_v9  ;;  %v1466_v53 = vld [vmem:[#allocation5 + $0x150] sm:$0xff]  ;;  %v171_v56 = vld [vmem:[#allocation2 + $0x69] sm:$0xff]  ;;  %v222_v63 = vld [vmem:[#allocation2 + $0x201] sm:$0xff] }
  0x30   :  { %10840 = vmatpush3.msra.mxu1 %v260_v9  ;;  %9250 = vmatpush3.msra.mxu0 %v260_v9  ;;  %v172_v58 = vld [vmem:[#allocation2 + $0x71] sm:$0xff]  ;;  %v150_v60 = vld [vmem:[#allocation5 + $0x40] sm:$0xff]  ;;  %v221_v61 = vld [vmem:[#allocation2 + $0x1f9] sm:$0xff] }
  0x31   :  { %10825 = vmatprep.subr.mxu1 %v259_v10  ;;  %9251 = vmatprep.subr.mxu0 %v259_v10  ;;  %v1465_v59 = vld [vmem:[#allocation5 + $0x148] sm:$0xff]  ;;  %v173_v62 = vld [vmem:[#allocation2 + $0x79] sm:$0xff]  ;;  %v174_v0 = vld [vmem:[#allocation2 + $0x81] sm:$0xff] }
  0x32   :  { %10841 = vmatpush3.msra.mxu1 %v259_v10  ;;  %9252 = vmatpush3.msra.mxu0 %v259_v10  ;;  %v1464_v1 = vld [vmem:[#allocation5 + $0x140] sm:$0xff]  ;;  %v149_v2 = vld [vmem:[#allocation5 + $0x38] sm:$0xff]  ;;  %v224_v5 = vld [vmem:[#allocation2 + $0x211] sm:$0xff] }
  0x33   :  { %10826 = vmatprep.subr.mxu1 %v258_v11  ;;  %9253 = vmatprep.subr.mxu0 %v258_v11  ;;  %v223_v3 = vld [vmem:[#allocation2 + $0x209] sm:$0xff]  ;;  %v176_v6 = vld [vmem:[#allocation2 + $0x91] sm:$0xff]  ;;  %v1463_v7 = vld [vmem:[#allocation5 + $0x138] sm:$0xff] }
  0x34   :  { %10842 = vmatpush3.msra.mxu1 %v258_v11  ;;  %9254 = vmatpush3.msra.mxu0 %v258_v11  ;;  %v175_v4 = vld [vmem:[#allocation2 + $0x89] sm:$0xff]  ;;  %v148_v8 = vld [vmem:[#allocation5 + $0x30] sm:$0xff]  ;;  %v226_v11 = vld [vmem:[#allocation2 + $0x221] sm:$0xff] }
  0x35   :  { %10827 = vmatprep.subr.mxu1 %v257_v12  ;;  %9255 = vmatprep.subr.mxu0 %v257_v12  ;;  %v225_v9 = vld [vmem:[#allocation2 + $0x219] sm:$0xff] }
  0x36   :  { %10843 = vmatpush3.msra.mxu1 %v257_v12  ;;  %9256 = vmatpush3.msra.mxu0 %v257_v12  ;;  %v177_v10 = vld [vmem:[#allocation2 + $0x99] sm:$0xff]  ;;  %v178_v12 = vld [vmem:[#allocation2 + $0xa1] sm:$0xff] }
  0x37   :  { %10828 = vmatprep.subr.mxu1 %v256_v13  ;;  %9257 = vmatprep.subr.mxu0 %v256_v13 }
  0x38   :  { %10844 = vmatpush3.msra.mxu1 %v256_v13  ;;  %9258 = vmatpush3.msra.mxu0 %v256_v13  ;;  %v1462_v13 = vld [vmem:[#allocation5 + $0x130] sm:$0xff] }
  0x39   :  { %10829 = vmatprep.subr.mxu1 %v255_v14  ;;  %9259 = vmatprep.subr.mxu0 %v255_v14 }
  0x3a   :  { %10845 = vmatpush3.msra.mxu1 %v255_v14  ;;  %9260 = vmatpush3.msra.mxu0 %v255_v14  ;;  %v147_v14 = vld [vmem:[#allocation5 + $0x28] sm:$0xff] }
  0x3b   :  { %10830 = vmatprep.subr.mxu1 %v254_v15  ;;  %9261 = vmatprep.subr.mxu0 %v254_v15 }
  0x3c   :  { %10846 = vmatpush3.msra.mxu1 %v254_v15  ;;  %9335 = vmatprep.mubr.f32.mxu1 %v206_v16  ;;  %v179_v16 = vld [vmem:[#allocation2 + $0xa9] sm:$0xff] }
  0x3d   :  { %9262 = vmatpush3.msra.mxu0 %v254_v15  ;;  %9263 = vmatprep.mubr.f32.mxu0 %v158_v17  ;;  %v227_v15 = vld [vmem:[#allocation2 + $0x229] sm:$0xff]  ;;  %v228_v17 = vld [vmem:[#allocation2 + $0x231] sm:$0xff] }
  0x3e   :  { %9336 = vmatmul.mubr.f32.vlgmr.msra.gmra.mxu1 %v207_v18  ;;  %9407 = vmatprep.subr.mxu1 %v157_v19  ;;  %v180_v18 = vld [vmem:[#allocation2 + $0xb1] sm:$0xff] }
  0x3f   :  { %9264 = vmatmul.mubr.f32.vlgmr.msra.gmra.mxu0 %v159_v20  ;;  %9408 = vmatpush3.msra.mxu1 %v157_v19  ;;  %v1461_v19 = vld [vmem:[#allocation5 + $0x128] sm:$0xff]  ;;  %v146_v20 = vld [vmem:[#allocation5 + $0x20] sm:$0xff] }
  0x40   :  { %9583 = vmatprep.subr.mxu0 %v1471_v21  ;;  %9338 = vmatprep.mubr.f32.mxu1 %v208_v22  ;;  %v181_v22 = vld [vmem:[#allocation2 + $0xb9] sm:$0xff] }
  0x41   :  { %9584 = vmatpush3.msra.mxu0 %v1471_v21  ;;  %9266 = vmatprep.mubr.f32.mxu0 %v160_v23  ;;  %v229_v21 = vld [vmem:[#allocation2 + $0x239] sm:$0xff]  ;;  %v230_v23 = vld [vmem:[#allocation2 + $0x241] sm:$0xff] }
  0x42   :  { %9339 = vmatmul.mubr.f32.gmra.mxu1 %v209_v24  ;;  %9409 = vmatprep.subr.mxu1 %v156_v25  ;;  %v182_v24 = vld [vmem:[#allocation2 + $0xc1] sm:$0xff] }
  0x43   :  { %9267 = vmatmul.mubr.f32.gmra.mxu0 %v161_v26  ;;  %9341 = vmatprep.mubr.f32.mxu1 %v210_v27  ;;  %v145_v26 = vld [vmem:[#allocation5 + $0x18] sm:$0xff]  ;;  %v231_v27 = vld [vmem:[#allocation2 + $0x249] sm:$0xff] }
  0x44   :  { %9410 = vmatpush3.msra.mxu1 %v156_v25  ;;  %9269 = vmatprep.mubr.f32.mxu0 %v162_v28  ;;  %v1460_v25 = vld [vmem:[#allocation5 + $0x120] sm:$0xff] }
  0x45   :  { %9585 = vmatprep.subr.mxu0 %v1470_v29  ;;  %9411 = vmatprep.subr.mxu1 %v155_v30  ;;  %v183_v28 = vld [vmem:[#allocation2 + $0xc9] sm:$0xff] }
  0x46   :  { %9342 = vmatmul.mubr.f32.gmra.mxu1 %v211_v31  ;;  %9586 = vmatpush3.msra.mxu0 %v1470_v29  ;;  %v232_v29 = vld [vmem:[#allocation2 + $0x251] sm:$0xff]  ;;  %v1459_v31 = vld [vmem:[#allocation5 + $0x118] sm:$0xff] }
  0x47   :  { %9270 = vmatmul.mubr.f32.gmra.mxu0 %v163_v32  ;;  %9344 = vmatprep.mubr.f32.mxu1 %v212_v33  ;;  %v144_v32 = vld [vmem:[#allocation5 + $0x10] sm:$0xff] }
  0x48   :  { %9272 = vmatprep.mubr.f32.mxu0 %v164_v34  ;;  %9412 = vmatpush3.msra.mxu1 %v155_v30  ;;  %v184_v30 = vld [vmem:[#allocation2 + $0xd1] sm:$0xff]  ;;  %v233_v33 = vld [vmem:[#allocation2 + $0x259] sm:$0xff] }
  0x49   :  { %9587 = vmatprep.subr.mxu0 %v1469_v35  ;;  %9413 = vmatprep.subr.mxu1 %v154_v36  ;;  %v185_v34 = vld [vmem:[#allocation2 + $0xd9] sm:$0xff] }
  0x4a   :  { %9345 = vmatmul.mubr.f32.gmra.mxu1 %v213_v37  ;;  %9588 = vmatpush3.msra.mxu0 %v1469_v35  ;;  %v234_v35 = vld [vmem:[#allocation2 + $0x261] sm:$0xff]  ;;  %v1458_v37 = vld [vmem:[#allocation5 + $0x110] sm:$0xff] }
  0x4b   :  { %9273 = vmatmul.mubr.f32.gmra.mxu0 %v165_v38  ;;  %9347 = vmatprep.mubr.f32.mxu1 %v214_v39  ;;  %v143_v38 = vld [vmem:[#allocation5 + $0x8] sm:$0xff] }
  0x4c   :  { %9275 = vmatprep.mubr.f32.mxu0 %v166_v40  ;;  %9414 = vmatpush3.msra.mxu1 %v154_v36  ;;  %v186_v36 = vld [vmem:[#allocation2 + $0xe1] sm:$0xff]  ;;  %v235_v39 = vld [vmem:[#allocation2 + $0x269] sm:$0xff] }
  0x4d   :  { %9589 = vmatprep.subr.mxu0 %v1468_v41  ;;  %9415 = vmatprep.subr.mxu1 %v153_v42  ;;  %v187_v40 = vld [vmem:[#allocation2 + $0xe9] sm:$0xff] }
  0x4e   :  { %9348 = vmatmul.mubr.f32.gmra.mxu1 %v215_v43  ;;  %9590 = vmatpush3.msra.mxu0 %v1468_v41  ;;  %v236_v41 = vld [vmem:[#allocation2 + $0x271] sm:$0xff] }
  0x4f   :  { %9276 = vmatmul.mubr.f32.gmra.mxu0 %v167_v44  ;;  %9350 = vmatprep.mubr.f32.mxu1 %v216_v45  ;;  %v1457_v43 = vld [vmem:[#allocation5 + $0x108] sm:$0xff]  ;;  %v142_v44 = vld [vmem:[#allocation5] sm:$0xff]  ;;  %v237_v45 = vld [vmem:[#allocation2 + $0x279] sm:$0xff] }
  0x50   :  { %9278 = vmatprep.mubr.f32.mxu0 %v168_v46  ;;  %9416 = vmatpush3.msra.mxu1 %v153_v42  ;;  %v188_v42 = vld [vmem:[#allocation2 + $0xf1] sm:$0xff]  ;;  %v189_v46 = vld [vmem:[#allocation2 + $0xf9] sm:$0xff] }
  0x51   :  { %9591 = vmatprep.subr.mxu0 %v1467_v47  ;;  %9417 = vmatprep.subr.mxu1 %v152_v48 }
  0x52   :  { %9351 = vmatmul.mubr.f32.gmra.mxu1 %v217_v49  ;;  %9592 = vmatpush3.msra.mxu0 %v1467_v47  ;;  %v238_v47 = vld [vmem:[#allocation2 + $0x281] sm:$0xff] }
  0x53   :  { %9279 = vmatmul.mubr.f32.gmra.mxu0 %v169_v50  ;;  %9353 = vmatprep.mubr.f32.mxu1 %v218_v51  ;;  %v1456_v49 = vld [vmem:[#allocation5 + $0x100] sm:$0xff]  ;;  %v10968_v50 = vld [vmem:[#allocation5 + $0x1f8] sm:$0xff] }
  0x54   :  { %9281 = vmatprep.mubr.f32.mxu0 %v170_v52  ;;  %9418 = vmatpush3.msra.mxu1 %v152_v48  ;;  %v190_v48 = vld [vmem:[#allocation2 + $0x101] sm:$0xff]  ;;  %v239_v51 = vld [vmem:[#allocation2 + $0x289] sm:$0xff] }
  0x55   :  { %9593 = vmatprep.subr.mxu0 %v1466_v53  ;;  %9419 = vmatprep.subr.mxu1 %v151_v54  ;;  %v191_v52 = vld [vmem:[#allocation2 + $0x109] sm:$0xff] }
  0x56   :  { %9354 = vmatmul.mubr.f32.gmra.mxu1 %v219_v55  ;;  %9594 = vmatpush3.msra.mxu0 %v1466_v53  ;;  %v240_v53 = vld [vmem:[#allocation2 + $0x291] sm:$0xff]  ;;  %v10971_v55 = vld [vmem:[#allocation5 + $0x278] sm:$0xff] }
  0x57   :  { %9282 = vmatmul.mubr.f32.gmra.mxu0 %v171_v56  ;;  %9356 = vmatprep.mubr.f32.mxu1 %v220_v57  ;;  %v241_v56 = vld [vmem:[#allocation2 + $0x299] sm:$0xff] }
  0x58   :  { %9284 = vmatprep.mubr.f32.mxu0 %v172_v58  ;;  %9420 = vmatpush3.msra.mxu1 %v151_v54  ;;  %v192_v54 = vld [vmem:[#allocation2 + $0x111] sm:$0xff]  ;;  %v193_v57 = vld [vmem:[#allocation2 + $0x119] sm:$0xff]  ;;  %v242_v58 = vld [vmem:[#allocation2 + $0x2a1] sm:$0xff] }
  0x59   :  { %9595 = vmatprep.subr.mxu0 %v1465_v59  ;;  %9421 = vmatprep.subr.mxu1 %v150_v60 }
  0x5a   :  { %9357 = vmatmul.mubr.f32.gmra.mxu1 %v221_v61  ;;  %9596 = vmatpush3.msra.mxu0 %v1465_v59  ;;  %v194_v59 = vld [vmem:[#allocation2 + $0x121] sm:$0xff]  ;;  %v195_v61 = vld [vmem:[#allocation2 + $0x129] sm:$0xff] }
  0x5b   :  { %9285 = vmatmul.mubr.f32.gmra.mxu0 %v173_v62  ;;  %9359 = vmatprep.mubr.f32.mxu1 %v222_v63  ;;  %v244_v62 = vld [vmem:[#allocation2 + $0x2b1] sm:$0xff] }
  0x5c   :  { %9287 = vmatprep.mubr.f32.mxu0 %v174_v0  ;;  %9422 = vmatpush3.msra.mxu1 %v150_v60  ;;  %v243_v60 = vld [vmem:[#allocation2 + $0x2a9] sm:$0xff]  ;;  %v196_v63 = vld [vmem:[#allocation2 + $0x131] sm:$0xff]  ;;  %v245_v0 = vld [vmem:[#allocation2 + $0x2b9] sm:$0xff] }
  0x5d   :  { %9597 = vmatprep.subr.mxu0 %v1464_v1  ;;  %9423 = vmatprep.subr.mxu1 %v149_v2 }
  0x5e   :  { %9360 = vmatmul.mubr.f32.gmra.mxu1 %v223_v3  ;;  %9598 = vmatpush3.msra.mxu0 %v1464_v1  ;;  %v197_v1 = vld [vmem:[#allocation2 + $0x139] sm:$0xff]  ;;  %v198_v3 = vld [vmem:[#allocation2 + $0x141] sm:$0xff] }
  0x5f   :  { %9288 = vmatmul.mubr.f32.gmra.mxu0 %v175_v4  ;;  %9362 = vmatprep.mubr.f32.mxu1 %v224_v5  ;;  %v247_v4 = vld [vmem:[#allocation2 + $0x2c9] sm:$0xff] }
  0x60   :  { %9290 = vmatprep.mubr.f32.mxu0 %v176_v6  ;;  %9424 = vmatpush3.msra.mxu1 %v149_v2  ;;  %v246_v2 = vld [vmem:[#allocation2 + $0x2c1] sm:$0xff]  ;;  %v199_v5 = vld [vmem:[#allocation2 + $0x149] sm:$0xff]  ;;  %v248_v6 = vld [vmem:[#allocation2 + $0x2d1] sm:$0xff] }
  0x61   :  { %9599 = vmatprep.subr.mxu0 %v1463_v7  ;;  %9425 = vmatprep.subr.mxu1 %v148_v8 }
  0x62   :  { %9363 = vmatmul.mubr.f32.gmra.mxu1 %v225_v9  ;;  %9600 = vmatpush3.msra.mxu0 %v1463_v7  ;;  %v200_v7 = vld [vmem:[#allocation2 + $0x151] sm:$0xff]  ;;  %v201_v9 = vld [vmem:[#allocation2 + $0x159] sm:$0xff] }
  0x63   :  { %9291 = vmatmul.mubr.f32.gmra.mxu0 %v177_v10  ;;  %9365 = vmatprep.mubr.f32.mxu1 %v226_v11  ;;  %v250_v10 = vld [vmem:[#allocation2 + $0x2e1] sm:$0xff] }
  0x64   :  { %9293 = vmatprep.mubr.f32.mxu0 %v178_v12  ;;  %9426 = vmatpush3.msra.mxu1 %v148_v8  ;;  %v249_v8 = vld [vmem:[#allocation2 + $0x2d9] sm:$0xff]  ;;  %v202_v11 = vld [vmem:[#allocation2 + $0x161] sm:$0xff]  ;;  %v251_v12 = vld [vmem:[#allocation2 + $0x2e9] sm:$0xff] }
  0x65   :  { %9601 = vmatprep.subr.mxu0 %v1462_v13  ;;  %9427 = vmatprep.subr.mxu1 %v147_v14 }
  0x66   :  { %9366 = vmatmul.mubr.f32.gmra.mxu1 %v227_v15  ;;  %9602 = vmatpush3.msra.mxu0 %v1462_v13  ;;  %v203_v13 = vld [vmem:[#allocation2 + $0x169] sm:$0xff]  ;;  %v204_v15 = vld [vmem:[#allocation2 + $0x171] sm:$0xff] }
  0x67   :  { %9294 = vmatmul.mubr.f32.gmra.mxu0 %v179_v16  ;;  %9368 = vmatprep.mubr.f32.mxu1 %v228_v17  ;;  %v253_v16 = vld [vmem:[#allocation2 + $0x2f9] sm:$0xff] }
  0x68   :  { %9296 = vmatprep.mubr.f32.mxu0 %v180_v18  ;;  %9428 = vmatpush3.msra.mxu1 %v147_v14  ;;  %v252_v14 = vld [vmem:[#allocation2 + $0x2f1] sm:$0xff]  ;;  %v205_v17 = vld [vmem:[#allocation2 + $0x179] sm:$0xff] }
  0x69   :  { %9603 = vmatprep.subr.mxu0 %v1461_v19  ;;  %9429 = vmatprep.subr.mxu1 %v146_v20  ;;  %v46_v18 = vld [vmem:[#allocation2] sm:$0xff] }
  0x6a   :  { %9369 = vmatmul.mubr.f32.gmra.mxu1 %v229_v21  ;;  %9604 = vmatpush3.msra.mxu0 %v1461_v19  ;;  %v1360_v19 = vld [vmem:[#allocation2 + $0x2] sm:$0xff]  ;;  %v1361_v21 = vld [vmem:[#allocation2 + $0xa] sm:$0xff] }
  0x6b   :  { %9297 = vmatmul.mubr.f32.gmra.mxu0 %v181_v22  ;;  %9371 = vmatprep.mubr.f32.mxu1 %v230_v23  ;;  %v48_v22 = vld [vmem:[#allocation2 + $0x10] sm:$0xff] }
  0x6c   :  { %9299 = vmatprep.mubr.f32.mxu0 %v182_v24  ;;  %9430 = vmatpush3.msra.mxu1 %v146_v20  ;;  %v47_v20 = vld [vmem:[#allocation2 + $0x8] sm:$0xff]  ;;  %v1362_v23 = vld [vmem:[#allocation2 + $0x12] sm:$0xff] }
  0x6d   :  { %9605 = vmatprep.subr.mxu0 %v1460_v25  ;;  %9431 = vmatprep.subr.mxu1 %v145_v26  ;;  %v2223_v24 = vld [vmem:[#allocation5 + $0x1f0] sm:$0xff] }
  0x6e   :  { %9372 = vmatmul.mubr.f32.gmra.mxu1 %v231_v27  ;;  %9606 = vmatpush3.msra.mxu0 %v1460_v25  ;;  %v49_v25 = vld [vmem:[#allocation2 + $0x18] sm:$0xff] }
  0x6f   :  { %9300 = vmatmul.mubr.f32.gmra.mxu0 %v183_v28  ;;  %9374 = vmatprep.mubr.f32.mxu1 %v232_v29  ;;  %v1363_v27 = vld [vmem:[#allocation2 + $0x1a] sm:$0xff]  ;;  %v1364_v29 = vld [vmem:[#allocation2 + $0x22] sm:$0xff] }
  0x70   :  { %9302 = vmatprep.mubr.f32.mxu0 %v184_v30  ;;  %9432 = vmatpush3.msra.mxu1 %v145_v26  ;;  %v2976_v26 = vld [vmem:[#allocation5 + $0x270] sm:$0xff]  ;;  %v50_v28 = vld [vmem:[#allocation2 + $0x20] sm:$0xff]  ;;  %v2222_v30 = vld [vmem:[#allocation5 + $0x1e8] sm:$0xff] }
  0x71   :  { %9607 = vmatprep.subr.mxu0 %v1459_v31  ;;  %9433 = vmatprep.subr.mxu1 %v144_v32 }
  0x72   :  { %9375 = vmatmul.mubr.f32.gmra.mxu1 %v233_v33  ;;  %9608 = vmatpush3.msra.mxu0 %v1459_v31  ;;  %v51_v31 = vld [vmem:[#allocation2 + $0x28] sm:$0xff] }
  0x73   :  { %9303 = vmatmul.mubr.f32.gmra.mxu0 %v185_v34  ;;  %9377 = vmatprep.mubr.f32.mxu1 %v234_v35  ;;  %v1365_v33 = vld [vmem:[#allocation2 + $0x2a] sm:$0xff]  ;;  %v1366_v35 = vld [vmem:[#allocation2 + $0x32] sm:$0xff] }
  0x74   :  { %9305 = vmatprep.mubr.f32.mxu0 %v186_v36  ;;  %9434 = vmatpush3.msra.mxu1 %v144_v32  ;;  %v2975_v32 = vld [vmem:[#allocation5 + $0x268] sm:$0xff]  ;;  %v2221_v36 = vld [vmem:[#allocation5 + $0x1e0] sm:$0xff] }
  0x75   :  { %9609 = vmatprep.subr.mxu0 %v1458_v37  ;;  %9435 = vmatprep.subr.mxu1 %v143_v38  ;;  %v52_v34 = vld [vmem:[#allocation2 + $0x30] sm:$0xff] }
  0x76   :  { %9378 = vmatmul.mubr.f32.gmra.mxu1 %v235_v39  ;;  %9610 = vmatpush3.msra.mxu0 %v1458_v37  ;;  %v53_v37 = vld [vmem:[#allocation2 + $0x38] sm:$0xff] }
  0x77   :  { %9306 = vmatmul.mubr.f32.gmra.mxu0 %v187_v40  ;;  %9380 = vmatprep.mubr.f32.mxu1 %v236_v41  ;;  %v1367_v39 = vld [vmem:[#allocation2 + $0x3a] sm:$0xff]  ;;  %v1368_v41 = vld [vmem:[#allocation2 + $0x42] sm:$0xff] }
  0x78   :  { %9308 = vmatprep.mubr.f32.mxu0 %v188_v42  ;;  %9436 = vmatpush3.msra.mxu1 %v143_v38  ;;  %v2974_v38 = vld [vmem:[#allocation5 + $0x260] sm:$0xff]  ;;  %v54_v40 = vld [vmem:[#allocation2 + $0x40] sm:$0xff] }
  0x79   :  { %9611 = vmatprep.subr.mxu0 %v1457_v43  ;;  %9437 = vmatprep.subr.mxu1 %v142_v44  ;;  %v2220_v42 = vld [vmem:[#allocation5 + $0x1d8] sm:$0xff] }
  0x7a   :  { %9381 = vmatmul.mubr.f32.gmra.mxu1 %v237_v45  ;;  %9612 = vmatpush3.msra.mxu0 %v1457_v43  ;;  %v55_v43 = vld [vmem:[#allocation2 + $0x48] sm:$0xff] }
  0x7b   :  { %9309 = vmatmul.mubr.f32.gmra.mxu0 %v189_v46  ;;  %9383 = vmatprep.mubr.f32.mxu1 %v238_v47  ;;  %v1369_v45 = vld [vmem:[#allocation2 + $0x4a] sm:$0xff]  ;;  %v1370_v47 = vld [vmem:[#allocation2 + $0x52] sm:$0xff] }
  0x7c   :  { %9311 = vmatprep.mubr.f32.mxu0 %v190_v48  ;;  %9438 = vmatpush3.msra.mxu1 %v142_v44  ;;  %v2973_v44 = vld [vmem:[#allocation5 + $0x258] sm:$0xff]  ;;  %v56_v46 = vld [vmem:[#allocation2 + $0x50] sm:$0xff]  ;;  %v2219_v48 = vld [vmem:[#allocation5 + $0x1d0] sm:$0xff] }
  0x7d   :  { %9613 = vmatprep.subr.mxu0 %v1456_v49  ;;  %9759 = vmatprep.subr.mxu1 %v10968_v50 }
  0x7e   :  { %9384 = vmatmul.mubr.f32.gmra.mxu1 %v239_v51  ;;  %9614 = vmatpush3.msra.mxu0 %v1456_v49  ;;  %v57_v49 = vld [vmem:[#allocation2 + $0x58] sm:$0xff] }
  0x7f   :  { %9312 = vmatmul.mubr.f32.gmra.mxu0 %v191_v52  ;;  %9386 = vmatprep.mubr.f32.mxu1 %v240_v53  ;;  %v1371_v51 = vld [vmem:[#allocation2 + $0x5a] sm:$0xff]  ;;  %v1372_v53 = vld [vmem:[#allocation2 + $0x62] sm:$0xff] }
  0x80   :  { %9314 = vmatprep.mubr.f32.mxu0 %v192_v54  ;;  %9935 = vmatprep.subr.mxu0 %v10971_v55  ;;  %v58_v52 = vld [vmem:[#allocation2 + $0x60] sm:$0xff]  ;;  %v2218_v54 = vld [vmem:[#allocation5 + $0x1c8] sm:$0xff] }
  0x82   :  { %9387 = vmatmul.mubr.f32.gmra.mxu1 %v241_v56  ;;  %v2971_v56 = vld [vmem:[#allocation5 + $0x248] sm:$0xff] }
  0x83   :  { %9315 = vmatmul.mubr.f32.gmra.mxu0 %v193_v57  ;;  %9389 = vmatprep.mubr.f32.mxu1 %v242_v58  ;;  %v1373_v57 = vld [vmem:[#allocation2 + $0x6a] sm:$0xff] }
  0x84   :  { %9317 = vmatprep.mubr.f32.mxu0 %v194_v59  ;;  %v60_v58 = vld [vmem:[#allocation2 + $0x70] sm:$0xff] }
  0x85   :  { %v1374_v59 = vld [vmem:[#allocation2 + $0x72] sm:$0xff] }
  0x86   :  { %9390 = vmatmul.mubr.f32.gmra.mxu1 %v243_v60  ;;  %v2217_v60 = vld [vmem:[#allocation5 + $0x1c0] sm:$0xff] }
  0x87   :  { %9318 = vmatmul.mubr.f32.gmra.mxu0 %v195_v61  ;;  %9392 = vmatprep.mubr.f32.mxu1 %v244_v62  ;;  %v61_v61 = vld [vmem:[#allocation2 + $0x78] sm:$0xff]  ;;  %v2970_v62 = vld [vmem:[#allocation5 + $0x240] sm:$0xff] }
  0x88   :  { %9320 = vmatprep.mubr.f32.mxu0 %v196_v63  ;;  %v1375_v63 = vld [vmem:[#allocation2 + $0x7a] sm:$0xff] }
  0x8a   :  { %9393 = vmatmul.mubr.f32.gmra.mxu1 %v245_v0  ;;  %v62_v0 = vld [vmem:[#allocation2 + $0x80] sm:$0xff] }
  0x8b   :  { %9321 = vmatmul.mubr.f32.gmra.mxu0 %v197_v1  ;;  %9395 = vmatprep.mubr.f32.mxu1 %v246_v2  ;;  %v1376_v1 = vld [vmem:[#allocation2 + $0x82] sm:$0xff] }
  0x8c   :  { %9323 = vmatprep.mubr.f32.mxu0 %v198_v3  ;;  %v2216_v2 = vld [vmem:[#allocation5 + $0x1b8] sm:$0xff]  ;;  %v63_v3 = vld [vmem:[#allocation2 + $0x88] sm:$0xff] }
  0x8e   :  { %9396 = vmatmul.mubr.f32.gmra.mxu1 %v247_v4  ;;  %v2969_v4 = vld [vmem:[#allocation5 + $0x238] sm:$0xff] }
  0x8f   :  { %9324 = vmatmul.mubr.f32.gmra.mxu0 %v199_v5  ;;  %9398 = vmatprep.mubr.f32.mxu1 %v248_v6  ;;  %v1377_v5 = vld [vmem:[#allocation2 + $0x8a] sm:$0xff] }
  0x90   :  { %9326 = vmatprep.mubr.f32.mxu0 %v200_v7  ;;  %v64_v6 = vld [vmem:[#allocation2 + $0x90] sm:$0xff] }
  0x91   :  { %v1378_v7 = vld [vmem:[#allocation2 + $0x92] sm:$0xff] }
  0x92   :  { %9399 = vmatmul.mubr.f32.gmra.mxu1 %v249_v8  ;;  %v2215_v8 = vld [vmem:[#allocation5 + $0x1b0] sm:$0xff] }
  0x93   :  { %9327 = vmatmul.mubr.f32.gmra.mxu0 %v201_v9  ;;  %9401 = vmatprep.mubr.f32.mxu1 %v250_v10  ;;  %v65_v9 = vld [vmem:[#allocation2 + $0x98] sm:$0xff] }
  0x94   :  { %9329 = vmatprep.mubr.f32.mxu0 %v202_v11  ;;  %v2968_v10 = vld [vmem:[#allocation5 + $0x230] sm:$0xff] }
  0x95   :  { %v1379_v11 = vld [vmem:[#allocation2 + $0x9a] sm:$0xff] }
  0x96   :  { %9402 = vmatmul.mubr.f32.gmra.mxu1 %v251_v12  ;;  %v66_v12 = vld [vmem:[#allocation2 + $0xa0] sm:$0xff] }
  0x97   :  { %9330 = vmatmul.mubr.f32.gmra.mxu0 %v203_v13  ;;  %9404 = vmatprep.mubr.f32.mxu1 %v252_v14  ;;  %v1380_v13 = vld [vmem:[#allocation2 + $0xa2] sm:$0xff]  ;;  %v2214_v14 = vld [vmem:[#allocation5 + $0x1a8] sm:$0xff] }
  0x98   :  { %9332 = vmatprep.mubr.f32.mxu0 %v204_v15  ;;  %v67_v15 = vld [vmem:[#allocation2 + $0xa8] sm:$0xff] }
  0x9a   :  { %9405 = vmatmul.mubr.f32.gmra.mxu1 %v253_v16  ;;  %v2967_v16 = vld [vmem:[#allocation5 + $0x228] sm:$0xff] }
  0x9b   :  { %9333 = vmatmul.mubr.f32.gmra.mxu0 %v205_v17  ;;  %9439 = vmatprep.mubr.f32.mxu1 %v46_v18  ;;  %v1381_v17 = vld [vmem:[#allocation2 + $0xaa] sm:$0xff] }
  0x9c   :  { %9615 = vmatprep.mubr.f32.mxu0 %v1360_v19  ;;  %v68_v18 = vld [vmem:[#allocation2 + $0xb0] sm:$0xff] }
  0x9d   :  { %v1382_v19 = vld [vmem:[#allocation2 + $0xb2] sm:$0xff] }
  0x9e   :  { %9440 = vmatmul.mubr.f32.vlgmr.msra.gmra.mxu1 %v47_v20  ;;  %v2213_v20 = vld [vmem:[#allocation5 + $0x1a0] sm:$0xff] }
  0x9f   :  { %9616 = vmatmul.mubr.f32.vlgmr.msra.gmra.mxu0 %v1361_v21  ;;  %9760 = vmatpush3.msra.mxu1 %v10968_v50  ;;  %v2972_v50 = vld [vmem:[#allocation5 + $0x250] sm:$0xff] }
  0xa0   :  { %9442 = vmatprep.mubr.f32.mxu1 %v48_v22  ;;  %9936 = vmatpush3.msra.mxu0 %v10971_v55  ;;  %v59_v55 = vld [vmem:[#allocation2 + $0x68] sm:$0xff]  ;;  %v69_v21 = vld [vmem:[#allocation2 + $0xb8] sm:$0xff] }
  0xa1   :  { %9618 = vmatprep.mubr.f32.mxu0 %v1362_v23  ;;  %9761 = vmatprep.subr.mxu1 %v2223_v24  ;;  %v2966_v22 = vld [vmem:[#allocation5 + $0x220] sm:$0xff]  ;;  %v1383_v23 = vld [vmem:[#allocation2 + $0xba] sm:$0xff] }
  0xa2   :  { %9443 = vmatmul.mubr.f32.gmra.mxu1 %v49_v25  ;;  %9937 = vmatprep.subr.mxu0 %v2976_v26  ;;  %v1384_v25 = vld [vmem:[#allocation2 + $0xc2] sm:$0xff] }
  0xa3   :  { %9619 = vmatmul.mubr.f32.gmra.mxu0 %v1363_v27  ;;  %9445 = vmatprep.mubr.f32.mxu1 %v50_v28  ;;  %v71_v27 = vld [vmem:[#allocation2 + $0xc8] sm:$0xff]  ;;  %v2965_v28 = vld [vmem:[#allocation5 + $0x218] sm:$0xff] }
  0xa4   :  { %9621 = vmatprep.mubr.f32.mxu0 %v1364_v29  ;;  %9762 = vmatpush3.msra.mxu1 %v2223_v24  ;;  %v70_v24 = vld [vmem:[#allocation2 + $0xc0] sm:$0xff]  ;;  %v1385_v29 = vld [vmem:[#allocation2 + $0xca] sm:$0xff] }
  0xa5   :  { %9938 = vmatpush3.msra.mxu0 %v2976_v26  ;;  %9763 = vmatprep.subr.mxu1 %v2222_v30  ;;  %v2212_v26 = vld [vmem:[#allocation5 + $0x198] sm:$0xff] }
  0xa6   :  { %9446 = vmatmul.mubr.f32.gmra.mxu1 %v51_v31  ;;  %9939 = vmatprep.subr.mxu0 %v2975_v32  ;;  %v1386_v31 = vld [vmem:[#allocation2 + $0xd2] sm:$0xff] }
  0xa7   :  { %9622 = vmatmul.mubr.f32.gmra.mxu0 %v1365_v33  ;;  %9448 = vmatprep.mubr.f32.mxu1 %v52_v34  ;;  %v73_v33 = vld [vmem:[#allocation2 + $0xd8] sm:$0xff] }
  0xa8   :  { %9624 = vmatprep.mubr.f32.mxu0 %v1366_v35  ;;  %9764 = vmatpush3.msra.mxu1 %v2222_v30  ;;  %v72_v30 = vld [vmem:[#allocation2 + $0xd0] sm:$0xff]  ;;  %v2964_v34 = vld [vmem:[#allocation5 + $0x210] sm:$0xff] }
  0xa9   :  { %9940 = vmatpush3.msra.mxu0 %v2975_v32  ;;  %9765 = vmatprep.subr.mxu1 %v2221_v36  ;;  %v2211_v32 = vld [vmem:[#allocation5 + $0x190] sm:$0xff] }
  0xaa   :  { %9449 = vmatmul.mubr.f32.gmra.mxu1 %v53_v37  ;;  %9941 = vmatprep.subr.mxu0 %v2974_v38  ;;  %v1387_v35 = vld [vmem:[#allocation2 + $0xda] sm:$0xff]  ;;  %v1388_v37 = vld [vmem:[#allocation2 + $0xe2] sm:$0xff] }
  0xab   :  { %9625 = vmatmul.mubr.f32.gmra.mxu0 %v1367_v39  ;;  %9451 = vmatprep.mubr.f32.mxu1 %v54_v40  ;;  %v75_v39 = vld [vmem:[#allocation2 + $0xe8] sm:$0xff]  ;;  %v2963_v40 = vld [vmem:[#allocation5 + $0x208] sm:$0xff] }
  0xac   :  { %9627 = vmatprep.mubr.f32.mxu0 %v1368_v41  ;;  %9766 = vmatpush3.msra.mxu1 %v2221_v36  ;;  %v74_v36 = vld [vmem:[#allocation2 + $0xe0] sm:$0xff]  ;;  %v1389_v41 = vld [vmem:[#allocation2 + $0xea] sm:$0xff] }
  0xad   :  { %9942 = vmatpush3.msra.mxu0 %v2974_v38  ;;  %9767 = vmatprep.subr.mxu1 %v2220_v42  ;;  %v2210_v38 = vld [vmem:[#allocation5 + $0x188] sm:$0xff] }
  0xae   :  { %9452 = vmatmul.mubr.f32.gmra.mxu1 %v55_v43  ;;  %9943 = vmatprep.subr.mxu0 %v2973_v44  ;;  %v1390_v43 = vld [vmem:[#allocation2 + $0xf2] sm:$0xff] }
  0xaf   :  { %9628 = vmatmul.mubr.f32.gmra.mxu0 %v1369_v45  ;;  %9454 = vmatprep.mubr.f32.mxu1 %v56_v46  ;;  %v77_v45 = vld [vmem:[#allocation2 + $0xf8] sm:$0xff]  ;;  %v2962_v46 = vld [vmem:[#allocation5 + $0x200] sm:$0xff] }
  0xb0   :  { %9630 = vmatprep.mubr.f32.mxu0 %v1370_v47  ;;  %9768 = vmatpush3.msra.mxu1 %v2220_v42  ;;  %v76_v42 = vld [vmem:[#allocation2 + $0xf0] sm:$0xff]  ;;  %v1391_v47 = vld [vmem:[#allocation2 + $0xfa] sm:$0xff] }
  0xb1   :  { %9944 = vmatpush3.msra.mxu0 %v2973_v44  ;;  %9769 = vmatprep.subr.mxu1 %v2219_v48  ;;  %v2209_v44 = vld [vmem:[#allocation5 + $0x180] sm:$0xff] }
  0xb2   :  { %9455 = vmatmul.mubr.f32.gmra.mxu1 %v57_v49  ;;  %9945 = vmatprep.subr.mxu0 %v2972_v50  ;;  %v1392_v49 = vld [vmem:[#allocation2 + $0x102] sm:$0xff] }
  0xb3   :  { %9631 = vmatmul.mubr.f32.gmra.mxu0 %v1371_v51  ;;  %9457 = vmatprep.mubr.f32.mxu1 %v58_v52  ;;  %v1393_v51 = vld [vmem:[#allocation2 + $0x10a] sm:$0xff] }
  0xb4   :  { %9633 = vmatprep.mubr.f32.mxu0 %v1372_v53  ;;  %9770 = vmatpush3.msra.mxu1 %v2219_v48  ;;  %v78_v48 = vld [vmem:[#allocation2 + $0x100] sm:$0xff]  ;;  %v80_v52 = vld [vmem:[#allocation2 + $0x110] sm:$0xff] }
  0xb5   :  { %9946 = vmatpush3.msra.mxu0 %v2972_v50  ;;  %9771 = vmatprep.subr.mxu1 %v2218_v54  ;;  %v79_v50 = vld [vmem:[#allocation2 + $0x108] sm:$0xff]  ;;  %v1394_v53 = vld [vmem:[#allocation2 + $0x112] sm:$0xff] }
  0xb6   :  { %9458 = vmatmul.mubr.f32.gmra.mxu1 %v59_v55  ;;  %9947 = vmatprep.subr.mxu0 %v2971_v56  ;;  %v10976_v55 = vld [vmem:[#allocation5 + $0x2f8] sm:$0xff] }
  0xb7   :  { %9634 = vmatmul.mubr.f32.gmra.mxu0 %v1373_v57  ;;  %9460 = vmatprep.mubr.f32.mxu1 %v60_v58  ;;  %v82_v57 = vld [vmem:[#allocation2 + $0x120] sm:$0xff] }
  0xb8   :  { %9636 = vmatprep.mubr.f32.mxu0 %v1374_v59  ;;  %9772 = vmatpush3.msra.mxu1 %v2218_v54  ;;  %v81_v54 = vld [vmem:[#allocation2 + $0x118] sm:$0xff]  ;;  %v1396_v58 = vld [vmem:[#allocation2 + $0x122] sm:$0xff] }
  0xb9   :  { %9948 = vmatpush3.msra.mxu0 %v2971_v56  ;;  %9773 = vmatprep.subr.mxu1 %v2217_v60  ;;  %v1395_v56 = vld [vmem:[#allocation2 + $0x11a] sm:$0xff] }
  0xba   :  { %9461 = vmatmul.mubr.f32.gmra.mxu1 %v61_v61  ;;  %9949 = vmatprep.subr.mxu0 %v2970_v62  ;;  %v10979_v59 = vld [vmem:[#allocation5 + $0x378] sm:$0xff]  ;;  %v1397_v61 = vld [vmem:[#allocation2 + $0x12a] sm:$0xff] }
  0xbb   :  { %9637 = vmatmul.mubr.f32.gmra.mxu0 %v1375_v63  ;;  %9463 = vmatprep.mubr.f32.mxu1 %v62_v0  ;;  %v1398_v63 = vld [vmem:[#allocation2 + $0x132] sm:$0xff] }
  0xbc   :  { %9639 = vmatprep.mubr.f32.mxu0 %v1376_v1  ;;  %9774 = vmatpush3.msra.mxu1 %v2217_v60  ;;  %v83_v60 = vld [vmem:[#allocation2 + $0x128] sm:$0xff]  ;;  %v85_v0 = vld [vmem:[#allocation2 + $0x138] sm:$0xff] }
  0xbd   :  { %9950 = vmatpush3.msra.mxu0 %v2970_v62  ;;  %9775 = vmatprep.subr.mxu1 %v2216_v2  ;;  %v84_v62 = vld [vmem:[#allocation2 + $0x130] sm:$0xff]  ;;  %v1399_v1 = vld [vmem:[#allocation2 + $0x13a] sm:$0xff] }
  0xbe   :  { %9464 = vmatmul.mubr.f32.gmra.mxu1 %v63_v3  ;;  %9951 = vmatprep.subr.mxu0 %v2969_v4  ;;  %v1400_v3 = vld [vmem:[#allocation2 + $0x142] sm:$0xff] }
  0xbf   :  { %9640 = vmatmul.mubr.f32.gmra.mxu0 %v1377_v5  ;;  %9466 = vmatprep.mubr.f32.mxu1 %v64_v6  ;;  %v1401_v5 = vld [vmem:[#allocation2 + $0x14a] sm:$0xff] }
  0xc0   :  { %9642 = vmatprep.mubr.f32.mxu0 %v1378_v7  ;;  %9776 = vmatpush3.msra.mxu1 %v2216_v2  ;;  %v86_v2 = vld [vmem:[#allocation2 + $0x140] sm:$0xff]  ;;  %v88_v6 = vld [vmem:[#allocation2 + $0x150] sm:$0xff] }
  0xc1   :  { %9952 = vmatpush3.msra.mxu0 %v2969_v4  ;;  %9777 = vmatprep.subr.mxu1 %v2215_v8  ;;  %v87_v4 = vld [vmem:[#allocation2 + $0x148] sm:$0xff]  ;;  %v1402_v7 = vld [vmem:[#allocation2 + $0x152] sm:$0xff] }
  0xc2   :  { %9467 = vmatmul.mubr.f32.gmra.mxu1 %v65_v9  ;;  %9953 = vmatprep.subr.mxu0 %v2968_v10  ;;  %v1403_v9 = vld [vmem:[#allocation2 + $0x15a] sm:$0xff] }
  0xc3   :  { %9643 = vmatmul.mubr.f32.gmra.mxu0 %v1379_v11  ;;  %9469 = vmatprep.mubr.f32.mxu1 %v66_v12  ;;  %v1404_v11 = vld [vmem:[#allocation2 + $0x162] sm:$0xff] }
  0xc4   :  { %9645 = vmatprep.mubr.f32.mxu0 %v1380_v13  ;;  %9778 = vmatpush3.msra.mxu1 %v2215_v8  ;;  %v89_v8 = vld [vmem:[#allocation2 + $0x158] sm:$0xff]  ;;  %v91_v12 = vld [vmem:[#allocation2 + $0x168] sm:$0xff] }
  0xc5   :  { %9954 = vmatpush3.msra.mxu0 %v2968_v10  ;;  %9779 = vmatprep.subr.mxu1 %v2214_v14  ;;  %v90_v10 = vld [vmem:[#allocation2 + $0x160] sm:$0xff]  ;;  %v1405_v13 = vld [vmem:[#allocation2 + $0x16a] sm:$0xff] }
  0xc6   :  { %9470 = vmatmul.mubr.f32.gmra.mxu1 %v67_v15  ;;  %9955 = vmatprep.subr.mxu0 %v2967_v16  ;;  %v1406_v15 = vld [vmem:[#allocation2 + $0x172] sm:$0xff] }
  0xc7   :  { %9646 = vmatmul.mubr.f32.gmra.mxu0 %v1381_v17  ;;  %9472 = vmatprep.mubr.f32.mxu1 %v68_v18  ;;  %v1407_v17 = vld [vmem:[#allocation2 + $0x17a] sm:$0xff] }
  0xc8   :  { %9648 = vmatprep.mubr.f32.mxu0 %v1382_v19  ;;  %9780 = vmatpush3.msra.mxu1 %v2214_v14  ;;  %v92_v14 = vld [vmem:[#allocation2 + $0x170] sm:$0xff]  ;;  %v94_v18 = vld [vmem:[#allocation2 + $0x180] sm:$0xff] }
  0xc9   :  { %9956 = vmatpush3.msra.mxu0 %v2967_v16  ;;  %9781 = vmatprep.subr.mxu1 %v2213_v20  ;;  %v93_v16 = vld [vmem:[#allocation2 + $0x178] sm:$0xff]  ;;  %v1408_v19 = vld [vmem:[#allocation2 + $0x182] sm:$0xff] }
  0xca   :  { %9473 = vmatmul.mubr.f32.gmra.mxu1 %v69_v21  ;;  %9957 = vmatprep.subr.mxu0 %v2966_v22  ;;  %v1409_v21 = vld [vmem:[#allocation2 + $0x18a] sm:$0xff] }
  0xcb   :  { %9649 = vmatmul.mubr.f32.gmra.mxu0 %v1383_v23  ;;  %9475 = vmatprep.mubr.f32.mxu1 %v70_v24  ;;  %v1410_v23 = vld [vmem:[#allocation2 + $0x192] sm:$0xff] }
  0xcc   :  { %9651 = vmatprep.mubr.f32.mxu0 %v1384_v25  ;;  %9782 = vmatpush3.msra.mxu1 %v2213_v20  ;;  %v95_v20 = vld [vmem:[#allocation2 + $0x188] sm:$0xff] }
  0xcd   :  { %9958 = vmatpush3.msra.mxu0 %v2966_v22  ;;  %9783 = vmatprep.subr.mxu1 %v2212_v26  ;;  %v96_v22 = vld [vmem:[#allocation2 + $0x190] sm:$0xff] }
  0xce   :  { %9476 = vmatmul.mubr.f32.gmra.mxu1 %v71_v27  ;;  %9959 = vmatprep.subr.mxu0 %v2965_v28 }
  0xcf   :  { %9652 = vmatmul.mubr.f32.gmra.mxu0 %v1385_v29  ;;  %9478 = vmatprep.mubr.f32.mxu1 %v72_v30  ;;  %v98_v29 = vld [vmem:[#allocation2 + $0x1a0] sm:$0xff] }
  0xd0   :  { %9654 = vmatprep.mubr.f32.mxu0 %v1386_v31  ;;  %9784 = vmatpush3.msra.mxu1 %v2212_v26  ;;  %v97_v26 = vld [vmem:[#allocation2 + $0x198] sm:$0xff]  ;;  %v1412_v31 = vld [vmem:[#allocation2 + $0x1a2] sm:$0xff] }
  0xd1   :  { %9960 = vmatpush3.msra.mxu0 %v2965_v28  ;;  %9785 = vmatprep.subr.mxu1 %v2211_v32  ;;  %v1411_v28 = vld [vmem:[#allocation2 + $0x19a] sm:$0xff] }
  0xd2   :  { %9479 = vmatmul.mubr.f32.gmra.mxu1 %v73_v33  ;;  %9961 = vmatprep.subr.mxu0 %v2964_v34 }
  0xd3   :  { %9655 = vmatmul.mubr.f32.gmra.mxu0 %v1387_v35  ;;  %9481 = vmatprep.mubr.f32.mxu1 %v74_v36  ;;  %v1413_v36 = vld [vmem:[#allocation2 + $0x1aa] sm:$0xff] }
  0xd4   :  { %9657 = vmatprep.mubr.f32.mxu0 %v1388_v37  ;;  %9786 = vmatpush3.msra.mxu1 %v2211_v32  ;;  %v100_v37 = vld [vmem:[#allocation2 + $0x1b0] sm:$0xff] }
  0xd5   :  { %9962 = vmatpush3.msra.mxu0 %v2964_v34  ;;  %9787 = vmatprep.subr.mxu1 %v2210_v38  ;;  %v99_v34 = vld [vmem:[#allocation2 + $0x1a8] sm:$0xff] }
  0xd6   :  { %9482 = vmatmul.mubr.f32.gmra.mxu1 %v75_v39  ;;  %9963 = vmatprep.subr.mxu0 %v2963_v40  ;;  %v1414_v39 = vld [vmem:[#allocation2 + $0x1b2] sm:$0xff] }
  0xd7   :  { %9658 = vmatmul.mubr.f32.gmra.mxu0 %v1389_v41  ;;  %9484 = vmatprep.mubr.f32.mxu1 %v76_v42  ;;  %v101_v42 = vld [vmem:[#allocation2 + $0x1b8] sm:$0xff] }
  0xd8   :  { %9660 = vmatprep.mubr.f32.mxu0 %v1390_v43  ;;  %9788 = vmatpush3.msra.mxu1 %v2210_v38 }
  0xd9   :  { %9964 = vmatpush3.msra.mxu0 %v2963_v40  ;;  %9789 = vmatprep.subr.mxu1 %v2209_v44 }
  0xda   :  { %9485 = vmatmul.mubr.f32.gmra.mxu1 %v77_v45  ;;  %9965 = vmatprep.subr.mxu0 %v2962_v46  ;;  %v102_v45 = vld [vmem:[#allocation2 + $0x1c0] sm:$0xff] }
  0xdb   :  { %9661 = vmatmul.mubr.f32.gmra.mxu0 %v1391_v47  ;;  %9487 = vmatprep.mubr.f32.mxu1 %v78_v48  ;;  %v1416_v47 = vld [vmem:[#allocation2 + $0x1c2] sm:$0xff] }
  0xdc   :  { %9663 = vmatprep.mubr.f32.mxu0 %v1392_v49  ;;  %9790 = vmatpush3.msra.mxu1 %v2209_v44  ;;  %v1415_v44 = vld [vmem:[#allocation2 + $0x1ba] sm:$0xff] }
  0xdd   :  { %9966 = vmatpush3.msra.mxu0 %v2962_v46  ;;  %10111 = vmatprep.subr.mxu1 %v10976_v55 }
  0xde   :  { %9488 = vmatmul.mubr.f32.gmra.mxu1 %v79_v50  ;;  %10287 = vmatprep.subr.mxu0 %v10979_v59  ;;  %v103_v50 = vld [vmem:[#allocation2 + $0x1c8] sm:$0xff] }
  0xdf   :  { %9664 = vmatmul.mubr.f32.gmra.mxu0 %v1393_v51  ;;  %9490 = vmatprep.mubr.f32.mxu1 %v80_v52  ;;  %v1417_v52 = vld [vmem:[#allocation2 + $0x1ca] sm:$0xff] }
  0xe0   :  { %9666 = vmatprep.mubr.f32.mxu0 %v1394_v53  ;;  %v104_v53 = vld [vmem:[#allocation2 + $0x1d0] sm:$0xff] }
  0xe2   :  { %9491 = vmatmul.mubr.f32.gmra.mxu1 %v81_v54 }
  0xe3   :  { %9667 = vmatmul.mubr.f32.gmra.mxu0 %v1395_v56  ;;  %9493 = vmatprep.mubr.f32.mxu1 %v82_v57  ;;  %v1418_v56 = vld [vmem:[#allocation2 + $0x1d2] sm:$0xff] }
  0xe4   :  { %9669 = vmatprep.mubr.f32.mxu0 %v1396_v58 }
  0xe6   :  { %9494 = vmatmul.mubr.f32.gmra.mxu1 %v83_v60  ;;  %v105_v60 = vld [vmem:[#allocation2 + $0x1d8] sm:$0xff] }
  0xe7   :  { %9670 = vmatmul.mubr.f32.gmra.mxu0 %v1397_v61  ;;  %9496 = vmatprep.mubr.f32.mxu1 %v84_v62  ;;  %v1419_v62 = vld [vmem:[#allocation2 + $0x1da] sm:$0xff] }
  0xe8   :  { %9672 = vmatprep.mubr.f32.mxu0 %v1398_v63  ;;  %v106_v63 = vld [vmem:[#allocation2 + $0x1e0] sm:$0xff] }
  0xea   :  { %9497 = vmatmul.mubr.f32.gmra.mxu1 %v85_v0 }
  0xeb   :  { %9673 = vmatmul.mubr.f32.gmra.mxu0 %v1399_v1  ;;  %9499 = vmatprep.mubr.f32.mxu1 %v86_v2  ;;  %v1420_v1 = vld [vmem:[#allocation2 + $0x1e2] sm:$0xff] }
  0xec   :  { %9675 = vmatprep.mubr.f32.mxu0 %v1400_v3 }
  0xee   :  { %9500 = vmatmul.mubr.f32.gmra.mxu1 %v87_v4  ;;  %v107_v4 = vld [vmem:[#allocation2 + $0x1e8] sm:$0xff] }
  0xef   :  { %9676 = vmatmul.mubr.f32.gmra.mxu0 %v1401_v5  ;;  %9502 = vmatprep.mubr.f32.mxu1 %v88_v6  ;;  %v1421_v6 = vld [vmem:[#allocation2 + $0x1ea] sm:$0xff] }
  0xf0   :  { %9678 = vmatprep.mubr.f32.mxu0 %v1402_v7  ;;  %v108_v7 = vld [vmem:[#allocation2 + $0x1f0] sm:$0xff] }
  0xf2   :  { %9503 = vmatmul.mubr.f32.gmra.mxu1 %v89_v8 }
  0xf3   :  { %9679 = vmatmul.mubr.f32.gmra.mxu0 %v1403_v9  ;;  %9505 = vmatprep.mubr.f32.mxu1 %v90_v10  ;;  %v1422_v9 = vld [vmem:[#allocation2 + $0x1f2] sm:$0xff] }
  0xf4   :  { %9681 = vmatprep.mubr.f32.mxu0 %v1404_v11 }
  0xf6   :  { %9506 = vmatmul.mubr.f32.gmra.mxu1 %v91_v12  ;;  %v109_v12 = vld [vmem:[#allocation2 + $0x1f8] sm:$0xff] }
  0xf7   :  { %9682 = vmatmul.mubr.f32.gmra.mxu0 %v1405_v13  ;;  %9508 = vmatprep.mubr.f32.mxu1 %v92_v14  ;;  %v1423_v14 = vld [vmem:[#allocation2 + $0x1fa] sm:$0xff] }
  0xf8   :  { %9684 = vmatprep.mubr.f32.mxu0 %v1406_v15  ;;  %v110_v15 = vld [vmem:[#allocation2 + $0x200] sm:$0xff] }
  0xfa   :  { %9509 = vmatmul.mubr.f32.gmra.mxu1 %v93_v16 }
  0xfb   :  { %9685 = vmatmul.mubr.f32.gmra.mxu0 %v1407_v17  ;;  %9511 = vmatprep.mubr.f32.mxu1 %v94_v18  ;;  %v1424_v17 = vld [vmem:[#allocation2 + $0x202] sm:$0xff] }
  0xfc   :  { %9687 = vmatprep.mubr.f32.mxu0 %v1408_v19 }
  0xfe   :  { %v10982_v24 = vpop.f32.mrf.mxu1  ;;  %9512 = vmatmul.mubr.f32.gmra.mxu1 %v95_v20  ;;  %v111_v20 = vld [vmem:[#allocation2 + $0x208] sm:$0xff] }
  0xff   :  { %14471 = vst [vmem:[#allocation11_spill] sm:$0xff] %v10982_v24  ;;  %v10984_v25 = vpop.f32.mrf.mxu0  ;;  %9688 = vmatmul.mubr.f32.gmra.mxu0 %v1409_v21  ;;  %9514 = vmatprep.mubr.f32.mxu1 %v96_v22  ;;  %v1425_v22 = vld [vmem:[#allocation2 + $0x20a] sm:$0xff] }
 0x100   :  { %v10986_v27 = vpop.f32.mrf.mxu1  ;;  %9690 = vmatprep.mubr.f32.mxu0 %v1410_v23  ;;  %v112_v23 = vld [vmem:[#allocation2 + $0x210] sm:$0xff] }
 0x101   :  { %14472 = vst [vmem:[#allocation12_spill] sm:$0xff] %v10986_v27  ;;  %v10988_v30 = vpop.f32.mrf.mxu0 }
 0x102   :  { %v10990_v32 = vpop.f32.mrf.mxu1  ;;  %9515 = vmatmul.mubr.f32.gmra.mxu1 %v97_v26 }
 0x103   :  { %14473 = vst [vmem:[#allocation13_spill] sm:$0xff] %v10990_v32  ;;  %v10992_v33 = vpop.f32.mrf.mxu0  ;;  %9691 = vmatmul.mubr.f32.gmra.mxu0 %v1411_v28  ;;  %9517 = vmatprep.mubr.f32.mxu1 %v98_v29  ;;  %v1426_v28 = vld [vmem:[#allocation2 + $0x212] sm:$0xff] }
 0x104   :  { %v10994_v35 = vpop.f32.mrf.mxu1  ;;  %9693 = vmatprep.mubr.f32.mxu0 %v1412_v31  ;;  %v3729_v32 = vld [vmem:[#allocation5 + $0x2f0] sm:$0xff] }
 0x105   :  { %14474 = vst [vmem:[#allocation14_spill] sm:$0xff] %v10994_v35  ;;  %v10996_v38 = vpop.f32.mrf.mxu0  ;;  %v2868_v35 = vld [vmem:[#allocation2 + $0x23] sm:$0xff] }
 0x106   :  { %v10998_v40 = vpop.f32.mrf.mxu1  ;;  %9518 = vmatmul.mubr.f32.gmra.mxu1 %v99_v34  ;;  %v113_v34 = vld [vmem:[#allocation2 + $0x218] sm:$0xff] }
 0x107   :  { %14475 = vst [vmem:[#allocation15_spill] sm:$0xff] %v10998_v40  ;;  %v11000_v41 = vpop.f32.mrf.mxu0  ;;  %9694 = vmatmul.mubr.f32.gmra.mxu0 %v1413_v36  ;;  %9520 = vmatprep.mubr.f32.mxu1 %v100_v37  ;;  %v1427_v37 = vld [vmem:[#allocation2 + $0x21a] sm:$0xff] }
 0x108   :  { %v11002_v43 = vpop.f32.mrf.mxu1  ;;  %9696 = vmatprep.mubr.f32.mxu0 %v1414_v39  ;;  %v114_v39 = vld [vmem:[#allocation2 + $0x220] sm:$0xff] }
 0x109   :  { %14476 = vst [vmem:[#allocation16_spill] sm:$0xff] %v11002_v43  ;;  %v11004_v46 = vpop.f32.mrf.mxu0 }
 0x10a   :  { %v11006_v48 = vpop.f32.mrf.mxu1  ;;  %9521 = vmatmul.mubr.f32.gmra.mxu1 %v101_v42 }
 0x10b   :  { %14477 = vst [vmem:[#allocation17_spill] sm:$0xff] %v11006_v48  ;;  %v11008_v49 = vpop.f32.mrf.mxu0  ;;  %9697 = vmatmul.mubr.f32.gmra.mxu0 %v1415_v44  ;;  %9523 = vmatprep.mubr.f32.mxu1 %v102_v45  ;;  %v1428_v44 = vld [vmem:[#allocation2 + $0x222] sm:$0xff] }
 0x10c   :  { %v11010_v51 = vpop.f32.mrf.mxu1  ;;  %9699 = vmatprep.mubr.f32.mxu0 %v1416_v47 }
 0x10d   :  { %14478 = vst [vmem:[#allocation18_spill] sm:$0xff] %v11010_v51  ;;  %v11012_v54 = vpop.f32.mrf.mxu0 }
 0x10e   :  { %v11014_v57 = vpop.f32.mrf.mxu1  ;;  %9524 = vmatmul.mubr.f32.gmra.mxu1 %v103_v50  ;;  %v115_v50 = vld [vmem:[#allocation2 + $0x228] sm:$0xff] }
 0x10f   :  { %14479 = vst [vmem:[#allocation19_spill] sm:$0xff] %v11014_v57  ;;  %v11016_v58 = vpop.f32.mrf.mxu0  ;;  %9700 = vmatmul.mubr.f32.gmra.mxu0 %v1417_v52  ;;  %9526 = vmatprep.mubr.f32.mxu1 %v104_v53  ;;  %v1429_v53 = vld [vmem:[#allocation2 + $0x22a] sm:$0xff] }
 0x110   :  { %v11018_v61 = vpop.f32.mrf.mxu1  ;;  %9702 = vmatprep.mubr.f32.mxu0 %v1418_v56  ;;  %v116_v56 = vld [vmem:[#allocation2 + $0x230] sm:$0xff] }
 0x111   :  { %14480 = vst [vmem:[#allocation20_spill] sm:$0xff] %v11018_v61  ;;  %v11020_v0 = vpop.f32.mrf.mxu0 }
 0x112   :  { %v11022_v2 = vpop.f32.mrf.mxu1  ;;  %9527 = vmatmul.mubr.f32.gmra.mxu1 %v105_v60 }
 0x113   :  { %14481 = vst [vmem:[#allocation21_spill] sm:$0xff] %v11022_v2  ;;  %v11024_v3 = vpop.f32.mrf.mxu0  ;;  %9703 = vmatmul.mubr.f32.gmra.mxu0 %v1419_v62  ;;  %9529 = vmatprep.mubr.f32.mxu1 %v106_v63  ;;  %v1430_v62 = vld [vmem:[#allocation2 + $0x232] sm:$0xff] }
 0x114   :  { %v11026_v5 = vpop.f32.mrf.mxu1  ;;  %9705 = vmatprep.mubr.f32.mxu0 %v1420_v1 }
 0x115   :  { %14482 = vst [vmem:[#allocation22_spill] sm:$0xff] %v11026_v5  ;;  %v11028_v8 = vpop.f32.mrf.mxu0 }
 0x116   :  { %v11030_v10 = vpop.f32.mrf.mxu1  ;;  %9530 = vmatmul.mubr.f32.gmra.mxu1 %v107_v4  ;;  %v117_v4 = vld [vmem:[#allocation2 + $0x238] sm:$0xff] }
 0x117   :  { %14483 = vst [vmem:[#allocation23_spill] sm:$0xff] %v11030_v10  ;;  %v11032_v11 = vpop.f32.mrf.mxu0  ;;  %9706 = vmatmul.mubr.f32.gmra.mxu0 %v1421_v6  ;;  %9532 = vmatprep.mubr.f32.mxu1 %v108_v7  ;;  %v1431_v7 = vld [vmem:[#allocation2 + $0x23a] sm:$0xff] }
 0x118   :  { %v11034_v13 = vpop.f32.mrf.mxu1  ;;  %9708 = vmatprep.mubr.f32.mxu0 %v1422_v9  ;;  %v118_v9 = vld [vmem:[#allocation2 + $0x240] sm:$0xff] }
 0x119   :  { %14484 = vst [vmem:[#allocation24_spill] sm:$0xff] %v11034_v13  ;;  %v11036_v16 = vpop.f32.mrf.mxu0 }
 0x11a   :  { %v11038_v18 = vpop.f32.mrf.mxu1  ;;  %9533 = vmatmul.mubr.f32.gmra.mxu1 %v109_v12 }
 0x11b   :  { %14485 = vst [vmem:[#allocation25_spill] sm:$0xff] %v11038_v18  ;;  %v11040_v19 = vpop.f32.mrf.mxu0  ;;  %9709 = vmatmul.mubr.f32.gmra.mxu0 %v1423_v14  ;;  %9535 = vmatprep.mubr.f32.mxu1 %v110_v15  ;;  %v1432_v14 = vld [vmem:[#allocation2 + $0x242] sm:$0xff] }
 0x11c   :  { %v11042_v21 = vpop.f32.mrf.mxu1  ;;  %9711 = vmatprep.mubr.f32.mxu0 %v1424_v17 }
 0x11d   :  { %14486 = vst [vmem:[#allocation26_spill] sm:$0xff] %v11042_v21  ;;  %v11044_v26 = vpop.f32.mrf.mxu0 }
 0x11e   :  { %v11046_v29 = vpop.f32.mrf.mxu1  ;;  %9536 = vmatmul.mubr.f32.gmra.mxu1 %v111_v20  ;;  %v119_v20 = vld [vmem:[#allocation2 + $0x248] sm:$0xff] }
 0x11f   :  { %14487 = vst [vmem:[#allocation27_spill] sm:$0xff] %v11046_v29  ;;  %v11048_v31 = vpop.f32.mrf.mxu0  ;;  %9712 = vmatmul.mubr.f32.gmra.mxu0 %v1425_v22  ;;  %9538 = vmatprep.mubr.f32.mxu1 %v112_v23  ;;  %v1433_v23 = vld [vmem:[#allocation2 + $0x24a] sm:$0xff] }
 0x120   :  { %v11050_v36 = vpop.f32.mrf.mxu1  ;;  %9714 = vmatprep.mubr.f32.mxu0 %v1426_v28  ;;  %v120_v28 = vld [vmem:[#allocation2 + $0x250] sm:$0xff] }
 0x121   :  { %14488 = vst [vmem:[#allocation28_spill] sm:$0xff] %v11050_v36  ;;  %v11052_v42 = vpop.f32.mrf.mxu0 }
 0x122   :  { %v11054_v45 = vpop.f32.mrf.mxu1  ;;  %9539 = vmatmul.mubr.f32.gmra.mxu1 %v113_v34 }
 0x123   :  { %14489 = vst [vmem:[#allocation29_spill] sm:$0xff] %v11054_v45  ;;  %v11056_v47 = vpop.f32.mrf.mxu0  ;;  %9715 = vmatmul.mubr.f32.gmra.mxu0 %v1427_v37  ;;  %9541 = vmatprep.mubr.f32.mxu1 %v114_v39  ;;  %v1434_v37 = vld [vmem:[#allocation2 + $0x252] sm:$0xff] }
 0x124   :  { %v11058_v52 = vpop.f32.mrf.mxu1  ;;  %9717 = vmatprep.mubr.f32.mxu0 %v1428_v44 }
 0x125   :  { %14490 = vst [vmem:[#allocation30_spill] sm:$0xff] %v11058_v52  ;;  %v11060_v60 = vpop.f32.mrf.mxu0 }
 0x126   :  { %v11062_v63 = vpop.f32.mrf.mxu1  ;;  %9542 = vmatmul.mubr.f32.gmra.mxu1 %v115_v50  ;;  %v121_v50 = vld [vmem:[#allocation2 + $0x258] sm:$0xff] }
 0x127   :  { %14491 = vst [vmem:[#allocation31_spill] sm:$0xff] %v11062_v63  ;;  %v11064_v1 = vpop.f32.mrf.mxu0  ;;  %9718 = vmatmul.mubr.f32.gmra.mxu0 %v1429_v53  ;;  %9544 = vmatprep.mubr.f32.mxu1 %v116_v56  ;;  %v1435_v56 = vld [vmem:[#allocation2 + $0x25a] sm:$0xff] }
 0x128   :  { %v11066_v6 = vpop.f32.mrf.mxu1  ;;  %9720 = vmatprep.mubr.f32.mxu0 %v1430_v62  ;;  %v122_v62 = vld [vmem:[#allocation2 + $0x260] sm:$0xff] }
 0x129   :  { %14492 = vst [vmem:[#allocation32_spill] sm:$0xff] %v11066_v6  ;;  %v11068_v12 = vpop.f32.mrf.mxu0 }
 0x12a   :  { %v11070_v15 = vpop.f32.mrf.mxu1  ;;  %9545 = vmatmul.mubr.f32.gmra.mxu1 %v117_v4 }
 0x12b   :  { %14493 = vst [vmem:[#allocation33_spill] sm:$0xff] %v11070_v15  ;;  %v11072_v17 = vpop.f32.mrf.mxu0  ;;  %9721 = vmatmul.mubr.f32.gmra.mxu0 %v1431_v7  ;;  %9547 = vmatprep.mubr.f32.mxu1 %v118_v9  ;;  %v1436_v7 = vld [vmem:[#allocation2 + $0x262] sm:$0xff] }
 0x12c   :  { %v11074_v22 = vpop.f32.mrf.mxu1  ;;  %9723 = vmatprep.mubr.f32.mxu0 %v1432_v14 }
 0x12d   :  { %14494 = vst [vmem:[#allocation34_spill] sm:$0xff] %v11074_v22  ;;  %v11076_v34 = vpop.f32.mrf.mxu0 }
 0x12e   :  { %v11078_v39 = vpop.f32.mrf.mxu1  ;;  %9548 = vmatmul.mubr.f32.gmra.mxu1 %v119_v20  ;;  %v123_v20 = vld [vmem:[#allocation2 + $0x268] sm:$0xff] }
 0x12f   :  { %14495 = vst [vmem:[#allocation35_spill] sm:$0xff] %v11078_v39  ;;  %v11080_v44 = vpop.f32.mrf.mxu0  ;;  %9724 = vmatmul.mubr.f32.gmra.mxu0 %v1433_v23  ;;  %9550 = vmatprep.mubr.f32.mxu1 %v120_v28  ;;  %v1437_v23 = vld [vmem:[#allocation2 + $0x26a] sm:$0xff] }
 0x130   :  { %v11082_v53 = vpop.f32.mrf.mxu1  ;;  %9726 = vmatprep.mubr.f32.mxu0 %v1434_v37  ;;  %v124_v28 = vld [vmem:[#allocation2 + $0x270] sm:$0xff] }
 0x131   :  { %14496 = vst [vmem:[#allocation36_spill] sm:$0xff] %v11082_v53  ;;  %v11084_v4 = vpop.f32.mrf.mxu0  ;;  %v1438_v37 = vld [vmem:[#allocation2 + $0x272] sm:$0xff] }
 0x132   :  { %v11086_v9 = vpop.f32.mrf.mxu1  ;;  %9551 = vmatmul.mubr.f32.gmra.mxu1 %v121_v50  ;;  %v125_v50 = vld [vmem:[#allocation2 + $0x278] sm:$0xff] }
 0x133   :  { %14497 = vst [vmem:[#allocation37_spill] sm:$0xff] %v11086_v9  ;;  %v11088_v14 = vpop.f32.mrf.mxu0  ;;  %9727 = vmatmul.mubr.f32.gmra.mxu0 %v1435_v56  ;;  %9553 = vmatprep.mubr.f32.mxu1 %v122_v62  ;;  %v1439_v56 = vld [vmem:[#allocation2 + $0x27a] sm:$0xff] }
 0x134   :  { %v11090_v39 = vpop.f32.mrf.mxu1  ;;  %9729 = vmatprep.mubr.f32.mxu0 %v1436_v7  ;;  %v126_v62 = vld [vmem:[#allocation2 + $0x280] sm:$0xff] }
 0x135   :  { %14498 = vst [vmem:[#allocation38_spill] sm:$0xff] %v11090_v39  ;;  %v11092_v53 = vpop.f32.mrf.mxu0  ;;  %v1440_v7 = vld [vmem:[#allocation2 + $0x282] sm:$0xff] }
 0x136   :  { %v11094_v22 = vpop.f32.mrf.mxu1  ;;  %9554 = vmatmul.mubr.f32.gmra.mxu1 %v123_v20  ;;  %v127_v20 = vld [vmem:[#allocation2 + $0x288] sm:$0xff] }
 0x137   :  { %14499 = vst [vmem:[#allocation39_spill] sm:$0xff] %v11094_v22  ;;  %v11096_v15 = vpop.f32.mrf.mxu0  ;;  %9730 = vmatmul.mubr.f32.gmra.mxu0 %v1437_v23  ;;  %9556 = vmatprep.mubr.f32.mxu1 %v124_v28  ;;  %v1441_v23 = vld [vmem:[#allocation2 + $0x28a] sm:$0xff] }
 0x138   :  { %v11098_v9 = vpop.f32.mrf.mxu1  ;;  %9732 = vmatprep.mubr.f32.mxu0 %v1438_v37  ;;  %v128_v28 = vld [vmem:[#allocation2 + $0x290] sm:$0xff] }
 0x139   :  { %14500 = vst [vmem:[#allocation40_spill] sm:$0xff] %v11098_v9  ;;  %v11100_v39 = vpop.f32.mrf.mxu0  ;;  %v1442_v37 = vld [vmem:[#allocation2 + $0x292] sm:$0xff] }
 0x13a   :  { %v11102_v6 = vpop.f32.mrf.mxu1  ;;  %9557 = vmatmul.mubr.f32.gmra.mxu1 %v125_v50  ;;  %v129_v50 = vld [vmem:[#allocation2 + $0x298] sm:$0xff] }
 0x13b   :  { %14501 = vst [vmem:[#allocation41_spill] sm:$0xff] %v11102_v6  ;;  %v11104_v63 = vpop.f32.mrf.mxu0  ;;  %9733 = vmatmul.mubr.f32.gmra.mxu0 %v1439_v56  ;;  %9559 = vmatprep.mubr.f32.mxu1 %v126_v62  ;;  %v1443_v56 = vld [vmem:[#allocation2 + $0x29a] sm:$0xff] }
 0x13c   :  { %v11106_v22 = vpop.f32.mrf.mxu1  ;;  %9735 = vmatprep.mubr.f32.mxu0 %v1440_v7  ;;  %v130_v62 = vld [vmem:[#allocation2 + $0x2a0] sm:$0xff] }
 0x13d   :  { %14502 = vst [vmem:[#allocation42_spill] sm:$0xff] %v11106_v22  ;;  %v11108_v9 = vpop.f32.mrf.mxu0  ;;  %v1444_v7 = vld [vmem:[#allocation2 + $0x2a2] sm:$0xff] }
 0x13e   :  { %v11110_v52 = vpop.f32.mrf.mxu1  ;;  %9560 = vmatmul.mubr.f32.gmra.mxu1 %v127_v20  ;;  %v131_v20 = vld [vmem:[#allocation2 + $0x2a8] sm:$0xff] }
 0x13f   :  { %14503 = vst [vmem:[#allocation43_spill] sm:$0xff] %v11110_v52  ;;  %v11112_v45 = vpop.f32.mrf.mxu0  ;;  %9736 = vmatmul.mubr.f32.gmra.mxu0 %v1441_v23  ;;  %9562 = vmatprep.mubr.f32.mxu1 %v128_v28  ;;  %v1445_v23 = vld [vmem:[#allocation2 + $0x2aa] sm:$0xff] }
 0x140   :  { %v11114_v6 = vpop.f32.mrf.mxu1  ;;  %9738 = vmatprep.mubr.f32.mxu0 %v1442_v37  ;;  %v132_v28 = vld [vmem:[#allocation2 + $0x2b0] sm:$0xff] }
 0x141   :  { %14504 = vst [vmem:[#allocation44_spill] sm:$0xff] %v11114_v6  ;;  %v11116_v22 = vpop.f32.mrf.mxu0  ;;  %v1446_v37 = vld [vmem:[#allocation2 + $0x2b2] sm:$0xff] }
 0x142   :  { %v11118_v36 = vpop.f32.mrf.mxu1  ;;  %9563 = vmatmul.mubr.f32.gmra.mxu1 %v129_v50  ;;  %v133_v50 = vld [vmem:[#allocation2 + $0x2b8] sm:$0xff] }
 0x143   :  { %14505 = vst [vmem:[#allocation45_spill] sm:$0xff] %v11118_v36  ;;  %v11120_v29 = vpop.f32.mrf.mxu0  ;;  %9739 = vmatmul.mubr.f32.gmra.mxu0 %v1443_v56  ;;  %9565 = vmatprep.mubr.f32.mxu1 %v130_v62  ;;  %v1447_v56 = vld [vmem:[#allocation2 + $0x2ba] sm:$0xff] }
 0x144   :  { %v11122_v52 = vpop.f32.mrf.mxu1  ;;  %9741 = vmatprep.mubr.f32.mxu0 %v1444_v7  ;;  %v134_v62 = vld [vmem:[#allocation2 + $0x2c0] sm:$0xff] }
 0x145   :  { %14506 = vst [vmem:[#allocation46_spill] sm:$0xff] %v11122_v52  ;;  %v11124_v6 = vpop.f32.mrf.mxu0  ;;  %v1448_v7 = vld [vmem:[#allocation2 + $0x2c2] sm:$0xff] }
 0x146   :  { %v11126_v21 = vpop.f32.mrf.mxu1  ;;  %9566 = vmatmul.mubr.f32.gmra.mxu1 %v131_v20  ;;  %v135_v20 = vld [vmem:[#allocation2 + $0x2c8] sm:$0xff] }
 0x147   :  { %14507 = vst [vmem:[#allocation47_spill] sm:$0xff] %v11126_v21  ;;  %v11128_v18 = vpop.f32.mrf.mxu0  ;;  %9742 = vmatmul.mubr.f32.gmra.mxu0 %v1445_v23  ;;  %9568 = vmatprep.mubr.f32.mxu1 %v132_v28  ;;  %v1449_v23 = vld [vmem:[#allocation2 + $0x2ca] sm:$0xff] }
 0x148   :  { %v11130_v36 = vpop.f32.mrf.mxu1  ;;  %9744 = vmatprep.mubr.f32.mxu0 %v1446_v37  ;;  %v136_v28 = vld [vmem:[#allocation2 + $0x2d0] sm:$0xff] }
 0x149   :  { %14508 = vst [vmem:[#allocation48_spill] sm:$0xff] %v11130_v36  ;;  %v11132_v52 = vpop.f32.mrf.mxu0  ;;  %v1450_v37 = vld [vmem:[#allocation2 + $0x2d2] sm:$0xff] }
 0x14a   :  { %v11134_v13 = vpop.f32.mrf.mxu1  ;;  %9569 = vmatmul.mubr.f32.gmra.mxu1 %v133_v50  ;;  %v137_v50 = vld [vmem:[#allocation2 + $0x2d8] sm:$0xff] }
 0x14b   :  { %14509 = vst [vmem:[#allocation49_spill] sm:$0xff] %v11134_v13  ;;  %v11136_v10 = vpop.f32.mrf.mxu0  ;;  %9745 = vmatmul.mubr.f32.gmra.mxu0 %v1447_v56  ;;  %9571 = vmatprep.mubr.f32.mxu1 %v134_v62  ;;  %v1451_v56 = vld [vmem:[#allocation2 + $0x2da] sm:$0xff] }
 0x14c   :  { %v11138_v21 = vpop.f32.mrf.mxu1  ;;  %9747 = vmatprep.mubr.f32.mxu0 %v1448_v7  ;;  %v138_v62 = vld [vmem:[#allocation2 + $0x2e0] sm:$0xff] }
 0x14d   :  { %14510 = vst [vmem:[#allocation50_spill] sm:$0xff] %v11138_v21  ;;  %v11140_v36 = vpop.f32.mrf.mxu0  ;;  %v1452_v7 = vld [vmem:[#allocation2 + $0x2e2] sm:$0xff] }
 0x14e   :  { %v11142_v5 = vpop.f32.mrf.mxu1  ;;  %9572 = vmatmul.mubr.f32.gmra.mxu1 %v135_v20  ;;  %v139_v20 = vld [vmem:[#allocation2 + $0x2e8] sm:$0xff] }
 0x14f   :  { %14511 = vst [vmem:[#allocation51_spill] sm:$0xff] %v11142_v5  ;;  %v11144_v2 = vpop.f32.mrf.mxu0  ;;  %9748 = vmatmul.mubr.f32.gmra.mxu0 %v1449_v23  ;;  %9574 = vmatprep.mubr.f32.mxu1 %v136_v28  ;;  %v1453_v23 = vld [vmem:[#allocation2 + $0x2ea] sm:$0xff] }
 0x150   :  { %v11146_v13 = vpop.f32.mrf.mxu1  ;;  %9750 = vmatprep.mubr.f32.mxu0 %v1450_v37  ;;  %v140_v28 = vld [vmem:[#allocation2 + $0x2f0] sm:$0xff] }
 0x151   :  { %14512 = vst [vmem:[#allocation52_spill] sm:$0xff] %v11146_v13  ;;  %v11148_v21 = vpop.f32.mrf.mxu0  ;;  %v1454_v37 = vld [vmem:[#allocation2 + $0x2f2] sm:$0xff] }
 0x152   :  { %v11150_v61 = vpop.f32.mrf.mxu1  ;;  %9575 = vmatmul.mubr.f32.gmra.mxu1 %v137_v50  ;;  %v141_v50 = vld [vmem:[#allocation2 + $0x2f8] sm:$0xff] }
 0x153   :  { %14513 = vst [vmem:[#allocation53_spill] sm:$0xff] %v11150_v61  ;;  %v11152_v57 = vpop.f32.mrf.mxu0  ;;  %9751 = vmatmul.mubr.f32.gmra.mxu0 %v1451_v56  ;;  %9577 = vmatprep.mubr.f32.mxu1 %v138_v62  ;;  %v1455_v56 = vld [vmem:[#allocation2 + $0x2fa] sm:$0xff]  ;;  %v2113_v62 = vld [vmem:[#allocation2 + $0x12] sm:$0xff] }
 0x154   :  { %v11154_v5 = vpop.f32.mrf.mxu1  ;;  %9753 = vmatprep.mubr.f32.mxu0 %v1452_v7  ;;  %v2866_v7 = vld [vmem:[#allocation2 + $0x13] sm:$0xff] }
 0x155   :  { %14514 = vst [vmem:[#allocation54_spill] sm:$0xff] %v11154_v5  ;;  %v11156_v13 = vpop.f32.mrf.mxu0 }
 0x156   :  { %v11158_v51 = vpop.f32.mrf.mxu1  ;;  %9578 = vmatmul.mubr.f32.gmra.mxu1 %v139_v20  ;;  %v2114_v20 = vld [vmem:[#allocation2 + $0x1a] sm:$0xff] }
 0x157   :  { %14515 = vst [vmem:[#allocation55_spill] sm:$0xff] %v11158_v51  ;;  %v11160_v48 = vpop.f32.mrf.mxu0  ;;  %9754 = vmatmul.mubr.f32.gmra.mxu0 %v1453_v23  ;;  %9580 = vmatprep.mubr.f32.mxu1 %v140_v28  ;;  %v2867_v23 = vld [vmem:[#allocation2 + $0x1b] sm:$0xff] }
 0x158   :  { %v11162_v61 = vpop.f32.mrf.mxu1  ;;  %9756 = vmatprep.mubr.f32.mxu0 %v1454_v37  ;;  %v2115_v37 = vld [vmem:[#allocation2 + $0x22] sm:$0xff] }
 0x159   :  { %14516 = vst [vmem:[#allocation56_spill] sm:$0xff] %v11162_v61  ;;  %v11164_v5 = vpop.f32.mrf.mxu0 }
 0x15a   :  { %14517 = vst [vmem:[#allocation57_spill] sm:$0xff] %v11164_v5  ;;  %v11166_v43 = vpop.f32.mrf.mxu1  ;;  %9581 = vmatmul.mubr.f32.gmra.mxu1 %v141_v50  ;;  %v2116_v50 = vld [vmem:[#allocation2 + $0x2a] sm:$0xff] }
 0x15b   :  { %14518 = vst [vmem:[#allocation58_spill] sm:$0xff] %v11166_v43  ;;  %v11168_v40 = vpop.f32.mrf.mxu0  ;;  %9757 = vmatmul.mubr.f32.gmra.mxu0 %v1455_v56  ;;  %9791 = vmatprep.mubr.f32.mxu1 %v2113_v62  ;;  %v4482_v56 = vld [vmem:[#allocation5 + $0x370] sm:$0xff]  ;;  %v2872_v5 = vld [vmem:[#allocation2 + $0x43] sm:$0xff] }
 0x15c   :  { %14519 = vst [vmem:[#allocation59_spill] sm:$0xff] %v11168_v40  ;;  %v11170_v51 = vpop.f32.mrf.mxu1  ;;  %9967 = vmatprep.mubr.f32.mxu0 %v2866_v7  ;;  %v2869_v7 = vld [vmem:[#allocation2 + $0x2b] sm:$0xff]  ;;  %v2870_v40 = vld [vmem:[#allocation2 + $0x33] sm:$0xff] }
 0x15d   :  { %14520 = vst [vmem:[#allocation60_spill] sm:$0xff] %v11170_v51  ;;  %v11172_v28 = vpop.f32.mrf.mxu0  ;;  %v2117_v51 = vld [vmem:[#allocation2 + $0x32] sm:$0xff] }
 0x15e   :  { %14521 = vst [vmem:[#allocation61_spill] sm:$0xff] %v11172_v28  ;;  %v9441_v61 = vpop.f32.mrf.mxu1  ;;  %9792 = vmatmul.mubr.f32.vlgmr.msra.gmra.mxu1 %v2114_v20 }
 0x15f   :  { %v887_v27 = vadd.f32 %v9441_v61, %v10984_v25  ;;  %v9617_v43 = vpop.f32.mrf.mxu0  ;;  %9968 = vmatmul.mubr.f32.vlgmr.msra.gmra.mxu0 %v2867_v23  ;;  %10112 = vmatpush3.msra.mxu1 %v10976_v55  ;;  %v3728_v55 = vld [vmem:[#allocation5 + $0x2e8] sm:$0xff] }
 0x160   :  { %v881_v62 = vpop.f32.mrf.mxu1  ;;  %9794 = vmatprep.mubr.f32.mxu1 %v2115_v37  ;;  %10288 = vmatpush3.msra.mxu0 %v10979_v59  ;;  %v2118_v59 = vld [vmem:[#allocation2 + $0x3a] sm:$0xff] }
 0x161   :  { %v11177_v24 = vadd.f32 %v9617_v43, %v887_v27  ;;  %v882_v20 = vadd.f32 %v881_v62, %v10988_v30  ;;  %v1538_v28 = vpop.f32.mrf.mxu0  ;;  %9970 = vmatprep.mubr.f32.mxu0 %v2868_v35  ;;  %10113 = vmatprep.subr.mxu1 %v3729_v32  ;;  %v4481_v27 = vld [vmem:[#allocation5 + $0x368] sm:$0xff]  ;;  %v2871_v30 = vld [vmem:[#allocation2 + $0x3b] sm:$0xff] }
 0x162   :  { %v9444_v25 = vpop.f32.mrf.mxu1  ;;  %9795 = vmatmul.mubr.f32.gmra.mxu1 %v2116_v50  ;;  %10289 = vmatprep.subr.mxu0 %v4482_v56  ;;  %v2119_v62 = vld [vmem:[#allocation2 + $0x42] sm:$0xff] }
 0x163   :  { %14522 = vst [vmem:[#allocation62_spill] sm:$0xff] %v11177_v24  ;;  %v11180_v61 = vadd.f32 %v1538_v28, %v882_v20  ;;  %v897_v23 = vadd.f32 %v9444_v25, %v10992_v33  ;;  %v9620_v37 = vpop.f32.mrf.mxu0  ;;  %9971 = vmatmul.mubr.f32.gmra.mxu0 %v2869_v7  ;;  %9797 = vmatprep.mubr.f32.mxu1 %v2117_v51  ;;  %v3727_v33 = vld [vmem:[#allocation5 + $0x2e0] sm:$0xff] }
 0x164   :  { %v891_v43 = vpop.f32.mrf.mxu1  ;;  %9973 = vmatprep.mubr.f32.mxu0 %v2870_v40  ;;  %10114 = vmatpush3.msra.mxu1 %v3729_v32  ;;  %v2120_v32 = vld [vmem:[#allocation2 + $0x4a] sm:$0xff] }
 0x165   :  { %v11183_v35 = vadd.f32 %v9620_v37, %v897_v23  ;;  %v892_v50 = vadd.f32 %v891_v43, %v10996_v38  ;;  %v1548_v24 = vpop.f32.mrf.mxu0  ;;  %10290 = vmatpush3.msra.mxu0 %v4482_v56  ;;  %10115 = vmatprep.subr.mxu1 %v3728_v55  ;;  %v4480_v20 = vld [vmem:[#allocation5 + $0x360] sm:$0xff]  ;;  %v2121_v23 = vld [vmem:[#allocation2 + $0x52] sm:$0xff] }
 0x166   :  { %v9447_v28 = vpop.f32.mrf.mxu1  ;;  %9798 = vmatmul.mubr.f32.gmra.mxu1 %v2118_v59  ;;  %10291 = vmatprep.subr.mxu0 %v4481_v27  ;;  %v2873_v38 = vld [vmem:[#allocation2 + $0x4b] sm:$0xff]  ;;  %v2874_v43 = vld [vmem:[#allocation2 + $0x53] sm:$0xff] }
 0x167   :  { %v11186_v51 = vadd.f32 %v1548_v24, %v892_v50  ;;  %v907_v7 = vadd.f32 %v9447_v28, %v11000_v41  ;;  %v9623_v40 = vpop.f32.mrf.mxu0  ;;  %9974 = vmatmul.mubr.f32.gmra.mxu0 %v2871_v30  ;;  %9800 = vmatprep.mubr.f32.mxu1 %v2119_v62  ;;  %v3726_v41 = vld [vmem:[#allocation5 + $0x2d8] sm:$0xff] }
 0x168   :  { %v901_v25 = vpop.f32.mrf.mxu1  ;;  %9976 = vmatprep.mubr.f32.mxu0 %v2872_v5  ;;  %10116 = vmatpush3.msra.mxu1 %v3728_v55  ;;  %v2122_v55 = vld [vmem:[#allocation2 + $0x5a] sm:$0xff] }
 0x169   :  { %v11189_v56 = vadd.f32 %v9623_v40, %v907_v7  ;;  %v902_v37 = vadd.f32 %v901_v25, %v11004_v46  ;;  %v1558_v59 = vpop.f32.mrf.mxu0  ;;  %10292 = vmatpush3.msra.mxu0 %v4481_v27  ;;  %10117 = vmatprep.subr.mxu1 %v3727_v33  ;;  %v4479_v50 = vld [vmem:[#allocation5 + $0x358] sm:$0xff] }
 0x16a   :  { %v9450_v24 = vpop.f32.mrf.mxu1  ;;  %9801 = vmatmul.mubr.f32.gmra.mxu1 %v2120_v32  ;;  %10293 = vmatprep.subr.mxu0 %v4480_v20  ;;  %v2875_v46 = vld [vmem:[#allocation2 + $0x5b] sm:$0xff]  ;;  %v2876_v25 = vld [vmem:[#allocation2 + $0x63] sm:$0xff] }
 0x16b   :  { %v11192_v30 = vadd.f32 %v1558_v59, %v902_v37  ;;  %v917_v62 = vadd.f32 %v9450_v24, %v11008_v49  ;;  %v9626_v5 = vpop.f32.mrf.mxu0  ;;  %9977 = vmatmul.mubr.f32.gmra.mxu0 %v2873_v38  ;;  %9803 = vmatprep.mubr.f32.mxu1 %v2121_v23  ;;  %v2123_v7 = vld [vmem:[#allocation2 + $0x62] sm:$0xff]  ;;  %v3725_v49 = vld [vmem:[#allocation5 + $0x2d0] sm:$0xff] }
 0x16c   :  { %v911_v28 = vpop.f32.mrf.mxu1  ;;  %9979 = vmatprep.mubr.f32.mxu0 %v2874_v43  ;;  %10118 = vmatpush3.msra.mxu1 %v3727_v33  ;;  %v2124_v33 = vld [vmem:[#allocation2 + $0x6a] sm:$0xff]  ;;  %v4478_v43 = vld [vmem:[#allocation5 + $0x350] sm:$0xff] }
 0x16d   :  { %v11195_v27 = vadd.f32 %v9626_v5, %v917_v62  ;;  %v912_v40 = vadd.f32 %v911_v28, %v11012_v54  ;;  %v1568_v32 = vpop.f32.mrf.mxu0  ;;  %10294 = vmatpush3.msra.mxu0 %v4480_v20  ;;  %10119 = vmatprep.subr.mxu1 %v3726_v41  ;;  %v2877_v54 = vld [vmem:[#allocation2 + $0x6b] sm:$0xff]  ;;  %v2878_v28 = vld [vmem:[#allocation2 + $0x73] sm:$0xff] }
 0x16e   :  { %v9453_v37 = vpop.f32.mrf.mxu1  ;;  %9804 = vmatmul.mubr.f32.gmra.mxu1 %v2122_v55  ;;  %10295 = vmatprep.subr.mxu0 %v4479_v50  ;;  %v2125_v62 = vld [vmem:[#allocation2 + $0x72] sm:$0xff] }
 0x16f   :  { %v11198_v38 = vadd.f32 %v1568_v32, %v912_v40  ;;  %v927_v23 = vadd.f32 %v9453_v37, %v11016_v58  ;;  %v9629_v59 = vpop.f32.mrf.mxu0  ;;  %9980 = vmatmul.mubr.f32.gmra.mxu0 %v2875_v46  ;;  %9806 = vmatprep.mubr.f32.mxu1 %v2123_v7  ;;  %v3724_v58 = vld [vmem:[#allocation5 + $0x2c8] sm:$0xff] }
 0x170   :  { %v921_v24 = vpop.f32.mrf.mxu1  ;;  %9982 = vmatprep.mubr.f32.mxu0 %v2876_v25  ;;  %10120 = vmatpush3.msra.mxu1 %v3726_v41  ;;  %v2126_v41 = vld [vmem:[#allocation2 + $0x7a] sm:$0xff]  ;;  %v4477_v25 = vld [vmem:[#allocation5 + $0x348] sm:$0xff] }
 0x171   :  { %v11201_v20 = vadd.f32 %v9629_v59, %v927_v23  ;;  %v922_v5 = vadd.f32 %v921_v24, %v11020_v0  ;;  %v1578_v55 = vpop.f32.mrf.mxu0  ;;  %10296 = vmatpush3.msra.mxu0 %v4479_v50  ;;  %10121 = vmatprep.subr.mxu1 %v3725_v49  ;;  %v2879_v0 = vld [vmem:[#allocation2 + $0x7b] sm:$0xff]  ;;  %v2880_v24 = vld [vmem:[#allocation2 + $0x83] sm:$0xff] }
 0x172   :  { %v9456_v40 = vpop.f32.mrf.mxu1  ;;  %9807 = vmatmul.mubr.f32.gmra.mxu1 %v2124_v33  ;;  %10297 = vmatprep.subr.mxu0 %v4478_v43  ;;  %v2127_v23 = vld [vmem:[#allocation2 + $0x82] sm:$0xff] }
 0x173   :  { %v11204_v46 = vadd.f32 %v1578_v55, %v922_v5  ;;  %v937_v7 = vadd.f32 %v9456_v40, %v11024_v3  ;;  %v9632_v32 = vpop.f32.mrf.mxu0  ;;  %9983 = vmatmul.mubr.f32.gmra.mxu0 %v2877_v54  ;;  %9809 = vmatprep.mubr.f32.mxu1 %v2125_v62  ;;  %v3723_v3 = vld [vmem:[#allocation5 + $0x2c0] sm:$0xff] }
 0x174   :  { %v931_v37 = vpop.f32.mrf.mxu1  ;;  %9985 = vmatprep.mubr.f32.mxu0 %v2878_v28  ;;  %10122 = vmatpush3.msra.mxu1 %v3725_v49  ;;  %v2128_v49 = vld [vmem:[#allocation2 + $0x8a] sm:$0xff] }
 0x175   :  { %v11207_v50 = vadd.f32 %v9632_v32, %v937_v7  ;;  %v932_v59 = vadd.f32 %v931_v37, %v11028_v8  ;;  %v1588_v33 = vpop.f32.mrf.mxu0  ;;  %10298 = vmatpush3.msra.mxu0 %v4478_v43  ;;  %10123 = vmatprep.subr.mxu1 %v3724_v58  ;;  %v4476_v28 = vld [vmem:[#allocation5 + $0x340] sm:$0xff]  ;;  %v2129_v7 = vld [vmem:[#allocation2 + $0x92] sm:$0xff] }
 0x176   :  { %v9459_v5 = vpop.f32.mrf.mxu1  ;;  %9810 = vmatmul.mubr.f32.gmra.mxu1 %v2126_v41  ;;  %10299 = vmatprep.subr.mxu0 %v4477_v25  ;;  %v2881_v8 = vld [vmem:[#allocation2 + $0x8b] sm:$0xff]  ;;  %v2882_v37 = vld [vmem:[#allocation2 + $0x93] sm:$0xff] }
 0x177   :  { %v11210_v54 = vadd.f32 %v1588_v33, %v932_v59  ;;  %v947_v62 = vadd.f32 %v9459_v5, %v11032_v11  ;;  %v9635_v55 = vpop.f32.mrf.mxu0  ;;  %9986 = vmatmul.mubr.f32.gmra.mxu0 %v2879_v0  ;;  %9812 = vmatprep.mubr.f32.mxu1 %v2127_v23  ;;  %v3722_v11 = vld [vmem:[#allocation5 + $0x2b8] sm:$0xff] }
 0x178   :  { %v941_v40 = vpop.f32.mrf.mxu1  ;;  %9988 = vmatprep.mubr.f32.mxu0 %v2880_v24  ;;  %10124 = vmatpush3.msra.mxu1 %v3724_v58  ;;  %v2130_v58 = vld [vmem:[#allocation2 + $0x9a] sm:$0xff] }
 0x179   :  { %v11213_v43 = vadd.f32 %v9635_v55, %v947_v62  ;;  %v942_v32 = vadd.f32 %v941_v40, %v11036_v16  ;;  %v1598_v41 = vpop.f32.mrf.mxu0  ;;  %10300 = vmatpush3.msra.mxu0 %v4477_v25  ;;  %10125 = vmatprep.subr.mxu1 %v3723_v3  ;;  %v4475_v24 = vld [vmem:[#allocation5 + $0x338] sm:$0xff] }
 0x17a   :  { %v9462_v59 = vpop.f32.mrf.mxu1  ;;  %9813 = vmatmul.mubr.f32.gmra.mxu1 %v2128_v49  ;;  %10301 = vmatprep.subr.mxu0 %v4476_v28  ;;  %v2883_v16 = vld [vmem:[#allocation2 + $0x9b] sm:$0xff]  ;;  %v2884_v40 = vld [vmem:[#allocation2 + $0xa3] sm:$0xff] }
 0x17b   :  { %v11216_v0 = vadd.f32 %v1598_v41, %v942_v32  ;;  %v957_v23 = vadd.f32 %v9462_v59, %v11040_v19  ;;  %v9638_v33 = vpop.f32.mrf.mxu0  ;;  %9989 = vmatmul.mubr.f32.gmra.mxu0 %v2881_v8  ;;  %9815 = vmatprep.mubr.f32.mxu1 %v2129_v7  ;;  %v2131_v62 = vld [vmem:[#allocation2 + $0xa2] sm:$0xff]  ;;  %v3721_v19 = vld [vmem:[#allocation5 + $0x2b0] sm:$0xff] }
 0x17c   :  { %v951_v5 = vpop.f32.mrf.mxu1  ;;  %9991 = vmatprep.mubr.f32.mxu0 %v2882_v37  ;;  %10126 = vmatpush3.msra.mxu1 %v3723_v3  ;;  %v2132_v3 = vld [vmem:[#allocation2 + $0xaa] sm:$0xff]  ;;  %v4474_v37 = vld [vmem:[#allocation5 + $0x330] sm:$0xff] }
 0x17d   :  { %v11219_v25 = vadd.f32 %v9638_v33, %v957_v23  ;;  %v952_v55 = vadd.f32 %v951_v5, %v11044_v26  ;;  %v1608_v49 = vpop.f32.mrf.mxu0  ;;  %10302 = vmatpush3.msra.mxu0 %v4476_v28  ;;  %10127 = vmatprep.subr.mxu1 %v3722_v11  ;;  %v2885_v26 = vld [vmem:[#allocation2 + $0xab] sm:$0xff]  ;;  %v2886_v5 = vld [vmem:[#allocation2 + $0xb3] sm:$0xff] }
 0x17e   :  { %v9465_v32 = vpop.f32.mrf.mxu1  ;;  %9816 = vmatmul.mubr.f32.gmra.mxu1 %v2130_v58  ;;  %10303 = vmatprep.subr.mxu0 %v4475_v24  ;;  %v2133_v23 = vld [vmem:[#allocation2 + $0xb2] sm:$0xff] }
 0x17f   :  { %v11222_v8 = vadd.f32 %v1608_v49, %v952_v55  ;;  %v967_v7 = vadd.f32 %v9465_v32, %v11048_v31  ;;  %v9641_v41 = vpop.f32.mrf.mxu0  ;;  %9992 = vmatmul.mubr.f32.gmra.mxu0 %v2883_v16  ;;  %9818 = vmatprep.mubr.f32.mxu1 %v2131_v62  ;;  %v3720_v31 = vld [vmem:[#allocation5 + $0x2a8] sm:$0xff] }
 0x180   :  { %v961_v59 = vpop.f32.mrf.mxu1  ;;  %9994 = vmatprep.mubr.f32.mxu0 %v2884_v40  ;;  %10128 = vmatpush3.msra.mxu1 %v3722_v11  ;;  %v2134_v11 = vld [vmem:[#allocation2 + $0xba] sm:$0xff]  ;;  %v4473_v40 = vld [vmem:[#allocation5 + $0x328] sm:$0xff] }
 0x181   :  { %v11225_v28 = vadd.f32 %v9641_v41, %v967_v7  ;;  %v962_v33 = vadd.f32 %v961_v59, %v11052_v42  ;;  %v1618_v58 = vpop.f32.mrf.mxu0  ;;  %10304 = vmatpush3.msra.mxu0 %v4475_v24  ;;  %10129 = vmatprep.subr.mxu1 %v3721_v19  ;;  %v2887_v42 = vld [vmem:[#allocation2 + $0xbb] sm:$0xff]  ;;  %v2888_v59 = vld [vmem:[#allocation2 + $0xc3] sm:$0xff] }
 0x182   :  { %v9468_v55 = vpop.f32.mrf.mxu1  ;;  %9819 = vmatmul.mubr.f32.gmra.mxu1 %v2132_v3  ;;  %10305 = vmatprep.subr.mxu0 %v4474_v37  ;;  %v2135_v7 = vld [vmem:[#allocation2 + $0xc2] sm:$0xff] }
 0x183   :  { %v11228_v16 = vadd.f32 %v1618_v58, %v962_v33  ;;  %v977_v62 = vadd.f32 %v9468_v55, %v11056_v47  ;;  %v9644_v49 = vpop.f32.mrf.mxu0  ;;  %9995 = vmatmul.mubr.f32.gmra.mxu0 %v2885_v26  ;;  %9821 = vmatprep.mubr.f32.mxu1 %v2133_v23  ;;  %v3719_v47 = vld [vmem:[#allocation5 + $0x2a0] sm:$0xff] }
 0x184   :  { %v971_v32 = vpop.f32.mrf.mxu1  ;;  %9997 = vmatprep.mubr.f32.mxu0 %v2886_v5  ;;  %10130 = vmatpush3.msra.mxu1 %v3721_v19  ;;  %v2136_v19 = vld [vmem:[#allocation2 + $0xca] sm:$0xff] }
 0x185   :  { %v11231_v24 = vadd.f32 %v9644_v49, %v977_v62  ;;  %v972_v41 = vadd.f32 %v971_v32, %v11060_v60  ;;  %v1628_v3 = vpop.f32.mrf.mxu0  ;;  %10306 = vmatpush3.msra.mxu0 %v4474_v37  ;;  %10131 = vmatprep.subr.mxu1 %v3720_v31  ;;  %v4472_v5 = vld [vmem:[#allocation5 + $0x320] sm:$0xff]  ;;  %v2137_v62 = vld [vmem:[#allocation2 + $0xd2] sm:$0xff] }
 0x186   :  { %v9471_v33 = vpop.f32.mrf.mxu1  ;;  %9822 = vmatmul.mubr.f32.gmra.mxu1 %v2134_v11  ;;  %10307 = vmatprep.subr.mxu0 %v4473_v40  ;;  %v2889_v60 = vld [vmem:[#allocation2 + $0xcb] sm:$0xff]  ;;  %v2890_v32 = vld [vmem:[#allocation2 + $0xd3] sm:$0xff] }
 0x187   :  { %v11234_v26 = vadd.f32 %v1628_v3, %v972_v41  ;;  %v987_v23 = vadd.f32 %v9471_v33, %v11064_v1  ;;  %v9647_v58 = vpop.f32.mrf.mxu0  ;;  %9998 = vmatmul.mubr.f32.gmra.mxu0 %v2887_v42  ;;  %9824 = vmatprep.mubr.f32.mxu1 %v2135_v7  ;;  %v3718_v1 = vld [vmem:[#allocation5 + $0x298] sm:$0xff] }
 0x188   :  { %v981_v55 = vpop.f32.mrf.mxu1  ;;  %10000 = vmatprep.mubr.f32.mxu0 %v2888_v59  ;;  %10132 = vmatpush3.msra.mxu1 %v3720_v31  ;;  %v2138_v31 = vld [vmem:[#allocation2 + $0xda] sm:$0xff] }
 0x189   :  { %v11237_v37 = vadd.f32 %v9647_v58, %v987_v23  ;;  %v982_v49 = vadd.f32 %v981_v55, %v11068_v12  ;;  %v1638_v11 = vpop.f32.mrf.mxu0  ;;  %10308 = vmatpush3.msra.mxu0 %v4473_v40  ;;  %10133 = vmatprep.subr.mxu1 %v3719_v47  ;;  %v4471_v59 = vld [vmem:[#allocation5 + $0x318] sm:$0xff] }
 0x18a   :  { %v9474_v41 = vpop.f32.mrf.mxu1  ;;  %9825 = vmatmul.mubr.f32.gmra.mxu1 %v2136_v19  ;;  %10309 = vmatprep.subr.mxu0 %v4472_v5  ;;  %v2891_v12 = vld [vmem:[#allocation2 + $0xdb] sm:$0xff]  ;;  %v2892_v55 = vld [vmem:[#allocation2 + $0xe3] sm:$0xff] }
 0x18b   :  { %v11240_v42 = vadd.f32 %v1638_v11, %v982_v49  ;;  %v997_v7 = vadd.f32 %v9474_v41, %v11072_v17  ;;  %v9650_v3 = vpop.f32.mrf.mxu0  ;;  %10001 = vmatmul.mubr.f32.gmra.mxu0 %v2889_v60  ;;  %9827 = vmatprep.mubr.f32.mxu1 %v2137_v62  ;;  %v2139_v23 = vld [vmem:[#allocation2 + $0xe2] sm:$0xff]  ;;  %v3717_v17 = vld [vmem:[#allocation5 + $0x290] sm:$0xff] }
 0x18c   :  { %v991_v33 = vpop.f32.mrf.mxu1  ;;  %10003 = vmatprep.mubr.f32.mxu0 %v2890_v32  ;;  %10134 = vmatpush3.msra.mxu1 %v3719_v47  ;;  %v2140_v47 = vld [vmem:[#allocation2 + $0xea] sm:$0xff]  ;;  %v4470_v32 = vld [vmem:[#allocation5 + $0x310] sm:$0xff] }
 0x18d   :  { %v11243_v40 = vadd.f32 %v9650_v3, %v997_v7  ;;  %v992_v58 = vadd.f32 %v991_v33, %v11076_v34  ;;  %v1648_v19 = vpop.f32.mrf.mxu0  ;;  %10310 = vmatpush3.msra.mxu0 %v4472_v5  ;;  %10135 = vmatprep.subr.mxu1 %v3718_v1  ;;  %v2893_v34 = vld [vmem:[#allocation2 + $0xeb] sm:$0xff]  ;;  %v2894_v33 = vld [vmem:[#allocation2 + $0xf3] sm:$0xff] }
 0x18e   :  { %v9477_v49 = vpop.f32.mrf.mxu1  ;;  %9828 = vmatmul.mubr.f32.gmra.mxu1 %v2138_v31  ;;  %10311 = vmatprep.subr.mxu0 %v4471_v59  ;;  %v2141_v7 = vld [vmem:[#allocation2 + $0xf2] sm:$0xff] }
 0x18f   :  { %v11246_v60 = vadd.f32 %v1648_v19, %v992_v58  ;;  %v1007_v62 = vadd.f32 %v9477_v49, %v11080_v44  ;;  %v9653_v11 = vpop.f32.mrf.mxu0  ;;  %10004 = vmatmul.mubr.f32.gmra.mxu0 %v2891_v12  ;;  %9830 = vmatprep.mubr.f32.mxu1 %v2139_v23  ;;  %v3716_v44 = vld [vmem:[#allocation5 + $0x288] sm:$0xff] }
 0x190   :  { %v1001_v41 = vpop.f32.mrf.mxu1  ;;  %10006 = vmatprep.mubr.f32.mxu0 %v2892_v55  ;;  %10136 = vmatpush3.msra.mxu1 %v3718_v1  ;;  %v2142_v1 = vld [vmem:[#allocation2 + $0xfa] sm:$0xff]  ;;  %v4469_v55 = vld [vmem:[#allocation5 + $0x308] sm:$0xff] }
 0x191   :  { %v11249_v5 = vadd.f32 %v9653_v11, %v1007_v62  ;;  %v1002_v3 = vadd.f32 %v1001_v41, %v11084_v4  ;;  %v1658_v31 = vpop.f32.mrf.mxu0  ;;  %10312 = vmatpush3.msra.mxu0 %v4471_v59  ;;  %10137 = vmatprep.subr.mxu1 %v3717_v17  ;;  %v2895_v4 = vld [vmem:[#allocation2 + $0xfb] sm:$0xff]  ;;  %v2896_v41 = vld [vmem:[#allocation2 + $0x103] sm:$0xff] }
 0x192   :  { %v9480_v58 = vpop.f32.mrf.mxu1  ;;  %9831 = vmatmul.mubr.f32.gmra.mxu1 %v2140_v47  ;;  %10313 = vmatprep.subr.mxu0 %v4470_v32  ;;  %v2143_v62 = vld [vmem:[#allocation2 + $0x102] sm:$0xff] }
 0x193   :  { %v11252_v12 = vadd.f32 %v1658_v31, %v1002_v3  ;;  %v1017_v23 = vadd.f32 %v9480_v58, %v11088_v14  ;;  %v9656_v19 = vpop.f32.mrf.mxu0  ;;  %10007 = vmatmul.mubr.f32.gmra.mxu0 %v2893_v34  ;;  %9833 = vmatprep.mubr.f32.mxu1 %v2141_v7  ;;  %v3715_v14 = vld [vmem:[#allocation5 + $0x280] sm:$0xff] }
 0x194   :  { %v1011_v49 = vpop.f32.mrf.mxu1  ;;  %10009 = vmatprep.mubr.f32.mxu0 %v2894_v33  ;;  %10138 = vmatpush3.msra.mxu1 %v3717_v17  ;;  %v2144_v17 = vld [vmem:[#allocation2 + $0x10a] sm:$0xff] }
 0x195   :  { %v11255_v59 = vadd.f32 %v9656_v19, %v1017_v23  ;;  %v1012_v11 = vadd.f32 %v1011_v49, %v11092_v53  ;;  %v1668_v47 = vpop.f32.mrf.mxu0  ;;  %10314 = vmatpush3.msra.mxu0 %v4470_v32  ;;  %10139 = vmatprep.subr.mxu1 %v3716_v44  ;;  %v4468_v33 = vld [vmem:[#allocation5 + $0x300] sm:$0xff]  ;;  %v2145_v23 = vld [vmem:[#allocation2 + $0x112] sm:$0xff] }
 0x196   :  { %v9483_v3 = vpop.f32.mrf.mxu1  ;;  %9834 = vmatmul.mubr.f32.gmra.mxu1 %v2142_v1  ;;  %10315 = vmatprep.subr.mxu0 %v4469_v55  ;;  %v2897_v53 = vld [vmem:[#allocation2 + $0x10b] sm:$0xff]  ;;  %v2898_v49 = vld [vmem:[#allocation2 + $0x113] sm:$0xff] }
 0x197   :  { %v11258_v34 = vadd.f32 %v1668_v47, %v1012_v11  ;;  %v1027_v7 = vadd.f32 %v9483_v3, %v11096_v15  ;;  %v9659_v31 = vpop.f32.mrf.mxu0  ;;  %10010 = vmatmul.mubr.f32.gmra.mxu0 %v2895_v4  ;;  %9836 = vmatprep.mubr.f32.mxu1 %v2143_v62  ;;  %v2146_v47 = vld [vmem:[#allocation2 + $0x11a] sm:$0xff]  ;;  %v2147_v3 = vld [vmem:[#allocation2 + $0x122] sm:$0xff] }
 0x198   :  { %v1021_v58 = vpop.f32.mrf.mxu1  ;;  %10012 = vmatprep.mubr.f32.mxu0 %v2896_v41  ;;  %10140 = vmatpush3.msra.mxu1 %v3716_v44  ;;  %v2899_v41 = vld [vmem:[#allocation2 + $0x11b] sm:$0xff] }
 0x199   :  { %v11261_v32 = vadd.f32 %v9659_v31, %v1027_v7  ;;  %v1022_v19 = vadd.f32 %v1021_v58, %v11100_v39  ;;  %v1678_v1 = vpop.f32.mrf.mxu0  ;;  %10316 = vmatpush3.msra.mxu0 %v4469_v55  ;;  %10141 = vmatprep.subr.mxu1 %v3715_v14  ;;  %v2900_v31 = vld [vmem:[#allocation2 + $0x123] sm:$0xff] }
 0x19a   :  { %v9486_v11 = vpop.f32.mrf.mxu1  ;;  %9837 = vmatmul.mubr.f32.gmra.mxu1 %v2144_v17  ;;  %10317 = vmatprep.subr.mxu0 %v4468_v33 }
 0x19b   :  { %v11264_v15 = vadd.f32 %v1678_v1, %v1022_v19  ;;  %v1037_v4 = vadd.f32 %v9486_v11, %v11104_v63  ;;  %v9662_v62 = vpop.f32.mrf.mxu0  ;;  %10013 = vmatmul.mubr.f32.gmra.mxu0 %v2897_v53  ;;  %9839 = vmatprep.mubr.f32.mxu1 %v2145_v23  ;;  %v2148_v23 = vld [vmem:[#allocation2 + $0x12a] sm:$0xff]  ;;  %v5236_v19 = vld [vmem:[#allocation5 + $0x3f8] sm:$0xff] }
 0x19c   :  { %v1031_v44 = vpop.f32.mrf.mxu1  ;;  %10015 = vmatprep.mubr.f32.mxu0 %v2898_v49  ;;  %10142 = vmatpush3.msra.mxu1 %v3715_v14  ;;  %v2901_v14 = vld [vmem:[#allocation2 + $0x12b] sm:$0xff] }
 0x19d   :  { %v11267_v39 = vadd.f32 %v9662_v62, %v1037_v4  ;;  %v1032_v55 = vadd.f32 %v1031_v44, %v11108_v9  ;;  %v1688_v7 = vpop.f32.mrf.mxu0  ;;  %10318 = vmatpush3.msra.mxu0 %v4468_v33  ;;  %v2149_v49 = vld [vmem:[#allocation2 + $0x132] sm:$0xff]  ;;  %10463 = vmatprep.subr.mxu1 %v5236_v19  ;;  %v5989_v62 = vld [vmem:[#allocation5 + $0x478] sm:$0xff] }
 0x19e   :  { %v9489_v17 = vpop.f32.mrf.mxu1  ;;  %9840 = vmatmul.mubr.f32.gmra.mxu1 %v2146_v47  ;;  %v2902_v4 = vld [vmem:[#allocation2 + $0x133] sm:$0xff]  ;;  %10639 = vmatprep.subr.mxu0 %v5989_v62 }
 0x19f   :  { %v11270_v58 = vadd.f32 %v1688_v7, %v1032_v55  ;;  %v1047_v63 = vadd.f32 %v9489_v17, %v11112_v45  ;;  %v9665_v53 = vpop.f32.mrf.mxu0  ;;  %10016 = vmatmul.mubr.f32.gmra.mxu0 %v2899_v41  ;;  %9842 = vmatprep.mubr.f32.mxu1 %v2147_v3  ;;  %v2150_v3 = vld [vmem:[#allocation2 + $0x13a] sm:$0xff] }
 0x1a0   :  { %v1041_v1 = vpop.f32.mrf.mxu1  ;;  %10018 = vmatprep.mubr.f32.mxu0 %v2900_v31  ;;  %v2903_v7 = vld [vmem:[#allocation2 + $0x13b] sm:$0xff] }
 0x1a1   :  { %v11273_v9 = vadd.f32 %v9665_v53, %v1047_v63  ;;  %v1042_v33 = vadd.f32 %v1041_v1, %v11116_v22  ;;  %v1698_v11 = vpop.f32.mrf.mxu0  ;;  %v2151_v31 = vld [vmem:[#allocation2 + $0x142] sm:$0xff] }
 0x1a2   :  { %v9492_v47 = vpop.f32.mrf.mxu1  ;;  %9843 = vmatmul.mubr.f32.gmra.mxu1 %v2148_v23  ;;  %v2904_v53 = vld [vmem:[#allocation2 + $0x143] sm:$0xff] }
 0x1a3   :  { %v11276_v45 = vadd.f32 %v1698_v11, %v1042_v33  ;;  %v1057_v44 = vadd.f32 %v9492_v47, %v11120_v29  ;;  %v9668_v41 = vpop.f32.mrf.mxu0  ;;  %10019 = vmatmul.mubr.f32.gmra.mxu0 %v2901_v14  ;;  %9845 = vmatprep.mubr.f32.mxu1 %v2149_v49  ;;  %v2152_v14 = vld [vmem:[#allocation2 + $0x14a] sm:$0xff]  ;;  %v2153_v11 = vld [vmem:[#allocation2 + $0x152] sm:$0xff] }
 0x1a4   :  { %v1051_v55 = vpop.f32.mrf.mxu1  ;;  %10021 = vmatprep.mubr.f32.mxu0 %v2902_v4  ;;  %v2905_v33 = vld [vmem:[#allocation2 + $0x14b] sm:$0xff]  ;;  %v2906_v47 = vld [vmem:[#allocation2 + $0x153] sm:$0xff] }
 0x1a5   :  { %v11279_v17 = vadd.f32 %v9668_v41, %v1057_v44  ;;  %v1052_v22 = vadd.f32 %v1051_v55, %v11124_v6  ;;  %v1708_v63 = vpop.f32.mrf.mxu0  ;;  %v2154_v55 = vld [vmem:[#allocation2 + $0x15a] sm:$0xff] }
 0x1a6   :  { %v9495_v23 = vpop.f32.mrf.mxu1  ;;  %9846 = vmatmul.mubr.f32.gmra.mxu1 %v2150_v3 }
 0x1a7   :  { %v11282_v19 = vadd.f32 %v1708_v63, %v1052_v22  ;;  %v1067_v29 = vadd.f32 %v9495_v23, %v11128_v18  ;;  %v9671_v1 = vpop.f32.mrf.mxu0  ;;  %10022 = vmatmul.mubr.f32.gmra.mxu0 %v2903_v7  ;;  %9848 = vmatprep.mubr.f32.mxu1 %v2151_v31  ;;  %v2907_v31 = vld [vmem:[#allocation2 + $0x15b] sm:$0xff]  ;;  %v2908_v23 = vld [vmem:[#allocation2 + $0x163] sm:$0xff] }
 0x1a8   :  { %v1061_v49 = vpop.f32.mrf.mxu1  ;;  %10024 = vmatprep.mubr.f32.mxu0 %v2904_v53  ;;  %v2155_v22 = vld [vmem:[#allocation2 + $0x162] sm:$0xff] }
 0x1a9   :  { %v11285_v4 = vadd.f32 %v9671_v1, %v1067_v29  ;;  %v1062_v6 = vadd.f32 %v1061_v49, %v11132_v52  ;;  %v1718_v62 = vpop.f32.mrf.mxu0  ;;  %v2156_v49 = vld [vmem:[#allocation2 + $0x16a] sm:$0xff] }
 0x1aa   :  { %v9498_v44 = vpop.f32.mrf.mxu1  ;;  %9849 = vmatmul.mubr.f32.gmra.mxu1 %v2152_v14 }
 0x1ab   :  { %v11288_v41 = vadd.f32 %v1718_v62, %v1062_v6  ;;  %v1077_v18 = vadd.f32 %v9498_v44, %v11136_v10  ;;  %v9674_v3 = vpop.f32.mrf.mxu0  ;;  %10025 = vmatmul.mubr.f32.gmra.mxu0 %v2905_v33  ;;  %9851 = vmatprep.mubr.f32.mxu1 %v2153_v11  ;;  %v2909_v11 = vld [vmem:[#allocation2 + $0x16b] sm:$0xff]  ;;  %v2910_v44 = vld [vmem:[#allocation2 + $0x173] sm:$0xff] }
 0x1ac   :  { %v1071_v7 = vpop.f32.mrf.mxu1  ;;  %10027 = vmatprep.mubr.f32.mxu0 %v2906_v47  ;;  %v2157_v6 = vld [vmem:[#allocation2 + $0x172] sm:$0xff] }
 0x1ad   :  { %v11291_v63 = vadd.f32 %v9674_v3, %v1077_v18  ;;  %v1072_v52 = vadd.f32 %v1071_v7, %v11140_v36  ;;  %v1728_v53 = vpop.f32.mrf.mxu0  ;;  %v2158_v7 = vld [vmem:[#allocation2 + $0x17a] sm:$0xff] }
 0x1ae   :  { %v9501_v29 = vpop.f32.mrf.mxu1  ;;  %9852 = vmatmul.mubr.f32.gmra.mxu1 %v2154_v55 }
 0x1af   :  { %v11294_v1 = vadd.f32 %v1728_v53, %v1072_v52  ;;  %v1087_v10 = vadd.f32 %v9501_v29, %v11144_v2  ;;  %v9677_v14 = vpop.f32.mrf.mxu0  ;;  %10028 = vmatmul.mubr.f32.gmra.mxu0 %v2907_v31  ;;  %9854 = vmatprep.mubr.f32.mxu1 %v2155_v22  ;;  %v2911_v22 = vld [vmem:[#allocation2 + $0x17b] sm:$0xff]  ;;  %v2912_v29 = vld [vmem:[#allocation2 + $0x183] sm:$0xff] }
 0x1b0   :  { %v1081_v33 = vpop.f32.mrf.mxu1  ;;  %10030 = vmatprep.mubr.f32.mxu0 %v2908_v23  ;;  %v2159_v52 = vld [vmem:[#allocation2 + $0x182] sm:$0xff] }
 0x1b1   :  { %v11297_v62 = vadd.f32 %v9677_v14, %v1087_v10  ;;  %v1082_v36 = vadd.f32 %v1081_v33, %v11148_v21  ;;  %v1738_v47 = vpop.f32.mrf.mxu0  ;;  %v2160_v33 = vld [vmem:[#allocation2 + $0x18a] sm:$0xff] }
 0x1b2   :  { %v9504_v18 = vpop.f32.mrf.mxu1  ;;  %9855 = vmatmul.mubr.f32.gmra.mxu1 %v2156_v49 }
 0x1b3   :  { %v11300_v3 = vadd.f32 %v1738_v47, %v1082_v36  ;;  %v1097_v2 = vadd.f32 %v9504_v18, %v11152_v57  ;;  %v9680_v55 = vpop.f32.mrf.mxu0  ;;  %10031 = vmatmul.mubr.f32.gmra.mxu0 %v2909_v11  ;;  %9857 = vmatprep.mubr.f32.mxu1 %v2157_v6  ;;  %v2913_v6 = vld [vmem:[#allocation2 + $0x18b] sm:$0xff] }
 0x1b4   :  { %v1091_v31 = vpop.f32.mrf.mxu1  ;;  %10033 = vmatprep.mubr.f32.mxu0 %v2910_v44  ;;  %v2161_v36 = vld [vmem:[#allocation2 + $0x192] sm:$0xff] }
 0x1b5   :  { %v11303_v53 = vadd.f32 %v9680_v55, %v1097_v2  ;;  %v1092_v21 = vadd.f32 %v1091_v31, %v11156_v13  ;;  %v1748_v23 = vpop.f32.mrf.mxu0  ;;  %v14524_v44 = vld [vmem:[#allocation57_spill] sm:$0xff]  ;;  %v14526_v31 = vld [vmem:[#allocation59_spill] sm:$0xff] }
 0x1b6   :  { %v9507_v10 = vpop.f32.mrf.mxu1  ;;  %9858 = vmatmul.mubr.f32.gmra.mxu1 %v2158_v7  ;;  %v2914_v2 = vld [vmem:[#allocation2 + $0x193] sm:$0xff] }
 0x1b7   :  { %v11306_v14 = vadd.f32 %v1748_v23, %v1092_v21  ;;  %v1107_v57 = vadd.f32 %v9507_v10, %v11160_v48  ;;  %v9683_v49 = vpop.f32.mrf.mxu0  ;;  %10034 = vmatmul.mubr.f32.gmra.mxu0 %v2911_v22  ;;  %9860 = vmatprep.mubr.f32.mxu1 %v2159_v52  ;;  %v2162_v22 = vld [vmem:[#allocation2 + $0x19a] sm:$0xff] }
 0x1b8   :  { %v1101_v11 = vpop.f32.mrf.mxu1  ;;  %10036 = vmatprep.mubr.f32.mxu0 %v2912_v29  ;;  %v2915_v23 = vld [vmem:[#allocation2 + $0x19b] sm:$0xff] }
 0x1b9   :  { %v11309_v47 = vadd.f32 %v9683_v49, %v1107_v57  ;;  %v1102_v13 = vadd.f32 %v1101_v11, %v14524_v44  ;;  %v1758_v18 = vpop.f32.mrf.mxu0  ;;  %v2163_v29 = vld [vmem:[#allocation2 + $0x1a2] sm:$0xff]  ;;  %v14528_v57 = vld [vmem:[#allocation61_spill] sm:$0xff] }
 0x1ba   :  { %v9510_v55 = vpop.f32.mrf.mxu1  ;;  %9861 = vmatmul.mubr.f32.gmra.mxu1 %v2160_v33  ;;  %v2916_v44 = vld [vmem:[#allocation2 + $0x1a3] sm:$0xff] }
 0x1bb   :  { %14523 = vst [vmem:[#allocation63_spill] sm:$0xff] %v11309_v47  ;;  %v11312_v7 = vadd.f32 %v1758_v18, %v1102_v13  ;;  %v1117_v48 = vadd.f32 %v9510_v55, %v14526_v31  ;;  %v9686_v21 = vpop.f32.mrf.mxu0  ;;  %10037 = vmatmul.mubr.f32.gmra.mxu0 %v2913_v6  ;;  %9863 = vmatprep.mubr.f32.mxu1 %v2161_v36  ;;  %v14530_v13 = vld [vmem:[#allocation11_spill] sm:$0xff]  ;;  %v2165_v31 = vld [vmem:[#allocation2 + $0x1b2] sm:$0xff] }
 0x1bc   :  { %v1111_v52 = vpop.f32.mrf.mxu1  ;;  %10039 = vmatprep.mubr.f32.mxu0 %v2914_v2  ;;  %v2164_v6 = vld [vmem:[#allocation2 + $0x1aa] sm:$0xff] }
 0x1bd   :  { %14525 = vst [vmem:[#allocation57_spill] sm:$0xff] %v11312_v7  ;;  %v11315_v10 = vadd.f32 %v9686_v21, %v1117_v48  ;;  %v1112_v49 = vadd.f32 %v1111_v52, %v14528_v57  ;;  %v1768_v11 = vpop.f32.mrf.mxu0  ;;  %v2917_v2 = vld [vmem:[#allocation2 + $0x1ab] sm:$0xff] }
 0x1be   :  { %v9513_v47 = vpop.f32.mrf.mxu1  ;;  %9864 = vmatmul.mubr.f32.gmra.mxu1 %v2162_v22  ;;  %v14532_v21 = vld [vmem:[#allocation12_spill] sm:$0xff] }
 0x1bf   :  { %14527 = vst [vmem:[#allocation59_spill] sm:$0xff] %v11315_v10  ;;  %v11318_v33 = vadd.f32 %v1768_v11, %v1112_v49  ;;  %v1127_v18 = vadd.f32 %v9513_v47, %v14530_v13  ;;  %v9689_v55 = vpop.f32.mrf.mxu0  ;;  %10040 = vmatmul.mubr.f32.gmra.mxu0 %v2915_v23  ;;  %9866 = vmatprep.mubr.f32.mxu1 %v2163_v29  ;;  %v2918_v10 = vld [vmem:[#allocation2 + $0x1b3] sm:$0xff]  ;;  %v2167_v13 = vld [vmem:[#allocation2 + $0x1c2] sm:$0xff] }
 0x1c0   :  { %v1121_v36 = vpop.f32.mrf.mxu1  ;;  %10042 = vmatprep.mubr.f32.mxu0 %v2916_v44  ;;  %v14534_v49 = vld [vmem:[#allocation13_spill] sm:$0xff] }
 0x1c1   :  { %14529 = vst [vmem:[#allocation61_spill] sm:$0xff] %v11318_v33  ;;  %v11321_v48 = vadd.f32 %v9689_v55, %v1127_v18  ;;  %v1122_v52 = vadd.f32 %v1121_v36, %v14532_v21  ;;  %v1778_v57 = vpop.f32.mrf.mxu0  ;;  %v2166_v23 = vld [vmem:[#allocation2 + $0x1ba] sm:$0xff] }
 0x1c2   :  { %v9516_v7 = vpop.f32.mrf.mxu1  ;;  %9867 = vmatmul.mubr.f32.gmra.mxu1 %v2164_v6  ;;  %v2919_v44 = vld [vmem:[#allocation2 + $0x1bb] sm:$0xff] }
 0x1c3   :  { %14531 = vst [vmem:[#allocation11_spill] sm:$0xff] %v11321_v48  ;;  %v11324_v22 = vadd.f32 %v1778_v57, %v1122_v52  ;;  %v1137_v47 = vadd.f32 %v9516_v7, %v14534_v49  ;;  %v9692_v11 = vpop.f32.mrf.mxu0  ;;  %10043 = vmatmul.mubr.f32.gmra.mxu0 %v2917_v2  ;;  %9869 = vmatprep.mubr.f32.mxu1 %v2165_v31  ;;  %v14536_v55 = vld [vmem:[#allocation14_spill] sm:$0xff]  ;;  %v14538_v52 = vld [vmem:[#allocation15_spill] sm:$0xff]  ;;  %v2169_v49 = vld [vmem:[#allocation2 + $0x1d2] sm:$0xff] }
 0x1c4   :  { %v1131_v29 = vpop.f32.mrf.mxu1  ;;  %10045 = vmatprep.mubr.f32.mxu0 %v2918_v10  ;;  %v2920_v48 = vld [vmem:[#allocation2 + $0x1c3] sm:$0xff]  ;;  %v2921_v10 = vld [vmem:[#allocation2 + $0x1cb] sm:$0xff] }
 0x1c5   :  { %14533 = vst [vmem:[#allocation12_spill] sm:$0xff] %v11324_v22  ;;  %v11327_v18 = vadd.f32 %v9692_v11, %v1137_v47  ;;  %v1132_v36 = vadd.f32 %v1131_v29, %v14536_v55  ;;  %v1788_v21 = vpop.f32.mrf.mxu0  ;;  %v2168_v2 = vld [vmem:[#allocation2 + $0x1ca] sm:$0xff] }
 0x1c6   :  { %v9519_v33 = vpop.f32.mrf.mxu1  ;;  %9870 = vmatmul.mubr.f32.gmra.mxu1 %v2166_v23  ;;  %v14540_v11 = vld [vmem:[#allocation16_spill] sm:$0xff] }
 0x1c7   :  { %14535 = vst [vmem:[#allocation13_spill] sm:$0xff] %v11327_v18  ;;  %v11330_v6 = vadd.f32 %v1788_v21, %v1132_v36  ;;  %v1147_v7 = vadd.f32 %v9519_v33, %v14538_v52  ;;  %v9695_v57 = vpop.f32.mrf.mxu0  ;;  %10046 = vmatmul.mubr.f32.gmra.mxu0 %v2919_v44  ;;  %9872 = vmatprep.mubr.f32.mxu1 %v2167_v13  ;;  %v2922_v18 = vld [vmem:[#allocation2 + $0x1d3] sm:$0xff]  ;;  %v2171_v52 = vld [vmem:[#allocation2 + $0x1e2] sm:$0xff] }
 0x1c8   :  { %v1141_v31 = vpop.f32.mrf.mxu1  ;;  %10048 = vmatprep.mubr.f32.mxu0 %v2920_v48  ;;  %v14542_v36 = vld [vmem:[#allocation17_spill] sm:$0xff] }
 0x1c9   :  { %14537 = vst [vmem:[#allocation14_spill] sm:$0xff] %v11330_v6  ;;  %v11333_v47 = vadd.f32 %v9695_v57, %v1147_v7  ;;  %v1142_v29 = vadd.f32 %v1141_v31, %v14540_v11  ;;  %v1798_v55 = vpop.f32.mrf.mxu0  ;;  %v2170_v44 = vld [vmem:[#allocation2 + $0x1da] sm:$0xff] }
 0x1ca   :  { %v9522_v22 = vpop.f32.mrf.mxu1  ;;  %9873 = vmatmul.mubr.f32.gmra.mxu1 %v2168_v2  ;;  %v2923_v48 = vld [vmem:[#allocation2 + $0x1db] sm:$0xff] }
 0x1cb   :  { %14539 = vst [vmem:[#allocation15_spill] sm:$0xff] %v11333_v47  ;;  %v11336_v23 = vadd.f32 %v1798_v55, %v1142_v29  ;;  %v1157_v33 = vadd.f32 %v9522_v22, %v14542_v36  ;;  %v9698_v21 = vpop.f32.mrf.mxu0  ;;  %10049 = vmatmul.mubr.f32.gmra.mxu0 %v2921_v10  ;;  %9875 = vmatprep.mubr.f32.mxu1 %v2169_v49  ;;  %v14544_v57 = vld [vmem:[#allocation18_spill] sm:$0xff]  ;;  %v14546_v29 = vld [vmem:[#allocation19_spill] sm:$0xff]  ;;  %v2173_v36 = vld [vmem:[#allocation2 + $0x1f2] sm:$0xff] }
 0x1cc   :  { %v1151_v13 = vpop.f32.mrf.mxu1  ;;  %10051 = vmatprep.mubr.f32.mxu0 %v2922_v18  ;;  %v2924_v47 = vld [vmem:[#allocation2 + $0x1e3] sm:$0xff]  ;;  %v2925_v18 = vld [vmem:[#allocation2 + $0x1eb] sm:$0xff] }
 0x1cd   :  { %14541 = vst [vmem:[#allocation16_spill] sm:$0xff] %v11336_v23  ;;  %v11339_v7 = vadd.f32 %v9698_v21, %v1157_v33  ;;  %v1152_v31 = vadd.f32 %v1151_v13, %v14544_v57  ;;  %v1808_v11 = vpop.f32.mrf.mxu0  ;;  %v2172_v10 = vld [vmem:[#allocation2 + $0x1ea] sm:$0xff] }
 0x1ce   :  { %v9525_v6 = vpop.f32.mrf.mxu1  ;;  %9876 = vmatmul.mubr.f32.gmra.mxu1 %v2170_v44  ;;  %v14548_v21 = vld [vmem:[#allocation20_spill] sm:$0xff] }
 0x1cf   :  { %14543 = vst [vmem:[#allocation17_spill] sm:$0xff] %v11339_v7  ;;  %v11342_v2 = vadd.f32 %v1808_v11, %v1152_v31  ;;  %v1167_v22 = vadd.f32 %v9525_v6, %v14546_v29  ;;  %v9701_v55 = vpop.f32.mrf.mxu0  ;;  %10052 = vmatmul.mubr.f32.gmra.mxu0 %v2923_v48  ;;  %9878 = vmatprep.mubr.f32.mxu1 %v2171_v52  ;;  %v2926_v7 = vld [vmem:[#allocation2 + $0x1f3] sm:$0xff]  ;;  %v2175_v29 = vld [vmem:[#allocation2 + $0x202] sm:$0xff] }
 0x1d0   :  { %v1161_v49 = vpop.f32.mrf.mxu1  ;;  %10054 = vmatprep.mubr.f32.mxu0 %v2924_v47  ;;  %v14550_v31 = vld [vmem:[#allocation21_spill] sm:$0xff] }
 0x1d1   :  { %14545 = vst [vmem:[#allocation18_spill] sm:$0xff] %v11342_v2  ;;  %v11345_v33 = vadd.f32 %v9701_v55, %v1167_v22  ;;  %v1162_v13 = vadd.f32 %v1161_v49, %v14548_v21  ;;  %v1818_v57 = vpop.f32.mrf.mxu0  ;;  %v2174_v48 = vld [vmem:[#allocation2 + $0x1fa] sm:$0xff] }
 0x1d2   :  { %v9528_v23 = vpop.f32.mrf.mxu1  ;;  %9879 = vmatmul.mubr.f32.gmra.mxu1 %v2172_v10  ;;  %v2927_v47 = vld [vmem:[#allocation2 + $0x1fb] sm:$0xff] }
 0x1d3   :  { %14547 = vst [vmem:[#allocation19_spill] sm:$0xff] %v11345_v33  ;;  %v11348_v44 = vadd.f32 %v1818_v57, %v1162_v13  ;;  %v1177_v6 = vadd.f32 %v9528_v23, %v14550_v31  ;;  %v9704_v11 = vpop.f32.mrf.mxu0  ;;  %10055 = vmatmul.mubr.f32.gmra.mxu0 %v2925_v18  ;;  %9881 = vmatprep.mubr.f32.mxu1 %v2173_v36  ;;  %v14552_v55 = vld [vmem:[#allocation22_spill] sm:$0xff]  ;;  %v14554_v13 = vld [vmem:[#allocation23_spill] sm:$0xff]  ;;  %v2177_v31 = vld [vmem:[#allocation2 + $0x212] sm:$0xff] }
 0x1d4   :  { %v1171_v52 = vpop.f32.mrf.mxu1  ;;  %10057 = vmatprep.mubr.f32.mxu0 %v2926_v7  ;;  %v2928_v33 = vld [vmem:[#allocation2 + $0x203] sm:$0xff]  ;;  %v2929_v7 = vld [vmem:[#allocation2 + $0x20b] sm:$0xff] }
 0x1d5   :  { %14549 = vst [vmem:[#allocation20_spill] sm:$0xff] %v11348_v44  ;;  %v11351_v22 = vadd.f32 %v9704_v11, %v1177_v6  ;;  %v1172_v49 = vadd.f32 %v1171_v52, %v14552_v55  ;;  %v1828_v21 = vpop.f32.mrf.mxu0  ;;  %v2176_v18 = vld [vmem:[#allocation2 + $0x20a] sm:$0xff] }
 0x1d6   :  { %v9531_v2 = vpop.f32.mrf.mxu1  ;;  %9882 = vmatmul.mubr.f32.gmra.mxu1 %v2174_v48  ;;  %v14556_v11 = vld [vmem:[#allocation24_spill] sm:$0xff] }
 0x1d7   :  { %14551 = vst [vmem:[#allocation21_spill] sm:$0xff] %v11351_v22  ;;  %v11354_v10 = vadd.f32 %v1828_v21, %v1172_v49  ;;  %v1187_v23 = vadd.f32 %v9531_v2, %v14554_v13  ;;  %v9707_v57 = vpop.f32.mrf.mxu0  ;;  %10058 = vmatmul.mubr.f32.gmra.mxu0 %v2927_v47  ;;  %9884 = vmatprep.mubr.f32.mxu1 %v2175_v29  ;;  %v2930_v22 = vld [vmem:[#allocation2 + $0x213] sm:$0xff]  ;;  %v2179_v13 = vld [vmem:[#allocation2 + $0x222] sm:$0xff] }
 0x1d8   :  { %v1181_v36 = vpop.f32.mrf.mxu1  ;;  %10060 = vmatprep.mubr.f32.mxu0 %v2928_v33  ;;  %v14558_v49 = vld [vmem:[#allocation25_spill] sm:$0xff] }
 0x1d9   :  { %14553 = vst [vmem:[#allocation22_spill] sm:$0xff] %v11354_v10  ;;  %v11357_v6 = vadd.f32 %v9707_v57, %v1187_v23  ;;  %v1182_v52 = vadd.f32 %v1181_v36, %v14556_v11  ;;  %v1838_v55 = vpop.f32.mrf.mxu0  ;;  %v2178_v47 = vld [vmem:[#allocation2 + $0x21a] sm:$0xff] }
 0x1da   :  { %v9534_v44 = vpop.f32.mrf.mxu1  ;;  %9885 = vmatmul.mubr.f32.gmra.mxu1 %v2176_v18  ;;  %v2931_v33 = vld [vmem:[#allocation2 + $0x21b] sm:$0xff] }
 0x1db   :  { %14555 = vst [vmem:[#allocation23_spill] sm:$0xff] %v11357_v6  ;;  %v11360_v48 = vadd.f32 %v1838_v55, %v1182_v52  ;;  %v1197_v2 = vadd.f32 %v9534_v44, %v14558_v49  ;;  %v9710_v21 = vpop.f32.mrf.mxu0  ;;  %10061 = vmatmul.mubr.f32.gmra.mxu0 %v2929_v7  ;;  %9887 = vmatprep.mubr.f32.mxu1 %v2177_v31  ;;  %v14560_v57 = vld [vmem:[#allocation26_spill] sm:$0xff]  ;;  %v14562_v52 = vld [vmem:[#allocation27_spill] sm:$0xff]  ;;  %v2181_v49 = vld [vmem:[#allocation2 + $0x232] sm:$0xff] }
 0x1dc   :  { %v1191_v29 = vpop.f32.mrf.mxu1  ;;  %10063 = vmatprep.mubr.f32.mxu0 %v2930_v22  ;;  %v2932_v6 = vld [vmem:[#allocation2 + $0x223] sm:$0xff]  ;;  %v2933_v22 = vld [vmem:[#allocation2 + $0x22b] sm:$0xff] }
 0x1dd   :  { %14557 = vst [vmem:[#allocation24_spill] sm:$0xff] %v11360_v48  ;;  %v11363_v23 = vadd.f32 %v9710_v21, %v1197_v2  ;;  %v1192_v36 = vadd.f32 %v1191_v29, %v14560_v57  ;;  %v1848_v11 = vpop.f32.mrf.mxu0  ;;  %v2180_v7 = vld [vmem:[#allocation2 + $0x22a] sm:$0xff] }
 0x1de   :  { %v9537_v10 = vpop.f32.mrf.mxu1  ;;  %9888 = vmatmul.mubr.f32.gmra.mxu1 %v2178_v47  ;;  %v14564_v21 = vld [vmem:[#allocation28_spill] sm:$0xff] }
 0x1df   :  { %14559 = vst [vmem:[#allocation25_spill] sm:$0xff] %v11363_v23  ;;  %v11366_v18 = vadd.f32 %v1848_v11, %v1192_v36  ;;  %v1207_v44 = vadd.f32 %v9537_v10, %v14562_v52  ;;  %v9713_v55 = vpop.f32.mrf.mxu0  ;;  %10064 = vmatmul.mubr.f32.gmra.mxu0 %v2931_v33  ;;  %9890 = vmatprep.mubr.f32.mxu1 %v2179_v13  ;;  %v2934_v23 = vld [vmem:[#allocation2 + $0x233] sm:$0xff]  ;;  %v2183_v52 = vld [vmem:[#allocation2 + $0x242] sm:$0xff] }
 0x1e0   :  { %v1201_v31 = vpop.f32.mrf.mxu1  ;;  %10066 = vmatprep.mubr.f32.mxu0 %v2932_v6  ;;  %v14566_v36 = vld [vmem:[#allocation29_spill] sm:$0xff] }
 0x1e1   :  { %14561 = vst [vmem:[#allocation26_spill] sm:$0xff] %v11366_v18  ;;  %v11369_v2 = vadd.f32 %v9713_v55, %v1207_v44  ;;  %v1202_v29 = vadd.f32 %v1201_v31, %v14564_v21  ;;  %v1858_v57 = vpop.f32.mrf.mxu0  ;;  %v2182_v33 = vld [vmem:[#allocation2 + $0x23a] sm:$0xff] }
 0x1e2   :  { %v9540_v48 = vpop.f32.mrf.mxu1  ;;  %9891 = vmatmul.mubr.f32.gmra.mxu1 %v2180_v7  ;;  %v2935_v6 = vld [vmem:[#allocation2 + $0x23b] sm:$0xff] }
 0x1e3   :  { %14563 = vst [vmem:[#allocation27_spill] sm:$0xff] %v11369_v2  ;;  %v11372_v47 = vadd.f32 %v1858_v57, %v1202_v29  ;;  %v1217_v10 = vadd.f32 %v9540_v48, %v14566_v36  ;;  %v9716_v11 = vpop.f32.mrf.mxu0  ;;  %10067 = vmatmul.mubr.f32.gmra.mxu0 %v2933_v22  ;;  %9893 = vmatprep.mubr.f32.mxu1 %v2181_v49  ;;  %v14568_v55 = vld [vmem:[#allocation30_spill] sm:$0xff]  ;;  %v14570_v29 = vld [vmem:[#allocation31_spill] sm:$0xff]  ;;  %v2185_v36 = vld [vmem:[#allocation2 + $0x252] sm:$0xff] }
 0x1e4   :  { %v1211_v13 = vpop.f32.mrf.mxu1  ;;  %10069 = vmatprep.mubr.f32.mxu0 %v2934_v23  ;;  %v2936_v2 = vld [vmem:[#allocation2 + $0x243] sm:$0xff]  ;;  %v2937_v23 = vld [vmem:[#allocation2 + $0x24b] sm:$0xff] }
 0x1e5   :  { %14565 = vst [vmem:[#allocation28_spill] sm:$0xff] %v11372_v47  ;;  %v11375_v44 = vadd.f32 %v9716_v11, %v1217_v10  ;;  %v1212_v31 = vadd.f32 %v1211_v13, %v14568_v55  ;;  %v1868_v21 = vpop.f32.mrf.mxu0  ;;  %v2184_v22 = vld [vmem:[#allocation2 + $0x24a] sm:$0xff] }
 0x1e6   :  { %v9543_v18 = vpop.f32.mrf.mxu1  ;;  %9894 = vmatmul.mubr.f32.gmra.mxu1 %v2182_v33  ;;  %v14572_v11 = vld [vmem:[#allocation32_spill] sm:$0xff] }
 0x1e7   :  { %14567 = vst [vmem:[#allocation29_spill] sm:$0xff] %v11375_v44  ;;  %v11378_v7 = vadd.f32 %v1868_v21, %v1212_v31  ;;  %v1227_v48 = vadd.f32 %v9543_v18, %v14570_v29  ;;  %v9719_v57 = vpop.f32.mrf.mxu0  ;;  %10070 = vmatmul.mubr.f32.gmra.mxu0 %v2935_v6  ;;  %9896 = vmatprep.mubr.f32.mxu1 %v2183_v52  ;;  %v2938_v44 = vld [vmem:[#allocation2 + $0x253] sm:$0xff]  ;;  %v2187_v29 = vld [vmem:[#allocation2 + $0x262] sm:$0xff] }
 0x1e8   :  { %v1221_v49 = vpop.f32.mrf.mxu1  ;;  %10072 = vmatprep.mubr.f32.mxu0 %v2936_v2  ;;  %v14574_v31 = vld [vmem:[#allocation33_spill] sm:$0xff] }
 0x1e9   :  { %14569 = vst [vmem:[#allocation30_spill] sm:$0xff] %v11378_v7  ;;  %v11381_v10 = vadd.f32 %v9719_v57, %v1227_v48  ;;  %v1222_v13 = vadd.f32 %v1221_v49, %v14572_v11  ;;  %v1878_v55 = vpop.f32.mrf.mxu0  ;;  %v2186_v6 = vld [vmem:[#allocation2 + $0x25a] sm:$0xff]  ;;  %v10929_v7 = vmov 0  }
 0x1ea   :  { %v9546_v47 = vpop.f32.mrf.mxu1  ;;  %9897 = vmatmul.mubr.f32.gmra.mxu1 %v2184_v22  ;;  %v2939_v2 = vld [vmem:[#allocation2 + $0x25b] sm:$0xff]  ;;  %10853 = vset.pattern.permute.xlu0 %v10929_v7 }
 0x1eb   :  { %14571 = vst [vmem:[#allocation31_spill] sm:$0xff] %v11381_v10  ;;  %v11384_v33 = vadd.f32 %v1878_v55, %v1222_v13  ;;  %v1237_v18 = vadd.f32 %v9546_v47, %v14574_v31  ;;  %v9722_v21 = vpop.f32.mrf.mxu0  ;;  %10073 = vmatmul.mubr.f32.gmra.mxu0 %v2937_v23  ;;  %9899 = vmatprep.mubr.f32.mxu1 %v2185_v36  ;;  %v14576_v57 = vld [vmem:[#allocation34_spill] sm:$0xff]  ;;  %v2188_v55 = vld [vmem:[#allocation2 + $0x26a] sm:$0xff] }
 0x1ec   :  { %v1231_v52 = vpop.f32.mrf.mxu1  ;;  %10075 = vmatprep.mubr.f32.mxu0 %v2938_v44  ;;  %v2940_v10 = vld [vmem:[#allocation2 + $0x263] sm:$0xff]  ;;  %10854 = vset.pattern.permute.xlu1 %v10929_v7 }
 0x1ed   :  { %14573 = vst [vmem:[#allocation32_spill] sm:$0xff] %v11384_v33  ;;  %v11387_v48 = vadd.f32 %v9722_v21, %v1237_v18  ;;  %v1232_v49 = vadd.f32 %v1231_v52, %v14576_v57  ;;  %v1888_v11 = vpop.f32.mrf.mxu0  ;;  %v6633_v47 = vld [vmem:[%s14329_s3] sm:$0xff]  ;;  %v14578_v44 = vld [vmem:[#allocation35_spill] sm:$0xff]  ;;  %v2189_v21 = vld [vmem:[#allocation2 + $0x272] sm:$0xff] }
 0x1ee   :  { %v9549_v22 = vpop.f32.mrf.mxu1  ;;  %9900 = vmatmul.mubr.f32.gmra.mxu1 %v2186_v6  ;;  %6831 = vperm.xlu0 %10853, %v6633_v47   ;;  %v2941_v18 = vld [vmem:[#allocation2 + $0x26b] sm:$0xff]  ;;  %v2942_v33 = vld [vmem:[#allocation2 + $0x273] sm:$0xff] }
 0x1ef   :  { %14575 = vst [vmem:[#allocation33_spill] sm:$0xff] %v11387_v48  ;;  %v11393_v23 = vadd.f32 %v1888_v11, %v1232_v49  ;;  %v1247_v36 = vadd.f32 %v9549_v22, %v14578_v44  ;;  %v9725_v13 = vpop.f32.mrf.mxu0  ;;  %10076 = vmatmul.mubr.f32.gmra.mxu0 %v2939_v2  ;;  %9902 = vmatprep.mubr.f32.mxu1 %v2187_v29  ;;  %v14580_v57 = vld [vmem:[#allocation36_spill] sm:$0xff]  ;;  %v6634_v2 = vld [vmem:[%s14329_s3 + $0x8] sm:$0xff]  ;;  %v14582_v49 = vld [vmem:[#allocation37_spill] sm:$0xff] }
 0x1f0   :  { %v1241_v31 = vpop.f32.mrf.mxu1  ;;  %10078 = vmatprep.mubr.f32.mxu0 %v2940_v10  ;;  %v6635_v6 = vld [vmem:[%s14329_s3 + $0x10] sm:$0xff]  ;;  %v2190_v22 = vld [vmem:[#allocation2 + $0x27a] sm:$0xff] }
 0x1f1   :  { %14577 = vst [vmem:[#allocation34_spill] sm:$0xff] %v11393_v23  ;;  %v11396_v52 = vadd.f32 %v9725_v13, %v1247_v36  ;;  %v1242_v48 = vadd.f32 %v1241_v31, %v14580_v57  ;;  %v1898_v7 = vpop.f32.mrf.mxu0  ;;  %6841 = vperm.xlu1 %10854, %v6635_v6   ;;  %v2943_v36 = vld [vmem:[#allocation2 + $0x27b] sm:$0xff] }
 0x1f2   :  { %v9552_v29 = vpop.f32.mrf.mxu1  ;;  %9903 = vmatmul.mubr.f32.gmra.mxu1 %v2188_v55  ;;  %v2191_v13 = vld [vmem:[#allocation2 + $0x282] sm:$0xff]  ;;  %6836 = vperm.xlu0 %10853, %v6634_v2  }
 0x1f3   :  { %14579 = vst [vmem:[#allocation35_spill] sm:$0xff] %v11396_v52  ;;  %v11405_v10 = vadd.f32 %v1898_v7, %v1242_v48  ;;  %v1257_v11 = vadd.f32 %v9552_v29, %v14582_v49  ;;  %v9728_v47 = vpop.f32.mrf.mxu0  ;;  %10079 = vmatmul.mubr.f32.gmra.mxu0 %v2941_v18  ;;  %9905 = vmatprep.mubr.f32.mxu1 %v2189_v21  ;;  %v14584_v57 = vld [vmem:[#allocation38_spill] sm:$0xff]  ;;  %v6636_v48 = vld [vmem:[%s14329_s3 + $0x18] sm:$0xff]  ;;  %v14586_v7 = vld [vmem:[#allocation39_spill] sm:$0xff] }
 0x1f4   :  { %v1251_v44 = vpop.f32.mrf.mxu1  ;;  %10081 = vmatprep.mubr.f32.mxu0 %v2942_v33  ;;  %v2944_v55 = vld [vmem:[#allocation2 + $0x283] sm:$0xff] }
 0x1f5   :  { %14581 = vst [vmem:[#allocation36_spill] sm:$0xff] %v11405_v10  ;;  %v11408_v31 = vadd.f32 %v9728_v47, %v1257_v11  ;;  %v1252_v52 = vadd.f32 %v1251_v44, %v14584_v57  ;;  %v1908_v23 = vpop.f32.mrf.mxu0  ;;  %v6637_v18 = vld [vmem:[%s14329_s3 + $0x20] sm:$0xff]  ;;  %6846 = vperm.xlu1 %10854, %v6636_v48   ;;  %v2192_v29 = vld [vmem:[#allocation2 + $0x28a] sm:$0xff]  ;;  %v2193_v47 = vld [vmem:[#allocation2 + $0x292] sm:$0xff] }
 0x1f6   :  { %v9555_v21 = vpop.f32.mrf.mxu1  ;;  %9906 = vmatmul.mubr.f32.gmra.mxu1 %v2190_v22  ;;  %v2945_v11 = vld [vmem:[#allocation2 + $0x28b] sm:$0xff]  ;;  %6851 = vperm.xlu0 %10853, %v6637_v18   ;;  %v2946_v22 = vld [vmem:[#allocation2 + $0x293] sm:$0xff] }
 0x1f7   :  { %14583 = vst [vmem:[#allocation37_spill] sm:$0xff] %v11408_v31  ;;  %v11417_v33 = vadd.f32 %v1908_v23, %v1252_v52  ;;  %v1267_v6 = vadd.f32 %v9555_v21, %v14586_v7  ;;  %v9731_v2 = vpop.f32.mrf.mxu0  ;;  %10082 = vmatmul.mubr.f32.gmra.mxu0 %v2943_v36  ;;  %9908 = vmatprep.mubr.f32.mxu1 %v2191_v13  ;;  %v14588_v57 = vld [vmem:[#allocation40_spill] sm:$0xff]  ;;  %v6638_v23 = vld [vmem:[%s14329_s3 + $0x28] sm:$0xff]  ;;  %v2194_v21 = vld [vmem:[#allocation2 + $0x29a] sm:$0xff] }
 0x1f8   :  { %v1261_v49 = vpop.f32.mrf.mxu1  ;;  %10084 = vmatprep.mubr.f32.mxu0 %v2944_v55  ;;  %v6639_v52 = vld [vmem:[%s14329_s3 + $0x30] sm:$0xff]  ;;  %v14590_v55 = vld [vmem:[#allocation41_spill] sm:$0xff] }
 0x1f9   :  { %14585 = vst [vmem:[#allocation38_spill] sm:$0xff] %v11417_v33  ;;  %v11420_v44 = vadd.f32 %v9731_v2, %v1267_v6  ;;  %v1262_v31 = vadd.f32 %v1261_v49, %v14588_v57  ;;  %v1918_v10 = vpop.f32.mrf.mxu0  ;;  %6856 = vperm.xlu1 %10854, %v6638_v23   ;;  %v2947_v6 = vld [vmem:[#allocation2 + $0x29b] sm:$0xff] }
 0x1fa   :  { %v9558_v36 = vpop.f32.mrf.mxu1  ;;  %9909 = vmatmul.mubr.f32.gmra.mxu1 %v2192_v29  ;;  %v2195_v2 = vld [vmem:[#allocation2 + $0x2a2] sm:$0xff]  ;;  %6861 = vperm.xlu0 %10853, %v6639_v52  }
 0x1fb   :  { %14587 = vst [vmem:[#allocation39_spill] sm:$0xff] %v11420_v44  ;;  %v11429_v13 = vadd.f32 %v1918_v10, %v1262_v31  ;;  %v1277_v48 = vadd.f32 %v9558_v36, %v14590_v55  ;;  %v9734_v18 = vpop.f32.mrf.mxu0  ;;  %10085 = vmatmul.mubr.f32.gmra.mxu0 %v2945_v11  ;;  %9911 = vmatprep.mubr.f32.mxu1 %v2193_v47  ;;  %v14592_v57 = vld [vmem:[#allocation42_spill] sm:$0xff]  ;;  %v6640_v10 = vld [vmem:[%s14329_s3 + $0x38] sm:$0xff]  ;;  %v2196_v36 = vld [vmem:[#allocation2 + $0x2aa] sm:$0xff] }
 0x1fc   :  { %v1271_v7 = vpop.f32.mrf.mxu1  ;;  %10087 = vmatprep.mubr.f32.mxu0 %v2946_v22  ;;  %v2948_v29 = vld [vmem:[#allocation2 + $0x2a3] sm:$0xff] }
 0x1fd   :  { %14589 = vst [vmem:[#allocation40_spill] sm:$0xff] %v11429_v13  ;;  %v11432_v49 = vadd.f32 %v9734_v18, %v1277_v48  ;;  %v1272_v44 = vadd.f32 %v1271_v7, %v14592_v57  ;;  %v1928_v33 = vpop.f32.mrf.mxu0  ;;  %v6641_v31 = vld [vmem:[%s14329_s3 + $0x40] sm:$0xff]  ;;  %6866 = vperm.xlu1 %10854, %v6640_v10   ;;  %v14594_v22 = vld [vmem:[#allocation43_spill] sm:$0xff]  ;;  %v2197_v18 = vld [vmem:[#allocation2 + $0x2b2] sm:$0xff] }
 0x1fe   :  { %v9561_v11 = vpop.f32.mrf.mxu1  ;;  %9912 = vmatmul.mubr.f32.gmra.mxu1 %v2194_v21  ;;  %v2949_v48 = vld [vmem:[#allocation2 + $0x2ab] sm:$0xff]  ;;  %6871 = vperm.xlu0 %10853, %v6641_v31   ;;  %v2950_v21 = vld [vmem:[#allocation2 + $0x2b3] sm:$0xff] }
 0x1ff   :  { %14591 = vst [vmem:[#allocation41_spill] sm:$0xff] %v11432_v49  ;;  %v11441_v47 = vadd.f32 %v1928_v33, %v1272_v44  ;;  %v1287_v23 = vadd.f32 %v9561_v11, %v14594_v22  ;;  %v9737_v52 = vpop.f32.mrf.mxu0  ;;  %10088 = vmatmul.mubr.f32.gmra.mxu0 %v2947_v6  ;;  %9914 = vmatprep.mubr.f32.mxu1 %v2195_v2  ;;  %v14596_v57 = vld [vmem:[#allocation44_spill] sm:$0xff]  ;;  %v6642_v33 = vld [vmem:[%s14329_s3 + $0x48] sm:$0xff]  ;;  %v2198_v11 = vld [vmem:[#allocation2 + $0x2ba] sm:$0xff] }
 0x200   :  { %v1281_v55 = vpop.f32.mrf.mxu1  ;;  %10090 = vmatprep.mubr.f32.mxu0 %v2948_v29  ;;  %v6643_v44 = vld [vmem:[%s14329_s3 + $0x50] sm:$0xff]  ;;  %v14598_v29 = vld [vmem:[#allocation45_spill] sm:$0xff] }
 0x201   :  { %14593 = vst [vmem:[#allocation42_spill] sm:$0xff] %v11441_v47  ;;  %v11444_v7 = vadd.f32 %v9737_v52, %v1287_v23  ;;  %v1282_v49 = vadd.f32 %v1281_v55, %v14596_v57  ;;  %v1938_v13 = vpop.f32.mrf.mxu0  ;;  %6876 = vperm.xlu1 %10854, %v6642_v33   ;;  %v2951_v23 = vld [vmem:[#allocation2 + $0x2bb] sm:$0xff] }
 0x202   :  { %v9564_v6 = vpop.f32.mrf.mxu1  ;;  %9915 = vmatmul.mubr.f32.gmra.mxu1 %v2196_v36  ;;  %v2199_v52 = vld [vmem:[#allocation2 + $0x2c2] sm:$0xff]  ;;  %6881 = vperm.xlu0 %10853, %v6643_v44  }
 0x203   :  { %14595 = vst [vmem:[#allocation43_spill] sm:$0xff] %v11444_v7  ;;  %v11453_v2 = vadd.f32 %v1938_v13, %v1282_v49  ;;  %v1297_v10 = vadd.f32 %v9564_v6, %v14598_v29  ;;  %v9740_v31 = vpop.f32.mrf.mxu0  ;;  %10091 = vmatmul.mubr.f32.gmra.mxu0 %v2949_v48  ;;  %9917 = vmatprep.mubr.f32.mxu1 %v2197_v18  ;;  %v14600_v57 = vld [vmem:[#allocation46_spill] sm:$0xff]  ;;  %v6644_v13 = vld [vmem:[%s14329_s3 + $0x58] sm:$0xff]  ;;  %v2200_v6 = vld [vmem:[#allocation2 + $0x2ca] sm:$0xff] }
 0x204   :  { %v1291_v22 = vpop.f32.mrf.mxu1  ;;  %10093 = vmatprep.mubr.f32.mxu0 %v2950_v21  ;;  %v2952_v36 = vld [vmem:[#allocation2 + $0x2c3] sm:$0xff] }
 0x205   :  { %14597 = vst [vmem:[#allocation44_spill] sm:$0xff] %v11453_v2  ;;  %v11456_v55 = vadd.f32 %v9740_v31, %v1297_v10  ;;  %v1292_v7 = vadd.f32 %v1291_v22, %v14600_v57  ;;  %v1948_v47 = vpop.f32.mrf.mxu0  ;;  %v6645_v49 = vld [vmem:[%s14329_s3 + $0x60] sm:$0xff]  ;;  %6886 = vperm.xlu1 %10854, %v6644_v13   ;;  %v14602_v21 = vld [vmem:[#allocation47_spill] sm:$0xff]  ;;  %v2201_v31 = vld [vmem:[#allocation2 + $0x2d2] sm:$0xff] }
 0x206   :  { %v9567_v48 = vpop.f32.mrf.mxu1  ;;  %9918 = vmatmul.mubr.f32.gmra.mxu1 %v2198_v11  ;;  %v2953_v10 = vld [vmem:[#allocation2 + $0x2cb] sm:$0xff]  ;;  %6891 = vperm.xlu0 %10853, %v6645_v49   ;;  %v2954_v11 = vld [vmem:[#allocation2 + $0x2d3] sm:$0xff] }
 0x207   :  { %14599 = vst [vmem:[#allocation45_spill] sm:$0xff] %v11456_v55  ;;  %v11465_v18 = vadd.f32 %v1948_v47, %v1292_v7  ;;  %v1307_v33 = vadd.f32 %v9567_v48, %v14602_v21  ;;  %v9743_v44 = vpop.f32.mrf.mxu0  ;;  %10094 = vmatmul.mubr.f32.gmra.mxu0 %v2951_v23  ;;  %9920 = vmatprep.mubr.f32.mxu1 %v2199_v52  ;;  %v14604_v57 = vld [vmem:[#allocation48_spill] sm:$0xff]  ;;  %v6646_v47 = vld [vmem:[%s14329_s3 + $0x68] sm:$0xff]  ;;  %v2202_v48 = vld [vmem:[#allocation2 + $0x2da] sm:$0xff] }
 0x208   :  { %v1301_v29 = vpop.f32.mrf.mxu1  ;;  %10096 = vmatprep.mubr.f32.mxu0 %v2952_v36  ;;  %v6647_v7 = vld [vmem:[%s14329_s3 + $0x70] sm:$0xff]  ;;  %v14606_v36 = vld [vmem:[#allocation49_spill] sm:$0xff] }
 0x209   :  { %14601 = vst [vmem:[#allocation46_spill] sm:$0xff] %v11465_v18  ;;  %v11468_v22 = vadd.f32 %v9743_v44, %v1307_v33  ;;  %v1302_v55 = vadd.f32 %v1301_v29, %v14604_v57  ;;  %v1958_v2 = vpop.f32.mrf.mxu0  ;;  %6896 = vperm.xlu1 %10854, %v6646_v47   ;;  %v2955_v33 = vld [vmem:[#allocation2 + $0x2db] sm:$0xff] }
 0x20a   :  { %v9570_v23 = vpop.f32.mrf.mxu1  ;;  %9921 = vmatmul.mubr.f32.gmra.mxu1 %v2200_v6  ;;  %v2203_v44 = vld [vmem:[#allocation2 + $0x2e2] sm:$0xff]  ;;  %6901 = vperm.xlu0 %10853, %v6647_v7  }
 0x20b   :  { %14603 = vst [vmem:[#allocation47_spill] sm:$0xff] %v11468_v22  ;;  %v11477_v52 = vadd.f32 %v1958_v2, %v1302_v55  ;;  %v1317_v13 = vadd.f32 %v9570_v23, %v14606_v36  ;;  %v9746_v49 = vpop.f32.mrf.mxu0  ;;  %10097 = vmatmul.mubr.f32.gmra.mxu0 %v2953_v10  ;;  %9923 = vmatprep.mubr.f32.mxu1 %v2201_v31  ;;  %v14608_v57 = vld [vmem:[#allocation50_spill] sm:$0xff]  ;;  %v6648_v2 = vld [vmem:[%s14329_s3 + $0x78] sm:$0xff]  ;;  %v2204_v23 = vld [vmem:[#allocation2 + $0x2ea] sm:$0xff] }
 0x20c   :  { %v1311_v21 = vpop.f32.mrf.mxu1  ;;  %10099 = vmatprep.mubr.f32.mxu0 %v2954_v11  ;;  %v2956_v6 = vld [vmem:[#allocation2 + $0x2e3] sm:$0xff] }
 0x20d   :  { %14605 = vst [vmem:[#allocation48_spill] sm:$0xff] %v11477_v52  ;;  %v11480_v29 = vadd.f32 %v9746_v49, %v1317_v13  ;;  %v1312_v22 = vadd.f32 %v1311_v21, %v14608_v57  ;;  %v1968_v18 = vpop.f32.mrf.mxu0  ;;  %v6649_v55 = vld [vmem:[%s14329_s3 + $0x80] sm:$0xff]  ;;  %6906 = vperm.xlu1 %10854, %v6648_v2   ;;  %v14610_v11 = vld [vmem:[#allocation51_spill] sm:$0xff]  ;;  %v2205_v49 = vld [vmem:[#allocation2 + $0x2f2] sm:$0xff] }
 0x20e   :  { %v9573_v10 = vpop.f32.mrf.mxu1  ;;  %9924 = vmatmul.mubr.f32.gmra.mxu1 %v2202_v48  ;;  %v2957_v13 = vld [vmem:[#allocation2 + $0x2eb] sm:$0xff]  ;;  %6911 = vperm.xlu0 %10853, %v6649_v55   ;;  %v2958_v48 = vld [vmem:[#allocation2 + $0x2f3] sm:$0xff] }
 0x20f   :  { %14607 = vst [vmem:[#allocation49_spill] sm:$0xff] %v11480_v29  ;;  %v11489_v31 = vadd.f32 %v1968_v18, %v1312_v22  ;;  %v1327_v47 = vadd.f32 %v9573_v10, %v14610_v11  ;;  %v9749_v7 = vpop.f32.mrf.mxu0  ;;  %10100 = vmatmul.mubr.f32.gmra.mxu0 %v2955_v33  ;;  %9926 = vmatprep.mubr.f32.mxu1 %v2203_v44  ;;  %v14612_v57 = vld [vmem:[#allocation52_spill] sm:$0xff]  ;;  %v6650_v18 = vld [vmem:[%s14329_s3 + $0x88] sm:$0xff]  ;;  %v2206_v10 = vld [vmem:[#allocation2 + $0x2fa] sm:$0xff] }
 0x210   :  { %v1321_v36 = vpop.f32.mrf.mxu1  ;;  %10102 = vmatprep.mubr.f32.mxu0 %v2956_v6  ;;  %v6651_v22 = vld [vmem:[%s14329_s3 + $0x90] sm:$0xff]  ;;  %v14614_v6 = vld [vmem:[#allocation53_spill] sm:$0xff] }
 0x211   :  { %14609 = vst [vmem:[#allocation50_spill] sm:$0xff] %v11489_v31  ;;  %v11492_v21 = vadd.f32 %v9749_v7, %v1327_v47  ;;  %v1322_v29 = vadd.f32 %v1321_v36, %v14612_v57  ;;  %v1978_v52 = vpop.f32.mrf.mxu0  ;;  %6916 = vperm.xlu1 %10854, %v6650_v18   ;;  %v2959_v47 = vld [vmem:[#allocation2 + $0x2fb] sm:$0xff] }
 0x212   :  { %v9576_v33 = vpop.f32.mrf.mxu1  ;;  %9927 = vmatmul.mubr.f32.gmra.mxu1 %v2204_v23  ;;  %v2207_v7 = vld [vmem:[#allocation2 + $0x302] sm:$0xff]  ;;  %6921 = vperm.xlu0 %10853, %v6651_v22  }
 0x213   :  { %14611 = vst [vmem:[#allocation51_spill] sm:$0xff] %v11492_v21  ;;  %v11501_v44 = vadd.f32 %v1978_v52, %v1322_v29  ;;  %v1337_v2 = vadd.f32 %v9576_v33, %v14614_v6  ;;  %v9752_v55 = vpop.f32.mrf.mxu0  ;;  %10103 = vmatmul.mubr.f32.gmra.mxu0 %v2957_v13  ;;  %9929 = vmatprep.mubr.f32.mxu1 %v2205_v49  ;;  %v14616_v57 = vld [vmem:[#allocation54_spill] sm:$0xff]  ;;  %v6652_v52 = vld [vmem:[%s14329_s3 + $0x98] sm:$0xff]  ;;  %v2208_v33 = vld [vmem:[#allocation2 + $0x30a] sm:$0xff] }
 0x214   :  { %v1331_v11 = vpop.f32.mrf.mxu1  ;;  %10105 = vmatprep.mubr.f32.mxu0 %v2958_v48  ;;  %v2960_v23 = vld [vmem:[#allocation2 + $0x303] sm:$0xff] }
 0x215   :  { %14613 = vst [vmem:[#allocation52_spill] sm:$0xff] %v11501_v44  ;;  %v11504_v36 = vadd.f32 %v9752_v55, %v1337_v2  ;;  %v1332_v21 = vadd.f32 %v1331_v11, %v14616_v57  ;;  %v1988_v31 = vpop.f32.mrf.mxu0  ;;  %v6653_v29 = vld [vmem:[%s14329_s3 + $0xa0] sm:$0xff]  ;;  %6926 = vperm.xlu1 %10854, %v6652_v52   ;;  %v14617_v48 = vld [vmem:[#allocation55_spill] sm:$0xff]  ;;  %v3619_v55 = vld [vmem:[#allocation2 + $0x14] sm:$0xff] }
 0x216   :  { %v9579_v13 = vpop.f32.mrf.mxu1  ;;  %9930 = vmatmul.mubr.f32.gmra.mxu1 %v2206_v10  ;;  %v2961_v2 = vld [vmem:[#allocation2 + $0x30b] sm:$0xff]  ;;  %6931 = vperm.xlu0 %10853, %v6653_v29  }
 0x217   :  { %14615 = vst [vmem:[#allocation53_spill] sm:$0xff] %v11504_v36  ;;  %v11513_v49 = vadd.f32 %v1988_v31, %v1332_v21  ;;  %v1347_v18 = vadd.f32 %v9579_v13, %v14617_v48  ;;  %v9755_v22 = vpop.f32.mrf.mxu0  ;;  %10106 = vmatmul.mubr.f32.gmra.mxu0 %v2959_v47  ;;  %9932 = vmatprep.mubr.f32.mxu1 %v2207_v7  ;;  %v14619_v57 = vld [vmem:[#allocation56_spill] sm:$0xff]  ;;  %v4372_v10 = vld [vmem:[#allocation2 + $0x24] sm:$0xff]  ;;  %v3620_v13 = vld [vmem:[#allocation2 + $0x1c] sm:$0xff] }
 0x218   :  { %v1341_v6 = vpop.f32.mrf.mxu1  ;;  %10108 = vmatprep.mubr.f32.mxu0 %v2960_v23  ;;  %v6654_v31 = vld [vmem:[%s14329_s3 + $0xa8] sm:$0xff]  ;;  %v6655_v21 = vld [vmem:[%s14329_s3 + $0xb0] sm:$0xff]  ;;  %v14621_v23 = vld [vmem:[#allocation58_spill] sm:$0xff] }
 0x219   :  { %v11516_v11 = vadd.f32 %v9755_v22, %v1347_v18  ;;  %v1342_v36 = vadd.f32 %v1341_v6, %v14619_v57  ;;  %v1998_v44 = vpop.f32.mrf.mxu0  ;;  %6936 = vperm.xlu1 %10854, %v6654_v31   ;;  %v4373_v18 = vld [vmem:[#allocation2 + $0x2c] sm:$0xff]  ;;  %v5235_v31 = vld [vmem:[#allocation5 + $0x3f0] sm:$0xff] }
 0x21a   :  { %v9582_v47 = vpop.f32.mrf.mxu1  ;;  %9933 = vmatmul.mubr.f32.gmra.mxu1 %v2208_v33  ;;  %6941 = vperm.xlu0 %10853, %v6655_v21   ;;  %v14623_v6 = vld [vmem:[#allocation60_spill] sm:$0xff]  ;;  %v10857_v21 = vld [vmem:[#allocation5 + $0x3f8] sm:$0xff] }
 0x21b   :  { %14618 = vst [vmem:[#allocation54_spill] sm:$0xff] %v11516_v11  ;;  %v11525_v7 = vadd.f32 %v1998_v44, %v1342_v36  ;;  %v1357_v52 = vadd.f32 %v9582_v47, %v14621_v23  ;;  %v9758_v29 = vpop.f32.mrf.mxu0  ;;  %10109 = vmatmul.mubr.f32.gmra.mxu0 %v2961_v2  ;;  %10143 = vmatprep.mubr.f32.mxu1 %v3619_v55  ;;  %v6656_v44 = vld [vmem:[%s14329_s3 + $0xb8] sm:$0xff]  ;;  %v14624_v55 = vld [vmem:[#allocation62_spill] sm:$0xff] }
 0x21c   :  { %v1351_v48 = vpop.f32.mrf.mxu1  ;;  %10319 = vmatprep.mubr.f32.mxu0 %v4372_v10  ;;  %v4374_v33 = vld [vmem:[#allocation2 + $0x34] sm:$0xff] }
 0x21d   :  { %14620 = vst [vmem:[#allocation55_spill] sm:$0xff] %v11525_v7  ;;  %v11528_v22 = vadd.f32 %v9758_v29, %v1357_v52  ;;  %v1352_v57 = vadd.f32 %v1351_v48, %v14623_v6  ;;  %v2008_v11 = vpop.f32.mrf.mxu0  ;;  %6946 = vperm.xlu1 %10854, %v6656_v44   ;;  %v5988_v52 = vld [vmem:[#allocation5 + $0x470] sm:$0xff]  ;;  %v10858_v48 = vld [vmem:[#allocation5 + $0x478] sm:$0xff]  ;;  %v5234_v44 = vld [vmem:[#allocation5 + $0x3e8] sm:$0xff] }
 0x21e   :  { %v9793_v36 = vpop.f32.mrf.mxu1  ;;  %10144 = vmatmul.mubr.f32.vlgmr.msra.gmra.mxu1 %v3620_v13  ;;  %v4375_v6 = vld [vmem:[#allocation2 + $0x3c] sm:$0xff] }
 0x21f   :  { %14622 = vst [vmem:[#allocation56_spill] sm:$0xff] %v11528_v22  ;;  %v11534_v2 = vadd.f32 %v2008_v11, %v1352_v57  ;;  %v2771_v47 = vadd.f32 %v9793_v36, %v14624_v55  ;;  %v9969_v23 = vpop.f32.mrf.mxu0  ;;  %10320 = vmatmul.mubr.f32.vlgmr.msra.gmra.mxu0 %v4373_v18  ;;  %10464 = vmatpush3.msra.mxu1 %v10857_v21  ;;  %v4376_v11 = vld [vmem:[#allocation2 + $0x44] sm:$0xff]  ;;  %v5987_v21 = vld [vmem:[#allocation5 + $0x468] sm:$0xff] }
 0x220   :  { %v2291_v29 = vpop.f32.mrf.mxu1  ;;  %10146 = vmatprep.mubr.f32.mxu1 %v4372_v10  ;;  %10640 = vmatpush3.msra.mxu0 %v10858_v48 }
 0x221   :  { %v11537_v22 = vadd.f32 %v9969_v23, %v2771_v47  ;;  %v2770_v13 = vadd.f32 %v2291_v29, %v11180_v61  ;;  %v3044_v7 = vpop.f32.mrf.mxu0  ;;  %10322 = vmatprep.mubr.f32.mxu0 %v4374_v33  ;;  %10465 = vmatprep.subr.mxu1 %v5235_v31  ;;  %v4377_v23 = vld [vmem:[#allocation2 + $0x4c] sm:$0xff] }
 0x222   :  { %v9796_v57 = vpop.f32.mrf.mxu1  ;;  %10147 = vmatmul.mubr.f32.gmra.mxu1 %v4373_v18  ;;  %10641 = vmatprep.subr.mxu0 %v5988_v52  ;;  %v4378_v18 = vld [vmem:[#allocation2 + $0x54] sm:$0xff] }
 0x223   :  { %v11540_v36 = vadd.f32 %v3044_v7, %v2770_v13  ;;  %v2773_v55 = vadd.f32 %v9796_v57, %v11183_v35  ;;  %v9972_v10 = vpop.f32.mrf.mxu0  ;;  %10323 = vmatmul.mubr.f32.gmra.mxu0 %v4375_v6  ;;  %10149 = vmatprep.mubr.f32.mxu1 %v4374_v33  ;;  %v5233_v35 = vld [vmem:[#allocation5 + $0x3e0] sm:$0xff] }
 0x224   :  { %v2301_v47 = vpop.f32.mrf.mxu1  ;;  %10325 = vmatprep.mubr.f32.mxu0 %v4376_v11  ;;  %10466 = vmatpush3.msra.mxu1 %v5235_v31  ;;  %v5986_v31 = vld [vmem:[#allocation5 + $0x460] sm:$0xff] }
 0x225   :  { %v11543_v61 = vadd.f32 %v9972_v10, %v2773_v55  ;;  %v2772_v29 = vadd.f32 %v2301_v47, %v11186_v51  ;;  %v3054_v48 = vpop.f32.mrf.mxu0  ;;  %10642 = vmatpush3.msra.mxu0 %v5988_v52  ;;  %10467 = vmatprep.subr.mxu1 %v5234_v44  ;;  %v4379_v10 = vld [vmem:[#allocation2 + $0x5c] sm:$0xff] }
 0x226   :  { %v9799_v7 = vpop.f32.mrf.mxu1  ;;  %10150 = vmatmul.mubr.f32.gmra.mxu1 %v4375_v6  ;;  %10643 = vmatprep.subr.mxu0 %v5987_v21  ;;  %v4380_v6 = vld [vmem:[#allocation2 + $0x64] sm:$0xff] }
 0x227   :  { %v11546_v13 = vadd.f32 %v3054_v48, %v2772_v29  ;;  %v2775_v33 = vadd.f32 %v9799_v7, %v11189_v56  ;;  %v9975_v57 = vpop.f32.mrf.mxu0  ;;  %10326 = vmatmul.mubr.f32.gmra.mxu0 %v4377_v23  ;;  %10152 = vmatprep.mubr.f32.mxu1 %v4376_v11  ;;  %v5232_v56 = vld [vmem:[#allocation5 + $0x3d8] sm:$0xff] }
 0x228   :  { %v2311_v55 = vpop.f32.mrf.mxu1  ;;  %10328 = vmatprep.mubr.f32.mxu0 %v4378_v18  ;;  %10468 = vmatpush3.msra.mxu1 %v5234_v44  ;;  %v5985_v44 = vld [vmem:[#allocation5 + $0x458] sm:$0xff] }
 0x229   :  { %v11549_v51 = vadd.f32 %v9975_v57, %v2775_v33  ;;  %v2774_v52 = vadd.f32 %v2311_v55, %v11192_v30  ;;  %v3064_v47 = vpop.f32.mrf.mxu0  ;;  %10644 = vmatpush3.msra.mxu0 %v5987_v21  ;;  %10469 = vmatprep.subr.mxu1 %v5233_v35  ;;  %v4381_v57 = vld [vmem:[#allocation2 + $0x6c] sm:$0xff] }
 0x22a   :  { %v9802_v29 = vpop.f32.mrf.mxu1  ;;  %10153 = vmatmul.mubr.f32.gmra.mxu1 %v4377_v23  ;;  %10645 = vmatprep.subr.mxu0 %v5986_v31  ;;  %v4382_v23 = vld [vmem:[#allocation2 + $0x74] sm:$0xff] }
 0x22b   :  { %v11552_v48 = vadd.f32 %v3064_v47, %v2774_v52  ;;  %v2777_v11 = vadd.f32 %v9802_v29, %v11195_v27  ;;  %v9978_v7 = vpop.f32.mrf.mxu0  ;;  %10329 = vmatmul.mubr.f32.gmra.mxu0 %v4379_v10  ;;  %10155 = vmatprep.mubr.f32.mxu1 %v4378_v18  ;;  %v5231_v27 = vld [vmem:[#allocation5 + $0x3d0] sm:$0xff] }
 0x22c   :  { %v2321_v33 = vpop.f32.mrf.mxu1  ;;  %10331 = vmatprep.mubr.f32.mxu0 %v4380_v6  ;;  %10470 = vmatpush3.msra.mxu1 %v5233_v35  ;;  %v5984_v35 = vld [vmem:[#allocation5 + $0x450] sm:$0xff] }
 0x22d   :  { %v11555_v30 = vadd.f32 %v9978_v7, %v2777_v11  ;;  %v2776_v21 = vadd.f32 %v2321_v33, %v11198_v38  ;;  %v3074_v55 = vpop.f32.mrf.mxu0  ;;  %10646 = vmatpush3.msra.mxu0 %v5986_v31  ;;  %10471 = vmatprep.subr.mxu1 %v5232_v56  ;;  %v4383_v7 = vld [vmem:[#allocation2 + $0x7c] sm:$0xff] }
 0x22e   :  { %v9805_v52 = vpop.f32.mrf.mxu1  ;;  %10156 = vmatmul.mubr.f32.gmra.mxu1 %v4379_v10  ;;  %10647 = vmatprep.subr.mxu0 %v5985_v44  ;;  %v4384_v10 = vld [vmem:[#allocation2 + $0x84] sm:$0xff] }
 0x22f   :  { %v11558_v47 = vadd.f32 %v3074_v55, %v2776_v21  ;;  %v2779_v18 = vadd.f32 %v9805_v52, %v11201_v20  ;;  %v9981_v29 = vpop.f32.mrf.mxu0  ;;  %10332 = vmatmul.mubr.f32.gmra.mxu0 %v4381_v57  ;;  %10158 = vmatprep.mubr.f32.mxu1 %v4380_v6  ;;  %v5230_v20 = vld [vmem:[#allocation5 + $0x3c8] sm:$0xff] }
 0x230   :  { %v2331_v11 = vpop.f32.mrf.mxu1  ;;  %10334 = vmatprep.mubr.f32.mxu0 %v4382_v23  ;;  %10472 = vmatpush3.msra.mxu1 %v5232_v56  ;;  %v5983_v56 = vld [vmem:[#allocation5 + $0x448] sm:$0xff] }
 0x231   :  { %v11561_v38 = vadd.f32 %v9981_v29, %v2779_v18  ;;  %v2778_v31 = vadd.f32 %v2331_v11, %v11204_v46  ;;  %v3084_v33 = vpop.f32.mrf.mxu0  ;;  %10648 = vmatpush3.msra.mxu0 %v5985_v44  ;;  %10473 = vmatprep.subr.mxu1 %v5231_v27  ;;  %v4385_v29 = vld [vmem:[#allocation2 + $0x8c] sm:$0xff] }
 0x232   :  { %v9808_v21 = vpop.f32.mrf.mxu1  ;;  %10159 = vmatmul.mubr.f32.gmra.mxu1 %v4381_v57  ;;  %10649 = vmatprep.subr.mxu0 %v5984_v35  ;;  %v4386_v57 = vld [vmem:[#allocation2 + $0x94] sm:$0xff] }
 0x233   :  { %v11564_v55 = vadd.f32 %v3084_v33, %v2778_v31  ;;  %v2781_v6 = vadd.f32 %v9808_v21, %v11207_v50  ;;  %v9984_v52 = vpop.f32.mrf.mxu0  ;;  %10335 = vmatmul.mubr.f32.gmra.mxu0 %v4383_v7  ;;  %10161 = vmatprep.mubr.f32.mxu1 %v4382_v23  ;;  %v5229_v50 = vld [vmem:[#allocation5 + $0x3c0] sm:$0xff] }
 0x234   :  { %v2341_v18 = vpop.f32.mrf.mxu1  ;;  %10337 = vmatprep.mubr.f32.mxu0 %v4384_v10  ;;  %10474 = vmatpush3.msra.mxu1 %v5231_v27  ;;  %v5982_v27 = vld [vmem:[#allocation5 + $0x440] sm:$0xff] }
 0x235   :  { %v11567_v46 = vadd.f32 %v9984_v52, %v2781_v6  ;;  %v2780_v44 = vadd.f32 %v2341_v18, %v11210_v54  ;;  %v3094_v11 = vpop.f32.mrf.mxu0  ;;  %10650 = vmatpush3.msra.mxu0 %v5984_v35  ;;  %10475 = vmatprep.subr.mxu1 %v5230_v20  ;;  %v4387_v52 = vld [vmem:[#allocation2 + $0x9c] sm:$0xff] }
 0x236   :  { %v9811_v31 = vpop.f32.mrf.mxu1  ;;  %10162 = vmatmul.mubr.f32.gmra.mxu1 %v4383_v7  ;;  %10651 = vmatprep.subr.mxu0 %v5983_v56  ;;  %v4388_v7 = vld [vmem:[#allocation2 + $0xa4] sm:$0xff] }
 0x237   :  { %v11570_v33 = vadd.f32 %v3094_v11, %v2780_v44  ;;  %v2783_v23 = vadd.f32 %v9811_v31, %v11213_v43  ;;  %v9987_v21 = vpop.f32.mrf.mxu0  ;;  %10338 = vmatmul.mubr.f32.gmra.mxu0 %v4385_v29  ;;  %10164 = vmatprep.mubr.f32.mxu1 %v4384_v10  ;;  %v5228_v43 = vld [vmem:[#allocation5 + $0x3b8] sm:$0xff] }
 0x238   :  { %v2351_v6 = vpop.f32.mrf.mxu1  ;;  %10340 = vmatprep.mubr.f32.mxu0 %v4386_v57  ;;  %10476 = vmatpush3.msra.mxu1 %v5230_v20  ;;  %v5981_v20 = vld [vmem:[#allocation5 + $0x438] sm:$0xff] }
 0x239   :  { %v11573_v54 = vadd.f32 %v9987_v21, %v2783_v23  ;;  %v2782_v35 = vadd.f32 %v2351_v6, %v11216_v0  ;;  %v3104_v18 = vpop.f32.mrf.mxu0  ;;  %10652 = vmatpush3.msra.mxu0 %v5983_v56  ;;  %10477 = vmatprep.subr.mxu1 %v5229_v50  ;;  %v4389_v21 = vld [vmem:[#allocation2 + $0xac] sm:$0xff] }
 0x23a   :  { %v9814_v44 = vpop.f32.mrf.mxu1  ;;  %10165 = vmatmul.mubr.f32.gmra.mxu1 %v4385_v29  ;;  %10653 = vmatprep.subr.mxu0 %v5982_v27  ;;  %v4390_v29 = vld [vmem:[#allocation2 + $0xb4] sm:$0xff] }
 0x23b   :  { %v11576_v11 = vadd.f32 %v3104_v18, %v2782_v35  ;;  %v2785_v10 = vadd.f32 %v9814_v44, %v11219_v25  ;;  %v9990_v31 = vpop.f32.mrf.mxu0  ;;  %10341 = vmatmul.mubr.f32.gmra.mxu0 %v4387_v52  ;;  %10167 = vmatprep.mubr.f32.mxu1 %v4386_v57  ;;  %v5227_v25 = vld [vmem:[#allocation5 + $0x3b0] sm:$0xff] }
 0x23c   :  { %v2361_v23 = vpop.f32.mrf.mxu1  ;;  %10343 = vmatprep.mubr.f32.mxu0 %v4388_v7  ;;  %10478 = vmatpush3.msra.mxu1 %v5229_v50  ;;  %v5980_v50 = vld [vmem:[#allocation5 + $0x430] sm:$0xff] }
 0x23d   :  { %v11579_v0 = vadd.f32 %v9990_v31, %v2785_v10  ;;  %v2784_v56 = vadd.f32 %v2361_v23, %v11222_v8  ;;  %v3114_v6 = vpop.f32.mrf.mxu0  ;;  %10654 = vmatpush3.msra.mxu0 %v5982_v27  ;;  %10479 = vmatprep.subr.mxu1 %v5228_v43  ;;  %v4391_v31 = vld [vmem:[#allocation2 + $0xbc] sm:$0xff] }
 0x23e   :  { %v9817_v35 = vpop.f32.mrf.mxu1  ;;  %10168 = vmatmul.mubr.f32.gmra.mxu1 %v4387_v52  ;;  %10655 = vmatprep.subr.mxu0 %v5981_v20  ;;  %v4392_v52 = vld [vmem:[#allocation2 + $0xc4] sm:$0xff] }
 0x23f   :  { %v11582_v18 = vadd.f32 %v3114_v6, %v2784_v56  ;;  %v2787_v57 = vadd.f32 %v9817_v35, %v11225_v28  ;;  %v9993_v44 = vpop.f32.mrf.mxu0  ;;  %10344 = vmatmul.mubr.f32.gmra.mxu0 %v4389_v21  ;;  %10170 = vmatprep.mubr.f32.mxu1 %v4388_v7  ;;  %v5226_v28 = vld [vmem:[#allocation5 + $0x3a8] sm:$0xff] }
 0x240   :  { %v2371_v10 = vpop.f32.mrf.mxu1  ;;  %10346 = vmatprep.mubr.f32.mxu0 %v4390_v29  ;;  %10480 = vmatpush3.msra.mxu1 %v5228_v43  ;;  %v5979_v43 = vld [vmem:[#allocation5 + $0x428] sm:$0xff] }
 0x241   :  { %v11585_v8 = vadd.f32 %v9993_v44, %v2787_v57  ;;  %v2786_v27 = vadd.f32 %v2371_v10, %v11228_v16  ;;  %v3124_v23 = vpop.f32.mrf.mxu0  ;;  %10656 = vmatpush3.msra.mxu0 %v5981_v20  ;;  %10481 = vmatprep.subr.mxu1 %v5227_v25  ;;  %v4393_v44 = vld [vmem:[#allocation2 + $0xcc] sm:$0xff] }
 0x242   :  { %v9820_v56 = vpop.f32.mrf.mxu1  ;;  %10171 = vmatmul.mubr.f32.gmra.mxu1 %v4389_v21  ;;  %10657 = vmatprep.subr.mxu0 %v5980_v50  ;;  %v4394_v21 = vld [vmem:[#allocation2 + $0xd4] sm:$0xff] }
 0x243   :  { %v11588_v6 = vadd.f32 %v3124_v23, %v2786_v27  ;;  %v2789_v7 = vadd.f32 %v9820_v56, %v11231_v24  ;;  %v9996_v35 = vpop.f32.mrf.mxu0  ;;  %10347 = vmatmul.mubr.f32.gmra.mxu0 %v4391_v31  ;;  %10173 = vmatprep.mubr.f32.mxu1 %v4390_v29  ;;  %v6657_v24 = vld [vmem:[%s14329_s3 + $0xc0] sm:$0xff] }
 0x244   :  { %v2381_v57 = vpop.f32.mrf.mxu1  ;;  %10349 = vmatprep.mubr.f32.mxu0 %v4392_v52  ;;  %10482 = vmatpush3.msra.mxu1 %v5227_v25  ;;  %v4395_v56 = vld [vmem:[#allocation2 + $0xdc] sm:$0xff] }
 0x245   :  { %v11591_v16 = vadd.f32 %v9996_v35, %v2789_v7  ;;  %v2788_v20 = vadd.f32 %v2381_v57, %v11234_v26  ;;  %v3134_v10 = vpop.f32.mrf.mxu0  ;;  %10658 = vmatpush3.msra.mxu0 %v5980_v50  ;;  %10483 = vmatprep.subr.mxu1 %v5226_v28  ;;  %v6658_v26 = vld [vmem:[%s14329_s3 + $0xc8] sm:$0xff] }
 0x246   :  { %v9823_v27 = vpop.f32.mrf.mxu1  ;;  %10174 = vmatmul.mubr.f32.gmra.mxu1 %v4391_v31  ;;  %10659 = vmatprep.subr.mxu0 %v5979_v43  ;;  %v4396_v57 = vld [vmem:[#allocation2 + $0xe4] sm:$0xff] }
 0x247   :  { %v11597_v29 = vadd.f32 %v3134_v10, %v2788_v20  ;;  %v2791_v23 = vadd.f32 %v9823_v27, %v11237_v37  ;;  %v9999_v25 = vpop.f32.mrf.mxu0  ;;  %10350 = vmatmul.mubr.f32.gmra.mxu0 %v4393_v44  ;;  %10176 = vmatprep.mubr.f32.mxu1 %v4392_v52  ;;  %v5225_v37 = vld [vmem:[#allocation5 + $0x3a0] sm:$0xff]  ;;  %v6659_v52 = vld [vmem:[%s14329_s3 + $0xd0] sm:$0xff] }
 0x248   :  { %v2391_v50 = vpop.f32.mrf.mxu1  ;;  %10352 = vmatprep.mubr.f32.mxu0 %v4394_v21  ;;  %10484 = vmatpush3.msra.mxu1 %v5226_v28 }
 0x249   :  { %v11603_v31 = vadd.f32 %v9999_v25, %v2791_v23  ;;  %v2790_v7 = vadd.f32 %v2391_v50, %v11240_v42  ;;  %v3144_v35 = vpop.f32.mrf.mxu0  ;;  %10660 = vmatpush3.msra.mxu0 %v5979_v43  ;;  %6951 = vperm.xlu0 %10853, %v6657_v24   ;;  %v5978_v42 = vld [vmem:[#allocation5 + $0x420] sm:$0xff] }
 0x24a   :  { %v9826_v20 = vpop.f32.mrf.mxu1  ;;  %10177 = vmatmul.mubr.f32.gmra.mxu1 %v4393_v44  ;;  %6956 = vperm.xlu1 %10854, %v6658_v26   ;;  %v4397_v43 = vld [vmem:[#allocation2 + $0xec] sm:$0xff]  ;;  %v4398_v26 = vld [vmem:[#allocation2 + $0xf4] sm:$0xff] }
 0x24b   :  { %v11609_v10 = vadd.f32 %v3144_v35, %v2790_v7  ;;  %v2793_v28 = vadd.f32 %v9826_v20, %v11243_v40  ;;  %v10002_v27 = vpop.f32.mrf.mxu0  ;;  %10353 = vmatmul.mubr.f32.gmra.mxu0 %v4395_v56  ;;  %10179 = vmatprep.mubr.f32.mxu1 %v4394_v21  ;;  %v6660_v40 = vld [vmem:[%s14329_s3 + $0xd8] sm:$0xff]  ;;  %v6661_v21 = vld [vmem:[%s14329_s3 + $0xe0] sm:$0xff] }
 0x24c   :  { %v2401_v23 = vpop.f32.mrf.mxu1  ;;  %10355 = vmatprep.mubr.f32.mxu0 %v4396_v57  ;;  %10485 = vmatprep.subr.mxu1 %v5225_v37  ;;  %v5224_v20 = vld [vmem:[#allocation5 + $0x398] sm:$0xff] }
 0x24d   :  { %v11612_v24 = vadd.f32 %v10002_v27, %v2793_v28  ;;  %v2792_v44 = vadd.f32 %v2401_v23, %v11246_v60  ;;  %v3154_v25 = vpop.f32.mrf.mxu0  ;;  %6961 = vperm.xlu0 %10853, %v6659_v52   ;;  %10486 = vmatpush3.msra.mxu1 %v5225_v37  ;;  %v4400_v23 = vld [vmem:[#allocation2 + $0x104] sm:$0xff] }
 0x24e   :  { %v9829_v50 = vpop.f32.mrf.mxu1  ;;  %10180 = vmatmul.mubr.f32.gmra.mxu1 %v4395_v56  ;;  %10661 = vmatprep.subr.mxu0 %v5978_v42  ;;  %v4399_v56 = vld [vmem:[#allocation2 + $0xfc] sm:$0xff] }
 0x24f   :  { %v11621_v7 = vadd.f32 %v3154_v25, %v2792_v44  ;;  %v2795_v35 = vadd.f32 %v9829_v50, %v11249_v5  ;;  %v10005_v60 = vpop.f32.mrf.mxu0  ;;  %10356 = vmatmul.mubr.f32.gmra.mxu0 %v4397_v43  ;;  %10182 = vmatprep.mubr.f32.mxu1 %v4396_v57  ;;  %v6662_v5 = vld [vmem:[%s14329_s3 + $0xe8] sm:$0xff]  ;;  %v6663_v57 = vld [vmem:[%s14329_s3 + $0xf0] sm:$0xff]  ;;  %v5977_v50 = vld [vmem:[#allocation5 + $0x418] sm:$0xff] }
 0x250   :  { %v2411_v37 = vpop.f32.mrf.mxu1  ;;  %10358 = vmatprep.mubr.f32.mxu0 %v4398_v26  ;;  %10662 = vmatpush3.msra.mxu0 %v5978_v42 }
 0x251   :  { %v11624_v52 = vadd.f32 %v10005_v60, %v2795_v35  ;;  %v2794_v28 = vadd.f32 %v2411_v37, %v11252_v12  ;;  %v3164_v27 = vpop.f32.mrf.mxu0  ;;  %6966 = vperm.xlu1 %10854, %v6660_v40   ;;  %6971 = vperm.xlu0 %10853, %v6661_v21   ;;  %v4402_v37 = vld [vmem:[#allocation2 + $0x114] sm:$0xff] }
 0x252   :  { %v9832_v44 = vpop.f32.mrf.mxu1  ;;  %10183 = vmatmul.mubr.f32.gmra.mxu1 %v4397_v43  ;;  %10487 = vmatprep.subr.mxu1 %v5224_v20  ;;  %v4401_v43 = vld [vmem:[#allocation2 + $0x10c] sm:$0xff] }
 0x253   :  { %v11633_v42 = vadd.f32 %v3164_v27, %v2794_v28  ;;  %v2797_v25 = vadd.f32 %v9832_v44, %v11255_v59  ;;  %v10008_v12 = vpop.f32.mrf.mxu0  ;;  %10359 = vmatmul.mubr.f32.gmra.mxu0 %v4399_v56  ;;  %10185 = vmatprep.mubr.f32.mxu1 %v4398_v26  ;;  %v6664_v59 = vld [vmem:[%s14329_s3 + $0xf8] sm:$0xff]  ;;  %v6665_v26 = vld [vmem:[%s14329_s3 + $0x100] sm:$0xff] }
 0x254   :  { %v2421_v40 = vpop.f32.mrf.mxu1  ;;  %10361 = vmatprep.mubr.f32.mxu0 %v4400_v23  ;;  %10488 = vmatpush3.msra.mxu1 %v5224_v20  ;;  %v5223_v44 = vld [vmem:[#allocation5 + $0x390] sm:$0xff] }
 0x255   :  { %v11636_v21 = vadd.f32 %v10008_v12, %v2797_v25  ;;  %v2796_v35 = vadd.f32 %v2421_v40, %v11258_v34  ;;  %v3174_v60 = vpop.f32.mrf.mxu0  ;;  %6976 = vperm.xlu1 %10854, %v6662_v5   ;;  %6981 = vperm.xlu0 %10853, %v6663_v57   ;;  %v4404_v40 = vld [vmem:[#allocation2 + $0x124] sm:$0xff] }
 0x256   :  { %v9835_v28 = vpop.f32.mrf.mxu1  ;;  %10186 = vmatmul.mubr.f32.gmra.mxu1 %v4399_v56  ;;  %10663 = vmatprep.subr.mxu0 %v5977_v50  ;;  %v4403_v56 = vld [vmem:[#allocation2 + $0x11c] sm:$0xff] }
 0x257   :  { %v11645_v20 = vadd.f32 %v3174_v60, %v2796_v35  ;;  %v2799_v27 = vadd.f32 %v9835_v28, %v11261_v32  ;;  %v10011_v34 = vpop.f32.mrf.mxu0  ;;  %10362 = vmatmul.mubr.f32.gmra.mxu0 %v4401_v43  ;;  %10188 = vmatprep.mubr.f32.mxu1 %v4400_v23  ;;  %v6666_v32 = vld [vmem:[%s14329_s3 + $0x108] sm:$0xff]  ;;  %v6667_v23 = vld [vmem:[%s14329_s3 + $0x110] sm:$0xff]  ;;  %v5976_v28 = vld [vmem:[#allocation5 + $0x410] sm:$0xff] }
 0x258   :  { %v2431_v5 = vpop.f32.mrf.mxu1  ;;  %10364 = vmatprep.mubr.f32.mxu0 %v4402_v37  ;;  %10664 = vmatpush3.msra.mxu0 %v5977_v50 }
 0x259   :  { %v11648_v57 = vadd.f32 %v10011_v34, %v2799_v27  ;;  %v2798_v25 = vadd.f32 %v2431_v5, %v11264_v15  ;;  %v3184_v12 = vpop.f32.mrf.mxu0  ;;  %6986 = vperm.xlu1 %10854, %v6664_v59   ;;  %6991 = vperm.xlu0 %10853, %v6665_v26   ;;  %v4406_v5 = vld [vmem:[#allocation2 + $0x134] sm:$0xff] }
 0x25a   :  { %v9838_v35 = vpop.f32.mrf.mxu1  ;;  %10189 = vmatmul.mubr.f32.gmra.mxu1 %v4401_v43  ;;  %10489 = vmatprep.subr.mxu1 %v5223_v44  ;;  %v4405_v43 = vld [vmem:[#allocation2 + $0x12c] sm:$0xff] }
 0x25b   :  { %v11657_v50 = vadd.f32 %v3184_v12, %v2798_v25  ;;  %v2801_v60 = vadd.f32 %v9838_v35, %v11267_v39  ;;  %v10014_v15 = vpop.f32.mrf.mxu0  ;;  %10365 = vmatmul.mubr.f32.gmra.mxu0 %v4403_v56  ;;  %10191 = vmatprep.mubr.f32.mxu1 %v4402_v37  ;;  %v6668_v39 = vld [vmem:[%s14329_s3 + $0x118] sm:$0xff]  ;;  %v6669_v37 = vld [vmem:[%s14329_s3 + $0x120] sm:$0xff]  ;;  %v5222_v35 = vld [vmem:[#allocation5 + $0x388] sm:$0xff] }
 0x25c   :  { %v2441_v59 = vpop.f32.mrf.mxu1  ;;  %10367 = vmatprep.mubr.f32.mxu0 %v4404_v40  ;;  %10490 = vmatpush3.msra.mxu1 %v5223_v44 }
 0x25d   :  { %v11660_v26 = vadd.f32 %v10014_v15, %v2801_v60  ;;  %v2800_v27 = vadd.f32 %v2441_v59, %v11270_v58  ;;  %v3194_v34 = vpop.f32.mrf.mxu0  ;;  %6996 = vperm.xlu1 %10854, %v6666_v32   ;;  %7001 = vperm.xlu0 %10853, %v6667_v23   ;;  %v4408_v59 = vld [vmem:[#allocation2 + $0x144] sm:$0xff] }
 0x25e   :  { %v9841_v25 = vpop.f32.mrf.mxu1  ;;  %10192 = vmatmul.mubr.f32.gmra.mxu1 %v4403_v56  ;;  %10665 = vmatprep.subr.mxu0 %v5976_v28  ;;  %v4407_v56 = vld [vmem:[#allocation2 + $0x13c] sm:$0xff] }
 0x25f   :  { %v11669_v44 = vadd.f32 %v3194_v34, %v2800_v27  ;;  %v2803_v12 = vadd.f32 %v9841_v25, %v11273_v9  ;;  %v10017_v58 = vpop.f32.mrf.mxu0  ;;  %10368 = vmatmul.mubr.f32.gmra.mxu0 %v4405_v43  ;;  %10194 = vmatprep.mubr.f32.mxu1 %v4404_v40  ;;  %v6670_v9 = vld [vmem:[%s14329_s3 + $0x128] sm:$0xff]  ;;  %v6671_v40 = vld [vmem:[%s14329_s3 + $0x130] sm:$0xff] }
 0x260   :  { %v2451_v32 = vpop.f32.mrf.mxu1  ;;  %10370 = vmatprep.mubr.f32.mxu0 %v4406_v5  ;;  %10666 = vmatpush3.msra.mxu0 %v5976_v28  ;;  %v5975_v25 = vld [vmem:[#allocation5 + $0x408] sm:$0xff] }
 0x261   :  { %v11672_v23 = vadd.f32 %v10017_v58, %v2803_v12  ;;  %v2802_v60 = vadd.f32 %v2451_v32, %v11276_v45  ;;  %v3204_v15 = vpop.f32.mrf.mxu0  ;;  %7006 = vperm.xlu1 %10854, %v6668_v39   ;;  %7011 = vperm.xlu0 %10853, %v6669_v37   ;;  %v4410_v32 = vld [vmem:[#allocation2 + $0x154] sm:$0xff] }
 0x262   :  { %v9844_v27 = vpop.f32.mrf.mxu1  ;;  %10195 = vmatmul.mubr.f32.gmra.mxu1 %v4405_v43  ;;  %10491 = vmatprep.subr.mxu1 %v5222_v35  ;;  %v4409_v43 = vld [vmem:[#allocation2 + $0x14c] sm:$0xff] }
 0x263   :  { %v11681_v28 = vadd.f32 %v3204_v15, %v2802_v60  ;;  %v2805_v34 = vadd.f32 %v9844_v27, %v11279_v17  ;;  %v10020_v45 = vpop.f32.mrf.mxu0  ;;  %10371 = vmatmul.mubr.f32.gmra.mxu0 %v4407_v56  ;;  %10197 = vmatprep.mubr.f32.mxu1 %v4406_v5  ;;  %v6672_v17 = vld [vmem:[%s14329_s3 + $0x138] sm:$0xff]  ;;  %v6673_v5 = vld [vmem:[%s14329_s3 + $0x140] sm:$0xff]  ;;  %v5221_v27 = vld [vmem:[#allocation5 + $0x380] sm:$0xff] }
 0x264   :  { %v2461_v39 = vpop.f32.mrf.mxu1  ;;  %10373 = vmatprep.mubr.f32.mxu0 %v4408_v59  ;;  %10492 = vmatpush3.msra.mxu1 %v5222_v35 }
 0x265   :  { %v11684_v37 = vadd.f32 %v10020_v45, %v2805_v34  ;;  %v2804_v12 = vadd.f32 %v2461_v39, %v11282_v19  ;;  %v3214_v58 = vpop.f32.mrf.mxu0  ;;  %7016 = vperm.xlu1 %10854, %v6670_v9   ;;  %7021 = vperm.xlu0 %10853, %v6671_v40   ;;  %v4412_v39 = vld [vmem:[#allocation2 + $0x164] sm:$0xff] }
 0x266   :  { %v9847_v60 = vpop.f32.mrf.mxu1  ;;  %10198 = vmatmul.mubr.f32.gmra.mxu1 %v4407_v56  ;;  %10667 = vmatprep.subr.mxu0 %v5975_v25  ;;  %v4411_v56 = vld [vmem:[#allocation2 + $0x15c] sm:$0xff] }
 0x267   :  { %v11693_v35 = vadd.f32 %v3214_v58, %v2804_v12  ;;  %v2807_v15 = vadd.f32 %v9847_v60, %v11285_v4  ;;  %v10023_v19 = vpop.f32.mrf.mxu0  ;;  %10374 = vmatmul.mubr.f32.gmra.mxu0 %v4409_v43  ;;  %10200 = vmatprep.mubr.f32.mxu1 %v4408_v59  ;;  %v6674_v4 = vld [vmem:[%s14329_s3 + $0x148] sm:$0xff]  ;;  %v6675_v59 = vld [vmem:[%s14329_s3 + $0x150] sm:$0xff] }
 0x268   :  { %v2471_v9 = vpop.f32.mrf.mxu1  ;;  %10376 = vmatprep.mubr.f32.mxu0 %v4410_v32  ;;  %10668 = vmatpush3.msra.mxu0 %v5975_v25  ;;  %v5974_v60 = vld [vmem:[#allocation5 + $0x400] sm:$0xff] }
 0x269   :  { %v11696_v40 = vadd.f32 %v10023_v19, %v2807_v15  ;;  %v2806_v34 = vadd.f32 %v2471_v9, %v11288_v41  ;;  %v3224_v45 = vpop.f32.mrf.mxu0  ;;  %7026 = vperm.xlu1 %10854, %v6672_v17   ;;  %7031 = vperm.xlu0 %10853, %v6673_v5   ;;  %v4414_v9 = vld [vmem:[#allocation2 + $0x174] sm:$0xff] }
 0x26a   :  { %v9850_v12 = vpop.f32.mrf.mxu1  ;;  %10201 = vmatmul.mubr.f32.gmra.mxu1 %v4409_v43  ;;  %10493 = vmatprep.subr.mxu1 %v5221_v27  ;;  %v4413_v43 = vld [vmem:[#allocation2 + $0x16c] sm:$0xff] }
 0x26b   :  { %v11705_v25 = vadd.f32 %v3224_v45, %v2806_v34  ;;  %v2809_v58 = vadd.f32 %v9850_v12, %v11291_v63  ;;  %v10026_v41 = vpop.f32.mrf.mxu0  ;;  %10377 = vmatmul.mubr.f32.gmra.mxu0 %v4411_v56  ;;  %10203 = vmatprep.mubr.f32.mxu1 %v4410_v32  ;;  %v6676_v63 = vld [vmem:[%s14329_s3 + $0x158] sm:$0xff]  ;;  %v6677_v32 = vld [vmem:[%s14329_s3 + $0x160] sm:$0xff] }
 0x26c   :  { %v2481_v17 = vpop.f32.mrf.mxu1  ;;  %10379 = vmatprep.mubr.f32.mxu0 %v4412_v39  ;;  %10494 = vmatpush3.msra.mxu1 %v5221_v27 }
 0x26d   :  { %v11708_v5 = vadd.f32 %v10026_v41, %v2809_v58  ;;  %v2808_v15 = vadd.f32 %v2481_v17, %v11294_v1  ;;  %v3234_v19 = vpop.f32.mrf.mxu0  ;;  %7036 = vperm.xlu1 %10854, %v6674_v4   ;;  %7041 = vperm.xlu0 %10853, %v6675_v59   ;;  %v4415_v4 = vld [vmem:[#allocation2 + $0x17c] sm:$0xff]  ;;  %v4416_v41 = vld [vmem:[#allocation2 + $0x184] sm:$0xff] }
 0x26e   :  { %v9853_v34 = vpop.f32.mrf.mxu1  ;;  %10204 = vmatmul.mubr.f32.gmra.mxu1 %v4411_v56  ;;  %10669 = vmatprep.subr.mxu0 %v5974_v60 }
 0x26f   :  { %v11717_v27 = vadd.f32 %v3234_v19, %v2808_v15  ;;  %v2811_v45 = vadd.f32 %v9853_v34, %v11297_v62  ;;  %v10029_v1 = vpop.f32.mrf.mxu0  ;;  %10380 = vmatmul.mubr.f32.gmra.mxu0 %v4413_v43  ;;  %10206 = vmatprep.mubr.f32.mxu1 %v4412_v39  ;;  %v6678_v62 = vld [vmem:[%s14329_s3 + $0x168] sm:$0xff]  ;;  %v6679_v39 = vld [vmem:[%s14329_s3 + $0x170] sm:$0xff] }
 0x270   :  { %v2491_v12 = vpop.f32.mrf.mxu1  ;;  %10382 = vmatprep.mubr.f32.mxu0 %v4414_v9  ;;  %10670 = vmatpush3.msra.mxu0 %v5974_v60  ;;  %v4417_v34 = vld [vmem:[#allocation2 + $0x18c] sm:$0xff] }
 0x271   :  { %v11720_v56 = vadd.f32 %v10029_v1, %v2811_v45  ;;  %v2810_v59 = vadd.f32 %v2491_v12, %v11300_v3  ;;  %v3244_v58 = vpop.f32.mrf.mxu0  ;;  %7046 = vperm.xlu1 %10854, %v6676_v63   ;;  %7051 = vperm.xlu0 %10853, %v6677_v32   ;;  %v4418_v45 = vld [vmem:[#allocation2 + $0x194] sm:$0xff] }
 0x272   :  { %v9856_v17 = vpop.f32.mrf.mxu1  ;;  %10207 = vmatmul.mubr.f32.gmra.mxu1 %v4413_v43 }
 0x273   :  { %v11729_v15 = vadd.f32 %v3244_v58, %v2810_v59  ;;  %v2813_v60 = vadd.f32 %v9856_v17, %v11303_v53  ;;  %v10032_v19 = vpop.f32.mrf.mxu0  ;;  %10383 = vmatmul.mubr.f32.gmra.mxu0 %v4415_v4  ;;  %10209 = vmatprep.mubr.f32.mxu1 %v4414_v9  ;;  %v6680_v53 = vld [vmem:[%s14329_s3 + $0x178] sm:$0xff]  ;;  %v6681_v9 = vld [vmem:[%s14329_s3 + $0x180] sm:$0xff]  ;;  %v14627_v59 = vld [vmem:[#allocation63_spill] sm:$0xff] }
 0x274   :  { %v2501_v3 = vpop.f32.mrf.mxu1  ;;  %10385 = vmatprep.mubr.f32.mxu0 %v4416_v41 }
 0x275   :  { %v11732_v63 = vadd.f32 %v10032_v19, %v2813_v60  ;;  %v2812_v43 = vadd.f32 %v2501_v3, %v11306_v14  ;;  %v3254_v32 = vpop.f32.mrf.mxu0  ;;  %7056 = vperm.xlu1 %10854, %v6678_v62   ;;  %7061 = vperm.xlu0 %10853, %v6679_v39   ;;  %v4419_v62 = vld [vmem:[#allocation2 + $0x19c] sm:$0xff]  ;;  %v4420_v3 = vld [vmem:[#allocation2 + $0x1a4] sm:$0xff] }
 0x276   :  { %v9859_v1 = vpop.f32.mrf.mxu1  ;;  %10210 = vmatmul.mubr.f32.gmra.mxu1 %v4415_v4  ;;  %v14629_v4 = vld [vmem:[#allocation57_spill] sm:$0xff] }
 0x277   :  { %14625 = vst [vmem:[#allocation58_spill] sm:$0xff] %v11732_v63  ;;  %v11741_v12 = vadd.f32 %v3254_v32, %v2812_v43  ;;  %v2815_v58 = vadd.f32 %v9859_v1, %v14627_v59  ;;  %v10035_v17 = vpop.f32.mrf.mxu0  ;;  %10386 = vmatmul.mubr.f32.gmra.mxu0 %v4417_v34  ;;  %10212 = vmatprep.mubr.f32.mxu1 %v4416_v41  ;;  %v6682_v43 = vld [vmem:[%s14329_s3 + $0x188] sm:$0xff]  ;;  %v6683_v41 = vld [vmem:[%s14329_s3 + $0x190] sm:$0xff] }
 0x278   :  { %v2511_v14 = vpop.f32.mrf.mxu1  ;;  %10388 = vmatprep.mubr.f32.mxu0 %v4418_v45  ;;  %v14631_v1 = vld [vmem:[#allocation59_spill] sm:$0xff] }
 0x279   :  { %14626 = vst [vmem:[#allocation60_spill] sm:$0xff] %v11741_v12  ;;  %v11744_v39 = vadd.f32 %v10035_v17, %v2815_v58  ;;  %v2814_v60 = vadd.f32 %v2511_v14, %v14629_v4  ;;  %v3264_v19 = vpop.f32.mrf.mxu0  ;;  %7066 = vperm.xlu1 %10854, %v6680_v53   ;;  %7071 = vperm.xlu0 %10853, %v6681_v9   ;;  %v4421_v53 = vld [vmem:[#allocation2 + $0x1ac] sm:$0xff] }
 0x27a   :  { %v9862_v63 = vpop.f32.mrf.mxu1  ;;  %10213 = vmatmul.mubr.f32.gmra.mxu1 %v4417_v34  ;;  %v14633_v34 = vld [vmem:[#allocation61_spill] sm:$0xff] }
 0x27b   :  { %14628 = vst [vmem:[#allocation62_spill] sm:$0xff] %v11744_v39  ;;  %v11753_v32 = vadd.f32 %v3264_v19, %v2814_v60  ;;  %v2817_v59 = vadd.f32 %v9862_v63, %v14631_v1  ;;  %v10038_v58 = vpop.f32.mrf.mxu0  ;;  %10389 = vmatmul.mubr.f32.gmra.mxu0 %v4419_v62  ;;  %10215 = vmatprep.mubr.f32.mxu1 %v4418_v45  ;;  %v4422_v39 = vld [vmem:[#allocation2 + $0x1b4] sm:$0xff]  ;;  %v6685_v45 = vld [vmem:[%s14329_s3 + $0x1a0] sm:$0xff]  ;;  %v14635_v19 = vld [vmem:[#allocation11_spill] sm:$0xff] }
 0x27c   :  { %v2521_v17 = vpop.f32.mrf.mxu1  ;;  %10391 = vmatprep.mubr.f32.mxu0 %v4420_v3  ;;  %v6684_v63 = vld [vmem:[%s14329_s3 + $0x198] sm:$0xff] }
 0x27d   :  { %14630 = vst [vmem:[#allocation63_spill] sm:$0xff] %v11753_v32  ;;  %v11756_v9 = vadd.f32 %v10038_v58, %v2817_v59  ;;  %v2816_v14 = vadd.f32 %v2521_v17, %v14633_v34  ;;  %v3274_v4 = vpop.f32.mrf.mxu0  ;;  %7076 = vperm.xlu1 %10854, %v6682_v43   ;;  %7081 = vperm.xlu0 %10853, %v6683_v41   ;;  %v4423_v43 = vld [vmem:[#allocation2 + $0x1bc] sm:$0xff] }
 0x27e   :  { %v9865_v12 = vpop.f32.mrf.mxu1  ;;  %10216 = vmatmul.mubr.f32.gmra.mxu1 %v4419_v62  ;;  %v14637_v62 = vld [vmem:[#allocation12_spill] sm:$0xff] }
 0x27f   :  { %14632 = vst [vmem:[#allocation57_spill] sm:$0xff] %v11756_v9  ;;  %v11765_v60 = vadd.f32 %v3274_v4, %v2816_v14  ;;  %v2819_v1 = vadd.f32 %v9865_v12, %v14635_v19  ;;  %v10041_v59 = vpop.f32.mrf.mxu0  ;;  %10392 = vmatmul.mubr.f32.gmra.mxu0 %v4421_v53  ;;  %10218 = vmatprep.mubr.f32.mxu1 %v4420_v3  ;;  %v4424_v9 = vld [vmem:[#allocation2 + $0x1c4] sm:$0xff]  ;;  %v6687_v3 = vld [vmem:[%s14329_s3 + $0x1b0] sm:$0xff]  ;;  %v14639_v4 = vld [vmem:[#allocation13_spill] sm:$0xff] }
 0x280   :  { %v2531_v58 = vpop.f32.mrf.mxu1  ;;  %10394 = vmatprep.mubr.f32.mxu0 %v4422_v39  ;;  %v6686_v12 = vld [vmem:[%s14329_s3 + $0x1a8] sm:$0xff] }
 0x281   :  { %14634 = vst [vmem:[#allocation59_spill] sm:$0xff] %v11765_v60  ;;  %v11768_v41 = vadd.f32 %v10041_v59, %v2819_v1  ;;  %v2818_v17 = vadd.f32 %v2531_v58, %v14637_v62  ;;  %v3284_v34 = vpop.f32.mrf.mxu0  ;;  %7086 = vperm.xlu1 %10854, %v6684_v63   ;;  %7091 = vperm.xlu0 %10853, %v6685_v45   ;;  %v4425_v63 = vld [vmem:[#allocation2 + $0x1cc] sm:$0xff] }
 0x282   :  { %v9868_v32 = vpop.f32.mrf.mxu1  ;;  %10219 = vmatmul.mubr.f32.gmra.mxu1 %v4421_v53  ;;  %v14641_v53 = vld [vmem:[#allocation14_spill] sm:$0xff] }
 0x283   :  { %14636 = vst [vmem:[#allocation61_spill] sm:$0xff] %v11768_v41  ;;  %v11777_v14 = vadd.f32 %v3284_v34, %v2818_v17  ;;  %v2821_v19 = vadd.f32 %v9868_v32, %v14639_v4  ;;  %v10044_v1 = vpop.f32.mrf.mxu0  ;;  %10395 = vmatmul.mubr.f32.gmra.mxu0 %v4423_v43  ;;  %10221 = vmatprep.mubr.f32.mxu1 %v4422_v39  ;;  %v4426_v41 = vld [vmem:[#allocation2 + $0x1d4] sm:$0xff]  ;;  %v6689_v39 = vld [vmem:[%s14329_s3 + $0x1c0] sm:$0xff]  ;;  %v14643_v34 = vld [vmem:[#allocation15_spill] sm:$0xff] }
 0x284   :  { %v2541_v59 = vpop.f32.mrf.mxu1  ;;  %10397 = vmatprep.mubr.f32.mxu0 %v4424_v9  ;;  %v6688_v32 = vld [vmem:[%s14329_s3 + $0x1b8] sm:$0xff] }
 0x285   :  { %14638 = vst [vmem:[#allocation11_spill] sm:$0xff] %v11777_v14  ;;  %v11780_v45 = vadd.f32 %v10044_v1, %v2821_v19  ;;  %v2820_v58 = vadd.f32 %v2541_v59, %v14641_v53  ;;  %v3294_v62 = vpop.f32.mrf.mxu0  ;;  %7096 = vperm.xlu1 %10854, %v6686_v12   ;;  %7101 = vperm.xlu0 %10853, %v6687_v3   ;;  %v4427_v12 = vld [vmem:[#allocation2 + $0x1dc] sm:$0xff] }
 0x286   :  { %v9871_v60 = vpop.f32.mrf.mxu1  ;;  %10222 = vmatmul.mubr.f32.gmra.mxu1 %v4423_v43  ;;  %v14645_v43 = vld [vmem:[#allocation16_spill] sm:$0xff] }
 0x287   :  { %14640 = vst [vmem:[#allocation12_spill] sm:$0xff] %v11780_v45  ;;  %v11789_v17 = vadd.f32 %v3294_v62, %v2820_v58  ;;  %v2823_v4 = vadd.f32 %v9871_v60, %v14643_v34  ;;  %v10047_v19 = vpop.f32.mrf.mxu0  ;;  %10398 = vmatmul.mubr.f32.gmra.mxu0 %v4425_v63  ;;  %10224 = vmatprep.mubr.f32.mxu1 %v4424_v9  ;;  %v4428_v45 = vld [vmem:[#allocation2 + $0x1e4] sm:$0xff]  ;;  %v6691_v9 = vld [vmem:[%s14329_s3 + $0x1d0] sm:$0xff]  ;;  %v14647_v62 = vld [vmem:[#allocation17_spill] sm:$0xff] }
 0x288   :  { %v2551_v1 = vpop.f32.mrf.mxu1  ;;  %10400 = vmatprep.mubr.f32.mxu0 %v4426_v41  ;;  %v6690_v60 = vld [vmem:[%s14329_s3 + $0x1c8] sm:$0xff] }
 0x289   :  { %14642 = vst [vmem:[#allocation13_spill] sm:$0xff] %v11789_v17  ;;  %v11792_v3 = vadd.f32 %v10047_v19, %v2823_v4  ;;  %v2822_v59 = vadd.f32 %v2551_v1, %v14645_v43  ;;  %v3304_v53 = vpop.f32.mrf.mxu0  ;;  %7106 = vperm.xlu1 %10854, %v6688_v32   ;;  %7111 = vperm.xlu0 %10853, %v6689_v39   ;;  %v4429_v32 = vld [vmem:[#allocation2 + $0x1ec] sm:$0xff] }
 0x28a   :  { %v9874_v14 = vpop.f32.mrf.mxu1  ;;  %10225 = vmatmul.mubr.f32.gmra.mxu1 %v4425_v63  ;;  %v14649_v63 = vld [vmem:[#allocation18_spill] sm:$0xff] }
 0x28b   :  { %14644 = vst [vmem:[#allocation14_spill] sm:$0xff] %v11792_v3  ;;  %v11801_v58 = vadd.f32 %v3304_v53, %v2822_v59  ;;  %v2825_v34 = vadd.f32 %v9874_v14, %v14647_v62  ;;  %v10050_v4 = vpop.f32.mrf.mxu0  ;;  %10401 = vmatmul.mubr.f32.gmra.mxu0 %v4427_v12  ;;  %10227 = vmatprep.mubr.f32.mxu1 %v4426_v41  ;;  %v4430_v3 = vld [vmem:[#allocation2 + $0x1f4] sm:$0xff]  ;;  %v6693_v41 = vld [vmem:[%s14329_s3 + $0x1e0] sm:$0xff]  ;;  %v14651_v53 = vld [vmem:[#allocation19_spill] sm:$0xff] }
 0x28c   :  { %v2561_v19 = vpop.f32.mrf.mxu1  ;;  %10403 = vmatprep.mubr.f32.mxu0 %v4428_v45  ;;  %v6692_v14 = vld [vmem:[%s14329_s3 + $0x1d8] sm:$0xff] }
 0x28d   :  { %14646 = vst [vmem:[#allocation15_spill] sm:$0xff] %v11801_v58  ;;  %v11804_v39 = vadd.f32 %v10050_v4, %v2825_v34  ;;  %v2824_v1 = vadd.f32 %v2561_v19, %v14649_v63  ;;  %v3314_v43 = vpop.f32.mrf.mxu0  ;;  %7116 = vperm.xlu1 %10854, %v6690_v60   ;;  %7121 = vperm.xlu0 %10853, %v6691_v9   ;;  %v4431_v60 = vld [vmem:[#allocation2 + $0x1fc] sm:$0xff] }
 0x28e   :  { %v9877_v17 = vpop.f32.mrf.mxu1  ;;  %10228 = vmatmul.mubr.f32.gmra.mxu1 %v4427_v12  ;;  %v14653_v12 = vld [vmem:[#allocation20_spill] sm:$0xff] }
 0x28f   :  { %14648 = vst [vmem:[#allocation16_spill] sm:$0xff] %v11804_v39  ;;  %v11813_v59 = vadd.f32 %v3314_v43, %v2824_v1  ;;  %v2827_v62 = vadd.f32 %v9877_v17, %v14651_v53  ;;  %v10053_v34 = vpop.f32.mrf.mxu0  ;;  %10404 = vmatmul.mubr.f32.gmra.mxu0 %v4429_v32  ;;  %10230 = vmatprep.mubr.f32.mxu1 %v4428_v45  ;;  %v4432_v39 = vld [vmem:[#allocation2 + $0x204] sm:$0xff]  ;;  %v6695_v45 = vld [vmem:[%s14329_s3 + $0x1f0] sm:$0xff]  ;;  %v14655_v43 = vld [vmem:[#allocation21_spill] sm:$0xff] }
 0x290   :  { %v2571_v4 = vpop.f32.mrf.mxu1  ;;  %10406 = vmatprep.mubr.f32.mxu0 %v4430_v3  ;;  %v6694_v17 = vld [vmem:[%s14329_s3 + $0x1e8] sm:$0xff] }
 0x291   :  { %14650 = vst [vmem:[#allocation17_spill] sm:$0xff] %v11813_v59  ;;  %v11816_v9 = vadd.f32 %v10053_v34, %v2827_v62  ;;  %v2826_v19 = vadd.f32 %v2571_v4, %v14653_v12  ;;  %v3324_v63 = vpop.f32.mrf.mxu0  ;;  %7126 = vperm.xlu1 %10854, %v6692_v14   ;;  %7131 = vperm.xlu0 %10853, %v6693_v41   ;;  %v4433_v14 = vld [vmem:[#allocation2 + $0x20c] sm:$0xff] }
 0x292   :  { %v9880_v58 = vpop.f32.mrf.mxu1  ;;  %10231 = vmatmul.mubr.f32.gmra.mxu1 %v4429_v32  ;;  %v14657_v32 = vld [vmem:[#allocation22_spill] sm:$0xff] }
 0x293   :  { %14652 = vst [vmem:[#allocation18_spill] sm:$0xff] %v11816_v9  ;;  %v11825_v1 = vadd.f32 %v3324_v63, %v2826_v19  ;;  %v2829_v53 = vadd.f32 %v9880_v58, %v14655_v43  ;;  %v10056_v62 = vpop.f32.mrf.mxu0  ;;  %10407 = vmatmul.mubr.f32.gmra.mxu0 %v4431_v60  ;;  %10233 = vmatprep.mubr.f32.mxu1 %v4430_v3  ;;  %v4434_v9 = vld [vmem:[#allocation2 + $0x214] sm:$0xff]  ;;  %v6697_v3 = vld [vmem:[%s14329_s3 + $0x200] sm:$0xff]  ;;  %v14659_v63 = vld [vmem:[#allocation23_spill] sm:$0xff] }
 0x294   :  { %v2581_v34 = vpop.f32.mrf.mxu1  ;;  %10409 = vmatprep.mubr.f32.mxu0 %v4432_v39  ;;  %v6696_v58 = vld [vmem:[%s14329_s3 + $0x1f8] sm:$0xff] }
 0x295   :  { %14654 = vst [vmem:[#allocation19_spill] sm:$0xff] %v11825_v1  ;;  %v11828_v41 = vadd.f32 %v10056_v62, %v2829_v53  ;;  %v2828_v4 = vadd.f32 %v2581_v34, %v14657_v32  ;;  %v3334_v12 = vpop.f32.mrf.mxu0  ;;  %7136 = vperm.xlu1 %10854, %v6694_v17   ;;  %7141 = vperm.xlu0 %10853, %v6695_v45   ;;  %v4435_v17 = vld [vmem:[#allocation2 + $0x21c] sm:$0xff] }
 0x296   :  { %v9883_v59 = vpop.f32.mrf.mxu1  ;;  %10234 = vmatmul.mubr.f32.gmra.mxu1 %v4431_v60  ;;  %v14661_v60 = vld [vmem:[#allocation24_spill] sm:$0xff] }
 0x297   :  { %14656 = vst [vmem:[#allocation20_spill] sm:$0xff] %v11828_v41  ;;  %v11837_v19 = vadd.f32 %v3334_v12, %v2828_v4  ;;  %v2831_v43 = vadd.f32 %v9883_v59, %v14659_v63  ;;  %v10059_v53 = vpop.f32.mrf.mxu0  ;;  %10410 = vmatmul.mubr.f32.gmra.mxu0 %v4433_v14  ;;  %10236 = vmatprep.mubr.f32.mxu1 %v4432_v39  ;;  %v4436_v41 = vld [vmem:[#allocation2 + $0x224] sm:$0xff]  ;;  %v6699_v39 = vld [vmem:[%s14329_s3 + $0x210] sm:$0xff]  ;;  %v14663_v12 = vld [vmem:[#allocation25_spill] sm:$0xff] }
 0x298   :  { %v2591_v62 = vpop.f32.mrf.mxu1  ;;  %10412 = vmatprep.mubr.f32.mxu0 %v4434_v9  ;;  %v6698_v59 = vld [vmem:[%s14329_s3 + $0x208] sm:$0xff] }
 0x299   :  { %14658 = vst [vmem:[#allocation21_spill] sm:$0xff] %v11837_v19  ;;  %v11840_v45 = vadd.f32 %v10059_v53, %v2831_v43  ;;  %v2830_v34 = vadd.f32 %v2591_v62, %v14661_v60  ;;  %v3344_v32 = vpop.f32.mrf.mxu0  ;;  %7146 = vperm.xlu1 %10854, %v6696_v58   ;;  %7151 = vperm.xlu0 %10853, %v6697_v3   ;;  %v4437_v58 = vld [vmem:[#allocation2 + $0x22c] sm:$0xff] }
 0x29a   :  { %v9886_v1 = vpop.f32.mrf.mxu1  ;;  %10237 = vmatmul.mubr.f32.gmra.mxu1 %v4433_v14  ;;  %v14665_v14 = vld [vmem:[#allocation26_spill] sm:$0xff] }
 0x29b   :  { %14660 = vst [vmem:[#allocation22_spill] sm:$0xff] %v11840_v45  ;;  %v11849_v4 = vadd.f32 %v3344_v32, %v2830_v34  ;;  %v2833_v63 = vadd.f32 %v9886_v1, %v14663_v12  ;;  %v10062_v43 = vpop.f32.mrf.mxu0  ;;  %10413 = vmatmul.mubr.f32.gmra.mxu0 %v4435_v17  ;;  %10239 = vmatprep.mubr.f32.mxu1 %v4434_v9  ;;  %v4438_v45 = vld [vmem:[#allocation2 + $0x234] sm:$0xff]  ;;  %v6701_v9 = vld [vmem:[%s14329_s3 + $0x220] sm:$0xff]  ;;  %v14667_v32 = vld [vmem:[#allocation27_spill] sm:$0xff] }
 0x29c   :  { %v2601_v53 = vpop.f32.mrf.mxu1  ;;  %10415 = vmatprep.mubr.f32.mxu0 %v4436_v41  ;;  %v6700_v1 = vld [vmem:[%s14329_s3 + $0x218] sm:$0xff] }
 0x29d   :  { %14662 = vst [vmem:[#allocation23_spill] sm:$0xff] %v11849_v4  ;;  %v11852_v3 = vadd.f32 %v10062_v43, %v2833_v63  ;;  %v2832_v62 = vadd.f32 %v2601_v53, %v14665_v14  ;;  %v3354_v60 = vpop.f32.mrf.mxu0  ;;  %7156 = vperm.xlu1 %10854, %v6698_v59   ;;  %7161 = vperm.xlu0 %10853, %v6699_v39   ;;  %v4439_v59 = vld [vmem:[#allocation2 + $0x23c] sm:$0xff] }
 0x29e   :  { %v9889_v19 = vpop.f32.mrf.mxu1  ;;  %10240 = vmatmul.mubr.f32.gmra.mxu1 %v4435_v17  ;;  %v14669_v17 = vld [vmem:[#allocation28_spill] sm:$0xff] }
 0x29f   :  { %14664 = vst [vmem:[#allocation24_spill] sm:$0xff] %v11852_v3  ;;  %v11861_v34 = vadd.f32 %v3354_v60, %v2832_v62  ;;  %v2835_v12 = vadd.f32 %v9889_v19, %v14667_v32  ;;  %v10065_v63 = vpop.f32.mrf.mxu0  ;;  %10416 = vmatmul.mubr.f32.gmra.mxu0 %v4437_v58  ;;  %10242 = vmatprep.mubr.f32.mxu1 %v4436_v41  ;;  %v4440_v3 = vld [vmem:[#allocation2 + $0x244] sm:$0xff]  ;;  %v6703_v41 = vld [vmem:[%s14329_s3 + $0x230] sm:$0xff]  ;;  %v14671_v60 = vld [vmem:[#allocation29_spill] sm:$0xff] }
 0x2a0   :  { %v2611_v43 = vpop.f32.mrf.mxu1  ;;  %10418 = vmatprep.mubr.f32.mxu0 %v4438_v45  ;;  %v6702_v19 = vld [vmem:[%s14329_s3 + $0x228] sm:$0xff] }
 0x2a1   :  { %14666 = vst [vmem:[#allocation25_spill] sm:$0xff] %v11861_v34  ;;  %v11864_v39 = vadd.f32 %v10065_v63, %v2835_v12  ;;  %v2834_v53 = vadd.f32 %v2611_v43, %v14669_v17  ;;  %v3364_v14 = vpop.f32.mrf.mxu0  ;;  %7166 = vperm.xlu1 %10854, %v6700_v1   ;;  %7171 = vperm.xlu0 %10853, %v6701_v9   ;;  %v4441_v1 = vld [vmem:[#allocation2 + $0x24c] sm:$0xff] }
 0x2a2   :  { %v9892_v4 = vpop.f32.mrf.mxu1  ;;  %10243 = vmatmul.mubr.f32.gmra.mxu1 %v4437_v58  ;;  %v14673_v58 = vld [vmem:[#allocation30_spill] sm:$0xff] }
 0x2a3   :  { %14668 = vst [vmem:[#allocation26_spill] sm:$0xff] %v11864_v39  ;;  %v11873_v62 = vadd.f32 %v3364_v14, %v2834_v53  ;;  %v2837_v32 = vadd.f32 %v9892_v4, %v14671_v60  ;;  %v10068_v12 = vpop.f32.mrf.mxu0  ;;  %10419 = vmatmul.mubr.f32.gmra.mxu0 %v4439_v59  ;;  %10245 = vmatprep.mubr.f32.mxu1 %v4438_v45  ;;  %v4442_v39 = vld [vmem:[#allocation2 + $0x254] sm:$0xff]  ;;  %v6705_v45 = vld [vmem:[%s14329_s3 + $0x240] sm:$0xff]  ;;  %v14675_v14 = vld [vmem:[#allocation31_spill] sm:$0xff] }
 0x2a4   :  { %v2621_v63 = vpop.f32.mrf.mxu1  ;;  %10421 = vmatprep.mubr.f32.mxu0 %v4440_v3  ;;  %v6704_v4 = vld [vmem:[%s14329_s3 + $0x238] sm:$0xff] }
 0x2a5   :  { %14670 = vst [vmem:[#allocation27_spill] sm:$0xff] %v11873_v62  ;;  %v11876_v9 = vadd.f32 %v10068_v12, %v2837_v32  ;;  %v2836_v43 = vadd.f32 %v2621_v63, %v14673_v58  ;;  %v3374_v17 = vpop.f32.mrf.mxu0  ;;  %7176 = vperm.xlu1 %10854, %v6702_v19   ;;  %7181 = vperm.xlu0 %10853, %v6703_v41   ;;  %v4443_v19 = vld [vmem:[#allocation2 + $0x25c] sm:$0xff] }
 0x2a6   :  { %v9895_v34 = vpop.f32.mrf.mxu1  ;;  %10246 = vmatmul.mubr.f32.gmra.mxu1 %v4439_v59  ;;  %v14677_v59 = vld [vmem:[#allocation32_spill] sm:$0xff] }
 0x2a7   :  { %14672 = vst [vmem:[#allocation28_spill] sm:$0xff] %v11876_v9  ;;  %v11885_v53 = vadd.f32 %v3374_v17, %v2836_v43  ;;  %v2839_v60 = vadd.f32 %v9895_v34, %v14675_v14  ;;  %v10071_v32 = vpop.f32.mrf.mxu0  ;;  %10422 = vmatmul.mubr.f32.gmra.mxu0 %v4441_v1  ;;  %10248 = vmatprep.mubr.f32.mxu1 %v4440_v3  ;;  %v4444_v9 = vld [vmem:[#allocation2 + $0x264] sm:$0xff]  ;;  %v6707_v3 = vld [vmem:[%s14329_s3 + $0x250] sm:$0xff]  ;;  %v14679_v17 = vld [vmem:[#allocation33_spill] sm:$0xff] }
 0x2a8   :  { %v2631_v12 = vpop.f32.mrf.mxu1  ;;  %10424 = vmatprep.mubr.f32.mxu0 %v4442_v39  ;;  %v6706_v34 = vld [vmem:[%s14329_s3 + $0x248] sm:$0xff] }
 0x2a9   :  { %14674 = vst [vmem:[#allocation29_spill] sm:$0xff] %v11885_v53  ;;  %v11888_v41 = vadd.f32 %v10071_v32, %v2839_v60  ;;  %v2838_v63 = vadd.f32 %v2631_v12, %v14677_v59  ;;  %v3384_v58 = vpop.f32.mrf.mxu0  ;;  %7186 = vperm.xlu1 %10854, %v6704_v4   ;;  %7191 = vperm.xlu0 %10853, %v6705_v45   ;;  %v4445_v4 = vld [vmem:[#allocation2 + $0x26c] sm:$0xff] }
 0x2aa   :  { %v9898_v62 = vpop.f32.mrf.mxu1  ;;  %10249 = vmatmul.mubr.f32.gmra.mxu1 %v4441_v1  ;;  %v14681_v1 = vld [vmem:[#allocation34_spill] sm:$0xff] }
 0x2ab   :  { %14676 = vst [vmem:[#allocation30_spill] sm:$0xff] %v11888_v41  ;;  %v11897_v43 = vadd.f32 %v3384_v58, %v2838_v63  ;;  %v2841_v14 = vadd.f32 %v9898_v62, %v14679_v17  ;;  %v10074_v60 = vpop.f32.mrf.mxu0  ;;  %10425 = vmatmul.mubr.f32.gmra.mxu0 %v4443_v19  ;;  %10251 = vmatprep.mubr.f32.mxu1 %v4442_v39  ;;  %v4446_v41 = vld [vmem:[#allocation2 + $0x274] sm:$0xff]  ;;  %v6709_v39 = vld [vmem:[%s14329_s3 + $0x260] sm:$0xff]  ;;  %v14683_v58 = vld [vmem:[#allocation35_spill] sm:$0xff] }
 0x2ac   :  { %v2641_v32 = vpop.f32.mrf.mxu1  ;;  %10427 = vmatprep.mubr.f32.mxu0 %v4444_v9  ;;  %v6708_v62 = vld [vmem:[%s14329_s3 + $0x258] sm:$0xff] }
 0x2ad   :  { %14678 = vst [vmem:[#allocation31_spill] sm:$0xff] %v11897_v43  ;;  %v11900_v45 = vadd.f32 %v10074_v60, %v2841_v14  ;;  %v2840_v12 = vadd.f32 %v2641_v32, %v14681_v1  ;;  %v3394_v59 = vpop.f32.mrf.mxu0  ;;  %7196 = vperm.xlu1 %10854, %v6706_v34   ;;  %7201 = vperm.xlu0 %10853, %v6707_v3   ;;  %v4447_v34 = vld [vmem:[#allocation2 + $0x27c] sm:$0xff] }
 0x2ae   :  { %v9901_v53 = vpop.f32.mrf.mxu1  ;;  %10252 = vmatmul.mubr.f32.gmra.mxu1 %v4443_v19  ;;  %v14685_v19 = vld [vmem:[#allocation36_spill] sm:$0xff] }
 0x2af   :  { %14680 = vst [vmem:[#allocation32_spill] sm:$0xff] %v11900_v45  ;;  %v11909_v63 = vadd.f32 %v3394_v59, %v2840_v12  ;;  %v2843_v17 = vadd.f32 %v9901_v53, %v14683_v58  ;;  %v10077_v14 = vpop.f32.mrf.mxu0  ;;  %10428 = vmatmul.mubr.f32.gmra.mxu0 %v4445_v4  ;;  %10254 = vmatprep.mubr.f32.mxu1 %v4444_v9  ;;  %v4448_v45 = vld [vmem:[#allocation2 + $0x284] sm:$0xff]  ;;  %v6711_v9 = vld [vmem:[%s14329_s3 + $0x270] sm:$0xff]  ;;  %v14687_v59 = vld [vmem:[#allocation37_spill] sm:$0xff] }
 0x2b0   :  { %v2651_v60 = vpop.f32.mrf.mxu1  ;;  %10430 = vmatprep.mubr.f32.mxu0 %v4446_v41  ;;  %v6710_v53 = vld [vmem:[%s14329_s3 + $0x268] sm:$0xff] }
 0x2b1   :  { %14682 = vst [vmem:[#allocation33_spill] sm:$0xff] %v11909_v63  ;;  %v11912_v3 = vadd.f32 %v10077_v14, %v2843_v17  ;;  %v2842_v32 = vadd.f32 %v2651_v60, %v14685_v19  ;;  %v3404_v1 = vpop.f32.mrf.mxu0  ;;  %7206 = vperm.xlu1 %10854, %v6708_v62   ;;  %7211 = vperm.xlu0 %10853, %v6709_v39   ;;  %v4449_v62 = vld [vmem:[#allocation2 + $0x28c] sm:$0xff] }
 0x2b2   :  { %v9904_v43 = vpop.f32.mrf.mxu1  ;;  %10255 = vmatmul.mubr.f32.gmra.mxu1 %v4445_v4  ;;  %v14689_v4 = vld [vmem:[#allocation38_spill] sm:$0xff] }
 0x2b3   :  { %14684 = vst [vmem:[#allocation34_spill] sm:$0xff] %v11912_v3  ;;  %v11921_v12 = vadd.f32 %v3404_v1, %v2842_v32  ;;  %v2845_v58 = vadd.f32 %v9904_v43, %v14687_v59  ;;  %v10080_v17 = vpop.f32.mrf.mxu0  ;;  %10431 = vmatmul.mubr.f32.gmra.mxu0 %v4447_v34  ;;  %10257 = vmatprep.mubr.f32.mxu1 %v4446_v41  ;;  %v4450_v3 = vld [vmem:[#allocation2 + $0x294] sm:$0xff]  ;;  %v6713_v41 = vld [vmem:[%s14329_s3 + $0x280] sm:$0xff]  ;;  %v14691_v1 = vld [vmem:[#allocation39_spill] sm:$0xff] }
 0x2b4   :  { %v2661_v14 = vpop.f32.mrf.mxu1  ;;  %10433 = vmatprep.mubr.f32.mxu0 %v4448_v45  ;;  %v6712_v43 = vld [vmem:[%s14329_s3 + $0x278] sm:$0xff] }
 0x2b5   :  { %14686 = vst [vmem:[#allocation35_spill] sm:$0xff] %v11921_v12  ;;  %v11924_v39 = vadd.f32 %v10080_v17, %v2845_v58  ;;  %v2844_v60 = vadd.f32 %v2661_v14, %v14689_v4  ;;  %v3414_v19 = vpop.f32.mrf.mxu0  ;;  %7216 = vperm.xlu1 %10854, %v6710_v53   ;;  %7221 = vperm.xlu0 %10853, %v6711_v9   ;;  %v4451_v53 = vld [vmem:[#allocation2 + $0x29c] sm:$0xff] }
 0x2b6   :  { %v9907_v63 = vpop.f32.mrf.mxu1  ;;  %10258 = vmatmul.mubr.f32.gmra.mxu1 %v4447_v34  ;;  %v14693_v34 = vld [vmem:[#allocation40_spill] sm:$0xff] }
 0x2b7   :  { %14688 = vst [vmem:[#allocation36_spill] sm:$0xff] %v11924_v39  ;;  %v11933_v32 = vadd.f32 %v3414_v19, %v2844_v60  ;;  %v2847_v59 = vadd.f32 %v9907_v63, %v14691_v1  ;;  %v10083_v58 = vpop.f32.mrf.mxu0  ;;  %10434 = vmatmul.mubr.f32.gmra.mxu0 %v4449_v62  ;;  %10260 = vmatprep.mubr.f32.mxu1 %v4448_v45  ;;  %v4452_v39 = vld [vmem:[#allocation2 + $0x2a4] sm:$0xff]  ;;  %v6715_v45 = vld [vmem:[%s14329_s3 + $0x290] sm:$0xff]  ;;  %v14695_v19 = vld [vmem:[#allocation41_spill] sm:$0xff] }
 0x2b8   :  { %v2671_v17 = vpop.f32.mrf.mxu1  ;;  %10436 = vmatprep.mubr.f32.mxu0 %v4450_v3  ;;  %v6714_v63 = vld [vmem:[%s14329_s3 + $0x288] sm:$0xff] }
 0x2b9   :  { %14690 = vst [vmem:[#allocation37_spill] sm:$0xff] %v11933_v32  ;;  %v11936_v9 = vadd.f32 %v10083_v58, %v2847_v59  ;;  %v2846_v14 = vadd.f32 %v2671_v17, %v14693_v34  ;;  %v3424_v4 = vpop.f32.mrf.mxu0  ;;  %7226 = vperm.xlu1 %10854, %v6712_v43   ;;  %7231 = vperm.xlu0 %10853, %v6713_v41   ;;  %v4453_v43 = vld [vmem:[#allocation2 + $0x2ac] sm:$0xff] }
 0x2ba   :  { %v9910_v12 = vpop.f32.mrf.mxu1  ;;  %10261 = vmatmul.mubr.f32.gmra.mxu1 %v4449_v62  ;;  %v14697_v62 = vld [vmem:[#allocation42_spill] sm:$0xff] }
 0x2bb   :  { %14692 = vst [vmem:[#allocation38_spill] sm:$0xff] %v11936_v9  ;;  %v11945_v60 = vadd.f32 %v3424_v4, %v2846_v14  ;;  %v2849_v1 = vadd.f32 %v9910_v12, %v14695_v19  ;;  %v10086_v59 = vpop.f32.mrf.mxu0  ;;  %10437 = vmatmul.mubr.f32.gmra.mxu0 %v4451_v53  ;;  %10263 = vmatprep.mubr.f32.mxu1 %v4450_v3  ;;  %v4454_v9 = vld [vmem:[#allocation2 + $0x2b4] sm:$0xff]  ;;  %v6717_v3 = vld [vmem:[%s14329_s3 + $0x2a0] sm:$0xff]  ;;  %v14699_v4 = vld [vmem:[#allocation43_spill] sm:$0xff] }
 0x2bc   :  { %v2681_v58 = vpop.f32.mrf.mxu1  ;;  %10439 = vmatprep.mubr.f32.mxu0 %v4452_v39  ;;  %v6716_v12 = vld [vmem:[%s14329_s3 + $0x298] sm:$0xff] }
 0x2bd   :  { %14694 = vst [vmem:[#allocation39_spill] sm:$0xff] %v11945_v60  ;;  %v11948_v41 = vadd.f32 %v10086_v59, %v2849_v1  ;;  %v2848_v17 = vadd.f32 %v2681_v58, %v14697_v62  ;;  %v3434_v34 = vpop.f32.mrf.mxu0  ;;  %7236 = vperm.xlu1 %10854, %v6714_v63   ;;  %7241 = vperm.xlu0 %10853, %v6715_v45   ;;  %v4455_v63 = vld [vmem:[#allocation2 + $0x2bc] sm:$0xff] }
 0x2be   :  { %v9913_v32 = vpop.f32.mrf.mxu1  ;;  %10264 = vmatmul.mubr.f32.gmra.mxu1 %v4451_v53  ;;  %v14701_v53 = vld [vmem:[#allocation44_spill] sm:$0xff] }
 0x2bf   :  { %14696 = vst [vmem:[#allocation40_spill] sm:$0xff] %v11948_v41  ;;  %v11957_v14 = vadd.f32 %v3434_v34, %v2848_v17  ;;  %v2851_v19 = vadd.f32 %v9913_v32, %v14699_v4  ;;  %v10089_v1 = vpop.f32.mrf.mxu0  ;;  %10440 = vmatmul.mubr.f32.gmra.mxu0 %v4453_v43  ;;  %10266 = vmatprep.mubr.f32.mxu1 %v4452_v39  ;;  %v4456_v41 = vld [vmem:[#allocation2 + $0x2c4] sm:$0xff]  ;;  %v6719_v39 = vld [vmem:[%s14329_s3 + $0x2b0] sm:$0xff]  ;;  %v14703_v34 = vld [vmem:[#allocation45_spill] sm:$0xff] }
 0x2c0   :  { %v2691_v59 = vpop.f32.mrf.mxu1  ;;  %10442 = vmatprep.mubr.f32.mxu0 %v4454_v9  ;;  %v6718_v32 = vld [vmem:[%s14329_s3 + $0x2a8] sm:$0xff] }
 0x2c1   :  { %14698 = vst [vmem:[#allocation41_spill] sm:$0xff] %v11957_v14  ;;  %v11960_v45 = vadd.f32 %v10089_v1, %v2851_v19  ;;  %v2850_v58 = vadd.f32 %v2691_v59, %v14701_v53  ;;  %v3444_v62 = vpop.f32.mrf.mxu0  ;;  %7246 = vperm.xlu1 %10854, %v6716_v12   ;;  %7251 = vperm.xlu0 %10853, %v6717_v3   ;;  %v4457_v12 = vld [vmem:[#allocation2 + $0x2cc] sm:$0xff] }
 0x2c2   :  { %v9916_v60 = vpop.f32.mrf.mxu1  ;;  %10267 = vmatmul.mubr.f32.gmra.mxu1 %v4453_v43  ;;  %v14705_v43 = vld [vmem:[#allocation46_spill] sm:$0xff] }
 0x2c3   :  { %14700 = vst [vmem:[#allocation42_spill] sm:$0xff] %v11960_v45  ;;  %v11969_v17 = vadd.f32 %v3444_v62, %v2850_v58  ;;  %v2853_v4 = vadd.f32 %v9916_v60, %v14703_v34  ;;  %v10092_v19 = vpop.f32.mrf.mxu0  ;;  %10443 = vmatmul.mubr.f32.gmra.mxu0 %v4455_v63  ;;  %10269 = vmatprep.mubr.f32.mxu1 %v4454_v9  ;;  %v4458_v45 = vld [vmem:[#allocation2 + $0x2d4] sm:$0xff]  ;;  %v6721_v9 = vld [vmem:[%s14329_s3 + $0x2c0] sm:$0xff]  ;;  %v14707_v62 = vld [vmem:[#allocation47_spill] sm:$0xff] }
 0x2c4   :  { %v2701_v1 = vpop.f32.mrf.mxu1  ;;  %10445 = vmatprep.mubr.f32.mxu0 %v4456_v41  ;;  %v6720_v60 = vld [vmem:[%s14329_s3 + $0x2b8] sm:$0xff] }
 0x2c5   :  { %14702 = vst [vmem:[#allocation43_spill] sm:$0xff] %v11969_v17  ;;  %v11972_v3 = vadd.f32 %v10092_v19, %v2853_v4  ;;  %v2852_v59 = vadd.f32 %v2701_v1, %v14705_v43  ;;  %v3454_v53 = vpop.f32.mrf.mxu0  ;;  %7256 = vperm.xlu1 %10854, %v6718_v32   ;;  %7261 = vperm.xlu0 %10853, %v6719_v39   ;;  %v4459_v32 = vld [vmem:[#allocation2 + $0x2dc] sm:$0xff] }
 0x2c6   :  { %v9919_v14 = vpop.f32.mrf.mxu1  ;;  %10270 = vmatmul.mubr.f32.gmra.mxu1 %v4455_v63  ;;  %v14709_v63 = vld [vmem:[#allocation48_spill] sm:$0xff] }
 0x2c7   :  { %14704 = vst [vmem:[#allocation44_spill] sm:$0xff] %v11972_v3  ;;  %v11981_v58 = vadd.f32 %v3454_v53, %v2852_v59  ;;  %v2855_v34 = vadd.f32 %v9919_v14, %v14707_v62  ;;  %v10095_v4 = vpop.f32.mrf.mxu0  ;;  %10446 = vmatmul.mubr.f32.gmra.mxu0 %v4457_v12  ;;  %10272 = vmatprep.mubr.f32.mxu1 %v4456_v41  ;;  %v4460_v3 = vld [vmem:[#allocation2 + $0x2e4] sm:$0xff]  ;;  %v6723_v41 = vld [vmem:[%s14329_s3 + $0x2d0] sm:$0xff]  ;;  %v14711_v53 = vld [vmem:[#allocation49_spill] sm:$0xff] }
 0x2c8   :  { %v2711_v19 = vpop.f32.mrf.mxu1  ;;  %10448 = vmatprep.mubr.f32.mxu0 %v4458_v45  ;;  %v6722_v14 = vld [vmem:[%s14329_s3 + $0x2c8] sm:$0xff] }
 0x2c9   :  { %14706 = vst [vmem:[#allocation45_spill] sm:$0xff] %v11981_v58  ;;  %v11984_v39 = vadd.f32 %v10095_v4, %v2855_v34  ;;  %v2854_v1 = vadd.f32 %v2711_v19, %v14709_v63  ;;  %v3464_v43 = vpop.f32.mrf.mxu0  ;;  %7266 = vperm.xlu1 %10854, %v6720_v60   ;;  %7271 = vperm.xlu0 %10853, %v6721_v9   ;;  %v4461_v60 = vld [vmem:[#allocation2 + $0x2ec] sm:$0xff] }
 0x2ca   :  { %v9922_v17 = vpop.f32.mrf.mxu1  ;;  %10273 = vmatmul.mubr.f32.gmra.mxu1 %v4457_v12  ;;  %v14713_v12 = vld [vmem:[#allocation50_spill] sm:$0xff] }
 0x2cb   :  { %14708 = vst [vmem:[#allocation46_spill] sm:$0xff] %v11984_v39  ;;  %v11993_v59 = vadd.f32 %v3464_v43, %v2854_v1  ;;  %v2857_v62 = vadd.f32 %v9922_v17, %v14711_v53  ;;  %v10098_v34 = vpop.f32.mrf.mxu0  ;;  %10449 = vmatmul.mubr.f32.gmra.mxu0 %v4459_v32  ;;  %10275 = vmatprep.mubr.f32.mxu1 %v4458_v45  ;;  %v4462_v39 = vld [vmem:[#allocation2 + $0x2f4] sm:$0xff]  ;;  %v6725_v45 = vld [vmem:[%s14329_s3 + $0x2e0] sm:$0xff]  ;;  %v14714_v43 = vld [vmem:[#allocation51_spill] sm:$0xff] }
 0x2cc   :  { %v2721_v4 = vpop.f32.mrf.mxu1  ;;  %10451 = vmatprep.mubr.f32.mxu0 %v4460_v3  ;;  %v6724_v17 = vld [vmem:[%s14329_s3 + $0x2d8] sm:$0xff] }
 0x2cd   :  { %14710 = vst [vmem:[#allocation47_spill] sm:$0xff] %v11993_v59  ;;  %v11996_v9 = vadd.f32 %v10098_v34, %v2857_v62  ;;  %v2856_v19 = vadd.f32 %v2721_v4, %v14713_v12  ;;  %v3474_v63 = vpop.f32.mrf.mxu0  ;;  %7276 = vperm.xlu1 %10854, %v6722_v14   ;;  %7281 = vperm.xlu0 %10853, %v6723_v41   ;;  %v4463_v14 = vld [vmem:[#allocation2 + $0x2fc] sm:$0xff] }
 0x2ce   :  { %v9925_v58 = vpop.f32.mrf.mxu1  ;;  %10276 = vmatmul.mubr.f32.gmra.mxu1 %v4459_v32  ;;  %v14716_v32 = vld [vmem:[#allocation52_spill] sm:$0xff] }
 0x2cf   :  { %14712 = vst [vmem:[#allocation48_spill] sm:$0xff] %v11996_v9  ;;  %v12005_v1 = vadd.f32 %v3474_v63, %v2856_v19  ;;  %v2859_v53 = vadd.f32 %v9925_v58, %v14714_v43  ;;  %v10101_v62 = vpop.f32.mrf.mxu0  ;;  %10452 = vmatmul.mubr.f32.gmra.mxu0 %v4461_v60  ;;  %10278 = vmatprep.mubr.f32.mxu1 %v4460_v3  ;;  %v4464_v9 = vld [vmem:[#allocation2 + $0x304] sm:$0xff]  ;;  %v6727_v3 = vld [vmem:[%s14329_s3 + $0x2f0] sm:$0xff]  ;;  %v14718_v63 = vld [vmem:[#allocation53_spill] sm:$0xff] }
 0x2d0   :  { %v2731_v34 = vpop.f32.mrf.mxu1  ;;  %10454 = vmatprep.mubr.f32.mxu0 %v4462_v39  ;;  %v6726_v58 = vld [vmem:[%s14329_s3 + $0x2e8] sm:$0xff] }
 0x2d1   :  { %v12008_v41 = vadd.f32 %v10101_v62, %v2859_v53  ;;  %v2858_v4 = vadd.f32 %v2731_v34, %v14716_v32  ;;  %v3484_v12 = vpop.f32.mrf.mxu0  ;;  %7286 = vperm.xlu1 %10854, %v6724_v17   ;;  %7291 = vperm.xlu0 %10853, %v6725_v45   ;;  %v4465_v17 = vld [vmem:[#allocation2 + $0x30c] sm:$0xff]  ;;  %v4466_v32 = vld [vmem:[#allocation2 + $0x314] sm:$0xff] }
 0x2d2   :  { %v9928_v59 = vpop.f32.mrf.mxu1  ;;  %10279 = vmatmul.mubr.f32.gmra.mxu1 %v4461_v60 }
 0x2d3   :  { %14715 = vst [vmem:[#allocation49_spill] sm:$0xff] %v12008_v41  ;;  %v12017_v19 = vadd.f32 %v3484_v12, %v2858_v4  ;;  %v2861_v43 = vadd.f32 %v9928_v59, %v14718_v63  ;;  %v10104_v53 = vpop.f32.mrf.mxu0  ;;  %10455 = vmatmul.mubr.f32.gmra.mxu0 %v4463_v14  ;;  %10281 = vmatprep.mubr.f32.mxu1 %v4462_v39  ;;  %v6728_v59 = vld [vmem:[%s14329_s3 + $0x2f8] sm:$0xff]  ;;  %v14721_v39 = vld [vmem:[#allocation54_spill] sm:$0xff] }
 0x2d4   :  { %v2741_v62 = vpop.f32.mrf.mxu1  ;;  %10457 = vmatprep.mubr.f32.mxu0 %v4464_v9 }
 0x2d5   :  { %14717 = vst [vmem:[#allocation50_spill] sm:$0xff] %v12017_v19  ;;  %v12020_v45 = vadd.f32 %v10104_v53, %v2861_v43  ;;  %v2860_v60 = vadd.f32 %v2741_v62, %v11513_v49  ;;  %v3494_v34 = vpop.f32.mrf.mxu0  ;;  %7296 = vperm.xlu1 %10854, %v6726_v58   ;;  %7301 = vperm.xlu0 %10853, %v6727_v3   ;;  %v4467_v49 = vld [vmem:[#allocation2 + $0x31c] sm:$0xff]  ;;  %v5125_v53 = vld [vmem:[#allocation2 + $0x25] sm:$0xff] }
 0x2d6   :  { %v9931_v41 = vpop.f32.mrf.mxu1  ;;  %10282 = vmatmul.mubr.f32.gmra.mxu1 %v4463_v14  ;;  %v14723_v58 = vld [vmem:[#allocation55_spill] sm:$0xff] }
 0x2d7   :  { %14719 = vst [vmem:[#allocation51_spill] sm:$0xff] %v12020_v45  ;;  %v12026_v4 = vadd.f32 %v3494_v34, %v2860_v60  ;;  %v2863_v12 = vadd.f32 %v9931_v41, %v14721_v39  ;;  %v10107_v63 = vpop.f32.mrf.mxu0  ;;  %10458 = vmatmul.mubr.f32.gmra.mxu0 %v4465_v17  ;;  %10284 = vmatprep.mubr.f32.mxu1 %v4464_v9  ;;  %v5878_v45 = vld [vmem:[#allocation2 + $0x26] sm:$0xff]  ;;  %v14724_v34 = vld [vmem:[#allocation56_spill] sm:$0xff] }
 0x2d8   :  { %v2751_v43 = vpop.f32.mrf.mxu1  ;;  %10460 = vmatprep.mubr.f32.mxu0 %v4466_v32  ;;  %v5126_v9 = vld [vmem:[#allocation2 + $0x2d] sm:$0xff] }
 0x2d9   :  { %14720 = vst [vmem:[#allocation52_spill] sm:$0xff] %v12026_v4  ;;  %v12029_v62 = vadd.f32 %v10107_v63, %v2863_v12  ;;  %v2862_v3 = vadd.f32 %v2751_v43, %v14723_v58  ;;  %v3504_v14 = vpop.f32.mrf.mxu0  ;;  %7306 = vperm.xlu1 %10854, %v6728_v59   ;;  %v5879_v4 = vld [vmem:[#allocation2 + $0x2e] sm:$0xff]  ;;  %v5880_v59 = vld [vmem:[#allocation2 + $0x36] sm:$0xff] }
 0x2da   :  { %v9934_v19 = vpop.f32.mrf.mxu1  ;;  %10285 = vmatmul.mubr.f32.gmra.mxu1 %v4465_v17  ;;  %v5127_v12 = vld [vmem:[#allocation2 + $0x35] sm:$0xff] }
 0x2db   :  { %14722 = vst [vmem:[#allocation53_spill] sm:$0xff] %v12029_v62  ;;  %v12032_v60 = vadd.f32 %v3504_v14, %v2862_v3  ;;  %v2865_v41 = vadd.f32 %v9934_v19, %v14724_v34  ;;  %v10110_v39 = vpop.f32.mrf.mxu0  ;;  %10461 = vmatmul.mubr.f32.gmra.mxu0 %v4467_v49  ;;  %10495 = vmatprep.mubr.f32.mxu1 %v5125_v53  ;;  %v5128_v49 = vld [vmem:[#allocation2 + $0x3d] sm:$0xff]  ;;  %v5129_v14 = vld [vmem:[#allocation2 + $0x45] sm:$0xff] }
 0x2dc   :  { %v2761_v32 = vpop.f32.mrf.mxu1  ;;  %10671 = vmatprep.mubr.f32.mxu0 %v5878_v45  ;;  %v5881_v45 = vld [vmem:[#allocation2 + $0x3e] sm:$0xff] }
 0x2dd   :  { %v12035_v63 = vadd.f32 %v10110_v39, %v2865_v41  ;;  %v2864_v43 = vadd.f32 %v2761_v32, %v11534_v2  ;;  %v3514_v58 = vpop.f32.mrf.mxu0  ;;  %v5882_v39 = vld [vmem:[#allocation2 + $0x46] sm:$0xff] }
 0x2de   :  { %v10145_v62 = vpop.f32.mrf.mxu1  ;;  %10496 = vmatmul.mubr.f32.vlgmr.msra.gmra.mxu1 %v5126_v9 }
 0x2df   :  { %v12038_v17 = vadd.f32 %v3514_v58, %v2864_v43  ;;  %v4277_v19 = vadd.f32 %v10145_v62, %v11537_v22  ;;  %v10321_v3 = vpop.f32.mrf.mxu0  ;;  %10672 = vmatmul.mubr.f32.vlgmr.msra.gmra.mxu0 %v5879_v4  ;;  %10498 = vmatprep.mubr.f32.mxu1 %v5127_v12  ;;  %v5130_v4 = vld [vmem:[#allocation2 + $0x4d] sm:$0xff]  ;;  %v5131_v58 = vld [vmem:[#allocation2 + $0x55] sm:$0xff] }
 0x2e0   :  { %v3797_v53 = vpop.f32.mrf.mxu1  ;;  %10674 = vmatprep.mubr.f32.mxu0 %v5880_v59  ;;  %v5883_v43 = vld [vmem:[#allocation2 + $0x4e] sm:$0xff] }
 0x2e1   :  { %v12041_v34 = vadd.f32 %v10321_v3, %v4277_v19  ;;  %v4276_v2 = vadd.f32 %v3797_v53, %v11540_v36  ;;  %v4550_v41 = vpop.f32.mrf.mxu0  ;;  %v5884_v3 = vld [vmem:[#allocation2 + $0x56] sm:$0xff] }
 0x2e2   :  { %v10148_v32 = vpop.f32.mrf.mxu1  ;;  %10499 = vmatmul.mubr.f32.gmra.mxu1 %v5128_v49 }
 0x2e3   :  { %v12044_v9 = vadd.f32 %v4550_v41, %v4276_v2  ;;  %v4279_v22 = vadd.f32 %v10148_v32, %v11543_v61  ;;  %v10324_v62 = vpop.f32.mrf.mxu0  ;;  %10675 = vmatmul.mubr.f32.gmra.mxu0 %v5881_v45  ;;  %10501 = vmatprep.mubr.f32.mxu1 %v5129_v14  ;;  %v5132_v45 = vld [vmem:[#allocation2 + $0x5d] sm:$0xff] }
 0x2e4   :  { %v3807_v12 = vpop.f32.mrf.mxu1  ;;  %10677 = vmatprep.mubr.f32.mxu0 %v5882_v39  ;;  %v5885_v41 = vld [vmem:[#allocation2 + $0x5e] sm:$0xff] }
 0x2e5   :  { %v12047_v59 = vadd.f32 %v10324_v62, %v4279_v22  ;;  %v4278_v36 = vadd.f32 %v3807_v12, %v11546_v13  ;;  %v4560_v19 = vpop.f32.mrf.mxu0  ;;  %v5133_v39 = vld [vmem:[#allocation2 + $0x65] sm:$0xff] }
 0x2e6   :  { %v10151_v53 = vpop.f32.mrf.mxu1  ;;  %10502 = vmatmul.mubr.f32.gmra.mxu1 %v5130_v4  ;;  %v5886_v62 = vld [vmem:[#allocation2 + $0x66] sm:$0xff] }
 0x2e7   :  { %v12050_v49 = vadd.f32 %v4560_v19, %v4278_v36  ;;  %v4281_v61 = vadd.f32 %v10151_v53, %v11549_v51  ;;  %v10327_v2 = vpop.f32.mrf.mxu0  ;;  %10678 = vmatmul.mubr.f32.gmra.mxu0 %v5883_v43  ;;  %10504 = vmatprep.mubr.f32.mxu1 %v5131_v58  ;;  %v5134_v43 = vld [vmem:[#allocation2 + $0x6d] sm:$0xff] }
 0x2e8   :  { %v3817_v14 = vpop.f32.mrf.mxu1  ;;  %10680 = vmatprep.mubr.f32.mxu0 %v5884_v3  ;;  %v5887_v19 = vld [vmem:[#allocation2 + $0x6e] sm:$0xff] }
 0x2e9   :  { %v12053_v32 = vadd.f32 %v10327_v2, %v4281_v61  ;;  %v4280_v13 = vadd.f32 %v3817_v14, %v11552_v48  ;;  %v4570_v22 = vpop.f32.mrf.mxu0  ;;  %v5135_v3 = vld [vmem:[#allocation2 + $0x75] sm:$0xff] }
 0x2ea   :  { %v10154_v12 = vpop.f32.mrf.mxu1  ;;  %10505 = vmatmul.mubr.f32.gmra.mxu1 %v5132_v45  ;;  %v5888_v2 = vld [vmem:[#allocation2 + $0x76] sm:$0xff] }
 0x2eb   :  { %v12056_v4 = vadd.f32 %v4570_v22, %v4280_v13  ;;  %v4283_v51 = vadd.f32 %v10154_v12, %v11555_v30  ;;  %v10330_v36 = vpop.f32.mrf.mxu0  ;;  %10681 = vmatmul.mubr.f32.gmra.mxu0 %v5885_v41  ;;  %10507 = vmatprep.mubr.f32.mxu1 %v5133_v39  ;;  %v5136_v41 = vld [vmem:[#allocation2 + $0x7d] sm:$0xff] }
 0x2ec   :  { %v3827_v58 = vpop.f32.mrf.mxu1  ;;  %10683 = vmatprep.mubr.f32.mxu0 %v5886_v62  ;;  %v5889_v22 = vld [vmem:[#allocation2 + $0x7e] sm:$0xff] }
 0x2ed   :  { %v12059_v53 = vadd.f32 %v10330_v36, %v4283_v51  ;;  %v4282_v48 = vadd.f32 %v3827_v58, %v11558_v47  ;;  %v4580_v61 = vpop.f32.mrf.mxu0  ;;  %v5137_v62 = vld [vmem:[#allocation2 + $0x85] sm:$0xff] }
 0x2ee   :  { %v10157_v14 = vpop.f32.mrf.mxu1  ;;  %10508 = vmatmul.mubr.f32.gmra.mxu1 %v5134_v43  ;;  %v5890_v36 = vld [vmem:[#allocation2 + $0x86] sm:$0xff] }
 0x2ef   :  { %v12062_v45 = vadd.f32 %v4580_v61, %v4282_v48  ;;  %v4285_v30 = vadd.f32 %v10157_v14, %v11561_v38  ;;  %v10333_v13 = vpop.f32.mrf.mxu0  ;;  %10684 = vmatmul.mubr.f32.gmra.mxu0 %v5887_v19  ;;  %10510 = vmatprep.mubr.f32.mxu1 %v5135_v3  ;;  %v5138_v19 = vld [vmem:[#allocation2 + $0x8d] sm:$0xff] }
 0x2f0   :  { %v3837_v39 = vpop.f32.mrf.mxu1  ;;  %10686 = vmatprep.mubr.f32.mxu0 %v5888_v2  ;;  %v5891_v61 = vld [vmem:[#allocation2 + $0x8e] sm:$0xff] }
 0x2f1   :  { %v12065_v12 = vadd.f32 %v10333_v13, %v4285_v30  ;;  %v4284_v47 = vadd.f32 %v3837_v39, %v11564_v55  ;;  %v4590_v51 = vpop.f32.mrf.mxu0  ;;  %v5139_v2 = vld [vmem:[#allocation2 + $0x95] sm:$0xff] }
 0x2f2   :  { %v10160_v58 = vpop.f32.mrf.mxu1  ;;  %10511 = vmatmul.mubr.f32.gmra.mxu1 %v5136_v41  ;;  %v5892_v13 = vld [vmem:[#allocation2 + $0x96] sm:$0xff] }
 0x2f3   :  { %v12068_v43 = vadd.f32 %v4590_v51, %v4284_v47  ;;  %v4287_v38 = vadd.f32 %v10160_v58, %v11567_v46  ;;  %v10336_v48 = vpop.f32.mrf.mxu0  ;;  %10687 = vmatmul.mubr.f32.gmra.mxu0 %v5889_v22  ;;  %10513 = vmatprep.mubr.f32.mxu1 %v5137_v62  ;;  %v5140_v22 = vld [vmem:[#allocation2 + $0x9d] sm:$0xff] }
 0x2f4   :  { %v3847_v3 = vpop.f32.mrf.mxu1  ;;  %10689 = vmatprep.mubr.f32.mxu0 %v5890_v36  ;;  %v5893_v51 = vld [vmem:[#allocation2 + $0x9e] sm:$0xff] }
 0x2f5   :  { %v12071_v14 = vadd.f32 %v10336_v48, %v4287_v38  ;;  %v4286_v55 = vadd.f32 %v3847_v3, %v11570_v33  ;;  %v4600_v30 = vpop.f32.mrf.mxu0  ;;  %v5141_v36 = vld [vmem:[#allocation2 + $0xa5] sm:$0xff] }
 0x2f6   :  { %v10163_v39 = vpop.f32.mrf.mxu1  ;;  %10514 = vmatmul.mubr.f32.gmra.mxu1 %v5138_v19  ;;  %v5894_v48 = vld [vmem:[#allocation2 + $0xa6] sm:$0xff] }
 0x2f7   :  { %v12074_v41 = vadd.f32 %v4600_v30, %v4286_v55  ;;  %v4289_v46 = vadd.f32 %v10163_v39, %v11573_v54  ;;  %v10339_v47 = vpop.f32.mrf.mxu0  ;;  %10690 = vmatmul.mubr.f32.gmra.mxu0 %v5891_v61  ;;  %10516 = vmatprep.mubr.f32.mxu1 %v5139_v2  ;;  %v5142_v61 = vld [vmem:[#allocation2 + $0xad] sm:$0xff] }
 0x2f8   :  { %v3857_v62 = vpop.f32.mrf.mxu1  ;;  %10692 = vmatprep.mubr.f32.mxu0 %v5892_v13  ;;  %v5895_v30 = vld [vmem:[#allocation2 + $0xae] sm:$0xff] }
 0x2f9   :  { %v12077_v58 = vadd.f32 %v10339_v47, %v4289_v46  ;;  %v4288_v33 = vadd.f32 %v3857_v62, %v11576_v11  ;;  %v4610_v38 = vpop.f32.mrf.mxu0  ;;  %v5143_v13 = vld [vmem:[#allocation2 + $0xb5] sm:$0xff] }
 0x2fa   :  { %v10166_v3 = vpop.f32.mrf.mxu1  ;;  %10517 = vmatmul.mubr.f32.gmra.mxu1 %v5140_v22  ;;  %v5896_v47 = vld [vmem:[#allocation2 + $0xb6] sm:$0xff] }
 0x2fb   :  { %v12080_v19 = vadd.f32 %v4610_v38, %v4288_v33  ;;  %v4291_v54 = vadd.f32 %v10166_v3, %v11579_v0  ;;  %v10342_v55 = vpop.f32.mrf.mxu0  ;;  %10693 = vmatmul.mubr.f32.gmra.mxu0 %v5893_v51  ;;  %10519 = vmatprep.mubr.f32.mxu1 %v5141_v36  ;;  %v5144_v51 = vld [vmem:[#allocation2 + $0xbd] sm:$0xff] }
 0x2fc   :  { %v3867_v2 = vpop.f32.mrf.mxu1  ;;  %10695 = vmatprep.mubr.f32.mxu0 %v5894_v48  ;;  %v5897_v38 = vld [vmem:[#allocation2 + $0xbe] sm:$0xff] }
 0x2fd   :  { %v12083_v39 = vadd.f32 %v10342_v55, %v4291_v54  ;;  %v4290_v11 = vadd.f32 %v3867_v2, %v11582_v18  ;;  %v4620_v46 = vpop.f32.mrf.mxu0  ;;  %v5145_v48 = vld [vmem:[#allocation2 + $0xc5] sm:$0xff] }
 0x2fe   :  { %v10169_v62 = vpop.f32.mrf.mxu1  ;;  %10520 = vmatmul.mubr.f32.gmra.mxu1 %v5142_v61  ;;  %v5898_v55 = vld [vmem:[#allocation2 + $0xc6] sm:$0xff] }
 0x2ff   :  { %v12086_v22 = vadd.f32 %v4620_v46, %v4290_v11  ;;  %v4293_v0 = vadd.f32 %v10169_v62, %v11585_v8  ;;  %v10345_v33 = vpop.f32.mrf.mxu0  ;;  %10696 = vmatmul.mubr.f32.gmra.mxu0 %v5895_v30  ;;  %10522 = vmatprep.mubr.f32.mxu1 %v5143_v13  ;;  %v5146_v30 = vld [vmem:[#allocation2 + $0xcd] sm:$0xff] }
 0x300   :  { %v3877_v36 = vpop.f32.mrf.mxu1  ;;  %10698 = vmatprep.mubr.f32.mxu0 %v5896_v47  ;;  %v5899_v46 = vld [vmem:[#allocation2 + $0xce] sm:$0xff] }
 0x301   :  { %v12089_v3 = vadd.f32 %v10345_v33, %v4293_v0  ;;  %v4292_v18 = vadd.f32 %v3877_v36, %v11588_v6  ;;  %v4630_v54 = vpop.f32.mrf.mxu0  ;;  %v5147_v47 = vld [vmem:[#allocation2 + $0xd5] sm:$0xff] }
 0x302   :  { %v10172_v2 = vpop.f32.mrf.mxu1  ;;  %10523 = vmatmul.mubr.f32.gmra.mxu1 %v5144_v51  ;;  %v5900_v33 = vld [vmem:[#allocation2 + $0xd6] sm:$0xff] }
 0x303   :  { %v12092_v61 = vadd.f32 %v4630_v54, %v4292_v18  ;;  %v4295_v8 = vadd.f32 %v10172_v2, %v11591_v16  ;;  %v10348_v11 = vpop.f32.mrf.mxu0  ;;  %10699 = vmatmul.mubr.f32.gmra.mxu0 %v5897_v38  ;;  %10525 = vmatprep.mubr.f32.mxu1 %v5145_v48  ;;  %v5148_v38 = vld [vmem:[#allocation2 + $0xdd] sm:$0xff] }
 0x304   :  { %v3887_v13 = vpop.f32.mrf.mxu1  ;;  %10701 = vmatprep.mubr.f32.mxu0 %v5898_v55  ;;  %v5901_v54 = vld [vmem:[#allocation2 + $0xde] sm:$0xff] }
 0x305   :  { %v12095_v62 = vadd.f32 %v10348_v11, %v4295_v8  ;;  %v4294_v6 = vadd.f32 %v3887_v13, %v11597_v29  ;;  %v4640_v0 = vpop.f32.mrf.mxu0  ;;  %v5149_v55 = vld [vmem:[#allocation2 + $0xe5] sm:$0xff] }
 0x306   :  { %v10175_v36 = vpop.f32.mrf.mxu1  ;;  %10526 = vmatmul.mubr.f32.gmra.mxu1 %v5146_v30  ;;  %v5902_v11 = vld [vmem:[#allocation2 + $0xe6] sm:$0xff] }
 0x307   :  { %v12098_v51 = vadd.f32 %v4640_v0, %v4294_v6  ;;  %v4297_v16 = vadd.f32 %v10175_v36, %v11603_v31  ;;  %v10351_v18 = vpop.f32.mrf.mxu0  ;;  %10702 = vmatmul.mubr.f32.gmra.mxu0 %v5899_v46  ;;  %10528 = vmatprep.mubr.f32.mxu1 %v5147_v47  ;;  %v5150_v46 = vld [vmem:[#allocation2 + $0xed] sm:$0xff] }
 0x308   :  { %v3897_v48 = vpop.f32.mrf.mxu1  ;;  %10704 = vmatprep.mubr.f32.mxu0 %v5900_v33  ;;  %v5903_v0 = vld [vmem:[#allocation2 + $0xee] sm:$0xff] }
 0x309   :  { %v12101_v2 = vadd.f32 %v10351_v18, %v4297_v16  ;;  %v4296_v29 = vadd.f32 %v3897_v48, %v11609_v10  ;;  %v4650_v8 = vpop.f32.mrf.mxu0  ;;  %v5151_v33 = vld [vmem:[#allocation2 + $0xf5] sm:$0xff] }
 0x30a   :  { %v10178_v13 = vpop.f32.mrf.mxu1  ;;  %10529 = vmatmul.mubr.f32.gmra.mxu1 %v5148_v38  ;;  %v5904_v18 = vld [vmem:[#allocation2 + $0xf6] sm:$0xff] }
 0x30b   :  { %v12104_v30 = vadd.f32 %v4650_v8, %v4296_v29  ;;  %v4299_v31 = vadd.f32 %v10178_v13, %v11612_v24  ;;  %v10354_v6 = vpop.f32.mrf.mxu0  ;;  %10705 = vmatmul.mubr.f32.gmra.mxu0 %v5901_v54  ;;  %10531 = vmatprep.mubr.f32.mxu1 %v5149_v55  ;;  %v5152_v54 = vld [vmem:[#allocation2 + $0xfd] sm:$0xff] }
 0x30c   :  { %v3907_v47 = vpop.f32.mrf.mxu1  ;;  %10707 = vmatprep.mubr.f32.mxu0 %v5902_v11  ;;  %v5905_v8 = vld [vmem:[#allocation2 + $0xfe] sm:$0xff] }
 0x30d   :  { %14725 = vst [vmem:[#allocation54_spill] sm:$0xff] %v12104_v30  ;;  %v12107_v36 = vadd.f32 %v10354_v6, %v4299_v31  ;;  %v4298_v10 = vadd.f32 %v3907_v47, %v11621_v7  ;;  %v4660_v16 = vpop.f32.mrf.mxu0  ;;  %v5153_v11 = vld [vmem:[#allocation2 + $0x105] sm:$0xff] }
 0x30e   :  { %v10181_v48 = vpop.f32.mrf.mxu1  ;;  %10532 = vmatmul.mubr.f32.gmra.mxu1 %v5150_v46  ;;  %v5906_v6 = vld [vmem:[#allocation2 + $0x106] sm:$0xff] }
 0x30f   :  { %14726 = vst [vmem:[#allocation55_spill] sm:$0xff] %v12107_v36  ;;  %v12110_v38 = vadd.f32 %v4660_v16, %v4298_v10  ;;  %v4301_v24 = vadd.f32 %v10181_v48, %v11624_v52  ;;  %v10357_v29 = vpop.f32.mrf.mxu0  ;;  %10708 = vmatmul.mubr.f32.gmra.mxu0 %v5903_v0  ;;  %10534 = vmatprep.mubr.f32.mxu1 %v5151_v33  ;;  %v5154_v0 = vld [vmem:[#allocation2 + $0x10d] sm:$0xff]  ;;  %v5207_v36 = vld [vmem:[#allocation2 + $0x2b5] sm:$0xff] }
 0x310   :  { %v3917_v55 = vpop.f32.mrf.mxu1  ;;  %10710 = vmatprep.mubr.f32.mxu0 %v5904_v18  ;;  %v5907_v16 = vld [vmem:[#allocation2 + $0x10e] sm:$0xff] }
 0x311   :  { %14727 = vst [vmem:[#allocation56_spill] sm:$0xff] %v12110_v38  ;;  %v12113_v13 = vadd.f32 %v10357_v29, %v4301_v24  ;;  %v4300_v7 = vadd.f32 %v3917_v55, %v11633_v42  ;;  %v4670_v31 = vpop.f32.mrf.mxu0  ;;  %v5155_v18 = vld [vmem:[#allocation2 + $0x115] sm:$0xff] }
 0x312   :  { %v10184_v47 = vpop.f32.mrf.mxu1  ;;  %10535 = vmatmul.mubr.f32.gmra.mxu1 %v5152_v54  ;;  %v5908_v29 = vld [vmem:[#allocation2 + $0x116] sm:$0xff]  ;;  %v5959_v38 = vld [vmem:[#allocation2 + $0x2ae] sm:$0xff] }
 0x313   :  { %14728 = vst [vmem:[#allocation64_spill] sm:$0xff] %v12113_v13  ;;  %v12116_v46 = vadd.f32 %v4670_v31, %v4300_v7  ;;  %v4303_v52 = vadd.f32 %v10184_v47, %v11636_v21  ;;  %v10360_v10 = vpop.f32.mrf.mxu0  ;;  %10711 = vmatmul.mubr.f32.gmra.mxu0 %v5905_v8  ;;  %10537 = vmatprep.mubr.f32.mxu1 %v5153_v11  ;;  %v5156_v8 = vld [vmem:[#allocation2 + $0x11d] sm:$0xff] }
 0x314   :  { %v3927_v33 = vpop.f32.mrf.mxu1  ;;  %10713 = vmatprep.mubr.f32.mxu0 %v5906_v6  ;;  %v5909_v31 = vld [vmem:[#allocation2 + $0x11e] sm:$0xff] }
 0x315   :  { %14729 = vst [vmem:[#allocation65_spill] sm:$0xff] %v12116_v46  ;;  %v12119_v48 = vadd.f32 %v10360_v10, %v4303_v52  ;;  %v4302_v42 = vadd.f32 %v3927_v33, %v11645_v20  ;;  %v4680_v24 = vpop.f32.mrf.mxu0  ;;  %v5157_v6 = vld [vmem:[#allocation2 + $0x125] sm:$0xff] }
 0x316   :  { %v10187_v55 = vpop.f32.mrf.mxu1  ;;  %10538 = vmatmul.mubr.f32.gmra.mxu1 %v5154_v0  ;;  %v5910_v10 = vld [vmem:[#allocation2 + $0x126] sm:$0xff] }
 0x317   :  { %14730 = vst [vmem:[#allocation66_spill] sm:$0xff] %v12119_v48  ;;  %v12122_v54 = vadd.f32 %v4680_v24, %v4302_v42  ;;  %v4305_v21 = vadd.f32 %v10187_v55, %v11648_v57  ;;  %v10363_v7 = vpop.f32.mrf.mxu0  ;;  %10714 = vmatmul.mubr.f32.gmra.mxu0 %v5907_v16  ;;  %10540 = vmatprep.mubr.f32.mxu1 %v5155_v18  ;;  %v5158_v16 = vld [vmem:[#allocation2 + $0x12d] sm:$0xff]  ;;  %v5201_v48 = vld [vmem:[#allocation2 + $0x285] sm:$0xff] }
 0x318   :  { %v3937_v11 = vpop.f32.mrf.mxu1  ;;  %10716 = vmatprep.mubr.f32.mxu0 %v5908_v29  ;;  %v5911_v24 = vld [vmem:[#allocation2 + $0x12e] sm:$0xff] }
 0x319   :  { %14731 = vst [vmem:[#allocation67_spill] sm:$0xff] %v12122_v54  ;;  %v12125_v47 = vadd.f32 %v10363_v7, %v4305_v21  ;;  %v4304_v20 = vadd.f32 %v3937_v11, %v11657_v50  ;;  %v4690_v52 = vpop.f32.mrf.mxu0  ;;  %v5159_v29 = vld [vmem:[#allocation2 + $0x135] sm:$0xff]  ;;  %v5953_v54 = vld [vmem:[#allocation2 + $0x27e] sm:$0xff] }
 0x31a   :  { %v10190_v33 = vpop.f32.mrf.mxu1  ;;  %10541 = vmatmul.mubr.f32.gmra.mxu1 %v5156_v8  ;;  %v5912_v7 = vld [vmem:[#allocation2 + $0x136] sm:$0xff] }
 0x31b   :  { %14732 = vst [vmem:[#allocation68_spill] sm:$0xff] %v12125_v47  ;;  %v12128_v0 = vadd.f32 %v4690_v52, %v4304_v20  ;;  %v4307_v57 = vadd.f32 %v10190_v33, %v11660_v26  ;;  %v10366_v42 = vpop.f32.mrf.mxu0  ;;  %10717 = vmatmul.mubr.f32.gmra.mxu0 %v5909_v31  ;;  %10543 = vmatprep.mubr.f32.mxu1 %v5157_v6  ;;  %v5160_v31 = vld [vmem:[#allocation2 + $0x13d] sm:$0xff] }
 0x31c   :  { %v3947_v18 = vpop.f32.mrf.mxu1  ;;  %10719 = vmatprep.mubr.f32.mxu0 %v5910_v10  ;;  %v5913_v52 = vld [vmem:[#allocation2 + $0x13e] sm:$0xff] }
 0x31d   :  { %14733 = vst [vmem:[#allocation69_spill] sm:$0xff] %v12128_v0  ;;  %v12131_v55 = vadd.f32 %v10366_v42, %v4307_v57  ;;  %v4306_v50 = vadd.f32 %v3947_v18, %v11669_v44  ;;  %v4700_v21 = vpop.f32.mrf.mxu0  ;;  %v5161_v10 = vld [vmem:[#allocation2 + $0x145] sm:$0xff] }
 0x31e   :  { %v10193_v11 = vpop.f32.mrf.mxu1  ;;  %10544 = vmatmul.mubr.f32.gmra.mxu1 %v5158_v16  ;;  %v5914_v42 = vld [vmem:[#allocation2 + $0x146] sm:$0xff] }
 0x31f   :  { %14734 = vst [vmem:[#allocation70_spill] sm:$0xff] %v12131_v55  ;;  %v12134_v8 = vadd.f32 %v4700_v21, %v4306_v50  ;;  %v4309_v26 = vadd.f32 %v10193_v11, %v11672_v23  ;;  %v10369_v20 = vpop.f32.mrf.mxu0  ;;  %10720 = vmatmul.mubr.f32.gmra.mxu0 %v5911_v24  ;;  %10546 = vmatprep.mubr.f32.mxu1 %v5159_v29  ;;  %v5162_v24 = vld [vmem:[#allocation2 + $0x14d] sm:$0xff]  ;;  %v5195_v55 = vld [vmem:[#allocation2 + $0x255] sm:$0xff] }
 0x320   :  { %v3957_v6 = vpop.f32.mrf.mxu1  ;;  %10722 = vmatprep.mubr.f32.mxu0 %v5912_v7  ;;  %v5915_v21 = vld [vmem:[#allocation2 + $0x14e] sm:$0xff] }
 0x321   :  { %14735 = vst [vmem:[#allocation71_spill] sm:$0xff] %v12134_v8  ;;  %v12137_v33 = vadd.f32 %v10369_v20, %v4309_v26  ;;  %v4308_v44 = vadd.f32 %v3957_v6, %v11681_v28  ;;  %v4710_v57 = vpop.f32.mrf.mxu0  ;;  %v5163_v7 = vld [vmem:[#allocation2 + $0x155] sm:$0xff] }
 0x322   :  { %v10196_v18 = vpop.f32.mrf.mxu1  ;;  %10547 = vmatmul.mubr.f32.gmra.mxu1 %v5160_v31  ;;  %v5916_v20 = vld [vmem:[#allocation2 + $0x156] sm:$0xff]  ;;  %v5947_v8 = vld [vmem:[#allocation2 + $0x24e] sm:$0xff] }
 0x323   :  { %14736 = vst [vmem:[#allocation72_spill] sm:$0xff] %v12137_v33  ;;  %v12140_v16 = vadd.f32 %v4710_v57, %v4308_v44  ;;  %v4311_v23 = vadd.f32 %v10196_v18, %v11684_v37  ;;  %v10372_v50 = vpop.f32.mrf.mxu0  ;;  %10723 = vmatmul.mubr.f32.gmra.mxu0 %v5913_v52  ;;  %10549 = vmatprep.mubr.f32.mxu1 %v5161_v10  ;;  %v5164_v52 = vld [vmem:[#allocation2 + $0x15d] sm:$0xff] }
 0x324   :  { %v3967_v29 = vpop.f32.mrf.mxu1  ;;  %10725 = vmatprep.mubr.f32.mxu0 %v5914_v42  ;;  %v5917_v57 = vld [vmem:[#allocation2 + $0x15e] sm:$0xff] }
 0x325   :  { %14737 = vst [vmem:[#allocation73_spill] sm:$0xff] %v12140_v16  ;;  %v12143_v11 = vadd.f32 %v10372_v50, %v4311_v23  ;;  %v4310_v28 = vadd.f32 %v3967_v29, %v11693_v35  ;;  %v4720_v26 = vpop.f32.mrf.mxu0  ;;  %v5165_v42 = vld [vmem:[#allocation2 + $0x165] sm:$0xff] }
 0x326   :  { %v10199_v6 = vpop.f32.mrf.mxu1  ;;  %10550 = vmatmul.mubr.f32.gmra.mxu1 %v5162_v24  ;;  %v5918_v50 = vld [vmem:[#allocation2 + $0x166] sm:$0xff] }
 0x327   :  { %14738 = vst [vmem:[#allocation74_spill] sm:$0xff] %v12143_v11  ;;  %v12146_v31 = vadd.f32 %v4720_v26, %v4310_v28  ;;  %v4313_v37 = vadd.f32 %v10199_v6, %v11696_v40  ;;  %v10375_v44 = vpop.f32.mrf.mxu0  ;;  %10726 = vmatmul.mubr.f32.gmra.mxu0 %v5915_v21  ;;  %10552 = vmatprep.mubr.f32.mxu1 %v5163_v7  ;;  %v5166_v21 = vld [vmem:[#allocation2 + $0x16d] sm:$0xff]  ;;  %v5189_v11 = vld [vmem:[#allocation2 + $0x225] sm:$0xff] }
 0x328   :  { %v3977_v10 = vpop.f32.mrf.mxu1  ;;  %10728 = vmatprep.mubr.f32.mxu0 %v5916_v20  ;;  %v5919_v26 = vld [vmem:[#allocation2 + $0x16e] sm:$0xff] }
 0x329   :  { %14739 = vst [vmem:[#allocation75_spill] sm:$0xff] %v12146_v31  ;;  %v12149_v18 = vadd.f32 %v10375_v44, %v4313_v37  ;;  %v4312_v35 = vadd.f32 %v3977_v10, %v11705_v25  ;;  %v4730_v23 = vpop.f32.mrf.mxu0  ;;  %v5167_v20 = vld [vmem:[#allocation2 + $0x175] sm:$0xff]  ;;  %v5941_v31 = vld [vmem:[#allocation2 + $0x21e] sm:$0xff] }
 0x32a   :  { %v10202_v29 = vpop.f32.mrf.mxu1  ;;  %10553 = vmatmul.mubr.f32.gmra.mxu1 %v5164_v52  ;;  %v5920_v44 = vld [vmem:[#allocation2 + $0x176] sm:$0xff] }
 0x32b   :  { %14740 = vst [vmem:[#allocation76_spill] sm:$0xff] %v12149_v18  ;;  %v12152_v24 = vadd.f32 %v4730_v23, %v4312_v35  ;;  %v4315_v40 = vadd.f32 %v10202_v29, %v11708_v5  ;;  %v10378_v28 = vpop.f32.mrf.mxu0  ;;  %10729 = vmatmul.mubr.f32.gmra.mxu0 %v5917_v57  ;;  %10555 = vmatprep.mubr.f32.mxu1 %v5165_v42  ;;  %v5168_v57 = vld [vmem:[#allocation2 + $0x17d] sm:$0xff] }
 0x32c   :  { %v3987_v7 = vpop.f32.mrf.mxu1  ;;  %10731 = vmatprep.mubr.f32.mxu0 %v5918_v50  ;;  %v5921_v23 = vld [vmem:[#allocation2 + $0x17e] sm:$0xff] }
 0x32d   :  { %14741 = vst [vmem:[#allocation77_spill] sm:$0xff] %v12152_v24  ;;  %v12155_v6 = vadd.f32 %v10378_v28, %v4315_v40  ;;  %v4314_v25 = vadd.f32 %v3987_v7, %v11717_v27  ;;  %v4740_v37 = vpop.f32.mrf.mxu0  ;;  %v5169_v50 = vld [vmem:[#allocation2 + $0x185] sm:$0xff] }
 0x32e   :  { %v10205_v10 = vpop.f32.mrf.mxu1  ;;  %10556 = vmatmul.mubr.f32.gmra.mxu1 %v5166_v21  ;;  %v5922_v28 = vld [vmem:[#allocation2 + $0x186] sm:$0xff] }
 0x32f   :  { %14742 = vst [vmem:[#allocation78_spill] sm:$0xff] %v12155_v6  ;;  %v12158_v52 = vadd.f32 %v4740_v37, %v4314_v25  ;;  %v4317_v5 = vadd.f32 %v10205_v10, %v11720_v56  ;;  %v10381_v35 = vpop.f32.mrf.mxu0  ;;  %10732 = vmatmul.mubr.f32.gmra.mxu0 %v5919_v26  ;;  %10558 = vmatprep.mubr.f32.mxu1 %v5167_v20  ;;  %v14746_v25 = vld [vmem:[#allocation58_spill] sm:$0xff]  ;;  %v5170_v26 = vld [vmem:[#allocation2 + $0x18d] sm:$0xff]  ;;  %v5171_v10 = vld [vmem:[#allocation2 + $0x195] sm:$0xff] }
 0x330   :  { %v3997_v42 = vpop.f32.mrf.mxu1  ;;  %10734 = vmatprep.mubr.f32.mxu0 %v5920_v44  ;;  %v5923_v44 = vld [vmem:[#allocation2 + $0x18e] sm:$0xff] }
 0x331   :  { %14743 = vst [vmem:[#allocation79_spill] sm:$0xff] %v12158_v52  ;;  %v12161_v29 = vadd.f32 %v10381_v35, %v4317_v5  ;;  %v4316_v27 = vadd.f32 %v3997_v42, %v11729_v15  ;;  %v4750_v40 = vpop.f32.mrf.mxu0  ;;  %v14748_v35 = vld [vmem:[#allocation60_spill] sm:$0xff] }
 0x332   :  { %v10208_v7 = vpop.f32.mrf.mxu1  ;;  %10559 = vmatmul.mubr.f32.gmra.mxu1 %v5168_v57  ;;  %v5183_v6 = vld [vmem:[#allocation2 + $0x1f5] sm:$0xff] }
 0x333   :  { %14744 = vst [vmem:[#allocation80_spill] sm:$0xff] %v12161_v29  ;;  %v12164_v21 = vadd.f32 %v4750_v40, %v4316_v27  ;;  %v4319_v56 = vadd.f32 %v10208_v7, %v14746_v25  ;;  %v10384_v37 = vpop.f32.mrf.mxu0  ;;  %10735 = vmatmul.mubr.f32.gmra.mxu0 %v5921_v23  ;;  %10561 = vmatprep.mubr.f32.mxu1 %v5169_v50  ;;  %v5924_v29 = vld [vmem:[#allocation2 + $0x196] sm:$0xff]  ;;  %v14750_v27 = vld [vmem:[#allocation62_spill] sm:$0xff] }
 0x334   :  { %v4007_v20 = vpop.f32.mrf.mxu1  ;;  %10737 = vmatprep.mubr.f32.mxu0 %v5922_v28  ;;  %v5172_v23 = vld [vmem:[#allocation2 + $0x19d] sm:$0xff]  ;;  %v5173_v25 = vld [vmem:[#allocation2 + $0x1a5] sm:$0xff] }
 0x335   :  { %14745 = vst [vmem:[#allocation81_spill] sm:$0xff] %v12164_v21  ;;  %v12167_v5 = vadd.f32 %v10384_v37, %v4319_v56  ;;  %v4318_v15 = vadd.f32 %v4007_v20, %v14748_v35  ;;  %v4760_v42 = vpop.f32.mrf.mxu0  ;;  %v5925_v28 = vld [vmem:[#allocation2 + $0x19e] sm:$0xff]  ;;  %v14752_v37 = vld [vmem:[#allocation63_spill] sm:$0xff] }
 0x336   :  { %v10211_v52 = vpop.f32.mrf.mxu1  ;;  %10562 = vmatmul.mubr.f32.gmra.mxu1 %v5170_v26 }
 0x337   :  { %14747 = vst [vmem:[#allocation58_spill] sm:$0xff] %v12167_v5  ;;  %v12170_v57 = vadd.f32 %v4760_v42, %v4318_v15  ;;  %v4321_v40 = vadd.f32 %v10211_v52, %v14750_v27  ;;  %v10387_v7 = vpop.f32.mrf.mxu0  ;;  %10738 = vmatmul.mubr.f32.gmra.mxu0 %v5923_v44  ;;  %10564 = vmatprep.mubr.f32.mxu1 %v5171_v10  ;;  %v5926_v5 = vld [vmem:[#allocation2 + $0x1a6] sm:$0xff]  ;;  %v14754_v15 = vld [vmem:[#allocation57_spill] sm:$0xff] }
 0x338   :  { %v4017_v50 = vpop.f32.mrf.mxu1  ;;  %10740 = vmatprep.mubr.f32.mxu0 %v5924_v29  ;;  %v5174_v44 = vld [vmem:[#allocation2 + $0x1ad] sm:$0xff]  ;;  %v5175_v27 = vld [vmem:[#allocation2 + $0x1b5] sm:$0xff] }
 0x339   :  { %14749 = vst [vmem:[#allocation60_spill] sm:$0xff] %v12170_v57  ;;  %v12173_v56 = vadd.f32 %v10387_v7, %v4321_v40  ;;  %v4320_v20 = vadd.f32 %v4017_v50, %v14752_v37  ;;  %v4770_v35 = vpop.f32.mrf.mxu0  ;;  %v5927_v29 = vld [vmem:[#allocation2 + $0x1ae] sm:$0xff] }
 0x33a   :  { %v10214_v21 = vpop.f32.mrf.mxu1  ;;  %10565 = vmatmul.mubr.f32.gmra.mxu1 %v5172_v23  ;;  %v14756_v7 = vld [vmem:[#allocation59_spill] sm:$0xff] }
 0x33b   :  { %14751 = vst [vmem:[#allocation62_spill] sm:$0xff] %v12173_v56  ;;  %v12176_v26 = vadd.f32 %v4770_v35, %v4320_v20  ;;  %v4323_v52 = vadd.f32 %v10214_v21, %v14754_v15  ;;  %v10390_v42 = vpop.f32.mrf.mxu0  ;;  %10741 = vmatmul.mubr.f32.gmra.mxu0 %v5925_v28  ;;  %10567 = vmatprep.mubr.f32.mxu1 %v5173_v25  ;;  %v5928_v56 = vld [vmem:[#allocation2 + $0x1b6] sm:$0xff]  ;;  %v5177_v15 = vld [vmem:[#allocation2 + $0x1c5] sm:$0xff] }
 0x33c   :  { %v4027_v10 = vpop.f32.mrf.mxu1  ;;  %10743 = vmatprep.mubr.f32.mxu0 %v5926_v5  ;;  %v14758_v20 = vld [vmem:[#allocation61_spill] sm:$0xff] }
 0x33d   :  { %14753 = vst [vmem:[#allocation63_spill] sm:$0xff] %v12176_v26  ;;  %v12179_v40 = vadd.f32 %v10390_v42, %v4323_v52  ;;  %v4322_v50 = vadd.f32 %v4027_v10, %v14756_v7  ;;  %v4780_v37 = vpop.f32.mrf.mxu0  ;;  %v5176_v28 = vld [vmem:[#allocation2 + $0x1bd] sm:$0xff]  ;;  %v14760_v42 = vld [vmem:[#allocation11_spill] sm:$0xff] }
 0x33e   :  { %v10217_v57 = vpop.f32.mrf.mxu1  ;;  %10568 = vmatmul.mubr.f32.gmra.mxu1 %v5174_v44  ;;  %v5929_v5 = vld [vmem:[#allocation2 + $0x1be] sm:$0xff] }
 0x33f   :  { %14755 = vst [vmem:[#allocation57_spill] sm:$0xff] %v12179_v40  ;;  %v12182_v23 = vadd.f32 %v4780_v37, %v4322_v50  ;;  %v4325_v21 = vadd.f32 %v10217_v57, %v14758_v20  ;;  %v10393_v35 = vpop.f32.mrf.mxu0  ;;  %10744 = vmatmul.mubr.f32.gmra.mxu0 %v5927_v29  ;;  %10570 = vmatprep.mubr.f32.mxu1 %v5175_v27  ;;  %v5930_v40 = vld [vmem:[#allocation2 + $0x1c6] sm:$0xff]  ;;  %v14762_v50 = vld [vmem:[#allocation12_spill] sm:$0xff] }
 0x340   :  { %v4037_v25 = vpop.f32.mrf.mxu1  ;;  %10746 = vmatprep.mubr.f32.mxu0 %v5928_v56  ;;  %v5178_v29 = vld [vmem:[#allocation2 + $0x1cd] sm:$0xff]  ;;  %v5179_v20 = vld [vmem:[#allocation2 + $0x1d5] sm:$0xff] }
 0x341   :  { %14757 = vst [vmem:[#allocation59_spill] sm:$0xff] %v12182_v23  ;;  %v12185_v52 = vadd.f32 %v10393_v35, %v4325_v21  ;;  %v4324_v10 = vadd.f32 %v4037_v25, %v14760_v42  ;;  %v4790_v7 = vpop.f32.mrf.mxu0  ;;  %v5931_v56 = vld [vmem:[#allocation2 + $0x1ce] sm:$0xff]  ;;  %v14764_v35 = vld [vmem:[#allocation13_spill] sm:$0xff] }
 0x342   :  { %v10220_v26 = vpop.f32.mrf.mxu1  ;;  %10571 = vmatmul.mubr.f32.gmra.mxu1 %v5176_v28 }
 0x343   :  { %14759 = vst [vmem:[#allocation61_spill] sm:$0xff] %v12185_v52  ;;  %v12188_v44 = vadd.f32 %v4790_v7, %v4324_v10  ;;  %v4327_v57 = vadd.f32 %v10220_v26, %v14762_v50  ;;  %v10396_v37 = vpop.f32.mrf.mxu0  ;;  %10747 = vmatmul.mubr.f32.gmra.mxu0 %v5929_v5  ;;  %10573 = vmatprep.mubr.f32.mxu1 %v5177_v15  ;;  %v5932_v52 = vld [vmem:[#allocation2 + $0x1d6] sm:$0xff]  ;;  %v14766_v10 = vld [vmem:[#allocation14_spill] sm:$0xff]  ;;  %v12197_v15 = vpop.permute.xlu0 %6831 }
 0x344   :  { %v4047_v27 = vpop.f32.mrf.mxu1  ;;  %10749 = vmatprep.mubr.f32.mxu0 %v5930_v40  ;;  %v5180_v5 = vld [vmem:[#allocation2 + $0x1dd] sm:$0xff] }
 0x345   :  { %14761 = vst [vmem:[#allocation11_spill] sm:$0xff] %v12188_v44  ;;  %v12191_v21 = vadd.f32 %v10396_v37, %v4327_v57  ;;  %v4326_v25 = vadd.f32 %v4047_v27, %v14764_v35  ;;  %v4800_v42 = vpop.f32.mrf.mxu0  ;;  %v5933_v50 = vld [vmem:[#allocation2 + $0x1de] sm:$0xff]  ;;  %v12199_v37 = vpop.permute.xlu1 %6841  ;;  %v14768_v35 = vld [vmem:[#allocation15_spill] sm:$0xff] }
 0x346   :  { %v10223_v23 = vpop.f32.mrf.mxu1  ;;  %10574 = vmatmul.mubr.f32.gmra.mxu1 %v5178_v29  ;;  %v5181_v57 = vld [vmem:[#allocation2 + $0x1e5] sm:$0xff]  ;;  %v5935_v44 = vld [vmem:[#allocation2 + $0x1ee] sm:$0xff] }
 0x347   :  { %14763 = vst [vmem:[#allocation12_spill] sm:$0xff] %v12191_v21  ;;  %v12194_v28 = vadd.f32 %v4800_v42, %v4326_v25  ;;  %v4329_v26 = vadd.f32 %v10223_v23, %v14766_v10  ;;  %v10399_v7 = vpop.f32.mrf.mxu0  ;;  %10750 = vmatmul.mubr.f32.gmra.mxu0 %v5931_v56  ;;  %10576 = vmatprep.mubr.f32.mxu1 %v5179_v20  ;;  %v5934_v42 = vld [vmem:[#allocation2 + $0x1e6] sm:$0xff]  ;;  %v14770_v56 = vld [vmem:[#allocation16_spill] sm:$0xff]  ;;  %v12210_v24 = vpop.permute.xlu0 %6836 }
 0x348   :  { %v4057_v40 = vpop.f32.mrf.mxu1  ;;  %10752 = vmatprep.mubr.f32.mxu0 %v5932_v52  ;;  %v5182_v52 = vld [vmem:[#allocation2 + $0x1ed] sm:$0xff] }
 0x349   :  { %14765 = vst [vmem:[#allocation13_spill] sm:$0xff] %v12194_v28  ;;  %v12201_v27 = vadd.f32 %v10399_v7, %v4329_v26  ;;  %v4328_v29 = vadd.f32 %v4057_v40, %v14768_v35  ;;  %v4810_v25 = vpop.f32.mrf.mxu0  ;;  %v14772_v7 = vld [vmem:[#allocation17_spill] sm:$0xff] }
 0x34a   :  { %v10226_v28 = vpop.f32.mrf.mxu1  ;;  %10577 = vmatmul.mubr.f32.gmra.mxu1 %v5180_v5 }
 0x34b   :  { %14767 = vst [vmem:[#allocation14_spill] sm:$0xff] %v12201_v27  ;;  %v12204_v23 = vadd.f32 %v4810_v25, %v4328_v29  ;;  %v4331_v20 = vadd.f32 %v10226_v28, %v14770_v56  ;;  %v10402_v10 = vpop.f32.mrf.mxu0  ;;  %10753 = vmatmul.mubr.f32.gmra.mxu0 %v5933_v50  ;;  %10579 = vmatprep.mubr.f32.mxu1 %v5181_v57  ;;  %v5936_v27 = vld [vmem:[#allocation2 + $0x1f6] sm:$0xff]  ;;  %v12212_v29 = vpop.permute.xlu1 %6846  ;;  %v14774_v50 = vld [vmem:[#allocation18_spill] sm:$0xff] }
 0x34c   :  { %v4067_v21 = vpop.f32.mrf.mxu1  ;;  %10755 = vmatprep.mubr.f32.mxu0 %v5934_v42  ;;  %v5184_v42 = vld [vmem:[#allocation2 + $0x1fd] sm:$0xff] }
 0x34d   :  { %14769 = vst [vmem:[#allocation15_spill] sm:$0xff] %v12204_v23  ;;  %v12207_v26 = vadd.f32 %v10402_v10, %v4331_v20  ;;  %v4330_v40 = vadd.f32 %v4067_v21, %v14772_v7  ;;  %v4820_v35 = vpop.f32.mrf.mxu0  ;;  %v5937_v20 = vld [vmem:[#allocation2 + $0x1fe] sm:$0xff]  ;;  %v14776_v7 = vld [vmem:[#allocation19_spill] sm:$0xff] }
 0x34e   :  { %v10229_v5 = vpop.f32.mrf.mxu1  ;;  %10580 = vmatmul.mubr.f32.gmra.mxu1 %v5182_v52  ;;  %v5185_v21 = vld [vmem:[#allocation2 + $0x205] sm:$0xff] }
 0x34f   :  { %14771 = vst [vmem:[#allocation16_spill] sm:$0xff] %v12207_v26  ;;  %v12214_v28 = vadd.f32 %v4820_v35, %v4330_v40  ;;  %v4333_v57 = vadd.f32 %v10229_v5, %v14774_v50  ;;  %v10405_v25 = vpop.f32.mrf.mxu0  ;;  %10756 = vmatmul.mubr.f32.gmra.mxu0 %v5935_v44  ;;  %10582 = vmatprep.mubr.f32.mxu1 %v5183_v6  ;;  %v5938_v52 = vld [vmem:[#allocation2 + $0x206] sm:$0xff]  ;;  %v14778_v35 = vld [vmem:[#allocation20_spill] sm:$0xff]  ;;  %v12223_v44 = vpop.permute.xlu0 %6851 }
 0x350   :  { %v4077_v56 = vpop.f32.mrf.mxu1  ;;  %10758 = vmatprep.mubr.f32.mxu0 %v5936_v27  ;;  %v5186_v6 = vld [vmem:[#allocation2 + $0x20d] sm:$0xff] }
 0x351   :  { %14773 = vst [vmem:[#allocation17_spill] sm:$0xff] %v12214_v28  ;;  %v12217_v10 = vadd.f32 %v10405_v25, %v4333_v57  ;;  %v4332_v26 = vadd.f32 %v4077_v56, %v14776_v7  ;;  %v4830_v23 = vpop.f32.mrf.mxu0  ;;  %v5939_v57 = vld [vmem:[#allocation2 + $0x20e] sm:$0xff]  ;;  %v14780_v7 = vld [vmem:[#allocation21_spill] sm:$0xff] }
 0x352   :  { %v10232_v18 = vpop.f32.mrf.mxu1  ;;  %10583 = vmatmul.mubr.f32.gmra.mxu1 %v5184_v42  ;;  %v5187_v25 = vld [vmem:[#allocation2 + $0x215] sm:$0xff] }
 0x353   :  { %14775 = vst [vmem:[#allocation18_spill] sm:$0xff] %v12217_v10  ;;  %v12220_v40 = vadd.f32 %v4830_v23, %v4332_v26  ;;  %v4335_v5 = vadd.f32 %v10232_v18, %v14778_v35  ;;  %v10408_v50 = vpop.f32.mrf.mxu0  ;;  %10759 = vmatmul.mubr.f32.gmra.mxu0 %v5937_v20  ;;  %10585 = vmatprep.mubr.f32.mxu1 %v5185_v21  ;;  %v12225_v10 = vpop.permute.xlu1 %6856  ;;  %v5940_v26 = vld [vmem:[#allocation2 + $0x216] sm:$0xff]  ;;  %v14782_v20 = vld [vmem:[#allocation22_spill] sm:$0xff] }
 0x354   :  { %v4087_v27 = vpop.f32.mrf.mxu1  ;;  %10761 = vmatprep.mubr.f32.mxu0 %v5938_v52  ;;  %v5188_v52 = vld [vmem:[#allocation2 + $0x21d] sm:$0xff]  ;;  %v12236_v16 = vpop.permute.xlu0 %6861 }
 0x355   :  { %14777 = vst [vmem:[#allocation19_spill] sm:$0xff] %v12220_v40  ;;  %v12227_v56 = vadd.f32 %v10408_v50, %v4335_v5  ;;  %v4334_v42 = vadd.f32 %v4087_v27, %v14780_v7  ;;  %v4840_v23 = vpop.f32.mrf.mxu0  ;;  %v14784_v50 = vld [vmem:[#allocation23_spill] sm:$0xff] }
 0x356   :  { %v10235_v40 = vpop.f32.mrf.mxu1  ;;  %10586 = vmatmul.mubr.f32.gmra.mxu1 %v5186_v6 }
 0x357   :  { %14779 = vst [vmem:[#allocation20_spill] sm:$0xff] %v12227_v56  ;;  %v12230_v18 = vadd.f32 %v4840_v23, %v4334_v42  ;;  %v4337_v21 = vadd.f32 %v10235_v40, %v14782_v20  ;;  %v10411_v35 = vpop.f32.mrf.mxu0  ;;  %10762 = vmatmul.mubr.f32.gmra.mxu0 %v5939_v57  ;;  %10588 = vmatprep.mubr.f32.mxu1 %v5187_v25  ;;  %v5942_v56 = vld [vmem:[#allocation2 + $0x226] sm:$0xff]  ;;  %v12238_v42 = vpop.permute.xlu1 %6866  ;;  %v14786_v57 = vld [vmem:[#allocation24_spill] sm:$0xff] }
 0x358   :  { %v4097_v28 = vpop.f32.mrf.mxu1  ;;  %10764 = vmatprep.mubr.f32.mxu0 %v5940_v26  ;;  %v5190_v26 = vld [vmem:[#allocation2 + $0x22d] sm:$0xff] }
 0x359   :  { %14781 = vst [vmem:[#allocation21_spill] sm:$0xff] %v12230_v18  ;;  %v12233_v5 = vadd.f32 %v10411_v35, %v4337_v21  ;;  %v4336_v27 = vadd.f32 %v4097_v28, %v14784_v50  ;;  %v4850_v7 = vpop.f32.mrf.mxu0  ;;  %v5943_v21 = vld [vmem:[#allocation2 + $0x22e] sm:$0xff]  ;;  %v14788_v50 = vld [vmem:[#allocation25_spill] sm:$0xff] }
 0x35a   :  { %v10238_v6 = vpop.f32.mrf.mxu1  ;;  %10589 = vmatmul.mubr.f32.gmra.mxu1 %v5188_v52  ;;  %v5191_v28 = vld [vmem:[#allocation2 + $0x235] sm:$0xff] }
 0x35b   :  { %14783 = vst [vmem:[#allocation22_spill] sm:$0xff] %v12233_v5  ;;  %v12240_v40 = vadd.f32 %v4850_v7, %v4336_v27  ;;  %v4339_v25 = vadd.f32 %v10238_v6, %v14786_v57  ;;  %v10414_v23 = vpop.f32.mrf.mxu0  ;;  %10765 = vmatmul.mubr.f32.gmra.mxu0 %v5941_v31  ;;  %10591 = vmatprep.mubr.f32.mxu1 %v5189_v11  ;;  %v5944_v52 = vld [vmem:[#allocation2 + $0x236] sm:$0xff]  ;;  %v14790_v7 = vld [vmem:[#allocation26_spill] sm:$0xff]  ;;  %v12249_v31 = vpop.permute.xlu0 %6871 }
 0x35c   :  { %v4107_v20 = vpop.f32.mrf.mxu1  ;;  %10767 = vmatprep.mubr.f32.mxu0 %v5942_v56  ;;  %v5192_v11 = vld [vmem:[#allocation2 + $0x23d] sm:$0xff] }
 0x35d   :  { %14785 = vst [vmem:[#allocation23_spill] sm:$0xff] %v12240_v40  ;;  %v12243_v35 = vadd.f32 %v10414_v23, %v4339_v25  ;;  %v4338_v5 = vadd.f32 %v4107_v20, %v14788_v50  ;;  %v4860_v18 = vpop.f32.mrf.mxu0  ;;  %v5945_v25 = vld [vmem:[#allocation2 + $0x23e] sm:$0xff]  ;;  %v14792_v50 = vld [vmem:[#allocation27_spill] sm:$0xff] }
 0x35e   :  { %v10241_v33 = vpop.f32.mrf.mxu1  ;;  %10592 = vmatmul.mubr.f32.gmra.mxu1 %v5190_v26  ;;  %v5193_v23 = vld [vmem:[#allocation2 + $0x245] sm:$0xff] }
 0x35f   :  { %14787 = vst [vmem:[#allocation24_spill] sm:$0xff] %v12243_v35  ;;  %v12246_v27 = vadd.f32 %v4860_v18, %v4338_v5  ;;  %v4341_v6 = vadd.f32 %v10241_v33, %v14790_v7  ;;  %v10417_v57 = vpop.f32.mrf.mxu0  ;;  %10768 = vmatmul.mubr.f32.gmra.mxu0 %v5943_v21  ;;  %10594 = vmatprep.mubr.f32.mxu1 %v5191_v28  ;;  %v12251_v35 = vpop.permute.xlu1 %6876  ;;  %v5946_v5 = vld [vmem:[#allocation2 + $0x246] sm:$0xff]  ;;  %v14794_v21 = vld [vmem:[#allocation28_spill] sm:$0xff] }
 0x360   :  { %v4117_v56 = vpop.f32.mrf.mxu1  ;;  %10770 = vmatprep.mubr.f32.mxu0 %v5944_v52  ;;  %v5194_v52 = vld [vmem:[#allocation2 + $0x24d] sm:$0xff]  ;;  %v12262_v0 = vpop.permute.xlu0 %6881 }
 0x361   :  { %14789 = vst [vmem:[#allocation25_spill] sm:$0xff] %v12246_v27  ;;  %v12253_v20 = vadd.f32 %v10417_v57, %v4341_v6  ;;  %v4340_v26 = vadd.f32 %v4117_v56, %v14792_v50  ;;  %v4870_v18 = vpop.f32.mrf.mxu0  ;;  %v14796_v57 = vld [vmem:[#allocation29_spill] sm:$0xff] }
 0x362   :  { %v10244_v27 = vpop.f32.mrf.mxu1  ;;  %10595 = vmatmul.mubr.f32.gmra.mxu1 %v5192_v11 }
 0x363   :  { %14791 = vst [vmem:[#allocation26_spill] sm:$0xff] %v12253_v20  ;;  %v12256_v33 = vadd.f32 %v4870_v18, %v4340_v26  ;;  %v4343_v28 = vadd.f32 %v10244_v27, %v14794_v21  ;;  %v10420_v7 = vpop.f32.mrf.mxu0  ;;  %10771 = vmatmul.mubr.f32.gmra.mxu0 %v5945_v25  ;;  %10597 = vmatprep.mubr.f32.mxu1 %v5193_v23  ;;  %v5948_v20 = vld [vmem:[#allocation2 + $0x256] sm:$0xff]  ;;  %v12264_v26 = vpop.permute.xlu1 %6886  ;;  %v14798_v25 = vld [vmem:[#allocation30_spill] sm:$0xff] }
 0x364   :  { %v4127_v40 = vpop.f32.mrf.mxu1  ;;  %10773 = vmatprep.mubr.f32.mxu0 %v5946_v5  ;;  %v5196_v5 = vld [vmem:[#allocation2 + $0x25d] sm:$0xff] }
 0x365   :  { %14793 = vst [vmem:[#allocation27_spill] sm:$0xff] %v12256_v33  ;;  %v12259_v6 = vadd.f32 %v10420_v7, %v4343_v28  ;;  %v4342_v56 = vadd.f32 %v4127_v40, %v14796_v57  ;;  %v4880_v50 = vpop.f32.mrf.mxu0  ;;  %v5949_v28 = vld [vmem:[#allocation2 + $0x25e] sm:$0xff]  ;;  %v14800_v57 = vld [vmem:[#allocation31_spill] sm:$0xff] }
 0x366   :  { %v10247_v11 = vpop.f32.mrf.mxu1  ;;  %10598 = vmatmul.mubr.f32.gmra.mxu1 %v5194_v52  ;;  %v5197_v40 = vld [vmem:[#allocation2 + $0x265] sm:$0xff] }
 0x367   :  { %14795 = vst [vmem:[#allocation28_spill] sm:$0xff] %v12259_v6  ;;  %v12266_v27 = vadd.f32 %v4880_v50, %v4342_v56  ;;  %v4345_v23 = vadd.f32 %v10247_v11, %v14798_v25  ;;  %v10423_v18 = vpop.f32.mrf.mxu0  ;;  %10774 = vmatmul.mubr.f32.gmra.mxu0 %v5947_v8  ;;  %10600 = vmatprep.mubr.f32.mxu1 %v5195_v55  ;;  %v5950_v52 = vld [vmem:[#allocation2 + $0x266] sm:$0xff]  ;;  %v14802_v50 = vld [vmem:[#allocation32_spill] sm:$0xff]  ;;  %v12275_v8 = vpop.permute.xlu0 %6891 }
 0x368   :  { %v4137_v21 = vpop.f32.mrf.mxu1  ;;  %10776 = vmatprep.mubr.f32.mxu0 %v5948_v20  ;;  %v5198_v55 = vld [vmem:[#allocation2 + $0x26d] sm:$0xff] }
 0x369   :  { %14797 = vst [vmem:[#allocation29_spill] sm:$0xff] %v12266_v27  ;;  %v12269_v7 = vadd.f32 %v10423_v18, %v4345_v23  ;;  %v4344_v6 = vadd.f32 %v4137_v21, %v14800_v57  ;;  %v4890_v33 = vpop.f32.mrf.mxu0  ;;  %v5951_v23 = vld [vmem:[#allocation2 + $0x26e] sm:$0xff]  ;;  %v14804_v57 = vld [vmem:[#allocation33_spill] sm:$0xff] }
 0x36a   :  { %v10250_v47 = vpop.f32.mrf.mxu1  ;;  %10601 = vmatmul.mubr.f32.gmra.mxu1 %v5196_v5  ;;  %v5199_v18 = vld [vmem:[#allocation2 + $0x275] sm:$0xff] }
 0x36b   :  { %14799 = vst [vmem:[#allocation30_spill] sm:$0xff] %v12269_v7  ;;  %v12272_v56 = vadd.f32 %v4890_v33, %v4344_v6  ;;  %v4347_v11 = vadd.f32 %v10250_v47, %v14802_v50  ;;  %v10426_v25 = vpop.f32.mrf.mxu0  ;;  %10777 = vmatmul.mubr.f32.gmra.mxu0 %v5949_v28  ;;  %10603 = vmatprep.mubr.f32.mxu1 %v5197_v40  ;;  %v12277_v7 = vpop.permute.xlu1 %6896  ;;  %v5952_v6 = vld [vmem:[#allocation2 + $0x276] sm:$0xff]  ;;  %v14806_v28 = vld [vmem:[#allocation34_spill] sm:$0xff] }
 0x36c   :  { %v4147_v20 = vpop.f32.mrf.mxu1  ;;  %10779 = vmatprep.mubr.f32.mxu0 %v5950_v52  ;;  %v5200_v52 = vld [vmem:[#allocation2 + $0x27d] sm:$0xff]  ;;  %v12288_v46 = vpop.permute.xlu0 %6901 }
 0x36d   :  { %14801 = vst [vmem:[#allocation31_spill] sm:$0xff] %v12272_v56  ;;  %v12279_v21 = vadd.f32 %v10426_v25, %v4347_v11  ;;  %v4346_v5 = vadd.f32 %v4147_v20, %v14804_v57  ;;  %v4900_v33 = vpop.f32.mrf.mxu0  ;;  %v14808_v25 = vld [vmem:[#allocation35_spill] sm:$0xff] }
 0x36e   :  { %v10253_v56 = vpop.f32.mrf.mxu1  ;;  %10604 = vmatmul.mubr.f32.gmra.mxu1 %v5198_v55 }
 0x36f   :  { %14803 = vst [vmem:[#allocation32_spill] sm:$0xff] %v12279_v21  ;;  %v12282_v47 = vadd.f32 %v4900_v33, %v4346_v5  ;;  %v4349_v40 = vadd.f32 %v10253_v56, %v14806_v28  ;;  %v10429_v50 = vpop.f32.mrf.mxu0  ;;  %10780 = vmatmul.mubr.f32.gmra.mxu0 %v5951_v23  ;;  %10606 = vmatprep.mubr.f32.mxu1 %v5199_v18  ;;  %v5954_v21 = vld [vmem:[#allocation2 + $0x286] sm:$0xff]  ;;  %v12290_v5 = vpop.permute.xlu1 %6906  ;;  %v14810_v23 = vld [vmem:[#allocation36_spill] sm:$0xff] }
 0x370   :  { %v4157_v27 = vpop.f32.mrf.mxu1  ;;  %10782 = vmatprep.mubr.f32.mxu0 %v5952_v6  ;;  %v5202_v6 = vld [vmem:[#allocation2 + $0x28d] sm:$0xff] }
 0x371   :  { %14805 = vst [vmem:[#allocation33_spill] sm:$0xff] %v12282_v47  ;;  %v12285_v11 = vadd.f32 %v10429_v50, %v4349_v40  ;;  %v4348_v20 = vadd.f32 %v4157_v27, %v14808_v25  ;;  %v4910_v57 = vpop.f32.mrf.mxu0  ;;  %v5955_v40 = vld [vmem:[#allocation2 + $0x28e] sm:$0xff]  ;;  %v14812_v25 = vld [vmem:[#allocation37_spill] sm:$0xff] }
 0x372   :  { %v10256_v55 = vpop.f32.mrf.mxu1  ;;  %10607 = vmatmul.mubr.f32.gmra.mxu1 %v5200_v52  ;;  %v5203_v27 = vld [vmem:[#allocation2 + $0x295] sm:$0xff] }
 0x373   :  { %14807 = vst [vmem:[#allocation34_spill] sm:$0xff] %v12285_v11  ;;  %v12292_v56 = vadd.f32 %v4910_v57, %v4348_v20  ;;  %v4351_v18 = vadd.f32 %v10256_v55, %v14810_v23  ;;  %v10432_v33 = vpop.f32.mrf.mxu0  ;;  %10783 = vmatmul.mubr.f32.gmra.mxu0 %v5953_v54  ;;  %10609 = vmatprep.mubr.f32.mxu1 %v5201_v48  ;;  %v5956_v52 = vld [vmem:[#allocation2 + $0x296] sm:$0xff]  ;;  %v14814_v57 = vld [vmem:[#allocation38_spill] sm:$0xff]  ;;  %v12301_v54 = vpop.permute.xlu0 %6911 }
 0x374   :  { %v4167_v28 = vpop.f32.mrf.mxu1  ;;  %10785 = vmatprep.mubr.f32.mxu0 %v5954_v21  ;;  %v5204_v48 = vld [vmem:[#allocation2 + $0x29d] sm:$0xff] }
 0x375   :  { %14809 = vst [vmem:[#allocation35_spill] sm:$0xff] %v12292_v56  ;;  %v12295_v50 = vadd.f32 %v10432_v33, %v4351_v18  ;;  %v4350_v11 = vadd.f32 %v4167_v28, %v14812_v25  ;;  %v4920_v47 = vpop.f32.mrf.mxu0  ;;  %v5957_v18 = vld [vmem:[#allocation2 + $0x29e] sm:$0xff]  ;;  %v14816_v25 = vld [vmem:[#allocation39_spill] sm:$0xff] }
 0x376   :  { %v10259_v13 = vpop.f32.mrf.mxu1  ;;  %10610 = vmatmul.mubr.f32.gmra.mxu1 %v5202_v6  ;;  %v5205_v33 = vld [vmem:[#allocation2 + $0x2a5] sm:$0xff] }
 0x377   :  { %14811 = vst [vmem:[#allocation36_spill] sm:$0xff] %v12295_v50  ;;  %v12298_v20 = vadd.f32 %v4920_v47, %v4350_v11  ;;  %v4353_v55 = vadd.f32 %v10259_v13, %v14814_v57  ;;  %v10435_v23 = vpop.f32.mrf.mxu0  ;;  %10786 = vmatmul.mubr.f32.gmra.mxu0 %v5955_v40  ;;  %10612 = vmatprep.mubr.f32.mxu1 %v5203_v27  ;;  %v12303_v50 = vpop.permute.xlu1 %6916  ;;  %v5958_v11 = vld [vmem:[#allocation2 + $0x2a6] sm:$0xff]  ;;  %v14818_v40 = vld [vmem:[#allocation40_spill] sm:$0xff] }
 0x378   :  { %v4177_v21 = vpop.f32.mrf.mxu1  ;;  %10788 = vmatprep.mubr.f32.mxu0 %v5956_v52  ;;  %v5206_v52 = vld [vmem:[#allocation2 + $0x2ad] sm:$0xff]  ;;  %v12314_v30 = vpop.permute.xlu0 %6921 }
 0x379   :  { %14813 = vst [vmem:[#allocation37_spill] sm:$0xff] %v12298_v20  ;;  %v12305_v28 = vadd.f32 %v10435_v23, %v4353_v55  ;;  %v4352_v6 = vadd.f32 %v4177_v21, %v14816_v25  ;;  %v4930_v47 = vpop.f32.mrf.mxu0  ;;  %v14820_v23 = vld [vmem:[#allocation41_spill] sm:$0xff] }
 0x37a   :  { %v10262_v20 = vpop.f32.mrf.mxu1  ;;  %10613 = vmatmul.mubr.f32.gmra.mxu1 %v5204_v48  ;;  %14821 = vst [vmem:[#allocation41_spill] sm:$0xff] %v12314_v30 }
 0x37b   :  { %14815 = vst [vmem:[#allocation38_spill] sm:$0xff] %v12305_v28  ;;  %v12308_v13 = vadd.f32 %v4930_v47, %v4352_v6  ;;  %v4355_v27 = vadd.f32 %v10262_v20, %v14818_v40  ;;  %v10438_v57 = vpop.f32.mrf.mxu0  ;;  %10789 = vmatmul.mubr.f32.gmra.mxu0 %v5957_v18  ;;  %10615 = vmatprep.mubr.f32.mxu1 %v5205_v33  ;;  %v5960_v28 = vld [vmem:[#allocation2 + $0x2b6] sm:$0xff]  ;;  %v12316_v6 = vpop.permute.xlu1 %6926  ;;  %v14824_v18 = vld [vmem:[#allocation42_spill] sm:$0xff] }
 0x37c   :  { %v4187_v56 = vpop.f32.mrf.mxu1  ;;  %10791 = vmatprep.mubr.f32.mxu0 %v5958_v11  ;;  %14822 = vst [vmem:[#allocation82_spill] sm:$0xff] %v12316_v6  ;;  %v5208_v11 = vld [vmem:[#allocation2 + $0x2bd] sm:$0xff] }
 0x37d   :  { %14817 = vst [vmem:[#allocation39_spill] sm:$0xff] %v12308_v13  ;;  %v12311_v55 = vadd.f32 %v10438_v57, %v4355_v27  ;;  %v4354_v21 = vadd.f32 %v4187_v56, %v14820_v23  ;;  %v4940_v25 = vpop.f32.mrf.mxu0  ;;  %v5961_v27 = vld [vmem:[#allocation2 + $0x2be] sm:$0xff]  ;;  %v14826_v23 = vld [vmem:[#allocation43_spill] sm:$0xff] }
 0x37e   :  { %v10265_v48 = vpop.f32.mrf.mxu1  ;;  %10616 = vmatmul.mubr.f32.gmra.mxu1 %v5206_v52  ;;  %v5209_v56 = vld [vmem:[#allocation2 + $0x2c5] sm:$0xff] }
 0x37f   :  { %14819 = vst [vmem:[#allocation40_spill] sm:$0xff] %v12311_v55  ;;  %v12318_v20 = vadd.f32 %v4940_v25, %v4354_v21  ;;  %v4357_v33 = vadd.f32 %v10265_v48, %v14824_v18  ;;  %v10441_v47 = vpop.f32.mrf.mxu0  ;;  %10792 = vmatmul.mubr.f32.gmra.mxu0 %v5959_v38  ;;  %10618 = vmatprep.mubr.f32.mxu1 %v5207_v36  ;;  %v5962_v52 = vld [vmem:[#allocation2 + $0x2c6] sm:$0xff]  ;;  %v14828_v25 = vld [vmem:[#allocation44_spill] sm:$0xff]  ;;  %v12327_v38 = vpop.permute.xlu0 %6931 }
 0x380   :  { %v4197_v40 = vpop.f32.mrf.mxu1  ;;  %10794 = vmatprep.mubr.f32.mxu0 %v5960_v28  ;;  %v5210_v36 = vld [vmem:[#allocation2 + $0x2cd] sm:$0xff]  ;;  %14829 = vst [vmem:[#allocation44_spill] sm:$0xff] %v12327_v38  ;;  %v5965_v38 = vld [vmem:[#allocation2 + $0x2de] sm:$0xff] }
 0x381   :  { %14823 = vst [vmem:[#allocation83_spill] sm:$0xff] %v12318_v20  ;;  %v12321_v57 = vadd.f32 %v10441_v47, %v4357_v33  ;;  %v4356_v55 = vadd.f32 %v4197_v40, %v14826_v23  ;;  %v4950_v13 = vpop.f32.mrf.mxu0  ;;  %v5963_v33 = vld [vmem:[#allocation2 + $0x2ce] sm:$0xff]  ;;  %v14832_v23 = vld [vmem:[#allocation45_spill] sm:$0xff] }
 0x382   :  { %v10268_v30 = vpop.f32.mrf.mxu1  ;;  %10619 = vmatmul.mubr.f32.gmra.mxu1 %v5208_v11  ;;  %v5211_v47 = vld [vmem:[#allocation2 + $0x2d5] sm:$0xff] }
 0x383   :  { %14825 = vst [vmem:[#allocation42_spill] sm:$0xff] %v12321_v57  ;;  %v12324_v21 = vadd.f32 %v4950_v13, %v4356_v55  ;;  %v4359_v48 = vadd.f32 %v10268_v30, %v14828_v25  ;;  %v10444_v18 = vpop.f32.mrf.mxu0  ;;  %10795 = vmatmul.mubr.f32.gmra.mxu0 %v5961_v27  ;;  %10621 = vmatprep.mubr.f32.mxu1 %v5209_v56  ;;  %v12329_v57 = vpop.permute.xlu1 %6936  ;;  %v5964_v55 = vld [vmem:[#allocation2 + $0x2d6] sm:$0xff]  ;;  %v14834_v27 = vld [vmem:[#allocation46_spill] sm:$0xff] }
 0x384   :  { %v4207_v28 = vpop.f32.mrf.mxu1  ;;  %10797 = vmatprep.mubr.f32.mxu0 %v5962_v52  ;;  %14830 = vst [vmem:[#allocation84_spill] sm:$0xff] %v12329_v57  ;;  %v5212_v52 = vld [vmem:[#allocation2 + $0x2dd] sm:$0xff]  ;;  %v5213_v57 = vld [vmem:[#allocation2 + $0x2e5] sm:$0xff]  ;;  %v12340_v6 = vpop.permute.xlu0 %6941 }
 0x385   :  { %14827 = vst [vmem:[#allocation43_spill] sm:$0xff] %v12324_v21  ;;  %v12331_v40 = vadd.f32 %v10444_v18, %v4359_v48  ;;  %v4358_v11 = vadd.f32 %v4207_v28, %v14832_v23  ;;  %v4960_v13 = vpop.f32.mrf.mxu0  ;;  %v14836_v18 = vld [vmem:[#allocation47_spill] sm:$0xff] }
 0x386   :  { %v10271_v21 = vpop.f32.mrf.mxu1  ;;  %10622 = vmatmul.mubr.f32.gmra.mxu1 %v5210_v36  ;;  %14837 = vst [vmem:[#allocation47_spill] sm:$0xff] %v12340_v6 }
 0x387   :  { %14831 = vst [vmem:[#allocation85_spill] sm:$0xff] %v12331_v40  ;;  %v12334_v30 = vadd.f32 %v4960_v13, %v4358_v11  ;;  %v4361_v56 = vadd.f32 %v10271_v21, %v14834_v27  ;;  %v10447_v25 = vpop.f32.mrf.mxu0  ;;  %10798 = vmatmul.mubr.f32.gmra.mxu0 %v5963_v33  ;;  %10624 = vmatprep.mubr.f32.mxu1 %v5211_v47  ;;  %v5966_v40 = vld [vmem:[#allocation2 + $0x2e6] sm:$0xff]  ;;  %v12342_v11 = vpop.permute.xlu1 %6946  ;;  %v14839_v33 = vld [vmem:[#allocation48_spill] sm:$0xff] }
 0x388   :  { %v4217_v20 = vpop.f32.mrf.mxu1  ;;  %10800 = vmatprep.mubr.f32.mxu0 %v5964_v55  ;;  %v5214_v55 = vld [vmem:[#allocation2 + $0x2ed] sm:$0xff] }
 0x389   :  { %14833 = vst [vmem:[#allocation45_spill] sm:$0xff] %v12334_v30  ;;  %v12337_v48 = vadd.f32 %v10447_v25, %v4361_v56  ;;  %v4360_v28 = vadd.f32 %v4217_v20, %v14836_v18  ;;  %v4970_v23 = vpop.f32.mrf.mxu0  ;;  %v5967_v56 = vld [vmem:[#allocation2 + $0x2ee] sm:$0xff] }
 0x38a   :  { %v10274_v36 = vpop.f32.mrf.mxu1  ;;  %10625 = vmatmul.mubr.f32.gmra.mxu1 %v5212_v52  ;;  %v5215_v20 = vld [vmem:[#allocation2 + $0x2f5] sm:$0xff] }
 0x38b   :  { %14835 = vst [vmem:[#allocation46_spill] sm:$0xff] %v12337_v48  ;;  %v12344_v21 = vadd.f32 %v4970_v23, %v4360_v28  ;;  %v4363_v47 = vadd.f32 %v10274_v36, %v14839_v33  ;;  %v10450_v13 = vpop.f32.mrf.mxu0  ;;  %10801 = vmatmul.mubr.f32.gmra.mxu0 %v5965_v38  ;;  %10627 = vmatprep.mubr.f32.mxu1 %v5213_v57  ;;  %v5968_v52 = vld [vmem:[#allocation2 + $0x2f6] sm:$0xff]  ;;  %v12353_v38 = vpop.permute.xlu0 %6951 }
 0x38c   :  { %v4227_v27 = vpop.f32.mrf.mxu1  ;;  %10803 = vmatprep.mubr.f32.mxu0 %v5966_v40  ;;  %v14842_v23 = vld [vmem:[#allocation49_spill] sm:$0xff] }
 0x38d   :  { %14838 = vst [vmem:[#allocation86_spill] sm:$0xff] %v12344_v21  ;;  %v12347_v25 = vadd.f32 %v10450_v13, %v4363_v47  ;;  %v4362_v18 = vadd.f32 %v4227_v27, %v12005_v1  ;;  %v4980_v48 = vpop.f32.mrf.mxu0  ;;  %v5216_v57 = vld [vmem:[#allocation2 + $0x2fd] sm:$0xff]  ;;  %14843 = vst [vmem:[#allocation49_spill] sm:$0xff] %v12353_v38  ;;  %v5217_v13 = vld [vmem:[#allocation2 + $0x305] sm:$0xff] }
 0x38e   :  { %v10277_v30 = vpop.f32.mrf.mxu1  ;;  %10628 = vmatmul.mubr.f32.gmra.mxu1 %v5214_v55  ;;  %v5969_v47 = vld [vmem:[#allocation2 + $0x2fe] sm:$0xff]  ;;  %v5971_v38 = vld [vmem:[#allocation2 + $0x30e] sm:$0xff] }
 0x38f   :  { %14840 = vst [vmem:[#allocation48_spill] sm:$0xff] %v12347_v25  ;;  %v12350_v28 = vadd.f32 %v4980_v48, %v4362_v18  ;;  %v4365_v36 = vadd.f32 %v10277_v30, %v14842_v23  ;;  %v10453_v33 = vpop.f32.mrf.mxu0  ;;  %10804 = vmatmul.mubr.f32.gmra.mxu0 %v5967_v56  ;;  %10630 = vmatprep.mubr.f32.mxu1 %v5215_v20  ;;  %v12355_v25 = vpop.permute.xlu1 %6956  ;;  %v14846_v27 = vld [vmem:[#allocation50_spill] sm:$0xff]  ;;  %v14848_v56 = vld [vmem:[#allocation51_spill] sm:$0xff] }
 0x390   :  { %v4237_v40 = vpop.f32.mrf.mxu1  ;;  %10806 = vmatprep.mubr.f32.mxu0 %v5968_v52  ;;  %14844 = vst [vmem:[#allocation88_spill] sm:$0xff] %v12355_v25  ;;  %v5970_v18 = vld [vmem:[#allocation2 + $0x306] sm:$0xff]  ;;  %v5219_v25 = vld [vmem:[#allocation2 + $0x315] sm:$0xff]  ;;  %v12366_v6 = vpop.permute.xlu0 %6961 }
 0x391   :  { %14841 = vst [vmem:[#allocation87_spill] sm:$0xff] %v12350_v28  ;;  %v12357_v1 = vadd.f32 %v10453_v33, %v4365_v36  ;;  %v4364_v55 = vadd.f32 %v4237_v40, %v14846_v27  ;;  %v4990_v48 = vpop.f32.mrf.mxu0  ;;  %v5218_v52 = vld [vmem:[#allocation2 + $0x30d] sm:$0xff] }
 0x392   :  { %v10280_v28 = vpop.f32.mrf.mxu1  ;;  %10631 = vmatmul.mubr.f32.gmra.mxu1 %v5216_v57  ;;  %v14850_v33 = vld [vmem:[#allocation52_spill] sm:$0xff] }
 0x393   :  { %14845 = vst [vmem:[#allocation89_spill] sm:$0xff] %v12357_v1  ;;  %v12360_v30 = vadd.f32 %v4990_v48, %v4364_v55  ;;  %v4367_v20 = vadd.f32 %v10280_v28, %v14848_v56  ;;  %v10456_v23 = vpop.f32.mrf.mxu0  ;;  %10807 = vmatmul.mubr.f32.gmra.mxu0 %v5969_v47  ;;  %10633 = vmatprep.mubr.f32.mxu1 %v5217_v13  ;;  %v5972_v1 = vld [vmem:[#allocation2 + $0x316] sm:$0xff]  ;;  %v12368_v55 = vpop.permute.xlu1 %6966 }
 0x394   :  { %v4247_v21 = vpop.f32.mrf.mxu1  ;;  %10809 = vmatprep.mubr.f32.mxu0 %v5970_v18  ;;  %v14852_v47 = vld [vmem:[#allocation53_spill] sm:$0xff] }
 0x395   :  { %14847 = vst [vmem:[#allocation50_spill] sm:$0xff] %v12360_v30  ;;  %v12363_v36 = vadd.f32 %v10456_v23, %v4367_v20  ;;  %v4366_v40 = vadd.f32 %v4247_v21, %v14850_v33  ;;  %v5000_v27 = vpop.f32.mrf.mxu0  ;;  %v5220_v18 = vld [vmem:[#allocation2 + $0x31d] sm:$0xff] }
 0x396   :  { %v10283_v57 = vpop.f32.mrf.mxu1  ;;  %10634 = vmatmul.mubr.f32.gmra.mxu1 %v5218_v52  ;;  %v5973_v20 = vld [vmem:[#allocation2 + $0x31e] sm:$0xff] }
 0x397   :  { %14849 = vst [vmem:[#allocation51_spill] sm:$0xff] %v12363_v36  ;;  %v12370_v28 = vadd.f32 %v5000_v27, %v4366_v40  ;;  %v4369_v13 = vadd.f32 %v10283_v57, %v14852_v47  ;;  %v10459_v48 = vpop.f32.mrf.mxu0  ;;  %10810 = vmatmul.mubr.f32.gmra.mxu0 %v5971_v38  ;;  %10636 = vmatprep.mubr.f32.mxu1 %v5219_v25  ;;  %v6729_v36 = vlaneseq  ;;  %v12379_v38 = vpop.permute.xlu0 %6971 }
 0x398   :  { %v4257_v56 = vpop.f32.mrf.mxu1  ;;  %10812 = vmatprep.mubr.f32.mxu0 %v5972_v1  ;;  %v12381_v57 = vpop.permute.xlu1 %6976 }
 0x399   :  { %14851 = vst [vmem:[#allocation52_spill] sm:$0xff] %v12370_v28  ;;  %v12373_v21 = vadd.f32 %v10459_v48, %v4369_v13  ;;  %v4368_v23 = vadd.f32 %v4257_v56, %v12032_v60  ;;  %v5010_v33 = vpop.f32.mrf.mxu0  ;;  %v6730_v13 = vshrl.u32 %v6729_v36, 7 }
 0x39a   :  { %v10286_v52 = vpop.f32.mrf.mxu1  ;;  %10637 = vmatmul.mubr.f32.gmra.mxu1 %v5220_v18 }
 0x39b   :  { %14853 = vst [vmem:[#allocation53_spill] sm:$0xff] %v12373_v21  ;;  %v12376_v30 = vadd.f32 %v5010_v33, %v4368_v23  ;;  %v4371_v40 = vadd.f32 %v10286_v52, %v12035_v63  ;;  %v10462_v27 = vpop.f32.mrf.mxu0  ;;  %10813 = vmatmul.mubr.f32.gmra.mxu0 %v5973_v20  ;;  %v12390_v52 = vsub.s32 0, %v6730_v13 }
 0x39c   :  { %v4267_v25 = vpop.f32.mrf.mxu1 }
 0x39d   :  { %14854 = vst [vmem:[#allocation90_spill] sm:$0xff] %v12376_v30  ;;  %v12383_v1 = vadd.f32 %v10462_v27, %v4371_v40  ;;  %v4370_v47 = vadd.f32 %v4267_v25, %v12038_v17  ;;  %v5020_v60 = vpop.f32.mrf.mxu0  ;;  %14857 = vst [vmem:[#allocation93_spill] sm:$0xff] %v12390_v52  ;;  %v12392_v30 = vpop.permute.xlu0 %6981 }
 0x39e   :  { %v10497_v48 = vpop.f32.mrf.mxu1  ;;  %v12394_v27 = vpop.permute.xlu1 %6986 }
 0x39f   :  { %14855 = vst [vmem:[#allocation91_spill] sm:$0xff] %v12383_v1  ;;  %v12386_v56 = vadd.f32 %v5020_v60, %v4370_v47  ;;  %v10673_v18 = vpop.f32.mrf.mxu0  ;;  %v5783_v63 = vadd.f32 %v10497_v48, %v12041_v34 }
 0x3a0   :  { %v5303_v23 = vpop.f32.mrf.mxu1 }
 0x3a1   :  { %14856 = vst [vmem:[#allocation92_spill] sm:$0xff] %v12386_v56  ;;  %v5782_v20 = vadd.f32 %v5303_v23, %v12044_v9  ;;  %v6056_v33 = vpop.f32.mrf.mxu0  ;;  %v12399_v60 = vadd.f32 %v10673_v18, %v5783_v63 }
 0x3a2   :  { %v10500_v40 = vpop.f32.mrf.mxu1 }
 0x3a3   :  { %v12396_v17 = vadd.f32 %v6056_v33, %v5782_v20  ;;  %v5785_v36 = vadd.f32 %v10500_v40, %v12047_v59  ;;  %v10676_v25 = vpop.f32.mrf.mxu0  ;;  %14859 = vst [vmem:[#allocation95_spill] sm:$0xff] %v12399_v60  ;;  %v12416_v40 = vpop.permute.xlu0 %6991 }
 0x3a4   :  { %v5313_v47 = vpop.f32.mrf.mxu1 }
 0x3a5   :  { %14858 = vst [vmem:[#allocation94_spill] sm:$0xff] %v12396_v17  ;;  %v12403_v34 = vrot.slane %v12396_v17, %v12390_v52  ;;  %v12405_v9 = vadd.f32 %v10676_v25, %v5785_v36  ;;  %v5784_v13 = vadd.f32 %v5313_v47, %v12050_v49  ;;  %v6066_v48 = vpop.f32.mrf.mxu0  ;;  %v12419_v49 = vpop.permute.xlu1 %6996 }
 0x3a6   :  { %v10503_v23 = vpop.f32.mrf.mxu1 }
 0x3a7   :  { %14860 = vst [vmem:[#allocation96_spill] sm:$0xff] %v12405_v9  ;;  %v6733_v20 = vsub.f32 %v12396_v17, %v12403_v34  ;;  %v6734_v59 = vsub.f32 %v12399_v60, %v12403_v34  ;;  %v6736_v18 = vsub.f32 %v12405_v9, %v12403_v34  ;;  %v12414_v63 = vadd.f32 %v6066_v48, %v5784_v13  ;;  %v10679_v33 = vpop.f32.mrf.mxu0 }
 0x3a8   :  { %v5787_v36 = vadd.f32 %v10503_v23, %v12053_v32  ;;  %v5323_v25 = vpop.f32.mrf.mxu1 }
 0x3a9   :  { %v7309_v47 = vmul.f32 %v12197_v15, %v6733_v20  ;;  %v7310_v52 = vmul.f32 %v12210_v24, %v6734_v59  ;;  %v6735_v60 = vsub.f32 %v12414_v63, %v12403_v34  ;;  %v6076_v17 = vpop.f32.mrf.mxu0  ;;  %v5786_v13 = vadd.f32 %v5323_v25, %v12056_v4  ;;  %v12436_v25 = vpop.permute.xlu0 %7001 }
 0x3aa   :  { %v12425_v56 = vadd.f32 %v10679_v33, %v5787_v36  ;;  %v10506_v48 = vpop.f32.mrf.mxu1  ;;  %v7312_v32 = vmul.f32 %v12212_v29, %v6736_v18 }
 0x3ab   :  { %v7405_v9 = vadd.f32 %v7310_v52, %v7309_v47  ;;  %v7507_v1 = vmul.f32 %v7309_v47, %v7309_v47  ;;  %v7508_v21 = vmul.f32 %v7310_v52, %v7310_v52  ;;  %v10682_v23 = vpop.f32.mrf.mxu0  ;;  %v7311_v28 = vmul.f32 %v12199_v37, %v6735_v60  ;;  %v12440_v60 = vpop.permute.xlu1 %7006 }
 0x3ac   :  { %14861 = vst [vmem:[#allocation97_spill] sm:$0xff] %v12425_v56  ;;  %v6738_v24 = vsub.f32 %v12425_v56, %v12403_v34  ;;  %v12432_v15 = vadd.f32 %v6076_v17, %v5786_v13  ;;  %v5789_v20 = vadd.f32 %v10506_v48, %v12059_v53  ;;  %v5333_v59 = vpop.f32.mrf.mxu1  ;;  %v7510_v18 = vmul.f32 %v7312_v32, %v7312_v32 }
 0x3ad   :  { %v7603_v33 = vadd.f32 %v7508_v21, %v7507_v1  ;;  %v5788_v4 = vadd.f32 %v5333_v59, %v12062_v45  ;;  %v6086_v36 = vpop.f32.mrf.mxu0  ;;  %v7406_v52 = vadd.f32 %v7405_v9, %v7311_v28  ;;  %v7509_v47 = vmul.f32 %v7311_v28, %v7311_v28 }
 0x3ae   :  { %v6737_v29 = vsub.f32 %v12432_v15, %v12403_v34  ;;  %v10509_v37 = vpop.f32.mrf.mxu1  ;;  %v12442_v17 = vadd.f32 %v10682_v23, %v5789_v20  ;;  %v7314_v48 = vmul.f32 %v12225_v10, %v6738_v24 }
 0x3af   :  { %v12444_v13 = vadd.f32 %v6086_v36, %v5788_v4  ;;  %v5791_v53 = vadd.f32 %v10509_v37, %v12065_v12  ;;  %v10685_v21 = vpop.f32.mrf.mxu0  ;;  %v7407_v45 = vadd.f32 %v7406_v52, %v7312_v32  ;;  %v7604_v1 = vadd.f32 %v7603_v33, %v7509_v47 }
 0x3b0   :  { %v7313_v28 = vmul.f32 %v12223_v44, %v6737_v29  ;;  %v5343_v9 = vpop.f32.mrf.mxu1  ;;  %v6740_v59 = vsub.f32 %v12442_v17, %v12403_v34  ;;  %v12462_v29 = vpop.permute.xlu0 %7011  ;;  %v7512_v37 = vmul.f32 %v7314_v48, %v7314_v48 }
 0x3b1   :  { %v6739_v56 = vsub.f32 %v12444_v13, %v12403_v34  ;;  %v12453_v23 = vadd.f32 %v10685_v21, %v5791_v53  ;;  %v5790_v20 = vadd.f32 %v5343_v9, %v12068_v43  ;;  %v6096_v4 = vpop.f32.mrf.mxu0  ;;  %v7605_v12 = vadd.f32 %v7604_v1, %v7510_v18 }
 0x3b2   :  { %v7408_v36 = vadd.f32 %v7407_v45, %v7313_v28  ;;  %v7511_v32 = vmul.f32 %v7313_v28, %v7313_v28  ;;  %v10512_v33 = vpop.f32.mrf.mxu1  ;;  %v7316_v10 = vmul.f32 %v12238_v42, %v6740_v59  ;;  %v12465_v45 = vpop.permute.xlu1 %7016 }
 0x3b3   :  { %14862 = vst [vmem:[#allocation98_spill] sm:$0xff] %v12453_v23  ;;  %v7315_v44 = vmul.f32 %v12236_v16, %v6739_v56  ;;  %v6742_v24 = vsub.f32 %v12453_v23, %v12403_v34  ;;  %v12460_v52 = vadd.f32 %v6096_v4, %v5790_v20  ;;  %v10688_v47 = vpop.f32.mrf.mxu0  ;;  %v5793_v18 = vadd.f32 %v10512_v33, %v12071_v14 }
 0x3b4   :  { %v7409_v53 = vadd.f32 %v7408_v36, %v7314_v48  ;;  %v7606_v43 = vadd.f32 %v7605_v12, %v7511_v32  ;;  %v5353_v21 = vpop.f32.mrf.mxu1  ;;  %v7514_v4 = vmul.f32 %v7316_v10, %v7316_v10 }
 0x3b5   :  { %v7513_v1 = vmul.f32 %v7315_v44, %v7315_v44  ;;  %v6741_v16 = vsub.f32 %v12460_v52, %v12403_v34  ;;  %v6106_v42 = vpop.f32.mrf.mxu0  ;;  %v12469_v9 = vadd.f32 %v10688_v47, %v5793_v18  ;;  %v5792_v59 = vadd.f32 %v5353_v21, %v12074_v41 }
 0x3b6   :  { %v7607_v56 = vadd.f32 %v7606_v43, %v7512_v37  ;;  %v7410_v28 = vadd.f32 %v7409_v53, %v7315_v44  ;;  %v10515_v20 = vpop.f32.mrf.mxu1  ;;  %v7318_v48 = vmul.f32 %v12251_v35, %v6742_v24  ;;  %v12482_v35 = vpop.permute.xlu0 %7021 }
 0x3b7   :  { %v7317_v14 = vmul.f32 %v12249_v31, %v6741_v16  ;;  %v5795_v12 = vadd.f32 %v10515_v20, %v12077_v58  ;;  %v10691_v36 = vpop.f32.mrf.mxu0  ;;  %v6744_v23 = vsub.f32 %v12469_v9, %v12403_v34  ;;  %v12477_v37 = vadd.f32 %v6106_v42, %v5792_v59  ;;  %v12486_v18 = vpop.permute.xlu1 %7026 }
 0x3b8   :  { %v7411_v32 = vadd.f32 %v7410_v28, %v7316_v10  ;;  %v7608_v33 = vadd.f32 %v7607_v56, %v7513_v1  ;;  %v5363_v44 = vpop.f32.mrf.mxu1  ;;  %v7516_v56 = vmul.f32 %v7318_v48, %v7318_v48 }
 0x3b9   :  { %v7515_v47 = vmul.f32 %v7317_v14, %v7317_v14  ;;  %v12479_v53 = vadd.f32 %v10691_v36, %v5795_v12  ;;  %v5794_v41 = vadd.f32 %v5363_v44, %v12080_v19  ;;  %v6116_v43 = vpop.f32.mrf.mxu0  ;;  %v6743_v58 = vsub.f32 %v12477_v37, %v12403_v34 }
 0x3ba   :  { %v7609_v31 = vadd.f32 %v7608_v33, %v7514_v4  ;;  %v7412_v24 = vadd.f32 %v7411_v32, %v7317_v14  ;;  %v10518_v10 = vpop.f32.mrf.mxu1  ;;  %v7320_v21 = vmul.f32 %v12264_v26, %v6744_v23 }
 0x3bb   :  { %v6746_v1 = vsub.f32 %v12479_v53, %v12403_v34  ;;  %v12491_v16 = vadd.f32 %v6116_v43, %v5794_v41  ;;  %v5797_v19 = vadd.f32 %v10518_v10, %v12083_v39  ;;  %v10694_v42 = vpop.f32.mrf.mxu0  ;;  %v7319_v20 = vmul.f32 %v12262_v0, %v6743_v58  ;;  %v12504_v43 = vpop.permute.xlu0 %7031 }
 0x3bc   :  { %v7413_v28 = vadd.f32 %v7412_v24, %v7318_v48  ;;  %v7610_v59 = vadd.f32 %v7609_v31, %v7515_v47  ;;  %v5373_v4 = vpop.f32.mrf.mxu1  ;;  %v7518_v39 = vmul.f32 %v7320_v21, %v7320_v21 }
 0x3bd   :  { %v6745_v14 = vsub.f32 %v12491_v16, %v12403_v34  ;;  %v12497_v12 = vadd.f32 %v10694_v42, %v5797_v19  ;;  %v5796_v26 = vadd.f32 %v5373_v4, %v12086_v22  ;;  %v6126_v23 = vpop.f32.mrf.mxu0  ;;  %v7517_v33 = vmul.f32 %v7319_v20, %v7319_v20  ;;  %v12509_v19 = vpop.permute.xlu1 %7036 }
 0x3be   :  { %v7611_v36 = vadd.f32 %v7610_v59, %v7516_v56  ;;  %v7414_v32 = vadd.f32 %v7413_v28, %v7319_v20  ;;  %v10521_v44 = vpop.f32.mrf.mxu1  ;;  %v7322_v41 = vmul.f32 %v12277_v7, %v6746_v1 }
 0x3bf   :  { %v7321_v48 = vmul.f32 %v12275_v8, %v6745_v14  ;;  %v12502_v47 = vadd.f32 %v6126_v23, %v5796_v26  ;;  %v10697_v0 = vpop.f32.mrf.mxu0  ;;  %v6748_v22 = vsub.f32 %v12497_v12, %v12403_v34  ;;  %v5799_v58 = vadd.f32 %v10521_v44, %v12089_v3 }
 0x3c0   :  { %v7415_v31 = vadd.f32 %v7414_v32, %v7320_v21  ;;  %v7612_v24 = vadd.f32 %v7611_v36, %v7517_v33  ;;  %v5383_v10 = vpop.f32.mrf.mxu1  ;;  %v7520_v20 = vmul.f32 %v7322_v41, %v7322_v41 }
 0x3c1   :  { %v7519_v42 = vmul.f32 %v7321_v48, %v7321_v48  ;;  %v6747_v7 = vsub.f32 %v12502_v47, %v12403_v34  ;;  %v5798_v8 = vadd.f32 %v5383_v10, %v12092_v61  ;;  %v6136_v1 = vpop.f32.mrf.mxu0  ;;  %v12514_v59 = vadd.f32 %v10697_v0, %v5799_v58  ;;  %v12530_v58 = vpop.permute.xlu1 %7046 }
 0x3c2   :  { %v7613_v56 = vadd.f32 %v7612_v24, %v7518_v39  ;;  %v7416_v28 = vadd.f32 %v7415_v31, %v7321_v48  ;;  %v10524_v21 = vpop.f32.mrf.mxu1  ;;  %v7324_v32 = vmul.f32 %v12290_v5, %v6748_v22  ;;  %v12528_v31 = vpop.permute.xlu0 %7041 }
 0x3c3   :  { %14863 = vst [vmem:[#allocation99_spill] sm:$0xff] %v12514_v59  ;;  %v7323_v4 = vmul.f32 %v12288_v46, %v6747_v7  ;;  %v12517_v14 = vadd.f32 %v6136_v1, %v5798_v8  ;;  %v5801_v3 = vadd.f32 %v10524_v21, %v12095_v62  ;;  %v10700_v26 = vpop.f32.mrf.mxu0  ;;  %v6750_v61 = vsub.f32 %v12514_v59, %v12403_v34  ;;  %v14888_v59 = vld [vmem:[#allocation88_spill] sm:$0xff] }
 0x3c4   :  { %v7417_v23 = vadd.f32 %v7416_v28, %v7322_v41  ;;  %v7614_v36 = vadd.f32 %v7613_v56, %v7519_v42  ;;  %v5393_v33 = vpop.f32.mrf.mxu1  ;;  %v7522_v8 = vmul.f32 %v7324_v32, %v7324_v32 }
 0x3c5   :  { %v7521_v44 = vmul.f32 %v7323_v4, %v7323_v4  ;;  %v6749_v39 = vsub.f32 %v12517_v14, %v12403_v34  ;;  %v12525_v48 = vadd.f32 %v10700_v26, %v5801_v3  ;;  %v5800_v46 = vadd.f32 %v5393_v33, %v12098_v51  ;;  %v6146_v0 = vpop.f32.mrf.mxu0  ;;  %v14867_v26 = vld [vmem:[#allocation54_spill] sm:$0xff] }
 0x3c6   :  { %v7615_v62 = vadd.f32 %v7614_v36, %v7520_v20  ;;  %v7418_v41 = vadd.f32 %v7417_v23, %v7323_v4  ;;  %v10527_v24 = vpop.f32.mrf.mxu1  ;;  %v7326_v5 = vmul.f32 %v12303_v50, %v6750_v61  ;;  %v14868_v61 = vld [vmem:[#allocation41_spill] sm:$0xff] }
 0x3c7   :  { %14864 = vst [vmem:[#allocation100_spill] sm:$0xff] %v12525_v48  ;;  %v7325_v22 = vmul.f32 %v12301_v54, %v6749_v39  ;;  %v12534_v10 = vadd.f32 %v6146_v0, %v5800_v46  ;;  %v5803_v42 = vadd.f32 %v10527_v24, %v12101_v2  ;;  %v10703_v7 = vpop.f32.mrf.mxu0  ;;  %v6752_v56 = vsub.f32 %v12525_v48, %v12403_v34  ;;  %v12548_v0 = vpop.permute.xlu0 %7051  ;;  %v14870_v24 = vld [vmem:[#allocation82_spill] sm:$0xff] }
 0x3c8   :  { %v7419_v1 = vadd.f32 %v7418_v41, %v7324_v32  ;;  %v7616_v51 = vadd.f32 %v7615_v62, %v7521_v44  ;;  %v5403_v28 = vpop.f32.mrf.mxu1  ;;  %v7524_v36 = vmul.f32 %v7326_v5, %v7326_v5  ;;  %v14869_v44 = vld [vmem:[#allocation55_spill] sm:$0xff] }
 0x3c9   :  { %14865 = vst [vmem:[#allocation101_spill] sm:$0xff] %v12534_v10  ;;  %v7523_v21 = vmul.f32 %v7325_v22, %v7325_v22  ;;  %v6751_v20 = vsub.f32 %v12534_v10, %v12403_v34  ;;  %v12541_v4 = vadd.f32 %v10703_v7, %v5803_v42  ;;  %v6156_v50 = vpop.f32.mrf.mxu0  ;;  %v5802_v23 = vadd.f32 %v5403_v28, %v14867_v26  ;;  %v14873_v28 = vld [vmem:[#allocation56_spill] sm:$0xff] }
 0x3ca   :  { %v7617_v54 = vadd.f32 %v7616_v51, %v7522_v8  ;;  %v7420_v3 = vadd.f32 %v7419_v1, %v7325_v22  ;;  %v10530_v2 = vpop.f32.mrf.mxu1  ;;  %v7328_v42 = vmul.f32 %v14870_v24, %v6752_v56  ;;  %v12553_v8 = vpop.permute.xlu1 %7056 }
 0x3cb   :  { %14866 = vst [vmem:[#allocation102_spill] sm:$0xff] %v12541_v4  ;;  %v7327_v32 = vmul.f32 %v14868_v61, %v6751_v20  ;;  %v6754_v33 = vsub.f32 %v12541_v4, %v12403_v34  ;;  %v5805_v39 = vadd.f32 %v10530_v2, %v14869_v44  ;;  %v10706_v46 = vpop.f32.mrf.mxu0  ;;  %v12551_v7 = vadd.f32 %v6156_v50, %v5802_v23 }
 0x3cc   :  { %v7421_v62 = vadd.f32 %v7420_v3, %v7326_v5  ;;  %v7618_v41 = vadd.f32 %v7617_v54, %v7523_v21  ;;  %v5413_v22 = vpop.f32.mrf.mxu1  ;;  %v14874_v21 = vld [vmem:[#allocation84_spill] sm:$0xff] }
 0x3cd   :  { %14871 = vst [vmem:[#allocation54_spill] sm:$0xff] %v12551_v7  ;;  %v7525_v1 = vmul.f32 %v7327_v32, %v7327_v32  ;;  %v12555_v51 = vadd.f32 %v10706_v46, %v5805_v39  ;;  %v5804_v20 = vadd.f32 %v5413_v22, %v14873_v28  ;;  %v6166_v26 = vpop.f32.mrf.mxu0  ;;  %v6753_v44 = vsub.f32 %v12551_v7, %v12403_v34  ;;  %v14876_v3 = vld [vmem:[#allocation64_spill] sm:$0xff] }
 0x3ce   :  { %v7619_v61 = vadd.f32 %v7618_v41, %v7524_v36  ;;  %v7422_v2 = vadd.f32 %v7421_v62, %v7327_v32  ;;  %v10533_v5 = vpop.f32.mrf.mxu1  ;;  %v7330_v54 = vmul.f32 %v14874_v21, %v6754_v33  ;;  %v7526_v46 = vmul.f32 %v7328_v42, %v7328_v42  ;;  %v14877_v28 = vld [vmem:[#allocation44_spill] sm:$0xff]  ;;  %v14879_v33 = vld [vmem:[#allocation65_spill] sm:$0xff]  ;;  %v12574_v7 = vpop.permute.xlu1 %7066 }
 0x3cf   :  { %14872 = vst [vmem:[#allocation41_spill] sm:$0xff] %v12555_v51  ;;  %v6756_v56 = vsub.f32 %v12555_v51, %v12403_v34  ;;  %v12563_v50 = vadd.f32 %v6166_v26, %v5804_v20  ;;  %v5807_v23 = vadd.f32 %v10533_v5, %v14876_v3  ;;  %v10709_v39 = vpop.f32.mrf.mxu0  ;;  %v7329_v36 = vmul.f32 %v14877_v28, %v6753_v44  ;;  %v12572_v51 = vpop.permute.xlu0 %7061 }
 0x3d0   :  { %v7423_v24 = vadd.f32 %v7422_v2, %v7328_v42  ;;  %v7620_v22 = vadd.f32 %v7619_v61, %v7525_v1  ;;  %v5423_v32 = vpop.f32.mrf.mxu1  ;;  %v7528_v42 = vmul.f32 %v7330_v54, %v7330_v54  ;;  %v14880_v61 = vld [vmem:[#allocation47_spill] sm:$0xff] }
 0x3d1   :  { %14875 = vst [vmem:[#allocation55_spill] sm:$0xff] %v12563_v50  ;;  %v6755_v62 = vsub.f32 %v12563_v50, %v12403_v34  ;;  %v12569_v41 = vadd.f32 %v10709_v39, %v5807_v23  ;;  %v5806_v21 = vadd.f32 %v5423_v32, %v14879_v33  ;;  %v6176_v4 = vpop.f32.mrf.mxu0  ;;  %v7527_v5 = vmul.f32 %v7329_v36, %v7329_v36  ;;  %v14882_v33 = vld [vmem:[#allocation66_spill] sm:$0xff]  ;;  %v14883_v50 = vld [vmem:[#allocation67_spill] sm:$0xff] }
 0x3d2   :  { %v7621_v20 = vadd.f32 %v7620_v22, %v7526_v46  ;;  %v7424_v26 = vadd.f32 %v7423_v24, %v7329_v36  ;;  %v10536_v3 = vpop.f32.mrf.mxu1  ;;  %v7332_v1 = vmul.f32 %v12342_v11, %v6756_v56 }
 0x3d3   :  { %14878 = vst [vmem:[#allocation82_spill] sm:$0xff] %v12569_v41  ;;  %v7331_v2 = vmul.f32 %v14880_v61, %v6755_v62  ;;  %v12578_v44 = vadd.f32 %v6176_v4, %v5806_v21  ;;  %v10712_v23 = vpop.f32.mrf.mxu0  ;;  %v6758_v32 = vsub.f32 %v12569_v41, %v12403_v34  ;;  %v5809_v46 = vadd.f32 %v10536_v3, %v14882_v33  ;;  %v14887_v61 = vld [vmem:[#allocation68_spill] sm:$0xff]  ;;  %v12592_v41 = vpop.permute.xlu0 %7071 }
 0x3d4   :  { %v7425_v39 = vadd.f32 %v7424_v26, %v7330_v54  ;;  %v7622_v28 = vadd.f32 %v7621_v20, %v7527_v5  ;;  %v5433_v24 = vpop.f32.mrf.mxu1  ;;  %v7530_v54 = vmul.f32 %v7332_v1, %v7332_v1  ;;  %v14885_v20 = vld [vmem:[#allocation49_spill] sm:$0xff] }
 0x3d5   :  { %14881 = vst [vmem:[#allocation56_spill] sm:$0xff] %v12578_v44  ;;  %v7529_v22 = vmul.f32 %v7331_v2, %v7331_v2  ;;  %v6757_v36 = vsub.f32 %v12578_v44, %v12403_v34  ;;  %v5808_v48 = vadd.f32 %v5433_v24, %v14883_v50  ;;  %v6186_v11 = vpop.f32.mrf.mxu0  ;;  %v12586_v4 = vadd.f32 %v10712_v23, %v5809_v46  ;;  %v12597_v23 = vpop.permute.xlu1 %7076  ;;  %v14890_v46 = vld [vmem:[#allocation69_spill] sm:$0xff] }
 0x3d6   :  { %v7623_v56 = vadd.f32 %v7622_v28, %v7528_v42  ;;  %v7426_v62 = vadd.f32 %v7425_v39, %v7331_v2  ;;  %v10539_v21 = vpop.f32.mrf.mxu1  ;;  %v7334_v50 = vmul.f32 %v14888_v59, %v6758_v32 }
 0x3d7   :  { %14884 = vst [vmem:[#allocation84_spill] sm:$0xff] %v12586_v4  ;;  %v7333_v26 = vmul.f32 %v14885_v20, %v6757_v36  ;;  %v12589_v5 = vadd.f32 %v6186_v11, %v5808_v48  ;;  %v5811_v3 = vadd.f32 %v10539_v21, %v14887_v61  ;;  %v10715_v33 = vpop.f32.mrf.mxu0  ;;  %v6760_v42 = vsub.f32 %v12586_v4, %v12403_v34 }
 0x3d8   :  { %v7427_v10 = vadd.f32 %v7426_v62, %v7332_v1  ;;  %v7624_v44 = vadd.f32 %v7623_v56, %v7529_v22  ;;  %v5443_v2 = vpop.f32.mrf.mxu1  ;;  %v14891_v62 = vld [vmem:[#allocation70_spill] sm:$0xff]  ;;  %v7532_v61 = vmul.f32 %v7334_v50, %v7334_v50 }
 0x3d9   :  { %14886 = vst [vmem:[#allocation64_spill] sm:$0xff] %v12589_v5  ;;  %v7531_v39 = vmul.f32 %v7333_v26, %v7333_v26  ;;  %v6759_v48 = vsub.f32 %v12589_v5, %v12403_v34  ;;  %v12601_v28 = vadd.f32 %v10715_v33, %v5811_v3  ;;  %v5810_v24 = vadd.f32 %v5443_v2, %v14890_v46  ;;  %v6196_v36 = vpop.f32.mrf.mxu0 }
 0x3da   :  { %v7625_v11 = vadd.f32 %v7624_v44, %v7530_v54  ;;  %v7428_v1 = vadd.f32 %v7427_v10, %v7333_v26  ;;  %v10542_v22 = vpop.f32.mrf.mxu1  ;;  %v7336_v59 = vmul.f32 %v12368_v55, %v6760_v42  ;;  %v14893_v42 = vld [vmem:[#allocation71_spill] sm:$0xff] }
 0x3db   :  { %14889 = vst [vmem:[#allocation44_spill] sm:$0xff] %v12601_v28  ;;  %v7335_v32 = vmul.f32 %v12366_v6, %v6759_v48  ;;  %v12606_v56 = vadd.f32 %v6196_v36, %v5810_v24  ;;  %v5813_v21 = vadd.f32 %v10542_v22, %v14891_v62  ;;  %v10718_v20 = vpop.f32.mrf.mxu0  ;;  %v6762_v3 = vsub.f32 %v12601_v28, %v12403_v34  ;;  %v12615_v6 = vpop.permute.xlu0 %7081 }
 0x3dc   :  { %v7429_v4 = vadd.f32 %v7428_v1, %v7334_v50  ;;  %v7626_v5 = vadd.f32 %v7625_v11, %v7531_v39  ;;  %v5453_v33 = vpop.f32.mrf.mxu1  ;;  %v12618_v50 = vpop.permute.xlu1 %7086  ;;  %v7534_v39 = vmul.f32 %v7336_v59, %v7336_v59  ;;  %v14894_v11 = vld [vmem:[#allocation72_spill] sm:$0xff] }
 0x3dd   :  { %v7533_v2 = vmul.f32 %v7335_v32, %v7335_v32  ;;  %v6761_v10 = vsub.f32 %v12606_v56, %v12403_v34  ;;  %v12613_v44 = vadd.f32 %v10718_v20, %v5813_v21  ;;  %v6206_v55 = vpop.f32.mrf.mxu0  ;;  %v5812_v48 = vadd.f32 %v5453_v33, %v14893_v42  ;;  %v14896_v33 = vld [vmem:[#allocation73_spill] sm:$0xff] }
 0x3de   :  { %v7627_v54 = vadd.f32 %v7626_v5, %v7532_v61  ;;  %v7430_v26 = vadd.f32 %v7429_v4, %v7335_v32  ;;  %v10545_v46 = vpop.f32.mrf.mxu1  ;;  %v7338_v20 = vmul.f32 %v12381_v57, %v6762_v3 }
 0x3df   :  { %14892 = vst [vmem:[#allocation65_spill] sm:$0xff] %v12613_v44  ;;  %v7337_v24 = vmul.f32 %v12379_v38, %v6761_v10  ;;  %v6764_v36 = vsub.f32 %v12613_v44, %v12403_v34  ;;  %v5815_v1 = vadd.f32 %v10545_v46, %v14894_v11  ;;  %v10721_v22 = vpop.f32.mrf.mxu0  ;;  %v12625_v5 = vadd.f32 %v6206_v55, %v5812_v48 }
 0x3e0   :  { %v7431_v62 = vadd.f32 %v7430_v26, %v7336_v59  ;;  %v7628_v21 = vadd.f32 %v7627_v54, %v7533_v2  ;;  %v5463_v4 = vpop.f32.mrf.mxu1  ;;  %v14898_v2 = vld [vmem:[#allocation74_spill] sm:$0xff]  ;;  %v12638_v26 = vpop.permute.xlu0 %7091  ;;  %v7536_v48 = vmul.f32 %v7338_v20, %v7338_v20 }
 0x3e1   :  { %14895 = vst [vmem:[#allocation47_spill] sm:$0xff] %v12625_v5  ;;  %v7535_v32 = vmul.f32 %v7337_v24, %v7337_v24  ;;  %v12627_v61 = vadd.f32 %v10721_v22, %v5815_v1  ;;  %v5814_v42 = vadd.f32 %v5463_v4, %v14896_v33  ;;  %v6216_v28 = vpop.f32.mrf.mxu0  ;;  %v6763_v44 = vsub.f32 %v12625_v5, %v12403_v34  ;;  %v12641_v22 = vpop.permute.xlu1 %7096 }
 0x3e2   :  { %v7629_v38 = vadd.f32 %v7628_v21, %v7534_v39  ;;  %v7432_v10 = vadd.f32 %v7431_v62, %v7337_v24  ;;  %v10548_v46 = vpop.f32.mrf.mxu1  ;;  %v7340_v59 = vmul.f32 %v12394_v27, %v6764_v36 }
 0x3e3   :  { %v6766_v57 = vsub.f32 %v12627_v61, %v12403_v34  ;;  %v12635_v3 = vadd.f32 %v6216_v28, %v5814_v42  ;;  %v5817_v55 = vadd.f32 %v10548_v46, %v14898_v2  ;;  %v10724_v54 = vpop.f32.mrf.mxu0  ;;  %v7339_v24 = vmul.f32 %v12392_v30, %v6763_v44  ;;  %v14900_v28 = vld [vmem:[#allocation75_spill] sm:$0xff] }
 0x3e4   :  { %v7433_v11 = vadd.f32 %v7432_v10, %v7338_v20  ;;  %v7630_v39 = vadd.f32 %v7629_v38, %v7535_v32  ;;  %v5473_v1 = vpop.f32.mrf.mxu1  ;;  %v7538_v2 = vmul.f32 %v7340_v59, %v7340_v59 }
 0x3e5   :  { %14897 = vst [vmem:[#allocation66_spill] sm:$0xff] %v12635_v3  ;;  %v6765_v27 = vsub.f32 %v12635_v3, %v12403_v34  ;;  %v12645_v36 = vadd.f32 %v10724_v54, %v5817_v55  ;;  %v5816_v62 = vadd.f32 %v5473_v1, %v14900_v28  ;;  %v6226_v21 = vpop.f32.mrf.mxu0  ;;  %v7537_v42 = vmul.f32 %v7339_v24, %v7339_v24  ;;  %v14902_v54 = vld [vmem:[#allocation76_spill] sm:$0xff] }
 0x3e6   :  { %v7631_v4 = vadd.f32 %v7630_v39, %v7536_v48  ;;  %v7434_v33 = vadd.f32 %v7433_v11, %v7339_v24  ;;  %v10551_v46 = vpop.f32.mrf.mxu1  ;;  %v7342_v20 = vmul.f32 %v12419_v49, %v6766_v57  ;;  %v14903_v39 = vld [vmem:[#allocation77_spill] sm:$0xff]  ;;  %v12658_v57 = vpop.permute.xlu0 %7101 }
 0x3e7   :  { %14899 = vst [vmem:[#allocation67_spill] sm:$0xff] %v12645_v36  ;;  %v7341_v30 = vmul.f32 %v12416_v40, %v6765_v27  ;;  %v12650_v44 = vadd.f32 %v6226_v21, %v5816_v62  ;;  %v10727_v32 = vpop.f32.mrf.mxu0  ;;  %v6768_v55 = vsub.f32 %v12645_v36, %v12403_v34  ;;  %v5819_v1 = vadd.f32 %v10551_v46, %v14902_v54  ;;  %v12662_v21 = vpop.permute.xlu1 %7106  ;;  %v14906_v46 = vld [vmem:[#allocation78_spill] sm:$0xff] }
 0x3e8   :  { %v7435_v38 = vadd.f32 %v7434_v33, %v7340_v59  ;;  %v7632_v10 = vadd.f32 %v7631_v4, %v7537_v42  ;;  %v5483_v28 = vpop.f32.mrf.mxu1  ;;  %v7540_v4 = vmul.f32 %v7342_v20, %v7342_v20 }
 0x3e9   :  { %14901 = vst [vmem:[#allocation49_spill] sm:$0xff] %v12650_v44  ;;  %v7539_v48 = vmul.f32 %v7341_v30, %v7341_v30  ;;  %v6767_v11 = vsub.f32 %v12650_v44, %v12403_v34  ;;  %v5818_v24 = vadd.f32 %v5483_v28, %v14903_v39  ;;  %v6236_v49 = vpop.f32.mrf.mxu0  ;;  %v12660_v62 = vadd.f32 %v10727_v32, %v5819_v1 }
 0x3ea   :  { %v7633_v40 = vadd.f32 %v7632_v10, %v7538_v2  ;;  %v7436_v27 = vadd.f32 %v7435_v38, %v7341_v30  ;;  %v10554_v59 = vpop.f32.mrf.mxu1  ;;  %v7344_v39 = vmul.f32 %v12440_v60, %v6768_v55 }
 0x3eb   :  { %14904 = vst [vmem:[#allocation68_spill] sm:$0xff] %v12660_v62  ;;  %v7343_v33 = vmul.f32 %v12436_v25, %v6767_v11  ;;  %v12665_v42 = vadd.f32 %v6236_v49, %v5818_v24  ;;  %v5821_v54 = vadd.f32 %v10554_v59, %v14906_v46  ;;  %v10730_v36 = vpop.f32.mrf.mxu0  ;;  %v6770_v2 = vsub.f32 %v12660_v62, %v12403_v34  ;;  %v14908_v25 = vld [vmem:[#allocation79_spill] sm:$0xff]  ;;  %v12681_v46 = vpop.permute.xlu0 %7111 }
 0x3ec   :  { %v7437_v44 = vadd.f32 %v7436_v27, %v7342_v20  ;;  %v7634_v28 = vadd.f32 %v7633_v40, %v7539_v48  ;;  %v5493_v30 = vpop.f32.mrf.mxu1  ;;  %v14910_v48 = vld [vmem:[#allocation80_spill] sm:$0xff]  ;;  %v7542_v62 = vmul.f32 %v7344_v39, %v7344_v39 }
 0x3ed   :  { %14905 = vst [vmem:[#allocation88_spill] sm:$0xff] %v12665_v42  ;;  %v7541_v32 = vmul.f32 %v7343_v33, %v7343_v33  ;;  %v6769_v38 = vsub.f32 %v12665_v42, %v12403_v34  ;;  %v12673_v10 = vadd.f32 %v10730_v36, %v5821_v54  ;;  %v5820_v1 = vadd.f32 %v5493_v30, %v14908_v25  ;;  %v6246_v11 = vpop.f32.mrf.mxu0  ;;  %v14912_v25 = vld [vmem:[#allocation81_spill] sm:$0xff] }
 0x3ee   :  { %v7635_v24 = vadd.f32 %v7634_v28, %v7540_v4  ;;  %v7438_v49 = vadd.f32 %v7437_v44, %v7343_v33  ;;  %v10557_v59 = vpop.f32.mrf.mxu1  ;;  %v7346_v20 = vmul.f32 %v12465_v45, %v6770_v2  ;;  %v12685_v44 = vpop.permute.xlu1 %7116 }
 0x3ef   :  { %14907 = vst [vmem:[#allocation69_spill] sm:$0xff] %v12673_v10  ;;  %v7345_v60 = vmul.f32 %v12462_v29, %v6769_v38  ;;  %v12678_v55 = vadd.f32 %v6246_v11, %v5820_v1  ;;  %v5823_v40 = vadd.f32 %v10557_v59, %v14910_v48  ;;  %v10733_v27 = vpop.f32.mrf.mxu0  ;;  %v6772_v30 = vsub.f32 %v12673_v10, %v12403_v34 }
 0x3f0   :  { %v7439_v36 = vadd.f32 %v7438_v49, %v7344_v39  ;;  %v7636_v54 = vadd.f32 %v7635_v24, %v7541_v32  ;;  %v5503_v4 = vpop.f32.mrf.mxu1  ;;  %v7544_v39 = vmul.f32 %v7346_v20, %v7346_v20  ;;  %v14913_v49 = vld [vmem:[#allocation58_spill] sm:$0xff] }
 0x3f1   :  { %14909 = vst [vmem:[#allocation70_spill] sm:$0xff] %v12678_v55  ;;  %v7543_v33 = vmul.f32 %v7345_v60, %v7345_v60  ;;  %v6771_v29 = vsub.f32 %v12678_v55, %v12403_v34  ;;  %v12689_v45 = vadd.f32 %v10733_v27, %v5823_v40  ;;  %v6256_v28 = vpop.f32.mrf.mxu0  ;;  %v5822_v1 = vadd.f32 %v5503_v4, %v14912_v25 }
 0x3f2   :  { %v7637_v2 = vadd.f32 %v7636_v54, %v7542_v62  ;;  %v7440_v38 = vadd.f32 %v7439_v36, %v7345_v60  ;;  %v10560_v11 = vpop.f32.mrf.mxu1  ;;  %v7348_v55 = vmul.f32 %v12486_v18, %v6772_v30  ;;  %v14915_v54 = vld [vmem:[#allocation60_spill] sm:$0xff] }
 0x3f3   :  { %14911 = vst [vmem:[#allocation71_spill] sm:$0xff] %v12689_v45  ;;  %v7347_v32 = vmul.f32 %v12482_v35, %v6771_v29  ;;  %v6774_v24 = vsub.f32 %v12689_v45, %v12403_v34  ;;  %v5825_v59 = vadd.f32 %v10560_v11, %v14913_v49  ;;  %v10736_v48 = vpop.f32.mrf.mxu0  ;;  %v12697_v27 = vadd.f32 %v6256_v28, %v5822_v1  ;;  %v12702_v35 = vpop.permute.xlu0 %7121  ;;  %v14917_v28 = vld [vmem:[#allocation62_spill] sm:$0xff] }
 0x3f4   :  { %v7638_v10 = vadd.f32 %v7637_v2, %v7543_v33  ;;  %v7441_v40 = vadd.f32 %v7440_v38, %v7346_v20  ;;  %v5513_v62 = vpop.f32.mrf.mxu1  ;;  %v12706_v2 = vpop.permute.xlu1 %7126  ;;  %v7546_v49 = vmul.f32 %v7348_v55, %v7348_v55 }
 0x3f5   :  { %v7545_v60 = vmul.f32 %v7347_v32, %v7347_v32  ;;  %v12699_v36 = vadd.f32 %v10736_v48, %v5825_v59  ;;  %v5824_v4 = vadd.f32 %v5513_v62, %v14915_v54  ;;  %v6266_v25 = vpop.f32.mrf.mxu0  ;;  %v6773_v11 = vsub.f32 %v12697_v27, %v12403_v34 }
 0x3f6   :  { %v7442_v29 = vadd.f32 %v7441_v40, %v7347_v32  ;;  %v7639_v45 = vadd.f32 %v7638_v10, %v7544_v39  ;;  %v10563_v33 = vpop.f32.mrf.mxu1  ;;  %v7350_v18 = vmul.f32 %v12509_v19, %v6774_v24  ;;  %v14919_v19 = vld [vmem:[#allocation63_spill] sm:$0xff] }
 0x3f7   :  { %14914 = vst [vmem:[#allocation72_spill] sm:$0xff] %v12699_v36  ;;  %v6776_v20 = vsub.f32 %v12699_v36, %v12403_v34  ;;  %v12711_v30 = vadd.f32 %v6266_v25, %v5824_v4  ;;  %v5827_v38 = vadd.f32 %v10563_v33, %v14917_v28  ;;  %v10739_v1 = vpop.f32.mrf.mxu0  ;;  %v7349_v10 = vmul.f32 %v12504_v43, %v6773_v11 }
 0x3f8   :  { %v7640_v59 = vadd.f32 %v7639_v45, %v7545_v60  ;;  %v7443_v39 = vadd.f32 %v7442_v29, %v7348_v55  ;;  %v5523_v32 = vpop.f32.mrf.mxu1  ;;  %v7548_v33 = vmul.f32 %v7350_v18, %v7350_v18  ;;  %v12724_v60 = vpop.permute.xlu0 %7131 }
 0x3f9   :  { %14916 = vst [vmem:[#allocation73_spill] sm:$0xff] %v12711_v30  ;;  %v6775_v48 = vsub.f32 %v12711_v30, %v12403_v34  ;;  %v12717_v40 = vadd.f32 %v10739_v1, %v5827_v38  ;;  %v5826_v24 = vadd.f32 %v5523_v32, %v14919_v19  ;;  %v6276_v62 = vpop.f32.mrf.mxu0  ;;  %v7547_v4 = vmul.f32 %v7349_v10, %v7349_v10  ;;  %v14921_v1 = vld [vmem:[#allocation57_spill] sm:$0xff] }
 0x3fa   :  { %v7444_v54 = vadd.f32 %v7443_v39, %v7349_v10  ;;  %v7641_v25 = vadd.f32 %v7640_v59, %v7546_v49  ;;  %v10566_v36 = vpop.f32.mrf.mxu1  ;;  %v7352_v28 = vmul.f32 %v12530_v58, %v6776_v20  ;;  %v12729_v49 = vpop.permute.xlu1 %7136 }
 0x3fb   :  { %14918 = vst [vmem:[#allocation74_spill] sm:$0xff] %v12717_v40  ;;  %v7351_v45 = vmul.f32 %v12528_v31, %v6775_v48  ;;  %v12722_v43 = vadd.f32 %v6276_v62, %v5826_v24  ;;  %v10742_v55 = vpop.f32.mrf.mxu0  ;;  %v6778_v38 = vsub.f32 %v12717_v40, %v12403_v34  ;;  %v5829_v39 = vadd.f32 %v10566_v36, %v14921_v1  ;;  %v14922_v31 = vld [vmem:[#allocation59_spill] sm:$0xff]  ;;  %v14925_v36 = vld [vmem:[#allocation61_spill] sm:$0xff] }
 0x3fc   :  { %v7642_v29 = vadd.f32 %v7641_v25, %v7547_v4  ;;  %v7445_v11 = vadd.f32 %v7444_v54, %v7350_v18  ;;  %v5533_v10 = vpop.f32.mrf.mxu1  ;;  %v7550_v62 = vmul.f32 %v7352_v28, %v7352_v28 }
 0x3fd   :  { %14920 = vst [vmem:[#allocation75_spill] sm:$0xff] %v12722_v43  ;;  %v7549_v59 = vmul.f32 %v7351_v45, %v7351_v45  ;;  %v6777_v58 = vsub.f32 %v12722_v43, %v12403_v34  ;;  %v5828_v20 = vadd.f32 %v5533_v10, %v14922_v31  ;;  %v6286_v32 = vpop.f32.mrf.mxu0  ;;  %v12734_v24 = vadd.f32 %v10742_v55, %v5829_v39 }
 0x3fe   :  { %v7446_v48 = vadd.f32 %v7445_v11, %v7351_v45  ;;  %v7643_v19 = vadd.f32 %v7642_v29, %v7548_v33  ;;  %v10569_v18 = vpop.f32.mrf.mxu1  ;;  %v7354_v30 = vmul.f32 %v12553_v8, %v6778_v38  ;;  %v12750_v8 = vpop.permute.xlu1 %7146 }
 0x3ff   :  { %14923 = vst [vmem:[#allocation76_spill] sm:$0xff] %v12734_v24  ;;  %v7353_v54 = vmul.f32 %v12548_v0, %v6777_v58  ;;  %v12737_v4 = vadd.f32 %v6286_v32, %v5828_v20  ;;  %v5831_v25 = vadd.f32 %v10569_v18, %v14925_v36  ;;  %v10745_v1 = vpop.f32.mrf.mxu0  ;;  %v6780_v10 = vsub.f32 %v12734_v24, %v12403_v34  ;;  %v14927_v0 = vld [vmem:[#allocation11_spill] sm:$0xff]  ;;  %v12748_v58 = vpop.permute.xlu0 %7141 }
 0x400   :  { %v7644_v40 = vadd.f32 %v7643_v19, %v7549_v59  ;;  %v7447_v43 = vadd.f32 %v7446_v48, %v7352_v28  ;;  %v5543_v45 = vpop.f32.mrf.mxu1  ;;  %v14929_v48 = vld [vmem:[#allocation12_spill] sm:$0xff]  ;;  %v7552_v36 = vmul.f32 %v7354_v30, %v7354_v30 }
 0x401   :  { %14924 = vst [vmem:[#allocation77_spill] sm:$0xff] %v12737_v4  ;;  %v7551_v33 = vmul.f32 %v7353_v54, %v7353_v54  ;;  %v6779_v55 = vsub.f32 %v12737_v4, %v12403_v34  ;;  %v12745_v29 = vadd.f32 %v10745_v1, %v5831_v25  ;;  %v5830_v11 = vadd.f32 %v5543_v45, %v14927_v0  ;;  %v6296_v39 = vpop.f32.mrf.mxu0 }
 0x402   :  { %v7448_v31 = vadd.f32 %v7447_v43, %v7353_v54  ;;  %v7645_v59 = vadd.f32 %v7644_v40, %v7550_v62  ;;  %v10572_v20 = vpop.f32.mrf.mxu1  ;;  %v7356_v28 = vmul.f32 %v12574_v7, %v6780_v10 }
 0x403   :  { %14926 = vst [vmem:[#allocation78_spill] sm:$0xff] %v12745_v29  ;;  %v7355_v38 = vmul.f32 %v12572_v51, %v6779_v55  ;;  %v12754_v32 = vadd.f32 %v6296_v39, %v5830_v11  ;;  %v5833_v19 = vadd.f32 %v10572_v20, %v14929_v48  ;;  %v10748_v18 = vpop.f32.mrf.mxu0  ;;  %v6782_v45 = vsub.f32 %v12745_v29, %v12403_v34  ;;  %v14931_v55 = vld [vmem:[#allocation13_spill] sm:$0xff]  ;;  %v12768_v48 = vpop.permute.xlu0 %7151 }
 0x404   :  { %v7646_v25 = vadd.f32 %v7645_v59, %v7551_v33  ;;  %v7449_v1 = vadd.f32 %v7448_v31, %v7354_v30  ;;  %v5553_v43 = vpop.f32.mrf.mxu1  ;;  %v7554_v39 = vmul.f32 %v7356_v28, %v7356_v28  ;;  %v14932_v31 = vld [vmem:[#allocation14_spill] sm:$0xff] }
 0x405   :  { %14928 = vst [vmem:[#allocation79_spill] sm:$0xff] %v12754_v32  ;;  %v7553_v40 = vmul.f32 %v7355_v38, %v7355_v38  ;;  %v6781_v62 = vsub.f32 %v12754_v32, %v12403_v34  ;;  %v12761_v54 = vadd.f32 %v10748_v18, %v5833_v19  ;;  %v6306_v7 = vpop.f32.mrf.mxu0  ;;  %v5832_v0 = vadd.f32 %v5553_v43, %v14931_v55 }
 0x406   :  { %v7450_v51 = vadd.f32 %v7449_v1, %v7355_v38  ;;  %v7647_v10 = vadd.f32 %v7646_v25, %v7552_v36  ;;  %v10575_v11 = vpop.f32.mrf.mxu1  ;;  %v7358_v19 = vmul.f32 %v12597_v23, %v6782_v45  ;;  %v12773_v25 = vpop.permute.xlu1 %7156 }
 0x407   :  { %14930 = vst [vmem:[#allocation80_spill] sm:$0xff] %v12761_v54  ;;  %v7357_v33 = vmul.f32 %v12592_v41, %v6781_v62  ;;  %v6784_v30 = vsub.f32 %v12761_v54, %v12403_v34  ;;  %v5835_v59 = vadd.f32 %v10575_v11, %v14932_v31  ;;  %v10751_v20 = vpop.f32.mrf.mxu0  ;;  %v12771_v38 = vadd.f32 %v6306_v7, %v5832_v0  ;;  %v14935_v41 = vld [vmem:[#allocation15_spill] sm:$0xff]  ;;  %v14937_v7 = vld [vmem:[#allocation16_spill] sm:$0xff] }
 0x408   :  { %v7648_v29 = vadd.f32 %v7647_v10, %v7553_v40  ;;  %v7451_v18 = vadd.f32 %v7450_v51, %v7356_v28  ;;  %v5563_v36 = vpop.f32.mrf.mxu1  ;;  %v7556_v0 = vmul.f32 %v7358_v19, %v7358_v19 }
 0x409   :  { %14933 = vst [vmem:[#allocation81_spill] sm:$0xff] %v12771_v38  ;;  %v7555_v1 = vmul.f32 %v7357_v33, %v7357_v33  ;;  %v12775_v43 = vadd.f32 %v10751_v20, %v5835_v59  ;;  %v5834_v62 = vadd.f32 %v5563_v36, %v14935_v41  ;;  %v6316_v55 = vpop.f32.mrf.mxu0  ;;  %v6783_v31 = vsub.f32 %v12771_v38, %v12403_v34  ;;  %v12792_v41 = vpop.permute.xlu0 %7161 }
 0x40a   :  { %v7452_v54 = vadd.f32 %v7451_v18, %v7357_v33  ;;  %v7649_v11 = vadd.f32 %v7648_v29, %v7554_v39  ;;  %v10578_v40 = vpop.f32.mrf.mxu1  ;;  %v7360_v23 = vmul.f32 %v12618_v50, %v6784_v30  ;;  %v14939_v50 = vld [vmem:[#allocation17_spill] sm:$0xff] }
 0x40b   :  { %14934 = vst [vmem:[#allocation58_spill] sm:$0xff] %v12775_v43  ;;  %v6786_v28 = vsub.f32 %v12775_v43, %v12403_v34  ;;  %v12783_v45 = vadd.f32 %v6316_v55, %v5834_v62  ;;  %v5837_v51 = vadd.f32 %v10578_v40, %v14937_v7  ;;  %v10754_v10 = vpop.f32.mrf.mxu0  ;;  %v7359_v20 = vmul.f32 %v12615_v6, %v6783_v31  ;;  %v12794_v43 = vpop.permute.xlu1 %7166 }
 0x40c   :  { %v7650_v59 = vadd.f32 %v7649_v11, %v7555_v1  ;;  %v7453_v33 = vadd.f32 %v7452_v54, %v7358_v19  ;;  %v5573_v29 = vpop.f32.mrf.mxu1  ;;  %v7558_v1 = vmul.f32 %v7360_v23, %v7360_v23 }
 0x40d   :  { %14936 = vst [vmem:[#allocation60_spill] sm:$0xff] %v12783_v45  ;;  %v6785_v39 = vsub.f32 %v12783_v45, %v12403_v34  ;;  %v12789_v18 = vadd.f32 %v10754_v10, %v5837_v51  ;;  %v5836_v30 = vadd.f32 %v5573_v29, %v14939_v50  ;;  %v6326_v36 = vpop.f32.mrf.mxu0  ;;  %v7557_v55 = vmul.f32 %v7359_v20, %v7359_v20  ;;  %v14941_v29 = vld [vmem:[#allocation18_spill] sm:$0xff]  ;;  %v14942_v50 = vld [vmem:[#allocation19_spill] sm:$0xff] }
 0x40e   :  { %v7454_v62 = vadd.f32 %v7453_v33, %v7359_v20  ;;  %v7651_v40 = vadd.f32 %v7650_v59, %v7556_v0  ;;  %v10581_v7 = vpop.f32.mrf.mxu1  ;;  %v7362_v6 = vmul.f32 %v12641_v22, %v6786_v28 }
 0x40f   :  { %14938 = vst [vmem:[#allocation62_spill] sm:$0xff] %v12789_v18  ;;  %v7361_v54 = vmul.f32 %v12638_v26, %v6785_v39  ;;  %v12798_v19 = vadd.f32 %v6326_v36, %v5836_v30  ;;  %v10757_v11 = vpop.f32.mrf.mxu0  ;;  %v6788_v10 = vsub.f32 %v12789_v18, %v12403_v34  ;;  %v5839_v33 = vadd.f32 %v10581_v7, %v14941_v29  ;;  %v12812_v29 = vpop.permute.xlu0 %7171 }
 0x410   :  { %v7652_v31 = vadd.f32 %v7651_v40, %v7557_v55  ;;  %v7455_v51 = vadd.f32 %v7454_v62, %v7360_v23  ;;  %v5583_v20 = vpop.f32.mrf.mxu1  ;;  %v7560_v36 = vmul.f32 %v7362_v6, %v7362_v6  ;;  %v14945_v55 = vld [vmem:[#allocation20_spill] sm:$0xff] }
 0x411   :  { %14940 = vst [vmem:[#allocation63_spill] sm:$0xff] %v12798_v19  ;;  %v7559_v0 = vmul.f32 %v7361_v54, %v7361_v54  ;;  %v6787_v59 = vsub.f32 %v12798_v19, %v12403_v34  ;;  %v5838_v45 = vadd.f32 %v5583_v20, %v14942_v50  ;;  %v6336_v22 = vpop.f32.mrf.mxu0  ;;  %v12806_v39 = vadd.f32 %v10757_v11, %v5839_v33  ;;  %v12817_v11 = vpop.permute.xlu1 %7176 }
 0x412   :  { %v7456_v28 = vadd.f32 %v7455_v51, %v7361_v54  ;;  %v7653_v26 = vadd.f32 %v7652_v31, %v7558_v1  ;;  %v10584_v30 = vpop.f32.mrf.mxu1  ;;  %v7364_v19 = vmul.f32 %v12662_v21, %v6788_v10  ;;  %v14947_v51 = vld [vmem:[#allocation21_spill] sm:$0xff] }
 0x413   :  { %14943 = vst [vmem:[#allocation57_spill] sm:$0xff] %v12806_v39  ;;  %v7363_v23 = vmul.f32 %v12658_v57, %v6787_v59  ;;  %v12809_v62 = vadd.f32 %v6336_v22, %v5838_v45  ;;  %v5841_v40 = vadd.f32 %v10584_v30, %v14945_v55  ;;  %v10760_v7 = vpop.f32.mrf.mxu0  ;;  %v6790_v1 = vsub.f32 %v12806_v39, %v12403_v34 }
 0x414   :  { %v7654_v18 = vadd.f32 %v7653_v26, %v7559_v0  ;;  %v7457_v20 = vadd.f32 %v7456_v28, %v7362_v6  ;;  %v5593_v54 = vpop.f32.mrf.mxu1  ;;  %v14949_v28 = vld [vmem:[#allocation22_spill] sm:$0xff]  ;;  %v7562_v55 = vmul.f32 %v7364_v19, %v7364_v19 }
 0x415   :  { %14944 = vst [vmem:[#allocation59_spill] sm:$0xff] %v12809_v62  ;;  %v7561_v31 = vmul.f32 %v7363_v23, %v7363_v23  ;;  %v6789_v57 = vsub.f32 %v12809_v62, %v12403_v34  ;;  %v12821_v45 = vadd.f32 %v10760_v7, %v5841_v40  ;;  %v5840_v33 = vadd.f32 %v5593_v54, %v14947_v51  ;;  %v6346_v59 = vpop.f32.mrf.mxu0 }
 0x416   :  { %v7458_v50 = vadd.f32 %v7457_v20, %v7363_v23  ;;  %v7655_v0 = vadd.f32 %v7654_v18, %v7560_v36  ;;  %v10587_v22 = vpop.f32.mrf.mxu1  ;;  %v7366_v21 = vmul.f32 %v12685_v44, %v6790_v1  ;;  %v14951_v1 = vld [vmem:[#allocation23_spill] sm:$0xff] }
 0x417   :  { %14946 = vst [vmem:[#allocation61_spill] sm:$0xff] %v12821_v45  ;;  %v7365_v6 = vmul.f32 %v12681_v46, %v6789_v57  ;;  %v12826_v10 = vadd.f32 %v6346_v59, %v5840_v33  ;;  %v5843_v26 = vadd.f32 %v10587_v22, %v14949_v28  ;;  %v10763_v30 = vpop.f32.mrf.mxu0  ;;  %v6792_v40 = vsub.f32 %v12821_v45, %v12403_v34  ;;  %v12835_v46 = vpop.permute.xlu0 %7181 }
 0x418   :  { %v7656_v39 = vadd.f32 %v7655_v0, %v7561_v31  ;;  %v7459_v62 = vadd.f32 %v7458_v50, %v7364_v19  ;;  %v5603_v7 = vpop.f32.mrf.mxu1  ;;  %v12838_v31 = vpop.permute.xlu1 %7186  ;;  %v7564_v19 = vmul.f32 %v7366_v21, %v7366_v21  ;;  %v14952_v50 = vld [vmem:[#allocation24_spill] sm:$0xff] }
 0x419   :  { %14948 = vst [vmem:[#allocation11_spill] sm:$0xff] %v12826_v10  ;;  %v7563_v54 = vmul.f32 %v7365_v6, %v7365_v6  ;;  %v6791_v18 = vsub.f32 %v12826_v10, %v12403_v34  ;;  %v12833_v36 = vadd.f32 %v10763_v30, %v5843_v26  ;;  %v6356_v44 = vpop.f32.mrf.mxu0  ;;  %v5842_v57 = vadd.f32 %v5603_v7, %v14951_v1  ;;  %v14955_v7 = vld [vmem:[#allocation25_spill] sm:$0xff] }
 0x41a   :  { %v7460_v23 = vadd.f32 %v7459_v62, %v7365_v6  ;;  %v7657_v20 = vadd.f32 %v7656_v39, %v7562_v55  ;;  %v10590_v51 = vpop.f32.mrf.mxu1  ;;  %v7368_v26 = vmul.f32 %v12706_v2, %v6792_v40  ;;  %v14957_v40 = vld [vmem:[#allocation26_spill] sm:$0xff] }
 0x41b   :  { %14950 = vst [vmem:[#allocation12_spill] sm:$0xff] %v12833_v36  ;;  %v7367_v33 = vmul.f32 %v12702_v35, %v6791_v18  ;;  %v6794_v59 = vsub.f32 %v12833_v36, %v12403_v34  ;;  %v5845_v0 = vadd.f32 %v10590_v51, %v14952_v50  ;;  %v10766_v22 = vpop.f32.mrf.mxu0  ;;  %v12845_v62 = vadd.f32 %v6356_v44, %v5842_v57 }
 0x41c   :  { %v7658_v28 = vadd.f32 %v7657_v20, %v7563_v54  ;;  %v7461_v30 = vadd.f32 %v7460_v23, %v7366_v21  ;;  %v5613_v39 = vpop.f32.mrf.mxu1  ;;  %v12858_v20 = vpop.permute.xlu0 %7191  ;;  %v7566_v57 = vmul.f32 %v7368_v26, %v7368_v26 }
 0x41d   :  { %14953 = vst [vmem:[#allocation13_spill] sm:$0xff] %v12845_v62  ;;  %v7565_v6 = vmul.f32 %v7367_v33, %v7367_v33  ;;  %v12847_v55 = vadd.f32 %v10766_v22, %v5845_v0  ;;  %v5844_v1 = vadd.f32 %v5613_v39, %v14955_v7  ;;  %v6366_v45 = vpop.f32.mrf.mxu0  ;;  %v6793_v36 = vsub.f32 %v12845_v62, %v12403_v34  ;;  %v12861_v22 = vpop.permute.xlu1 %7196 }
 0x41e   :  { %v7462_v35 = vadd.f32 %v7461_v30, %v7367_v33  ;;  %v7659_v18 = vadd.f32 %v7658_v28, %v7564_v19  ;;  %v10593_v51 = vpop.f32.mrf.mxu1  ;;  %v7370_v54 = vmul.f32 %v12729_v49, %v6794_v59  ;;  %v15052_v4 = vld [vmem:[#allocation61_spill] sm:$0xff] }
 0x41f   :  { %14954 = vst [vmem:[#allocation14_spill] sm:$0xff] %v12847_v55  ;;  %v6796_v2 = vsub.f32 %v12847_v55, %v12403_v34  ;;  %v12855_v21 = vadd.f32 %v6366_v45, %v5844_v1  ;;  %v5847_v44 = vadd.f32 %v10593_v51, %v14957_v40  ;;  %v10769_v23 = vpop.f32.mrf.mxu0  ;;  %v7369_v19 = vmul.f32 %v12724_v60, %v6793_v36  ;;  %v14959_v45 = vld [vmem:[#allocation27_spill] sm:$0xff] }
 0x420   :  { %v7660_v50 = vadd.f32 %v7659_v18, %v7565_v6  ;;  %v7463_v33 = vadd.f32 %v7462_v35, %v7368_v26  ;;  %v5623_v0 = vpop.f32.mrf.mxu1  ;;  %v7568_v40 = vmul.f32 %v7370_v54, %v7370_v54 }
 0x421   :  { %14956 = vst [vmem:[#allocation15_spill] sm:$0xff] %v12855_v21  ;;  %v6795_v49 = vsub.f32 %v12855_v21, %v12403_v34  ;;  %v12865_v59 = vadd.f32 %v10769_v23, %v5847_v44  ;;  %v5846_v28 = vadd.f32 %v5623_v0, %v14959_v45  ;;  %v6376_v30 = vpop.f32.mrf.mxu0  ;;  %v7567_v7 = vmul.f32 %v7369_v19, %v7369_v19  ;;  %v14961_v23 = vld [vmem:[#allocation28_spill] sm:$0xff] }
 0x422   :  { %v7464_v39 = vadd.f32 %v7463_v33, %v7369_v19  ;;  %v7661_v1 = vadd.f32 %v7660_v50, %v7566_v57  ;;  %v10596_v51 = vpop.f32.mrf.mxu1  ;;  %v7372_v6 = vmul.f32 %v12750_v8, %v6796_v2  ;;  %v14962_v50 = vld [vmem:[#allocation29_spill] sm:$0xff]  ;;  %v12878_v2 = vpop.permute.xlu0 %7201 }
 0x423   :  { %14958 = vst [vmem:[#allocation16_spill] sm:$0xff] %v12865_v59  ;;  %v7371_v60 = vmul.f32 %v12748_v58, %v6795_v49  ;;  %v12870_v36 = vadd.f32 %v6376_v30, %v5846_v28  ;;  %v10772_v26 = vpop.f32.mrf.mxu0  ;;  %v6798_v44 = vsub.f32 %v12865_v59, %v12403_v34  ;;  %v5849_v0 = vadd.f32 %v10596_v51, %v14961_v23  ;;  %v12882_v30 = vpop.permute.xlu1 %7206  ;;  %v14965_v51 = vld [vmem:[#allocation30_spill] sm:$0xff] }
 0x424   :  { %v7662_v35 = vadd.f32 %v7661_v1, %v7567_v7  ;;  %v7465_v18 = vadd.f32 %v7464_v39, %v7370_v54  ;;  %v5633_v45 = vpop.f32.mrf.mxu1  ;;  %v7570_v39 = vmul.f32 %v7372_v6, %v7372_v6 }
 0x425   :  { %14960 = vst [vmem:[#allocation17_spill] sm:$0xff] %v12870_v36  ;;  %v7569_v33 = vmul.f32 %v7371_v60, %v7371_v60  ;;  %v6797_v57 = vsub.f32 %v12870_v36, %v12403_v34  ;;  %v5848_v19 = vadd.f32 %v5633_v45, %v14962_v50  ;;  %v6386_v8 = vpop.f32.mrf.mxu0  ;;  %v12880_v28 = vadd.f32 %v10772_v26, %v5849_v0 }
 0x426   :  { %v7466_v58 = vadd.f32 %v7465_v18, %v7371_v60  ;;  %v7663_v49 = vadd.f32 %v7662_v35, %v7568_v40  ;;  %v10599_v54 = vpop.f32.mrf.mxu1  ;;  %v7374_v45 = vmul.f32 %v12773_v25, %v6798_v44  ;;  %v14969_v44 = vld [vmem:[#allocation32_spill] sm:$0xff] }
 0x427   :  { %14963 = vst [vmem:[#allocation18_spill] sm:$0xff] %v12880_v28  ;;  %v7373_v7 = vmul.f32 %v12768_v48, %v6797_v57  ;;  %v12885_v1 = vadd.f32 %v6386_v8, %v5848_v19  ;;  %v5851_v23 = vadd.f32 %v10599_v54, %v14965_v51  ;;  %v10775_v59 = vpop.f32.mrf.mxu0  ;;  %v6800_v40 = vsub.f32 %v12880_v28, %v12403_v34  ;;  %v14967_v48 = vld [vmem:[#allocation31_spill] sm:$0xff]  ;;  %v12901_v51 = vpop.permute.xlu0 %7211 }
 0x428   :  { %v7664_v36 = vadd.f32 %v7663_v49, %v7569_v33  ;;  %v7467_v50 = vadd.f32 %v7466_v58, %v7372_v6  ;;  %v5643_v60 = vpop.f32.mrf.mxu1  ;;  %v7572_v28 = vmul.f32 %v7374_v45, %v7374_v45 }
 0x429   :  { %14964 = vst [vmem:[#allocation19_spill] sm:$0xff] %v12885_v1  ;;  %v7571_v26 = vmul.f32 %v7373_v7, %v7373_v7  ;;  %v6799_v35 = vsub.f32 %v12885_v1, %v12403_v34  ;;  %v12893_v18 = vadd.f32 %v10775_v59, %v5851_v23  ;;  %v5850_v0 = vadd.f32 %v5643_v60, %v14967_v48  ;;  %v6396_v57 = vpop.f32.mrf.mxu0  ;;  %v14971_v48 = vld [vmem:[#allocation33_spill] sm:$0xff] }
 0x42a   :  { %v7468_v19 = vadd.f32 %v7467_v50, %v7373_v7  ;;  %v7665_v8 = vadd.f32 %v7664_v36, %v7570_v39  ;;  %v10602_v54 = vpop.f32.mrf.mxu1  ;;  %v7376_v33 = vmul.f32 %v12794_v43, %v6800_v40  ;;  %v12905_v36 = vpop.permute.xlu1 %7216 }
 0x42b   :  { %14966 = vst [vmem:[#allocation20_spill] sm:$0xff] %v12893_v18  ;;  %v7375_v25 = vmul.f32 %v12792_v41, %v6799_v35  ;;  %v12898_v6 = vadd.f32 %v6396_v57, %v5850_v0  ;;  %v5853_v58 = vadd.f32 %v10602_v54, %v14969_v44  ;;  %v10778_v49 = vpop.f32.mrf.mxu0  ;;  %v6802_v60 = vsub.f32 %v12893_v18, %v12403_v34 }
 0x42c   :  { %v7666_v59 = vadd.f32 %v7665_v8, %v7571_v26  ;;  %v7469_v23 = vadd.f32 %v7468_v19, %v7374_v45  ;;  %v5653_v7 = vpop.f32.mrf.mxu1  ;;  %v7574_v26 = vmul.f32 %v7376_v33, %v7376_v33  ;;  %v14972_v8 = vld [vmem:[#allocation34_spill] sm:$0xff] }
 0x42d   :  { %14968 = vst [vmem:[#allocation21_spill] sm:$0xff] %v12898_v6  ;;  %v7573_v39 = vmul.f32 %v7375_v25, %v7375_v25  ;;  %v6801_v43 = vsub.f32 %v12898_v6, %v12403_v34  ;;  %v12909_v41 = vadd.f32 %v10778_v49, %v5853_v58  ;;  %v6406_v50 = vpop.f32.mrf.mxu0  ;;  %v5852_v0 = vadd.f32 %v5653_v7, %v14971_v48 }
 0x42e   :  { %v7470_v40 = vadd.f32 %v7469_v23, %v7375_v25  ;;  %v7667_v35 = vadd.f32 %v7666_v59, %v7572_v28  ;;  %v10605_v57 = vpop.f32.mrf.mxu1  ;;  %v7378_v6 = vmul.f32 %v12817_v11, %v6802_v60  ;;  %v14974_v23 = vld [vmem:[#allocation35_spill] sm:$0xff]  ;;  %v15056_v24 = vld [vmem:[#allocation18_spill] sm:$0xff] }
 0x42f   :  { %14970 = vst [vmem:[#allocation22_spill] sm:$0xff] %v12909_v41  ;;  %v7377_v45 = vmul.f32 %v12812_v29, %v6801_v43  ;;  %v6804_v19 = vsub.f32 %v12909_v41, %v12403_v34  ;;  %v5855_v54 = vadd.f32 %v10605_v57, %v14972_v8  ;;  %v10781_v44 = vpop.f32.mrf.mxu0  ;;  %v12917_v49 = vadd.f32 %v6406_v50, %v5852_v0  ;;  %v12922_v29 = vpop.permute.xlu0 %7221  ;;  %v14976_v50 = vld [vmem:[#allocation36_spill] sm:$0xff] }
 0x430   :  { %v7668_v18 = vadd.f32 %v7667_v35, %v7573_v39  ;;  %v7471_v58 = vadd.f32 %v7470_v40, %v7376_v33  ;;  %v5663_v25 = vpop.f32.mrf.mxu1  ;;  %v12926_v35 = vpop.permute.xlu1 %7226  ;;  %v7576_v8 = vmul.f32 %v7378_v6, %v7378_v6 }
 0x431   :  { %v7575_v28 = vmul.f32 %v7377_v45, %v7377_v45  ;;  %v12919_v59 = vadd.f32 %v10781_v44, %v5855_v54  ;;  %v5854_v7 = vadd.f32 %v5663_v25, %v14974_v23  ;;  %v6416_v48 = vpop.f32.mrf.mxu0  ;;  %v6803_v57 = vsub.f32 %v12917_v49, %v12403_v34 }
 0x432   :  { %v7472_v43 = vadd.f32 %v7471_v58, %v7377_v45  ;;  %v7669_v41 = vadd.f32 %v7668_v18, %v7574_v26  ;;  %v10608_v39 = vpop.f32.mrf.mxu1  ;;  %v7380_v11 = vmul.f32 %v12838_v31, %v6804_v19  ;;  %v14978_v31 = vld [vmem:[#allocation37_spill] sm:$0xff]  ;;  %v15058_v21 = vld [vmem:[#allocation20_spill] sm:$0xff] }
 0x433   :  { %14973 = vst [vmem:[#allocation23_spill] sm:$0xff] %v12919_v59  ;;  %v6806_v33 = vsub.f32 %v12919_v59, %v12403_v34  ;;  %v12931_v60 = vadd.f32 %v6416_v48, %v5854_v7  ;;  %v5857_v40 = vadd.f32 %v10608_v39, %v14976_v50  ;;  %v10784_v0 = vpop.f32.mrf.mxu0  ;;  %v7379_v18 = vmul.f32 %v12835_v46, %v6803_v57 }
 0x434   :  { %v7670_v54 = vadd.f32 %v7669_v41, %v7575_v28  ;;  %v7473_v26 = vadd.f32 %v7472_v43, %v7378_v6  ;;  %v5673_v45 = vpop.f32.mrf.mxu1  ;;  %v7578_v39 = vmul.f32 %v7380_v11, %v7380_v11  ;;  %v12944_v28 = vpop.permute.xlu0 %7231  ;;  %v15057_v32 = vld [vmem:[#allocation21_spill] sm:$0xff] }
 0x435   :  { %14975 = vst [vmem:[#allocation24_spill] sm:$0xff] %v12931_v60  ;;  %v6805_v44 = vsub.f32 %v12931_v60, %v12403_v34  ;;  %v12937_v58 = vadd.f32 %v10784_v0, %v5857_v40  ;;  %v5856_v19 = vadd.f32 %v5673_v45, %v14978_v31  ;;  %v6426_v25 = vpop.f32.mrf.mxu0  ;;  %v7577_v7 = vmul.f32 %v7379_v18, %v7379_v18  ;;  %v14980_v0 = vld [vmem:[#allocation38_spill] sm:$0xff] }
 0x436   :  { %v7474_v23 = vadd.f32 %v7473_v26, %v7379_v18  ;;  %v7671_v48 = vadd.f32 %v7670_v54, %v7576_v8  ;;  %v10611_v59 = vpop.f32.mrf.mxu1  ;;  %v7382_v50 = vmul.f32 %v12861_v22, %v6806_v33  ;;  %v12949_v8 = vpop.permute.xlu1 %7236  ;;  %v15059_v5 = vld [vmem:[#allocation22_spill] sm:$0xff] }
 0x437   :  { %14977 = vst [vmem:[#allocation25_spill] sm:$0xff] %v12937_v58  ;;  %v7381_v41 = vmul.f32 %v12858_v20, %v6805_v44  ;;  %v12942_v46 = vadd.f32 %v6426_v25, %v5856_v19  ;;  %v10787_v6 = vpop.f32.mrf.mxu0  ;;  %v6808_v40 = vsub.f32 %v12937_v58, %v12403_v34  ;;  %v5859_v26 = vadd.f32 %v10611_v59, %v14980_v0  ;;  %v14981_v20 = vld [vmem:[#allocation39_spill] sm:$0xff]  ;;  %v14984_v59 = vld [vmem:[#allocation40_spill] sm:$0xff] }
 0x438   :  { %v7672_v43 = vadd.f32 %v7671_v48, %v7577_v7  ;;  %v7475_v57 = vadd.f32 %v7474_v23, %v7380_v11  ;;  %v5683_v18 = vpop.f32.mrf.mxu1  ;;  %v7580_v25 = vmul.f32 %v7382_v50, %v7382_v50 }
 0x439   :  { %14979 = vst [vmem:[#allocation26_spill] sm:$0xff] %v12942_v46  ;;  %v7579_v54 = vmul.f32 %v7381_v41, %v7381_v41  ;;  %v6807_v22 = vsub.f32 %v12942_v46, %v12403_v34  ;;  %v5858_v33 = vadd.f32 %v5683_v18, %v14981_v20  ;;  %v6436_v45 = vpop.f32.mrf.mxu0  ;;  %v12954_v19 = vadd.f32 %v10787_v6, %v5859_v26 }
 0x43a   :  { %v7476_v44 = vadd.f32 %v7475_v57, %v7381_v41  ;;  %v7673_v31 = vadd.f32 %v7672_v43, %v7578_v39  ;;  %v10614_v11 = vpop.f32.mrf.mxu1  ;;  %v7384_v60 = vmul.f32 %v12882_v30, %v6808_v40  ;;  %v7247_v30 = vpop.permute.xlu1 %7246 }
 0x43b   :  { %14982 = vst [vmem:[#allocation27_spill] sm:$0xff] %v12954_v19  ;;  %v7383_v23 = vmul.f32 %v12878_v2, %v6807_v22  ;;  %v12957_v7 = vadd.f32 %v6436_v45, %v5858_v33  ;;  %v5861_v48 = vadd.f32 %v10614_v11, %v14984_v59  ;;  %v10790_v0 = vpop.f32.mrf.mxu0  ;;  %v6810_v18 = vsub.f32 %v12954_v19, %v12403_v34  ;;  %v14986_v2 = vld [vmem:[#allocation83_spill] sm:$0xff]  ;;  %v12968_v22 = vpop.permute.xlu0 %7241 }
 0x43c   :  { %v7674_v58 = vadd.f32 %v7673_v31, %v7579_v54  ;;  %v7477_v46 = vadd.f32 %v7476_v44, %v7382_v50  ;;  %v5693_v41 = vpop.f32.mrf.mxu1  ;;  %v14988_v44 = vld [vmem:[#allocation42_spill] sm:$0xff]  ;;  %v7582_v59 = vmul.f32 %v7384_v60, %v7384_v60 }
 0x43d   :  { %14983 = vst [vmem:[#allocation28_spill] sm:$0xff] %v12957_v7  ;;  %v7581_v39 = vmul.f32 %v7383_v23, %v7383_v23  ;;  %v6809_v6 = vsub.f32 %v12957_v7, %v12403_v34  ;;  %v12965_v43 = vadd.f32 %v10790_v0, %v5861_v48  ;;  %v5860_v57 = vadd.f32 %v5693_v41, %v14986_v2  ;;  %v6446_v26 = vpop.f32.mrf.mxu0 }
 0x43e   :  { %v7478_v20 = vadd.f32 %v7477_v46, %v7383_v23  ;;  %v7675_v54 = vadd.f32 %v7674_v58, %v7580_v25  ;;  %v10617_v33 = vpop.f32.mrf.mxu1  ;;  %v7386_v50 = vmul.f32 %v12905_v36, %v6810_v18  ;;  %v14990_v18 = vld [vmem:[#allocation43_spill] sm:$0xff] }
 0x43f   :  { %14985 = vst [vmem:[#allocation29_spill] sm:$0xff] %v12965_v43  ;;  %v7385_v40 = vmul.f32 %v12901_v51, %v6809_v6  ;;  %v12972_v45 = vadd.f32 %v6446_v26, %v5860_v57  ;;  %v5863_v31 = vadd.f32 %v10617_v33, %v14988_v44  ;;  %v10793_v11 = vpop.f32.mrf.mxu0  ;;  %v6812_v41 = vsub.f32 %v12965_v43, %v12403_v34  ;;  %v7252_v44 = vpop.permute.xlu0 %7251 }
 0x440   :  { %v7676_v48 = vadd.f32 %v7675_v54, %v7581_v39  ;;  %v7479_v0 = vadd.f32 %v7478_v20, %v7384_v60  ;;  %v5703_v2 = vpop.f32.mrf.mxu1  ;;  %v7584_v26 = vmul.f32 %v7386_v50, %v7386_v50  ;;  %v14991_v20 = vld [vmem:[#allocation85_spill] sm:$0xff] }
 0x441   :  { %14987 = vst [vmem:[#allocation30_spill] sm:$0xff] %v12972_v45  ;;  %v7583_v46 = vmul.f32 %v7385_v40, %v7385_v40  ;;  %v6811_v58 = vsub.f32 %v12972_v45, %v12403_v34  ;;  %v12979_v25 = vadd.f32 %v10793_v11, %v5863_v31  ;;  %v6456_v36 = vpop.f32.mrf.mxu0  ;;  %v5862_v6 = vadd.f32 %v5703_v2, %v14990_v18  ;;  %v14994_v2 = vld [vmem:[#allocation45_spill] sm:$0xff] }
 0x442   :  { %v7480_v51 = vadd.f32 %v7479_v0, %v7385_v40  ;;  %v7677_v23 = vadd.f32 %v7676_v48, %v7582_v59  ;;  %v10620_v57 = vpop.f32.mrf.mxu1  ;;  %v7388_v31 = vmul.f32 %v12926_v35, %v6812_v41  ;;  %v7257_v59 = vpop.permute.xlu1 %7256  ;;  %v14996_v41 = vld [vmem:[#allocation46_spill] sm:$0xff] }
 0x443   :  { %14989 = vst [vmem:[#allocation31_spill] sm:$0xff] %v12979_v25  ;;  %v7387_v39 = vmul.f32 %v12922_v29, %v6811_v58  ;;  %v6814_v60 = vsub.f32 %v12979_v25, %v12403_v34  ;;  %v5865_v54 = vadd.f32 %v10620_v57, %v14991_v20  ;;  %v10796_v33 = vpop.f32.mrf.mxu0  ;;  %v12987_v45 = vadd.f32 %v6456_v36, %v5862_v6 }
 0x444   :  { %v7678_v43 = vadd.f32 %v7677_v23, %v7583_v46  ;;  %v7481_v11 = vadd.f32 %v7480_v51, %v7386_v50  ;;  %v5713_v40 = vpop.f32.mrf.mxu1  ;;  %v7586_v23 = vmul.f32 %v7388_v31, %v7388_v31 }
 0x445   :  { %14992 = vst [vmem:[#allocation32_spill] sm:$0xff] %v12987_v45  ;;  %v7585_v48 = vmul.f32 %v7387_v39, %v7387_v39  ;;  %v12989_v0 = vadd.f32 %v10796_v33, %v5865_v54  ;;  %v5864_v29 = vadd.f32 %v5713_v40, %v14994_v2  ;;  %v6466_v58 = vpop.f32.mrf.mxu0  ;;  %v6813_v57 = vsub.f32 %v12987_v45, %v12403_v34  ;;  %v7262_v40 = vpop.permute.xlu0 %7261 }
 0x446   :  { %v7482_v18 = vadd.f32 %v7481_v11, %v7387_v39  ;;  %v7679_v25 = vadd.f32 %v7678_v43, %v7584_v26  ;;  %v10623_v20 = vpop.f32.mrf.mxu1  ;;  %v7390_v46 = vmul.f32 %v12949_v8, %v6814_v60  ;;  %v14998_v8 = vld [vmem:[#allocation86_spill] sm:$0xff] }
 0x447   :  { %14993 = vst [vmem:[#allocation33_spill] sm:$0xff] %v12989_v0  ;;  %v6816_v35 = vsub.f32 %v12989_v0, %v12403_v34  ;;  %v12997_v50 = vadd.f32 %v6466_v58, %v5864_v29  ;;  %v5867_v36 = vadd.f32 %v10623_v20, %v14996_v41  ;;  %v10799_v51 = vpop.f32.mrf.mxu0  ;;  %v7389_v54 = vmul.f32 %v12944_v28, %v6813_v57  ;;  %v7267_v41 = vpop.permute.xlu1 %7266 }
 0x448   :  { %v7680_v6 = vadd.f32 %v7679_v25, %v7585_v48  ;;  %v7483_v39 = vadd.f32 %v7482_v18, %v7388_v31  ;;  %v5723_v43 = vpop.f32.mrf.mxu1  ;;  %v7588_v0 = vmul.f32 %v7390_v46, %v7390_v46  ;;  %v15065_v1 = vld [vmem:[#allocation30_spill] sm:$0xff] }
 0x449   :  { %14995 = vst [vmem:[#allocation34_spill] sm:$0xff] %v12997_v50  ;;  %v6815_v26 = vsub.f32 %v12997_v50, %v12403_v34  ;;  %v13003_v33 = vadd.f32 %v10799_v51, %v5867_v36  ;;  %v5866_v60 = vadd.f32 %v5723_v43, %v14998_v8  ;;  %v6476_v11 = vpop.f32.mrf.mxu0  ;;  %v7587_v29 = vmul.f32 %v7389_v54, %v7389_v54  ;;  %v14999_v51 = vld [vmem:[#allocation48_spill] sm:$0xff] }
 0x44a   :  { %v7484_v2 = vadd.f32 %v7483_v39, %v7389_v54  ;;  %v7681_v58 = vadd.f32 %v7680_v6, %v7586_v23  ;;  %v10626_v20 = vpop.f32.mrf.mxu1  ;;  %v7392_v25 = vmul.f32 %v7247_v30, %v6816_v35  ;;  %v15000_v6 = vld [vmem:[#allocation87_spill] sm:$0xff] }
 0x44b   :  { %14997 = vst [vmem:[#allocation35_spill] sm:$0xff] %v13003_v33  ;;  %v7391_v28 = vmul.f32 %v12968_v22, %v6815_v26  ;;  %v13007_v31 = vadd.f32 %v6476_v11, %v5866_v60  ;;  %v10802_v48 = vpop.f32.mrf.mxu0  ;;  %v6818_v36 = vsub.f32 %v13003_v33, %v12403_v34  ;;  %v5869_v43 = vadd.f32 %v10626_v20, %v14999_v51  ;;  %v7272_v51 = vpop.permute.xlu0 %7271 }
 0x44c   :  { %v7682_v18 = vadd.f32 %v7681_v58, %v7587_v29  ;;  %v7485_v57 = vadd.f32 %v7484_v2, %v7390_v46  ;;  %v5733_v8 = vpop.f32.mrf.mxu1  ;;  %v7590_v11 = vmul.f32 %v7392_v25, %v7392_v25  ;;  %v15003_v29 = vld [vmem:[#allocation89_spill] sm:$0xff] }
 0x44d   :  { %v7589_v39 = vmul.f32 %v7391_v28, %v7391_v28  ;;  %v6817_v23 = vsub.f32 %v13007_v31, %v12403_v34  ;;  %v5868_v54 = vadd.f32 %v5733_v8, %v15000_v6  ;;  %v6486_v30 = vpop.f32.mrf.mxu0  ;;  %v13015_v26 = vadd.f32 %v10802_v48, %v5869_v43 }
 0x44e   :  { %v7486_v35 = vadd.f32 %v7485_v57, %v7391_v28  ;;  %v7683_v22 = vadd.f32 %v7682_v18, %v7588_v0  ;;  %v10629_v60 = vpop.f32.mrf.mxu1  ;;  %v7394_v50 = vmul.f32 %v7257_v59, %v6818_v36  ;;  %v7277_v28 = vpop.permute.xlu1 %7276  ;;  %v15006_v36 = vld [vmem:[#allocation51_spill] sm:$0xff]  ;;  %v15071_v10 = vld [vmem:[#allocation33_spill] sm:$0xff] }
 0x44f   :  { %15001 = vst [vmem:[#allocation36_spill] sm:$0xff] %v13015_v26  ;;  %v7393_v46 = vmul.f32 %v7252_v44, %v6817_v23  ;;  %v13017_v2 = vadd.f32 %v6486_v30, %v5868_v54  ;;  %v5871_v58 = vadd.f32 %v10629_v60, %v15003_v29  ;;  %v10805_v20 = vpop.f32.mrf.mxu0  ;;  %v6820_v8 = vsub.f32 %v13015_v26, %v12403_v34  ;;  %v15005_v44 = vld [vmem:[#allocation50_spill] sm:$0xff] }
 0x450   :  { %v7684_v33 = vadd.f32 %v7683_v22, %v7589_v39  ;;  %v7487_v45 = vadd.f32 %v7486_v35, %v7392_v25  ;;  %v5743_v6 = vpop.f32.mrf.mxu1  ;;  %v7592_v60 = vmul.f32 %v7394_v50, %v7394_v50 }
 0x451   :  { %15002 = vst [vmem:[#allocation37_spill] sm:$0xff] %v13017_v2  ;;  %v7591_v0 = vmul.f32 %v7393_v46, %v7393_v46  ;;  %v6819_v48 = vsub.f32 %v13017_v2, %v12403_v34  ;;  %v13024_v18 = vadd.f32 %v10805_v20, %v5871_v58  ;;  %v5870_v57 = vadd.f32 %v5743_v6, %v15005_v44  ;;  %v6496_v43 = vpop.f32.mrf.mxu0 }
 0x452   :  { %v7488_v23 = vadd.f32 %v7487_v45, %v7393_v46  ;;  %v7685_v54 = vadd.f32 %v7684_v33, %v7590_v11  ;;  %v10632_v30 = vpop.f32.mrf.mxu1  ;;  %v7396_v26 = vmul.f32 %v7267_v41, %v6820_v8  ;;  %v7282_v11 = vpop.permute.xlu0 %7281  ;;  %v15008_v41 = vld [vmem:[#allocation53_spill] sm:$0xff] }
 0x453   :  { %15004 = vst [vmem:[#allocation38_spill] sm:$0xff] %v13024_v18  ;;  %v7395_v39 = vmul.f32 %v7262_v40, %v6819_v48  ;;  %v6822_v59 = vsub.f32 %v13024_v18, %v12403_v34  ;;  %v13029_v25 = vadd.f32 %v6496_v43, %v5870_v57  ;;  %v5873_v35 = vadd.f32 %v10632_v30, %v15006_v36  ;;  %v10808_v22 = vpop.f32.mrf.mxu0  ;;  %v15007_v48 = vld [vmem:[#allocation52_spill] sm:$0xff]  ;;  %v7287_v43 = vpop.permute.xlu1 %7286 }
 0x454   :  { %v7686_v29 = vadd.f32 %v7685_v54, %v7591_v0  ;;  %v7489_v58 = vadd.f32 %v7488_v23, %v7394_v50  ;;  %v5753_v20 = vpop.f32.mrf.mxu1  ;;  %v7594_v23 = vmul.f32 %v7396_v26, %v7396_v26 }
 0x455   :  { %v7593_v2 = vmul.f32 %v7395_v39, %v7395_v39  ;;  %v6821_v45 = vsub.f32 %v13029_v25, %v12403_v34  ;;  %v13034_v33 = vadd.f32 %v10808_v22, %v5873_v35  ;;  %v6506_v40 = vpop.f32.mrf.mxu0  ;;  %v5872_v44 = vadd.f32 %v5753_v20, %v15007_v48 }
 0x456   :  { %v7490_v46 = vadd.f32 %v7489_v58, %v7395_v39  ;;  %v7687_v6 = vadd.f32 %v7686_v29, %v7592_v60  ;;  %v10635_v57 = vpop.f32.mrf.mxu1  ;;  %v7398_v30 = vmul.f32 %v7277_v28, %v6822_v59  ;;  %v15010_v29 = vld [vmem:[#allocation90_spill] sm:$0xff] }
 0x457   :  { %v7397_v36 = vmul.f32 %v7272_v51, %v6821_v45  ;;  %v6824_v50 = vsub.f32 %v13034_v33, %v12403_v34  ;;  %v5875_v8 = vadd.f32 %v10635_v57, %v15008_v41  ;;  %v10811_v0 = vpop.f32.mrf.mxu0  ;;  %v13040_v22 = vadd.f32 %v6506_v40, %v5872_v44 }
 0x458   :  { %v7688_v54 = vadd.f32 %v7687_v6, %v7593_v2  ;;  %v7491_v35 = vadd.f32 %v7490_v46, %v7396_v26  ;;  %v5763_v18 = vpop.f32.mrf.mxu1  ;;  %v7596_v48 = vmul.f32 %v7398_v30, %v7398_v30  ;;  %v15012_v26 = vld [vmem:[#allocation91_spill] sm:$0xff]  ;;  %v7292_v46 = vpop.permute.xlu0 %7291 }
 0x459   :  { %v7595_v39 = vmul.f32 %v7397_v36, %v7397_v36  ;;  %v13042_v60 = vadd.f32 %v10811_v0, %v5875_v8  ;;  %v5874_v58 = vadd.f32 %v5763_v18, %v15010_v29  ;;  %v6516_v20 = vpop.f32.mrf.mxu0  ;;  %v6823_v59 = vsub.f32 %v13040_v22, %v12403_v34  ;;  %v7297_v0 = vpop.permute.xlu1 %7296 }
 0x45a   :  { %v7492_v28 = vadd.f32 %v7491_v35, %v7397_v36  ;;  %v7689_v51 = vadd.f32 %v7688_v54, %v7594_v23  ;;  %v10638_v45 = vpop.f32.mrf.mxu1  ;;  %v7400_v57 = vmul.f32 %v7287_v43, %v6824_v50  ;;  %v15014_v43 = vld [vmem:[#allocation92_spill] sm:$0xff]  ;;  %v15075_v7 = vld [vmem:[#allocation38_spill] sm:$0xff] }
 0x45b   :  { %15009 = vst [vmem:[#allocation39_spill] sm:$0xff] %v13042_v60  ;;  %v13047_v41 = vadd.f32 %v6516_v20, %v5874_v58  ;;  %v5877_v2 = vadd.f32 %v10638_v45, %v15012_v26  ;;  %v10814_v40 = vpop.f32.mrf.mxu0  ;;  %v7399_v44 = vmul.f32 %v7282_v11, %v6823_v59  ;;  %v6826_v18 = vsub.f32 %v13042_v60, %v12403_v34 }
 0x45c   :  { %v7690_v6 = vadd.f32 %v7689_v51, %v7595_v39  ;;  %v7493_v8 = vadd.f32 %v7492_v28, %v7398_v30  ;;  %v5773_v36 = vpop.f32.mrf.mxu1  ;;  %v7598_v45 = vmul.f32 %v7400_v57, %v7400_v57 }
 0x45d   :  { %15011 = vst [vmem:[#allocation40_spill] sm:$0xff] %v13047_v41  ;;  %v6825_v23 = vsub.f32 %v13047_v41, %v12403_v34  ;;  %v13054_v54 = vadd.f32 %v10814_v40, %v5877_v2  ;;  %v5876_v50 = vadd.f32 %v5773_v36, %v15014_v43  ;;  %v7597_v29 = vmul.f32 %v7399_v44, %v7399_v44  ;;  %v6526_v20 = vpop.f32.mrf.mxu0  ;;  %v7302_v40 = vpop.permute.xlu0 %7301 }
 0x45e   :  { %v7494_v35 = vadd.f32 %v7493_v8, %v7399_v44  ;;  %v7691_v58 = vadd.f32 %v7690_v6, %v7596_v48  ;;  %v7402_v28 = vmul.f32 %v7297_v0, %v6826_v18  ;;  %v7307_v44 = vpop.permute.xlu1 %7306 }
 0x45f   :  { %15013 = vst [vmem:[#allocation83_spill] sm:$0xff] %v13054_v54  ;;  %v7401_v39 = vmul.f32 %v7292_v46, %v6825_v23  ;;  %v13057_v11 = vadd.f32 %v6526_v20, %v5876_v50  ;;  %v6828_v59 = vsub.f32 %v13054_v54, %v12403_v34 }
 0x460   :  { %v7692_v30 = vadd.f32 %v7691_v58, %v7597_v29  ;;  %v7495_v51 = vadd.f32 %v7494_v35, %v7400_v57  ;;  %v7600_v6 = vmul.f32 %v7402_v28, %v7402_v28 }
 0x461   :  { %v7599_v26 = vmul.f32 %v7401_v39, %v7401_v39  ;;  %v6827_v2 = vsub.f32 %v13057_v11, %v12403_v34  ;;  %v7404_v46 = vmul.f32 %v7307_v44, %v6828_v59 }
 0x462   :  { %v7496_v36 = vadd.f32 %v7495_v51, %v7401_v39  ;;  %v7693_v8 = vadd.f32 %v7692_v30, %v7598_v45 }
 0x463   :  { %v7403_v48 = vmul.f32 %v7302_v40, %v6827_v2  ;;  %v7602_v57 = vmul.f32 %v7404_v46, %v7404_v46 }
 0x464   :  { %v7694_v43 = vadd.f32 %v7693_v8, %v7599_v26  ;;  %v7497_v23 = vadd.f32 %v7496_v36, %v7402_v28  ;;  %v15015_v8 = vld [vmem:[#allocation94_spill] sm:$0xff] }
 0x465   :  { %v7601_v50 = vmul.f32 %v7403_v48, %v7403_v48 }
 0x466   :  { %v7498_v29 = vadd.f32 %v7497_v23, %v7403_v48  ;;  %v7695_v18 = vadd.f32 %v7694_v43, %v7600_v6  ;;  %v15016_v6 = vld [vmem:[#allocation93_spill] sm:$0xff]  ;;  %v15046_v23 = vld [vmem:[#allocation60_spill] sm:$0xff]  ;;  %v15078_v38 = vld [vmem:[#allocation83_spill] sm:$0xff] }
 0x468   :  { %v7499_v0 = vadd.f32 %v7498_v29, %v7404_v46  ;;  %v7696_v35 = vadd.f32 %v7695_v18, %v7601_v50  ;;  %v15018_v29 = vld [vmem:[#allocation96_spill] sm:$0xff] }
 0x469   :  { %v15041_v50 = vld [vmem:[#allocation72_spill] sm:$0xff] }
 0x46a   :  { %v7500_v58 = vrot.slane %v7499_v0, 4  ;;  %v7697_v20 = vadd.f32 %v7696_v35, %v7602_v57  ;;  %v15038_v35 = vld [vmem:[#allocation69_spill] sm:$0xff] }
 0x46c   :  { %v7501_v54 = vadd.f32 %v7500_v58, %v7499_v0  ;;  %v7698_v60 = vrot.slane %v7697_v20, 4  ;;  %v15019_v0 = vld [vmem:[#allocation97_spill] sm:$0xff] }
 0x46e   :  { %v7502_v34 = vrot.slane %v7501_v54, 2  ;;  %v7699_v41 = vadd.f32 %v7698_v60, %v7697_v20  ;;  %v6631_v60 = vld [vmem:[%s14328_s2] sm:$0x1]  ;;  %v13234_v20 = vld [vmem:[%s14328_s2 + $0x1] ss:$0 sm:$0xff]  ;;  %s10930_s2 = smov [#allocation7]  }
 0x46f   :  { %15064 = vst [vmem:[#allocation42_spill] sm:$0xff] %v13234_v20  ;;  %s8209_s12 = sshll.u32 %s10930_s2, 4  ;;  %s8210_s12 = int_to_ptr.vmem [resolvable:$true] %s8209_s12 }
 0x470   :  { %v7503_v39 = vadd.f32 %v7502_v34, %v7501_v54  ;;  %v7700_v45 = vrot.slane %v7699_v41, 2  ;;  %v15039_v54 = vld [vmem:[#allocation71_spill] sm:$0xff]  ;;  %s10899_s13 = scalar_lea.vmem %s8210_s12, 12288  ;;  %p10904_p11 = scmp.lt.s32.totalorder %s8210_s12, %s8210_s12 }
 0x471   :  { %p10900_p10 = scmp.ne.s32.totalorder %s8210_s12, %s10899_s13  ;;  %p10905_p12 = scmp.lt.s32.totalorder %s10899_s13, %s10899_s13 }
 0x472   :  { %v7504_v30 = vrot.slane %v7503_v39, 1  ;;  %v7701_v51 = vadd.f32 %v7700_v45, %v7699_v41  ;;  %v15017_v41 = vld [vmem:[#allocation95_spill] sm:$0xff]  ;;  %v15020_v45 = vld [vmem:[#allocation98_spill] sm:$0xff] }
 0x473   :  { %p10906_p13 = por %p10905_p12, %p10904_p11 }
 0x474   :  { %v7505_v2 = vadd.f32 %v7504_v30, %v7503_v39  ;;  %v7702_v26 = vrot.slane %v7701_v51, 1  ;;  %v15032_v39 = vld [vmem:[#allocation44_spill] sm:$0xff]  ;;  %v15044_v30 = vld [vmem:[#allocation78_spill] sm:$0xff] }
 0x475   :  { %p10907_p0 = pnand %p10906_p13, %p10900_p10 }
 0x476   :  { %v7506_v59 = vmul.f32 0.001953125, %v7505_v2  ;;  %v7703_v28 = vadd.f32 %v7702_v26, %v7701_v51  ;;  %v15029_v2 = vld [vmem:[#allocation82_spill] sm:$0xff]  ;;  %v15030_v26 = vld [vmem:[#allocation64_spill] sm:$0xff] }
 0x477   :  { %v15031_v51 = vld [vmem:[#allocation84_spill] sm:$0xff] }
 0x478   :  { %v7704_v40 = vmul.f32 0.001953125, %v7703_v28  ;;  %v7705_v36 = vmul.f32 %v7506_v59, %v7506_v59  ;;  %v7708_v44 = vadd.f32 %v7506_v59, %v15015_v8  ;;  %v15024_v59 = vld [vmem:[#allocation54_spill] sm:$0xff] }
 0x479   :  { %v15025_v28 = vld [vmem:[#allocation102_spill] sm:$0xff] }
 0x47a   :  { %v7706_v48 = vsub.f32 %v7704_v40, %v7705_v36  ;;  %v13065_v43 = vrot.slane %v7708_v44, %v15016_v6  ;;  %v15021_v44 = vld [vmem:[#allocation99_spill] sm:$0xff]  ;;  %v15027_v36 = vld [vmem:[#allocation41_spill] sm:$0xff] }
 0x47b   :  { %v15026_v40 = vld [vmem:[#allocation55_spill] sm:$0xff] }
 0x47c   :  { %v7707_v46 = vmax.f32 %v7706_v48, 0.0  ;;  %v15028_v48 = vld [vmem:[#allocation56_spill] sm:$0xff]  ;;  %v15069_v34 = vsub.f32 %v13057_v11, %v13065_v43  ;;  %v15081_v55 = vsub.f32 %v12414_v63, %v13065_v43 }
 0x47e   :  { %v7809_v58 = vadd.f32 1e-05, %v7707_v46  ;;  %v15022_v46 = vld [vmem:[#allocation101_spill] sm:$0xff] }
 0x480   :  { %10855 = vrsqrt.f32 %v7809_v58  ;;  %v15023_v58 = vld [vmem:[#allocation100_spill] sm:$0xff] }
 0x48d   :  { %v10856_v42 = vpop.eup %10855 }
 0x48e   :  { %v7811_v18 = vmul.f32 %v10856_v42, %v6631_v60  ;;  %v15077_v42 = vld [vmem:[#allocation39_spill] sm:$0xff] }
 0x490   :  { %v13223_v57 = vrot.slane %v7811_v18, %v15016_v6  ;;  %v15076_v6 = vld [vmem:[#allocation40_spill] sm:$0xff]  ;;  %v15080_v18 = vsub.f32 %v15017_v41, %v13065_v43 }
 0x492   :  { %v7910_v19 = vmul.f32 %v13223_v57, %v15069_v34  ;;  %v13285_v62 = vmul.f32 %v13223_v57, %v15080_v18  ;;  %v13291_v11 = vmul.f32 %v13223_v57, %v15081_v55  ;;  %v15082_v34 = vsub.f32 %v15018_v29, %v13065_v43 }
 0x493   :  { %v15084_v18 = vsub.f32 %v15019_v0, %v13065_v43  ;;  %v15085_v55 = vsub.f32 %v12444_v13, %v13065_v43 }
 0x494   :  { %v8010_v3 = vadd.f32 %v13234_v20, %v7910_v19  ;;  %v15079_v19 = vsub.f32 %v15015_v8, %v13065_v43  ;;  %v13297_v8 = vmul.f32 %v13223_v57, %v15082_v34  ;;  %v15086_v34 = vsub.f32 %v12442_v17, %v13065_v43 }
 0x495   :  { %v13309_v63 = vmul.f32 %v13223_v57, %v15084_v18  ;;  %v13315_v29 = vmul.f32 %v13223_v57, %v15085_v55  ;;  %v15089_v18 = vsub.f32 %v12477_v37, %v13065_v43  ;;  %v15091_v55 = vsub.f32 %v12491_v16, %v13065_v43 }
 0x496   :  { %v13279_v60 = vmul.f32 %v13223_v57, %v15079_v19  ;;  %v8106_v20 = vmax.f32 %v8010_v3, 0.0  ;;  %v15083_v3 = vsub.f32 %v12432_v15, %v13065_v43  ;;  %v13321_v15 = vmul.f32 %v13223_v57, %v15086_v34 }
 0x497   :  { %v15087_v19 = vsub.f32 %v12460_v52, %v13065_v43  ;;  %v13339_v17 = vmul.f32 %v13223_v57, %v15089_v18  ;;  %v15092_v34 = vsub.f32 %v12479_v53, %v13065_v43  ;;  %v15095_v18 = vsub.f32 %v12517_v14, %v13065_v43 }
 0x498   :  { %v13303_v41 = vmul.f32 %v13223_v57, %v15083_v3  ;;  %8202 = vst [vmem:[#allocation7 + $0x2f0] sm:$0xff] %v8106_v20  ;;  %v15088_v3 = vsub.f32 %v15020_v45, %v13065_v43  ;;  %v15090_v20 = vsub.f32 %v12469_v9, %v13065_v43  ;;  %v13351_v45 = vmul.f32 %v13223_v57, %v15091_v55 }
 0x499   :  { %v13327_v0 = vmul.f32 %v13223_v57, %v15087_v19  ;;  %v13357_v37 = vmul.f32 %v13223_v57, %v15092_v34  ;;  %v15093_v19 = vsub.f32 %v12502_v47, %v13065_v43  ;;  %v13375_v53 = vmul.f32 %v13223_v57, %v15095_v18 }
 0x49a   :  { %v13333_v13 = vmul.f32 %v13223_v57, %v15088_v3  ;;  %v13345_v52 = vmul.f32 %v13223_v57, %v15090_v20  ;;  %v15094_v3 = vsub.f32 %v12497_v12, %v13065_v43  ;;  %v15096_v20 = vsub.f32 %v15021_v44, %v13065_v43 }
 0x49b   :  { %v13363_v9 = vmul.f32 %v13223_v57, %v15093_v19  ;;  %v15097_v55 = vsub.f32 %v15022_v46, %v13065_v43  ;;  %v15098_v34 = vsub.f32 %v15023_v58, %v13065_v43  ;;  %v15099_v19 = vsub.f32 %v15024_v59, %v13065_v43 }
 0x49c   :  { %v13369_v16 = vmul.f32 %v13223_v57, %v15094_v3  ;;  %v13381_v47 = vmul.f32 %v13223_v57, %v15096_v20  ;;  %v15100_v3 = vsub.f32 %v15025_v28, %v13065_v43  ;;  %v15101_v18 = vsub.f32 %v15026_v40, %v13065_v43 }
 0x49d   :  { %v13387_v12 = vmul.f32 %v13223_v57, %v15097_v55  ;;  %v13393_v14 = vmul.f32 %v13223_v57, %v15098_v34  ;;  %v13399_v44 = vmul.f32 %v13223_v57, %v15099_v19  ;;  %v15102_v20 = vsub.f32 %v15027_v36, %v13065_v43 }
 0x49e   :  { %v13405_v46 = vmul.f32 %v13223_v57, %v15100_v3  ;;  %v13411_v58 = vmul.f32 %v13223_v57, %v15101_v18  ;;  %v15103_v55 = vsub.f32 %v15028_v48, %v13065_v43  ;;  %v15104_v34 = vsub.f32 %v15029_v2, %v13065_v43 }
 0x49f   :  { %v13417_v59 = vmul.f32 %v13223_v57, %v15102_v20  ;;  %v15105_v19 = vsub.f32 %v15030_v26, %v13065_v43  ;;  %v15106_v3 = vsub.f32 %v15031_v51, %v13065_v43  ;;  %v15107_v18 = vsub.f32 %v12606_v56, %v13065_v43 }
 0x4a0   :  { %v13423_v28 = vmul.f32 %v13223_v57, %v15103_v55  ;;  %v13429_v40 = vmul.f32 %v13223_v57, %v15104_v34  ;;  %v15109_v20 = vsub.f32 %v15032_v39, %v13065_v43  ;;  %v15110_v55 = vld [vmem:[#allocation47_spill] sm:$0xff] }
 0x4a1   :  { %v13435_v36 = vmul.f32 %v13223_v57, %v15105_v19  ;;  %v13441_v48 = vmul.f32 %v13223_v57, %v15106_v3  ;;  %v13447_v2 = vmul.f32 %v13223_v57, %v15107_v18  ;;  %v15111_v34 = vsub.f32 %v15110_v55, %v13065_v43  ;;  %v15113_v19 = vld [vmem:[#allocation65_spill] sm:$0xff]  ;;  %v15116_v18 = vld [vmem:[#allocation66_spill] sm:$0xff] }
 0x4a2   :  { %v13453_v26 = vmul.f32 %v13223_v57, %v15109_v20  ;;  %v15114_v3 = vsub.f32 %v15113_v19, %v13065_v43  ;;  %v15119_v20 = vsub.f32 %v12627_v61, %v13065_v43 }
 0x4a3   :  { %15108 = vst [vmem:[#allocation43_spill] sm:$0xff] %v13447_v2  ;;  %v13459_v51 = vmul.f32 %v13223_v57, %v15111_v34  ;;  %v15117_v2 = vsub.f32 %v15116_v18, %v13065_v43  ;;  %v15121_v34 = vld [vmem:[#allocation49_spill] sm:$0xff] }
 0x4a4   :  { %v13465_v56 = vmul.f32 %v13223_v57, %v15114_v3  ;;  %v13477_v55 = vmul.f32 %v13223_v57, %v15119_v20  ;;  %v15124_v3 = vld [vmem:[#allocation67_spill] sm:$0xff]  ;;  %v15128_v20 = vld [vmem:[#allocation68_spill] sm:$0xff] }
 0x4a5   :  { %15112 = vst [vmem:[#allocation85_spill] sm:$0xff] %v13459_v51  ;;  %v13471_v39 = vmul.f32 %v13223_v57, %v15117_v2  ;;  %v15122_v51 = vsub.f32 %v15121_v34, %v13065_v43  ;;  %v15126_v2 = vld [vmem:[#allocation88_spill] sm:$0xff] }
 0x4a6   :  { %15115 = vst [vmem:[#allocation45_spill] sm:$0xff] %v13465_v56  ;;  %15120 = vst [vmem:[#allocation86_spill] sm:$0xff] %v13477_v55  ;;  %v15125_v56 = vsub.f32 %v15124_v3, %v13065_v43  ;;  %v15129_v55 = vsub.f32 %v15128_v20, %v13065_v43 }
 0x4a7   :  { %15118 = vst [vmem:[#allocation46_spill] sm:$0xff] %v13471_v39  ;;  %v13483_v19 = vmul.f32 %v13223_v57, %v15122_v51  ;;  %v15127_v39 = vsub.f32 %v15126_v2, %v13065_v43  ;;  %v15130_v51 = vld [vmem:[#allocation70_spill] sm:$0xff] }
 0x4a8   :  { %v13489_v18 = vmul.f32 %v13223_v57, %v15125_v56  ;;  %v13501_v34 = vmul.f32 %v13223_v57, %v15129_v55  ;;  %v15133_v56 = vsub.f32 %v15038_v35, %v13065_v43  ;;  %v15136_v55 = vsub.f32 %v15039_v54, %v13065_v43 }
 0x4a9   :  { %15123 = vst [vmem:[#allocation48_spill] sm:$0xff] %v13483_v19  ;;  %v13495_v61 = vmul.f32 %v13223_v57, %v15127_v39  ;;  %v15131_v19 = vsub.f32 %v15130_v51, %v13065_v43  ;;  %v15134_v39 = vsub.f32 %v12697_v27, %v13065_v43 }
 0x4aa   :  { %v13513_v2 = vmul.f32 %v13223_v57, %v15133_v56  ;;  %v13525_v51 = vmul.f32 %v13223_v57, %v15136_v55  ;;  %v15141_v56 = vsub.f32 %v15041_v50, %v13065_v43  ;;  %v15146_v55 = vld [vmem:[#allocation74_spill] sm:$0xff] }
 0x4ab   :  { %v13507_v3 = vmul.f32 %v13223_v57, %v15131_v19  ;;  %v13519_v20 = vmul.f32 %v13223_v57, %v15134_v39  ;;  %v15138_v19 = vld [vmem:[#allocation73_spill] sm:$0xff]  ;;  %v15143_v39 = vld [vmem:[#allocation75_spill] sm:$0xff] }
 0x4ac   :  { %15137 = vst [vmem:[#allocation50_spill] sm:$0xff] %v13525_v51  ;;  %v13537_v27 = vmul.f32 %v13223_v57, %v15141_v56  ;;  %v15147_v51 = vsub.f32 %v15146_v55, %v13065_v43  ;;  %v15151_v56 = vld [vmem:[#allocation76_spill] sm:$0xff] }
 0x4ad   :  { %15132 = vst [vmem:[#allocation87_spill] sm:$0xff] %v13507_v3  ;;  %15135 = vst [vmem:[#allocation89_spill] sm:$0xff] %v13519_v20  ;;  %v15139_v3 = vsub.f32 %v15138_v19, %v13065_v43  ;;  %v15144_v20 = vsub.f32 %v15143_v39, %v13065_v43 }
 0x4ae   :  { %15142 = vst [vmem:[#allocation52_spill] sm:$0xff] %v13537_v27  ;;  %v13549_v19 = vmul.f32 %v13223_v57, %v15147_v51  ;;  %v15152_v27 = vsub.f32 %v15151_v56, %v13065_v43  ;;  %v15156_v51 = vsub.f32 %v15044_v30, %v13065_v43 }
 0x4af   :  { %v13531_v35 = vmul.f32 %v13223_v57, %v15139_v3  ;;  %v13543_v54 = vmul.f32 %v13223_v57, %v15144_v20  ;;  %v15148_v3 = vld [vmem:[#allocation77_spill] sm:$0xff]  ;;  %v15154_v20 = vld [vmem:[#allocation79_spill] sm:$0xff] }
 0x4b0   :  { %v13561_v39 = vmul.f32 %v13223_v57, %v15152_v27  ;;  %v15161_v27 = vld [vmem:[#allocation80_spill] sm:$0xff] }
 0x4b1   :  { %15140 = vst [vmem:[#allocation51_spill] sm:$0xff] %v13531_v35  ;;  %15145 = vst [vmem:[#allocation53_spill] sm:$0xff] %v13543_v54  ;;  %v15149_v35 = vsub.f32 %v15148_v3, %v13065_v43  ;;  %v15155_v54 = vsub.f32 %v15154_v20, %v13065_v43  ;;  %v13573_v3 = vmul.f32 %v13223_v57, %v15156_v51  ;;  %v15166_v51 = vld [vmem:[#allocation58_spill] sm:$0xff] }
 0x4b2   :  { %15153 = vst [vmem:[#allocation91_spill] sm:$0xff] %v13561_v39  ;;  %v15162_v39 = vsub.f32 %v15161_v27, %v13065_v43 }
 0x4b3   :  { %v13555_v50 = vmul.f32 %v13223_v57, %v15149_v35  ;;  %v13567_v55 = vmul.f32 %v13223_v57, %v15155_v54  ;;  %15157 = vst [vmem:[#allocation92_spill] sm:$0xff] %v13573_v3  ;;  %v15158_v35 = vld [vmem:[#allocation81_spill] sm:$0xff]  ;;  %v15164_v54 = vsub.f32 %v15046_v23, %v13065_v43  ;;  %v15167_v3 = vsub.f32 %v15166_v51, %v13065_v43 }
 0x4b4   :  { %v13585_v20 = vmul.f32 %v13223_v57, %v15162_v39  ;;  %v15172_v39 = vld [vmem:[#allocation62_spill] sm:$0xff] }
 0x4b5   :  { %15150 = vst [vmem:[#allocation90_spill] sm:$0xff] %v13555_v50  ;;  %v15159_v50 = vsub.f32 %v15158_v35, %v13065_v43  ;;  %v13591_v30 = vmul.f32 %v13223_v57, %v15164_v54  ;;  %v13597_v35 = vmul.f32 %v13223_v57, %v15167_v3  ;;  %v15174_v54 = vld [vmem:[#allocation59_spill] sm:$0xff]  ;;  %v15177_v3 = vld [vmem:[#allocation57_spill] sm:$0xff] }
 0x4b6   :  { %15163 = vst [vmem:[#allocation93_spill] sm:$0xff] %v13585_v20  ;;  %v15173_v20 = vsub.f32 %v15172_v39, %v13065_v43 }
 0x4b7   :  { %v13579_v56 = vmul.f32 %v13223_v57, %v15159_v50  ;;  %15165 = vst [vmem:[#allocation95_spill] sm:$0xff] %v13591_v30  ;;  %15168 = vst [vmem:[#allocation96_spill] sm:$0xff] %v13597_v35  ;;  %v15169_v50 = vld [vmem:[#allocation63_spill] sm:$0xff]  ;;  %v15175_v30 = vsub.f32 %v15174_v54, %v13065_v43  ;;  %v15178_v35 = vsub.f32 %v15177_v3, %v13065_v43 }
 0x4b8   :  { %v13609_v23 = vmul.f32 %v13223_v57, %v15173_v20  ;;  %v15183_v20 = vsub.f32 %v15052_v4, %v13065_v43 }
 0x4b9   :  { %15160 = vst [vmem:[#allocation94_spill] sm:$0xff] %v13579_v56  ;;  %v15170_v56 = vsub.f32 %v15169_v50, %v13065_v43  ;;  %v13615_v51 = vmul.f32 %v13223_v57, %v15175_v30  ;;  %v13621_v50 = vmul.f32 %v13223_v57, %v15178_v35  ;;  %v15185_v30 = vld [vmem:[#allocation13_spill] sm:$0xff]  ;;  %v15188_v35 = vld [vmem:[#allocation12_spill] sm:$0xff] }
 0x4ba   :  { %v13633_v54 = vmul.f32 %v13223_v57, %v15183_v20  ;;  %v15194_v20 = vld [vmem:[#allocation14_spill] sm:$0xff] }
 0x4bb   :  { %v13603_v27 = vmul.f32 %v13223_v57, %v15170_v56  ;;  %15176 = vst [vmem:[#allocation98_spill] sm:$0xff] %v13615_v51  ;;  %15179 = vst [vmem:[#allocation99_spill] sm:$0xff] %v13621_v50  ;;  %v15180_v56 = vld [vmem:[#allocation11_spill] sm:$0xff]  ;;  %v15186_v51 = vsub.f32 %v15185_v30, %v13065_v43  ;;  %v15189_v50 = vsub.f32 %v15188_v35, %v13065_v43 }
 0x4bc   :  { %15184 = vst [vmem:[#allocation100_spill] sm:$0xff] %v13633_v54  ;;  %v15195_v54 = vsub.f32 %v15194_v20, %v13065_v43 }
 0x4bd   :  { %15171 = vst [vmem:[#allocation97_spill] sm:$0xff] %v13603_v27  ;;  %v15181_v27 = vsub.f32 %v15180_v56, %v13065_v43  ;;  %v13639_v3 = vmul.f32 %v13223_v57, %v15186_v51  ;;  %v13645_v56 = vmul.f32 %v13223_v57, %v15189_v50  ;;  %v15196_v51 = vld [vmem:[#allocation17_spill] sm:$0xff]  ;;  %v15198_v50 = vld [vmem:[#allocation16_spill] sm:$0xff] }
 0x4be   :  { %v13657_v30 = vmul.f32 %v13223_v57, %v15195_v54  ;;  %v15202_v54 = vsub.f32 %v15056_v24, %v13065_v43 }
 0x4bf   :  { %v13627_v39 = vmul.f32 %v13223_v57, %v15181_v27  ;;  %15187 = vst [vmem:[#allocation54_spill] sm:$0xff] %v13639_v3  ;;  %15190 = vst [vmem:[#allocation102_spill] sm:$0xff] %v13645_v56  ;;  %v15191_v27 = vld [vmem:[#allocation15_spill] sm:$0xff]  ;;  %v15197_v3 = vsub.f32 %v15196_v51, %v13065_v43  ;;  %v15199_v56 = vsub.f32 %v15198_v50, %v13065_v43 }
 0x4c0   :  { %v13681_v51 = vmul.f32 %v13223_v57, %v15202_v54  ;;  %v15209_v54 = vsub.f32 %v15059_v5, %v13065_v43 }
 0x4c1   :  { %15182 = vst [vmem:[#allocation101_spill] sm:$0xff] %v13627_v39  ;;  %v15192_v39 = vsub.f32 %v15191_v27, %v13065_v43  ;;  %v13663_v35 = vmul.f32 %v13223_v57, %v15197_v3  ;;  %v13669_v27 = vmul.f32 %v13223_v57, %v15199_v56  ;;  %v15203_v3 = vsub.f32 %v15057_v32, %v13065_v43 }
 0x4c2   :  { %v15205_v56 = vsub.f32 %v15058_v21, %v13065_v43  ;;  %v13705_v32 = vmul.f32 %v13223_v57, %v15209_v54  ;;  %v15219_v54 = vld [vmem:[#allocation25_spill] sm:$0xff] }
 0x4c3   :  { %v13651_v4 = vmul.f32 %v13223_v57, %v15192_v39  ;;  %v15200_v39 = vld [vmem:[#allocation19_spill] sm:$0xff]  ;;  %v13687_v50 = vmul.f32 %v13223_v57, %v15203_v3  ;;  %v15211_v3 = vld [vmem:[#allocation24_spill] sm:$0xff] }
 0x4c4   :  { %15210 = vst [vmem:[#allocation64_spill] sm:$0xff] %v13705_v32  ;;  %v15220_v32 = vsub.f32 %v15219_v54, %v13065_v43 }
 0x4c5   :  { %15193 = vst [vmem:[#allocation55_spill] sm:$0xff] %v13651_v4  ;;  %v15201_v4 = vsub.f32 %v15200_v39, %v13065_v43  ;;  %15204 = vst [vmem:[#allocation41_spill] sm:$0xff] %v13687_v50  ;;  %v13693_v39 = vmul.f32 %v13223_v57, %v15205_v56  ;;  %v15212_v50 = vsub.f32 %v15211_v3, %v13065_v43  ;;  %v15214_v56 = vld [vmem:[#allocation23_spill] sm:$0xff] }
 0x4c6   :  { %v13729_v3 = vmul.f32 %v13223_v57, %v15220_v32  ;;  %v15230_v32 = vld [vmem:[#allocation29_spill] sm:$0xff] }
 0x4c7   :  { %v13675_v20 = vmul.f32 %v13223_v57, %v15201_v4  ;;  %15206 = vst [vmem:[#allocation56_spill] sm:$0xff] %v13693_v39  ;;  %v15207_v4 = vsub.f32 %v12917_v49, %v13065_v43  ;;  %v13711_v21 = vmul.f32 %v13223_v57, %v15212_v50  ;;  %v15215_v39 = vsub.f32 %v15214_v56, %v13065_v43  ;;  %v15222_v50 = vld [vmem:[#allocation28_spill] sm:$0xff] }
 0x4c8   :  { %15221 = vst [vmem:[#allocation69_spill] sm:$0xff] %v13729_v3  ;;  %v15231_v3 = vsub.f32 %v15230_v32, %v13065_v43 }
 0x4c9   :  { %v13699_v24 = vmul.f32 %v13223_v57, %v15207_v4  ;;  %15213 = vst [vmem:[#allocation84_spill] sm:$0xff] %v13711_v21  ;;  %v13717_v49 = vmul.f32 %v13223_v57, %v15215_v39  ;;  %v15217_v4 = vld [vmem:[#allocation26_spill] sm:$0xff]  ;;  %v15223_v21 = vsub.f32 %v15222_v50, %v13065_v43  ;;  %v15225_v39 = vld [vmem:[#allocation27_spill] sm:$0xff] }
 0x4ca   :  { %v13753_v50 = vmul.f32 %v13223_v57, %v15231_v3  ;;  %v15240_v3 = vsub.f32 %v15071_v10, %v13065_v43 }
 0x4cb   :  { %15208 = vst [vmem:[#allocation82_spill] sm:$0xff] %v13699_v24  ;;  %15216 = vst [vmem:[#allocation44_spill] sm:$0xff] %v13717_v49  ;;  %v15218_v24 = vsub.f32 %v15217_v4, %v13065_v43  ;;  %v13735_v56 = vmul.f32 %v13223_v57, %v15223_v21  ;;  %v15226_v49 = vsub.f32 %v15225_v39, %v13065_v43  ;;  %v15232_v21 = vld [vmem:[#allocation32_spill] sm:$0xff] }
 0x4cd   :  { %v13723_v5 = vmul.f32 %v13223_v57, %v15218_v24  ;;  %15224 = vst [vmem:[#allocation71_spill] sm:$0xff] %v13735_v56  ;;  %v13741_v4 = vmul.f32 %v13223_v57, %v15226_v49  ;;  %v15228_v24 = vsub.f32 %v15065_v1, %v13065_v43  ;;  %v15233_v56 = vsub.f32 %v15232_v21, %v13065_v43  ;;  %v15234_v49 = vld [vmem:[#allocation31_spill] sm:$0xff] }
 0x4ce   :  { %v13777_v21 = vmul.f32 %v13223_v57, %v15240_v3  ;;  %v15247_v3 = vld [vmem:[#allocation36_spill] sm:$0xff] }
 0x4cf   :  { %15227 = vst [vmem:[#allocation72_spill] sm:$0xff] %v13741_v4  ;;  %v13747_v54 = vmul.f32 %v13223_v57, %v15228_v24  ;;  %v13759_v39 = vmul.f32 %v13223_v57, %v15233_v56  ;;  %v15235_v4 = vsub.f32 %v15234_v49, %v13065_v43  ;;  %v15237_v24 = vld [vmem:[#allocation34_spill] sm:$0xff]  ;;  %v15242_v56 = vsub.f32 %v13007_v31, %v13065_v43 }
 0x4d0   :  { %15241 = vst [vmem:[#allocation18_spill] sm:$0xff] %v13777_v21  ;;  %v15248_v21 = vsub.f32 %v15247_v3, %v13065_v43 }
 0x4d1   :  { %15229 = vst [vmem:[#allocation78_spill] sm:$0xff] %v13747_v54  ;;  %v13765_v1 = vmul.f32 %v13223_v57, %v15235_v4  ;;  %v15238_v54 = vsub.f32 %v15237_v24, %v13065_v43  ;;  %v13783_v49 = vmul.f32 %v13223_v57, %v15242_v56  ;;  %v15243_v4 = vld [vmem:[#allocation35_spill] sm:$0xff]  ;;  %v15249_v56 = vsub.f32 %v13029_v25, %v13065_v43 }
 0x4d2   :  { %v13801_v31 = vmul.f32 %v13223_v57, %v15248_v21  ;;  %v15252_v21 = vsub.f32 %v13034_v33, %v13065_v43 }
 0x4d3   :  { %15236 = vst [vmem:[#allocation60_spill] sm:$0xff] %v13765_v1  ;;  %v13771_v32 = vmul.f32 %v13223_v57, %v15238_v54  ;;  %v15244_v1 = vsub.f32 %v15243_v4, %v13065_v43  ;;  %v15245_v54 = vld [vmem:[#allocation37_spill] sm:$0xff]  ;;  %v13807_v4 = vmul.f32 %v13223_v57, %v15249_v56  ;;  %v15254_v56 = vsub.f32 %v15076_v6, %v13065_v43 }
 0x4d4   :  { %v13825_v25 = vmul.f32 %v13223_v57, %v15252_v21  ;;  %v15257_v21 = vld [vmem:[#allocation42_spill] sm:$0xff] }
 0x4d5   :  { %15239 = vst [vmem:[#allocation61_spill] sm:$0xff] %v13771_v32  ;;  %v13789_v24 = vmul.f32 %v13223_v57, %v15244_v1  ;;  %v15246_v32 = vsub.f32 %v15245_v54, %v13065_v43  ;;  %v15250_v1 = vsub.f32 %v15075_v7, %v13065_v43  ;;  %v13831_v7 = vmul.f32 %v13223_v57, %v15254_v56 }
 0x4d6   :  { %15253 = vst [vmem:[#allocation21_spill] sm:$0xff] %v13825_v25  ;;  %v13847_v25 = vadd.f32 %v15257_v21, %v13279_v60  ;;  %v13851_v6 = vadd.f32 %v15257_v21, %v13285_v62  ;;  %v13859_v56 = vadd.f32 %v15257_v21, %v13297_v8  ;;  %v13871_v62 = vadd.f32 %v15257_v21, %v13315_v29 }
 0x4d7   :  { %v13795_v10 = vmul.f32 %v13223_v57, %v15246_v32  ;;  %v13813_v54 = vmul.f32 %v13223_v57, %v15250_v1  ;;  %v15251_v32 = vsub.f32 %v13040_v22, %v13065_v43  ;;  %v15255_v1 = vsub.f32 %v15077_v42, %v13065_v43 }
 0x4d8   :  { %v13855_v42 = vadd.f32 %v15257_v21, %v13291_v11  ;;  %v13879_v60 = vadd.f32 %v15257_v21, %v13327_v0  ;;  %v13883_v11 = vadd.f32 %v15257_v21, %v13333_v13  ;;  %v13887_v8 = vadd.f32 %v15257_v21, %v13339_v17 }
 0x4d9   :  { %v13819_v3 = vmul.f32 %v13223_v57, %v15251_v32  ;;  %v13837_v22 = vmul.f32 %v13223_v57, %v15255_v1  ;;  %v15256_v32 = vsub.f32 %v15078_v38, %v13065_v43  ;;  %v13863_v38 = vadd.f32 %v15257_v21, %v13303_v41  ;;  %v15262_v1 = vld [vmem:[#allocation45_spill] sm:$0xff] }
 0x4da   :  { %v13867_v43 = vadd.f32 %v15257_v21, %v13309_v63  ;;  %v13891_v41 = vadd.f32 %v15257_v21, %v13345_v52  ;;  %v13895_v63 = vadd.f32 %v15257_v21, %v13351_v45  ;;  %v13899_v29 = vadd.f32 %v15257_v21, %v13357_v37 }
 0x4db   :  { %v13843_v33 = vmul.f32 %v13223_v57, %v15256_v32  ;;  %v13875_v57 = vadd.f32 %v15257_v21, %v13321_v15  ;;  %v13903_v15 = vadd.f32 %v15257_v21, %v13363_v9  ;;  %v13907_v0 = vadd.f32 %v15257_v21, %v13369_v16  ;;  %v15263_v32 = vld [vmem:[#allocation46_spill] sm:$0xff] }
 0x4dc   :  { %v13911_v13 = vadd.f32 %v15257_v21, %v13375_v53  ;;  %v13915_v17 = vadd.f32 %v15257_v21, %v13381_v47  ;;  %v13919_v52 = vadd.f32 %v15257_v21, %v13387_v12  ;;  %v13923_v45 = vadd.f32 %v15257_v21, %v13393_v14 }
 0x4dd   :  { %v13927_v37 = vadd.f32 %v15257_v21, %v13399_v44  ;;  %v13931_v9 = vadd.f32 %v15257_v21, %v13405_v46  ;;  %v13935_v16 = vadd.f32 %v15257_v21, %v13411_v58  ;;  %v13939_v53 = vadd.f32 %v15257_v21, %v13417_v59  ;;  %v15259_v46 = vld [vmem:[#allocation43_spill] sm:$0xff] }
 0x4de   :  { %v13943_v47 = vadd.f32 %v15257_v21, %v13423_v28  ;;  %v13947_v12 = vadd.f32 %v15257_v21, %v13429_v40  ;;  %v13951_v14 = vadd.f32 %v15257_v21, %v13435_v36  ;;  %v13955_v44 = vadd.f32 %v15257_v21, %v13441_v48  ;;  %v15261_v28 = vld [vmem:[#allocation85_spill] sm:$0xff] }
 0x4df   :  { %v13959_v58 = vadd.f32 %v15257_v21, %v15259_v46  ;;  %v13963_v59 = vadd.f32 %v15257_v21, %v13453_v26  ;;  %v13967_v40 = vadd.f32 %v15257_v21, %v15261_v28  ;;  %v13971_v36 = vadd.f32 %v15257_v21, %v15262_v1 }
 0x4e0   :  { %15258 = vst [vmem:[#allocation20_spill] sm:$0xff] %v13955_v44  ;;  %v13975_v48 = vadd.f32 %v15257_v21, %v15263_v32  ;;  %v15265_v44 = vld [vmem:[#allocation86_spill] sm:$0xff]  ;;  %v13987_v28 = vadd.f32 %v15257_v21, %v13489_v18  ;;  %v13991_v1 = vadd.f32 %v15257_v21, %v13495_v61  ;;  %v13995_v32 = vadd.f32 %v15257_v21, %v13501_v34 }
 0x4e1   :  { %15260 = vst [vmem:[#allocation22_spill] sm:$0xff] %v13959_v58  ;;  %v13979_v46 = vadd.f32 %v15257_v21, %v15265_v44  ;;  %v15266_v58 = vld [vmem:[#allocation48_spill] sm:$0xff] }
 0x4e2   :  { %15264 = vst [vmem:[#allocation30_spill] sm:$0xff] %v13975_v48  ;;  %v13983_v26 = vadd.f32 %v15257_v21, %v15266_v58  ;;  %15268 = vst [vmem:[#allocation38_spill] sm:$0xff] %v13987_v28  ;;  %v15271_v48 = vld [vmem:[#allocation87_spill] sm:$0xff]  ;;  %v14003_v58 = vadd.f32 %v15257_v21, %v13513_v2  ;;  %v15275_v28 = vld [vmem:[#allocation50_spill] sm:$0xff] }
 0x4e3   :  { %15269 = vst [vmem:[#allocation40_spill] sm:$0xff] %v13991_v1  ;;  %15270 = vst [vmem:[#allocation39_spill] sm:$0xff] %v13995_v32  ;;  %v13999_v44 = vadd.f32 %v15257_v21, %v15271_v48  ;;  %v14011_v61 = vadd.f32 %v15257_v21, %v15275_v28  ;;  %v15277_v1 = vld [vmem:[#allocation51_spill] sm:$0xff]  ;;  %v15278_v32 = vld [vmem:[#allocation52_spill] sm:$0xff] }
 0x4e4   :  { %15267 = vst [vmem:[#allocation33_spill] sm:$0xff] %v13983_v26  ;;  %v15273_v26 = vld [vmem:[#allocation89_spill] sm:$0xff]  ;;  %v14015_v34 = vadd.f32 %v15257_v21, %v15277_v1  ;;  %v14019_v48 = vadd.f32 %v15257_v21, %v15278_v32  ;;  %v14039_v32 = vadd.f32 %v15257_v21, %v13567_v55 }
 0x4e5   :  { %15272 = vst [vmem:[#allocation83_spill] sm:$0xff] %v13999_v44  ;;  %v14007_v18 = vadd.f32 %v15257_v21, %v15273_v26  ;;  %15276 = vst [vmem:[#allocation65_spill] sm:$0xff] %v14011_v61  ;;  %v15280_v44 = vld [vmem:[#allocation53_spill] sm:$0xff]  ;;  %v14027_v26 = vadd.f32 %v15257_v21, %v13549_v19  ;;  %v15285_v61 = vld [vmem:[#allocation91_spill] sm:$0xff] }
 0x4e6   :  { %15279 = vst [vmem:[#allocation66_spill] sm:$0xff] %v14019_v48  ;;  %v14023_v2 = vadd.f32 %v15257_v21, %v15280_v44  ;;  %v14035_v1 = vadd.f32 %v15257_v21, %v15285_v61  ;;  %15287 = vst [vmem:[#allocation70_spill] sm:$0xff] %v14039_v32  ;;  %v15288_v48 = vld [vmem:[#allocation92_spill] sm:$0xff]  ;;  %v15297_v32 = vld [vmem:[#allocation97_spill] sm:$0xff] }
 0x4e7   :  { %15274 = vst [vmem:[#allocation47_spill] sm:$0xff] %v14007_v18  ;;  %15282 = vst [vmem:[#allocation67_spill] sm:$0xff] %v14027_v26  ;;  %v15283_v18 = vld [vmem:[#allocation90_spill] sm:$0xff]  ;;  %v14043_v44 = vadd.f32 %v15257_v21, %v15288_v48  ;;  %v15291_v26 = vld [vmem:[#allocation93_spill] sm:$0xff]  ;;  %v14063_v48 = vadd.f32 %v15257_v21, %v15297_v32 }
 0x4e8   :  { %15281 = vst [vmem:[#allocation49_spill] sm:$0xff] %v14023_v2  ;;  %v14031_v28 = vadd.f32 %v15257_v21, %v15283_v18  ;;  %15286 = vst [vmem:[#allocation68_spill] sm:$0xff] %v14035_v1  ;;  %v15289_v2 = vld [vmem:[#allocation94_spill] sm:$0xff]  ;;  %v14051_v18 = vadd.f32 %v15257_v21, %v15291_v26  ;;  %v15295_v1 = vld [vmem:[#allocation96_spill] sm:$0xff] }
 0x4e9   :  { %v14047_v19 = vadd.f32 %v15257_v21, %v15289_v2  ;;  %v14059_v55 = vadd.f32 %v15257_v21, %v15295_v1  ;;  %15298 = vst [vmem:[#allocation76_spill] sm:$0xff] %v14063_v48  ;;  %v14067_v2 = vadd.f32 %v15257_v21, %v13609_v23  ;;  %v15305_v48 = vld [vmem:[#allocation54_spill] sm:$0xff] }
 0x4ea   :  { %15284 = vst [vmem:[#allocation88_spill] sm:$0xff] %v14031_v28  ;;  %15292 = vst [vmem:[#allocation75_spill] sm:$0xff] %v14051_v18  ;;  %v15293_v28 = vld [vmem:[#allocation95_spill] sm:$0xff]  ;;  %v14087_v23 = vadd.f32 %v15257_v21, %v15305_v48  ;;  %v14107_v48 = vadd.f32 %v15257_v21, %v13669_v27 }
 0x4eb   :  { %15290 = vst [vmem:[#allocation73_spill] sm:$0xff] %v14047_v19  ;;  %v14055_v61 = vadd.f32 %v15257_v21, %v15293_v28  ;;  %15296 = vst [vmem:[#allocation77_spill] sm:$0xff] %v14059_v55  ;;  %v15300_v19 = vld [vmem:[#allocation98_spill] sm:$0xff]  ;;  %v15302_v18 = vld [vmem:[#allocation99_spill] sm:$0xff] }
 0x4ec   :  { %15299 = vst [vmem:[#allocation79_spill] sm:$0xff] %v14067_v2  ;;  %v14071_v26 = vadd.f32 %v15257_v21, %v15300_v19  ;;  %v14075_v28 = vadd.f32 %v15257_v21, %v15302_v18  ;;  %v15304_v55 = vld [vmem:[#allocation100_spill] sm:$0xff]  ;;  %v15306_v2 = vld [vmem:[#allocation102_spill] sm:$0xff]  ;;  %15311 = vst [vmem:[#allocation62_spill] sm:$0xff] %v14107_v48 }
 0x4ed   :  { %15294 = vst [vmem:[#allocation74_spill] sm:$0xff] %v14055_v61  ;;  %v15303_v61 = vld [vmem:[#allocation101_spill] sm:$0xff]  ;;  %v14083_v32 = vadd.f32 %v15257_v21, %v15304_v55  ;;  %v14091_v19 = vadd.f32 %v15257_v21, %v15306_v2  ;;  %v14103_v55 = vadd.f32 %v15257_v21, %v13663_v35  ;;  %v14111_v2 = vadd.f32 %v15257_v21, %v13675_v20  ;;  %v15319_v48 = vld [vmem:[#allocation64_spill] sm:$0xff] }
 0x4ee   :  { %15301 = vst [vmem:[#allocation81_spill] sm:$0xff] %v14071_v26  ;;  %v14079_v1 = vadd.f32 %v15257_v21, %v15303_v61  ;;  %v15307_v26 = vld [vmem:[#allocation55_spill] sm:$0xff]  ;;  %v14099_v61 = vadd.f32 %v15257_v21, %v13657_v30  ;;  %v14131_v20 = vadd.f32 %v15257_v21, %v15319_v48 }
 0x4ef   :  { %v14095_v18 = vadd.f32 %v15257_v21, %v15307_v26  ;;  %15310 = vst [vmem:[#allocation63_spill] sm:$0xff] %v14103_v55  ;;  %15312 = vst [vmem:[#allocation59_spill] sm:$0xff] %v14111_v2  ;;  %v14115_v26 = vadd.f32 %v15257_v21, %v13681_v51  ;;  %v15317_v55 = vld [vmem:[#allocation82_spill] sm:$0xff]  ;;  %v15321_v2 = vld [vmem:[#allocation84_spill] sm:$0xff] }
 0x4f0   :  { %15309 = vst [vmem:[#allocation58_spill] sm:$0xff] %v14099_v61  ;;  %v15315_v61 = vld [vmem:[#allocation56_spill] sm:$0xff]  ;;  %v14127_v27 = vadd.f32 %v15257_v21, %v15317_v55  ;;  %15320 = vst [vmem:[#allocation12_spill] sm:$0xff] %v14131_v20  ;;  %v14135_v51 = vadd.f32 %v15257_v21, %v15321_v2 }
 0x4f1   :  { %15308 = vst [vmem:[#allocation80_spill] sm:$0xff] %v14095_v18  ;;  %15313 = vst [vmem:[#allocation57_spill] sm:$0xff] %v14115_v26  ;;  %v15314_v18 = vld [vmem:[#allocation41_spill] sm:$0xff]  ;;  %v14123_v35 = vadd.f32 %v15257_v21, %v15315_v61  ;;  %v15323_v26 = vld [vmem:[#allocation44_spill] sm:$0xff]  ;;  %v14143_v61 = vadd.f32 %v15257_v21, %v13723_v5  ;;  %v14163_v5 = vadd.f32 %v15257_v21, %v13753_v50 }
 0x4f2   :  { %v14119_v30 = vadd.f32 %v15257_v21, %v15314_v18  ;;  %15318 = vst [vmem:[#allocation13_spill] sm:$0xff] %v14127_v27  ;;  %15322 = vst [vmem:[#allocation15_spill] sm:$0xff] %v14135_v51  ;;  %v14139_v18 = vadd.f32 %v15257_v21, %v15323_v26  ;;  %v15326_v27 = vld [vmem:[#allocation71_spill] sm:$0xff]  ;;  %v15328_v20 = vld [vmem:[#allocation72_spill] sm:$0xff]  ;;  %v14183_v50 = vadd.f32 %v15257_v21, %v13783_v49 }
 0x4f3   :  { %15316 = vst [vmem:[#allocation11_spill] sm:$0xff] %v14123_v35  ;;  %v15324_v35 = vld [vmem:[#allocation69_spill] sm:$0xff]  ;;  %v14151_v48 = vadd.f32 %v15257_v21, %v15326_v27  ;;  %v14155_v2 = vadd.f32 %v15257_v21, %v15328_v20  ;;  %v15330_v51 = vld [vmem:[#allocation78_spill] sm:$0xff]  ;;  %v14203_v49 = vadd.f32 %v15257_v21, %v13813_v54  ;;  %v14223_v54 = vadd.f32 %v15257_v21, %v13843_v33 }
 0x4f4   :  { %v14147_v55 = vadd.f32 %v15257_v21, %v15324_v35  ;;  %v14159_v26 = vadd.f32 %v15257_v21, %v15330_v51  ;;  %v14167_v35 = vadd.f32 %v15257_v21, %v13759_v39  ;;  %v14187_v39 = vadd.f32 %v15257_v21, %v13789_v24 }
 0x4f5   :  { %15327 = vst [vmem:[#allocation17_spill] sm:$0xff] %v14151_v48  ;;  %15329 = vst [vmem:[#allocation16_spill] sm:$0xff] %v14155_v2  ;;  %v15332_v48 = vld [vmem:[#allocation61_spill] sm:$0xff]  ;;  %v15333_v2 = vld [vmem:[#allocation18_spill] sm:$0xff]  ;;  %v14207_v24 = vadd.f32 %v15257_v21, %v13819_v3  ;;  %v8013_v3 = vmax.f32 %v13851_v6, 0.0  ;;  %v8021_v33 = vmax.f32 %v13883_v11, 0.0 }
 0x4f6   :  { %15325 = vst [vmem:[#allocation14_spill] sm:$0xff] %v14147_v55  ;;  %v15331_v55 = vld [vmem:[#allocation60_spill] sm:$0xff]  ;;  %v14175_v20 = vadd.f32 %v15257_v21, %v15332_v48  ;;  %v14179_v51 = vadd.f32 %v15257_v21, %v15333_v2  ;;  %15334 = vst [vmem:[#allocation19_spill] sm:$0xff] %v14187_v39  ;;  %v14195_v48 = vadd.f32 %v15257_v21, %v13801_v31  ;;  %v15337_v39 = vld [vmem:[#allocation21_spill] sm:$0xff]  ;;  %v8024_v6 = vmax.f32 %v13895_v63, 0.0 }
 0x4f7   :  { %v14171_v27 = vadd.f32 %v15257_v21, %v15331_v55  ;;  %v14191_v55 = vadd.f32 %v15257_v21, %v13795_v10  ;;  %v14199_v2 = vadd.f32 %v15257_v21, %v13807_v4  ;;  %15335 = vst [vmem:[#allocation24_spill] sm:$0xff] %v14203_v49  ;;  %15336 = vst [vmem:[#allocation23_spill] sm:$0xff] %v14207_v24  ;;  %v8012_v49 = vmax.f32 %v13847_v25, 0.0 }
 0x4f8   :  { %v14211_v10 = vadd.f32 %v15257_v21, %v15337_v39  ;;  %v14215_v31 = vadd.f32 %v15257_v21, %v13831_v7  ;;  %v14219_v4 = vadd.f32 %v15257_v21, %v13837_v22  ;;  %v8014_v24 = vmax.f32 %v13855_v42, 0.0  ;;  %8109 = vst [vmem:[#allocation7 + $0x8] sm:$0xff] %v8013_v3  ;;  %8117 = vst [vmem:[#allocation7 + $0x48] sm:$0xff] %v8021_v33 }
 0x4f9   :  { %v8015_v39 = vmax.f32 %v13859_v56, 0.0  ;;  %v8017_v7 = vmax.f32 %v13867_v43, 0.0  ;;  %v8019_v22 = vmax.f32 %v13875_v57, 0.0  ;;  %8108 = vst [vmem:[#allocation7] sm:$0xff] %v8012_v49  ;;  %v8022_v25 = vmax.f32 %v13887_v8, 0.0  ;;  %8120 = vst [vmem:[#allocation7 + $0x60] sm:$0xff] %v8024_v6 }
 0x4fa   :  { %15338 = vst [vmem:[#allocation26_spill] sm:$0xff] %v14211_v10  ;;  %15339 = vst [vmem:[#allocation25_spill] sm:$0xff] %v14215_v31  ;;  %v8016_v10 = vmax.f32 %v13863_v38, 0.0  ;;  %v8018_v31 = vmax.f32 %v13871_v62, 0.0  ;;  %v8023_v21 = vmax.f32 %v13891_v41, 0.0  ;;  %v8025_v42 = vmax.f32 %v13899_v29, 0.0 }
 0x4fb   :  { %15340 = vst [vmem:[#allocation28_spill] sm:$0xff] %v14219_v4  ;;  %v8020_v4 = vmax.f32 %v13879_v60, 0.0  ;;  %8110 = vst [vmem:[#allocation7 + $0x10] sm:$0xff] %v8014_v24  ;;  %v8026_v56 = vmax.f32 %v13903_v15, 0.0  ;;  %v8027_v38 = vmax.f32 %v13907_v0, 0.0  ;;  %v8028_v43 = vmax.f32 %v13911_v13, 0.0 }
 0x4fc   :  { %8111 = vst [vmem:[#allocation7 + $0x18] sm:$0xff] %v8015_v39  ;;  %8112 = vst [vmem:[#allocation7 + $0x20] sm:$0xff] %v8016_v10  ;;  %v8029_v62 = vmax.f32 %v13915_v17, 0.0  ;;  %v8030_v57 = vmax.f32 %v13919_v52, 0.0  ;;  %v8031_v60 = vmax.f32 %v13923_v45, 0.0  ;;  %v8032_v11 = vmax.f32 %v13927_v37, 0.0 }
 0x4fd   :  { %8113 = vst [vmem:[#allocation7 + $0x28] sm:$0xff] %v8017_v7  ;;  %8114 = vst [vmem:[#allocation7 + $0x30] sm:$0xff] %v8018_v31  ;;  %v8033_v8 = vmax.f32 %v13931_v9, 0.0  ;;  %v8034_v41 = vmax.f32 %v13935_v16, 0.0  ;;  %v8035_v63 = vmax.f32 %v13939_v53, 0.0  ;;  %v8036_v29 = vmax.f32 %v13943_v47, 0.0 }
 0x4fe   :  { %8115 = vst [vmem:[#allocation7 + $0x38] sm:$0xff] %v8019_v22  ;;  %8116 = vst [vmem:[#allocation7 + $0x40] sm:$0xff] %v8020_v4  ;;  %v8037_v15 = vmax.f32 %v13947_v12, 0.0  ;;  %v8038_v0 = vmax.f32 %v13951_v14, 0.0  ;;  %v15341_v13 = vld [vmem:[#allocation20_spill] sm:$0xff]  ;;  %v15342_v52 = vld [vmem:[#allocation22_spill] sm:$0xff] }
 0x4ff   :  { %8118 = vst [vmem:[#allocation7 + $0x50] sm:$0xff] %v8022_v25  ;;  %8119 = vst [vmem:[#allocation7 + $0x58] sm:$0xff] %v8023_v21  ;;  %v8039_v17 = vmax.f32 %v15341_v13, 0.0  ;;  %v8040_v45 = vmax.f32 %v15342_v52, 0.0  ;;  %v8041_v37 = vmax.f32 %v13963_v59, 0.0  ;;  %v8042_v9 = vmax.f32 %v13967_v40, 0.0 }
 0x500   :  { %8121 = vst [vmem:[#allocation7 + $0x68] sm:$0xff] %v8025_v42  ;;  %8122 = vst [vmem:[#allocation7 + $0x70] sm:$0xff] %v8026_v56  ;;  %v8043_v16 = vmax.f32 %v13971_v36, 0.0  ;;  %v15343_v53 = vld [vmem:[#allocation30_spill] sm:$0xff]  ;;  %v8045_v12 = vmax.f32 %v13979_v46, 0.0  ;;  %v15344_v14 = vld [vmem:[#allocation33_spill] sm:$0xff] }
 0x501   :  { %8123 = vst [vmem:[#allocation7 + $0x78] sm:$0xff] %v8027_v38  ;;  %8124 = vst [vmem:[#allocation7 + $0x80] sm:$0xff] %v8028_v43  ;;  %v8044_v47 = vmax.f32 %v15343_v53, 0.0  ;;  %v8046_v49 = vmax.f32 %v15344_v14, 0.0  ;;  %v15345_v24 = vld [vmem:[#allocation38_spill] sm:$0xff]  ;;  %v15346_v10 = vld [vmem:[#allocation40_spill] sm:$0xff] }
 0x502   :  { %8125 = vst [vmem:[#allocation7 + $0x88] sm:$0xff] %v8029_v62  ;;  %8126 = vst [vmem:[#allocation7 + $0x90] sm:$0xff] %v8030_v57  ;;  %v8047_v59 = vmax.f32 %v15345_v24, 0.0  ;;  %v8048_v31 = vmax.f32 %v15346_v10, 0.0  ;;  %v15347_v4 = vld [vmem:[#allocation39_spill] sm:$0xff]  ;;  %v8051_v46 = vmax.f32 %v14003_v58, 0.0 }
 0x503   :  { %8127 = vst [vmem:[#allocation7 + $0x98] sm:$0xff] %v8031_v60  ;;  %8128 = vst [vmem:[#allocation7 + $0xa0] sm:$0xff] %v8032_v11  ;;  %v8049_v3 = vmax.f32 %v15347_v4, 0.0  ;;  %v15348_v40 = vld [vmem:[#allocation83_spill] sm:$0xff]  ;;  %v15350_v22 = vld [vmem:[#allocation65_spill] sm:$0xff]  ;;  %v8054_v25 = vmax.f32 %v14015_v34, 0.0 }
 0x504   :  { %8129 = vst [vmem:[#allocation7 + $0xa8] sm:$0xff] %v8033_v8  ;;  %8130 = vst [vmem:[#allocation7 + $0xb0] sm:$0xff] %v8034_v41  ;;  %v8050_v36 = vmax.f32 %v15348_v40, 0.0  ;;  %v15349_v39 = vld [vmem:[#allocation47_spill] sm:$0xff]  ;;  %v8053_v33 = vmax.f32 %v15350_v22, 0.0  ;;  %v15351_v21 = vld [vmem:[#allocation66_spill] sm:$0xff] }
 0x505   :  { %8131 = vst [vmem:[#allocation7 + $0xb8] sm:$0xff] %v8035_v63  ;;  %8132 = vst [vmem:[#allocation7 + $0xc0] sm:$0xff] %v8036_v29  ;;  %v8052_v7 = vmax.f32 %v15349_v39, 0.0  ;;  %v8055_v6 = vmax.f32 %v15351_v21, 0.0  ;;  %v15352_v42 = vld [vmem:[#allocation49_spill] sm:$0xff]  ;;  %v15353_v38 = vld [vmem:[#allocation67_spill] sm:$0xff] }
 0x506   :  { %8133 = vst [vmem:[#allocation7 + $0xc8] sm:$0xff] %v8037_v15  ;;  %8134 = vst [vmem:[#allocation7 + $0xd0] sm:$0xff] %v8038_v0  ;;  %v8056_v56 = vmax.f32 %v15352_v42, 0.0  ;;  %v8057_v43 = vmax.f32 %v15353_v38, 0.0  ;;  %v15354_v58 = vld [vmem:[#allocation88_spill] sm:$0xff]  ;;  %v15356_v11 = vld [vmem:[#allocation70_spill] sm:$0xff] }
 0x507   :  { %8135 = vst [vmem:[#allocation7 + $0xd8] sm:$0xff] %v8039_v17  ;;  %8136 = vst [vmem:[#allocation7 + $0xe0] sm:$0xff] %v8040_v45  ;;  %v8058_v62 = vmax.f32 %v15354_v58, 0.0  ;;  %v15355_v57 = vld [vmem:[#allocation68_spill] sm:$0xff]  ;;  %v8060_v8 = vmax.f32 %v15356_v11, 0.0  ;;  %v8061_v41 = vmax.f32 %v14043_v44, 0.0 }
 0x508   :  { %8137 = vst [vmem:[#allocation7 + $0xe8] sm:$0xff] %v8041_v37  ;;  %8138 = vst [vmem:[#allocation7 + $0xf0] sm:$0xff] %v8042_v9  ;;  %v8059_v60 = vmax.f32 %v15355_v57, 0.0  ;;  %v15357_v34 = vld [vmem:[#allocation73_spill] sm:$0xff]  ;;  %v15358_v29 = vld [vmem:[#allocation75_spill] sm:$0xff]  ;;  %v8071_v14 = vmax.f32 %v14083_v32, 0.0 }
 0x509   :  { %8139 = vst [vmem:[#allocation7 + $0xf8] sm:$0xff] %v8043_v16  ;;  %8140 = vst [vmem:[#allocation7 + $0x100] sm:$0xff] %v8044_v47  ;;  %v8062_v63 = vmax.f32 %v15357_v34, 0.0  ;;  %v8063_v15 = vmax.f32 %v15358_v29, 0.0  ;;  %v15359_v0 = vld [vmem:[#allocation74_spill] sm:$0xff]  ;;  %v15360_v17 = vld [vmem:[#allocation77_spill] sm:$0xff] }
 0x50a   :  { %8141 = vst [vmem:[#allocation7 + $0x108] sm:$0xff] %v8045_v12  ;;  %8142 = vst [vmem:[#allocation7 + $0x110] sm:$0xff] %v8046_v49  ;;  %v8064_v13 = vmax.f32 %v15359_v0, 0.0  ;;  %v8065_v52 = vmax.f32 %v15360_v17, 0.0  ;;  %v15361_v45 = vld [vmem:[#allocation76_spill] sm:$0xff]  ;;  %v15362_v9 = vld [vmem:[#allocation79_spill] sm:$0xff] }
 0x50b   :  { %8143 = vst [vmem:[#allocation7 + $0x118] sm:$0xff] %v8047_v59  ;;  %8144 = vst [vmem:[#allocation7 + $0x120] sm:$0xff] %v8048_v31  ;;  %v8066_v37 = vmax.f32 %v15361_v45, 0.0  ;;  %v8067_v44 = vmax.f32 %v15362_v9, 0.0  ;;  %v15363_v16 = vld [vmem:[#allocation81_spill] sm:$0xff]  ;;  %v8069_v47 = vmax.f32 %v14075_v28, 0.0 }
 0x50c   :  { %8145 = vst [vmem:[#allocation7 + $0x128] sm:$0xff] %v8049_v3  ;;  %8146 = vst [vmem:[#allocation7 + $0x130] sm:$0xff] %v8050_v36  ;;  %v8068_v53 = vmax.f32 %v15363_v16, 0.0  ;;  %v8070_v12 = vmax.f32 %v14079_v1, 0.0  ;;  %v8072_v49 = vmax.f32 %v14087_v23, 0.0  ;;  %v8073_v24 = vmax.f32 %v14091_v19, 0.0 }
 0x50d   :  { %8147 = vst [vmem:[#allocation7 + $0x138] sm:$0xff] %v8051_v46  ;;  %8148 = vst [vmem:[#allocation7 + $0x140] sm:$0xff] %v8052_v7  ;;  %v15364_v59 = vld [vmem:[#allocation80_spill] sm:$0xff]  ;;  %v15365_v31 = vld [vmem:[#allocation58_spill] sm:$0xff]  ;;  %v8080_v46 = vmax.f32 %v14119_v30, 0.0  ;;  %v8086_v30 = vmax.f32 %v14143_v61, 0.0 }
 0x50e   :  { %8149 = vst [vmem:[#allocation7 + $0x148] sm:$0xff] %v8053_v33  ;;  %8150 = vst [vmem:[#allocation7 + $0x150] sm:$0xff] %v8054_v25  ;;  %v8074_v10 = vmax.f32 %v15364_v59, 0.0  ;;  %v8075_v28 = vmax.f32 %v15365_v31, 0.0  ;;  %v15366_v4 = vld [vmem:[#allocation63_spill] sm:$0xff]  ;;  %v15367_v40 = vld [vmem:[#allocation62_spill] sm:$0xff] }
 0x50f   :  { %8151 = vst [vmem:[#allocation7 + $0x158] sm:$0xff] %v8055_v6  ;;  %8152 = vst [vmem:[#allocation7 + $0x160] sm:$0xff] %v8056_v56  ;;  %v8076_v3 = vmax.f32 %v15366_v4, 0.0  ;;  %v8077_v36 = vmax.f32 %v15367_v40, 0.0  ;;  %v15368_v1 = vld [vmem:[#allocation59_spill] sm:$0xff]  ;;  %v15369_v23 = vld [vmem:[#allocation57_spill] sm:$0xff] }
 0x510   :  { %8153 = vst [vmem:[#allocation7 + $0x168] sm:$0xff] %v8057_v43  ;;  %8154 = vst [vmem:[#allocation7 + $0x170] sm:$0xff] %v8058_v62  ;;  %v8078_v32 = vmax.f32 %v15368_v1, 0.0  ;;  %v8079_v19 = vmax.f32 %v15369_v23, 0.0  ;;  %v15370_v39 = vld [vmem:[#allocation11_spill] sm:$0xff]  ;;  %v15371_v22 = vld [vmem:[#allocation13_spill] sm:$0xff] }
 0x511   :  { %8155 = vst [vmem:[#allocation7 + $0x178] sm:$0xff] %v8059_v60  ;;  %8156 = vst [vmem:[#allocation7 + $0x180] sm:$0xff] %v8060_v8  ;;  %v8081_v7 = vmax.f32 %v15370_v39, 0.0  ;;  %v8082_v33 = vmax.f32 %v15371_v22, 0.0  ;;  %v15372_v25 = vld [vmem:[#allocation12_spill] sm:$0xff]  ;;  %v15373_v6 = vld [vmem:[#allocation15_spill] sm:$0xff] }
 0x512   :  { %8157 = vst [vmem:[#allocation7 + $0x188] sm:$0xff] %v8061_v41  ;;  %8158 = vst [vmem:[#allocation7 + $0x190] sm:$0xff] %v8062_v63  ;;  %v8083_v21 = vmax.f32 %v15372_v25, 0.0  ;;  %v8084_v42 = vmax.f32 %v15373_v6, 0.0  ;;  %v8085_v56 = vmax.f32 %v14139_v18, 0.0  ;;  %v15374_v38 = vld [vmem:[#allocation14_spill] sm:$0xff] }
 0x513   :  { %8159 = vst [vmem:[#allocation7 + $0x198] sm:$0xff] %v8063_v15  ;;  %8160 = vst [vmem:[#allocation7 + $0x1a0] sm:$0xff] %v8064_v13  ;;  %v8087_v43 = vmax.f32 %v15374_v38, 0.0  ;;  %v15375_v58 = vld [vmem:[#allocation17_spill] sm:$0xff]  ;;  %v15376_v57 = vld [vmem:[#allocation16_spill] sm:$0xff]  ;;  %v8090_v11 = vmax.f32 %v14159_v26, 0.0 }
 0x514   :  { %8161 = vst [vmem:[#allocation7 + $0x1a8] sm:$0xff] %v8065_v52  ;;  %8162 = vst [vmem:[#allocation7 + $0x1b0] sm:$0xff] %v8066_v37  ;;  %v8088_v62 = vmax.f32 %v15375_v58, 0.0  ;;  %v8089_v60 = vmax.f32 %v15376_v57, 0.0  ;;  %v8091_v18 = vmax.f32 %v14163_v5, 0.0  ;;  %v8092_v8 = vmax.f32 %v14167_v35, 0.0 }
 0x515   :  { %8163 = vst [vmem:[#allocation7 + $0x1b8] sm:$0xff] %v8067_v44  ;;  %8164 = vst [vmem:[#allocation7 + $0x1c0] sm:$0xff] %v8068_v53  ;;  %v8093_v41 = vmax.f32 %v14171_v27, 0.0  ;;  %v8094_v61 = vmax.f32 %v14175_v20, 0.0  ;;  %v8095_v34 = vmax.f32 %v14179_v51, 0.0  ;;  %v8096_v63 = vmax.f32 %v14183_v50, 0.0 }
 0x516   :  { %8165 = vst [vmem:[#allocation7 + $0x1c8] sm:$0xff] %v8069_v47  ;;  %8166 = vst [vmem:[#allocation7 + $0x1d0] sm:$0xff] %v8070_v12  ;;  %v15377_v29 = vld [vmem:[#allocation19_spill] sm:$0xff]  ;;  %v8098_v26 = vmax.f32 %v14191_v55, 0.0  ;;  %v8099_v5 = vmax.f32 %v14195_v48, 0.0  ;;  %v8100_v35 = vmax.f32 %v14199_v2, 0.0 }
 0x517   :  { %8167 = vst [vmem:[#allocation7 + $0x1d8] sm:$0xff] %v8071_v14  ;;  %8168 = vst [vmem:[#allocation7 + $0x1e0] sm:$0xff] %v8072_v49  ;;  %v8097_v15 = vmax.f32 %v15377_v29, 0.0  ;;  %v15378_v27 = vld [vmem:[#allocation24_spill] sm:$0xff]  ;;  %v15379_v51 = vld [vmem:[#allocation23_spill] sm:$0xff]  ;;  %v8107_v55 = vmax.f32 %v14223_v54, 0.0 }
 0x518   :  { %8169 = vst [vmem:[#allocation7 + $0x1e8] sm:$0xff] %v8073_v24  ;;  %8170 = vst [vmem:[#allocation7 + $0x1f0] sm:$0xff] %v8074_v10  ;;  %v8101_v20 = vmax.f32 %v15378_v27, 0.0  ;;  %v8102_v50 = vmax.f32 %v15379_v51, 0.0  ;;  %v15380_v0 = vld [vmem:[#allocation26_spill] sm:$0xff]  ;;  %v15381_v17 = vld [vmem:[#allocation25_spill] sm:$0xff] }
 0x519   :  { %8171 = vst [vmem:[#allocation7 + $0x1f8] sm:$0xff] %v8075_v28  ;;  %8172 = vst [vmem:[#allocation7 + $0x200] sm:$0xff] %v8076_v3  ;;  %v8103_v13 = vmax.f32 %v15380_v0, 0.0  ;;  %v8104_v52 = vmax.f32 %v15381_v17, 0.0  ;;  %v15382_v45 = vld [vmem:[#allocation28_spill] sm:$0xff] }
 0x51a   :  { %8173 = vst [vmem:[#allocation7 + $0x208] sm:$0xff] %v8077_v36  ;;  %8174 = vst [vmem:[#allocation7 + $0x210] sm:$0xff] %v8078_v32  ;;  %v8105_v37 = vmax.f32 %v15382_v45, 0.0 }
 0x51b   :  { %8175 = vst [vmem:[#allocation7 + $0x218] sm:$0xff] %v8079_v19  ;;  %8176 = vst [vmem:[#allocation7 + $0x220] sm:$0xff] %v8080_v46 }
 0x51c   :  { %8177 = vst [vmem:[#allocation7 + $0x228] sm:$0xff] %v8081_v7  ;;  %8178 = vst [vmem:[#allocation7 + $0x230] sm:$0xff] %v8082_v33 }
 0x51d   :  { %8179 = vst [vmem:[#allocation7 + $0x238] sm:$0xff] %v8083_v21  ;;  %8180 = vst [vmem:[#allocation7 + $0x240] sm:$0xff] %v8084_v42 }
 0x51e   :  { %8181 = vst [vmem:[#allocation7 + $0x248] sm:$0xff] %v8085_v56  ;;  %8182 = vst [vmem:[#allocation7 + $0x250] sm:$0xff] %v8086_v30 }
 0x51f   :  { %8183 = vst [vmem:[#allocation7 + $0x258] sm:$0xff] %v8087_v43  ;;  %8184 = vst [vmem:[#allocation7 + $0x260] sm:$0xff] %v8088_v62 }
 0x520   :  { %8185 = vst [vmem:[#allocation7 + $0x268] sm:$0xff] %v8089_v60  ;;  %8186 = vst [vmem:[#allocation7 + $0x270] sm:$0xff] %v8090_v11 }
 0x521   :  { %8187 = vst [vmem:[#allocation7 + $0x278] sm:$0xff] %v8091_v18  ;;  %8188 = vst [vmem:[#allocation7 + $0x280] sm:$0xff] %v8092_v8 }
 0x522   :  { %8189 = vst [vmem:[#allocation7 + $0x288] sm:$0xff] %v8093_v41  ;;  %8190 = vst [vmem:[#allocation7 + $0x290] sm:$0xff] %v8094_v61 }
 0x523   :  { %8191 = vst [vmem:[#allocation7 + $0x298] sm:$0xff] %v8095_v34  ;;  %8192 = vst [vmem:[#allocation7 + $0x2a0] sm:$0xff] %v8096_v63 }
 0x524   :  { %8193 = vst [vmem:[#allocation7 + $0x2a8] sm:$0xff] %v8097_v15  ;;  %8194 = vst [vmem:[#allocation7 + $0x2b0] sm:$0xff] %v8098_v26 }
 0x525   :  { %8195 = vst [vmem:[#allocation7 + $0x2b8] sm:$0xff] %v8099_v5  ;;  %8196 = vst [vmem:[#allocation7 + $0x2c0] sm:$0xff] %v8100_v35 }
 0x526   :  { %8197 = vst [vmem:[#allocation7 + $0x2c8] sm:$0xff] %v8101_v20  ;;  %8198 = vst [vmem:[#allocation7 + $0x2d0] sm:$0xff] %v8102_v50 }
 0x527   :  { %8199 = vst [vmem:[#allocation7 + $0x2d8] sm:$0xff] %v8103_v13  ;;  %8200 = vst [vmem:[#allocation7 + $0x2e0] sm:$0xff] %v8104_v52 }
 0x528   :  { %8201 = vst [vmem:[#allocation7 + $0x2e8] sm:$0xff] %v8105_v37  ;;  %8203 = vst [vmem:[#allocation7 + $0x2f8] sm:$0xff] %v8107_v55 }
 0x529   :  { %10910 = shalt.err (!%p10907_p0)
}
 0x52a   :  { %8215 = dma.vmem_to_hbm [thread:$0]  %s8210_s12, 12288, %s14330_s4, [#allocation4], %s10926_s18, %s10926_s18, %s10927_s19  }
 0x52b   :  { %10923 = dma.done.wait [#allocation4], 12288  }
 0x52c   :  { %10924 = vsyncadd [#allocation4], 4294955008 }
 0x52d   :  { %8219 = vsyncpa [#allocation3], 1 }
 0x52e   :  { %8220 = vsyncpa [#allocation6], 1 }
 0x52f   :  { %8221 = vsyncpa [#allocation4], 1 }

</bundles_post_ra>
